<compile_context>
chip_gen: v5e
topology: v5e:2x2
jax: 0.10.0
libtpu: 0.0.40
codegen_flags: <defaults>
</compile_context>

<pallas_src>
import functools

import numpy as np
import jax
import jax.numpy as jnp
from jax import lax
from jax.experimental import pallas as pl
from jax.experimental.pallas import tpu as pltpu

HIDDEN = 96
HIDDEN_PADDED = 128        # lane-aligned hidden size (per-gate vreg slice)
INPUT_SIZE = 1


def _lstm_kernel(x_ref,                      # (T*Bp, I)     time-major, flattened
                 wih0_ref,                   # (I, 4*Hp)
                 whh0_ref,                   # (Hp, 4*Hp)
                 b0_ref,                     # (1, 4*Hp)     b_ih + b_hh, layer 0
                 w1_ref,                     # (2*Hp, 4*Hp)  stacked [Wih1; Whh1]
                 b1_ref,                     # (1, 4*Hp)     b_ih + b_hh, layer 1
                 wfc_ref,                    # (Hp, 1)
                 bfc_ref,                    # (1, 1)
                 out_ref,                    # (Bp, 1)
                 *, mxu_dtype=jnp.float32):
    f32 = jnp.float32
    Bp = out_ref.shape[0]
    TB, I = x_ref.shape
    T = TB // Bp
    Hp = whh0_ref.shape[0]
    G = 4 * Hp

    # ---------------- hoisted, off-critical-path work ----------------
    # Layer-0 input projection for ALL timesteps at once (removes a K=I matmul
    # and a bias broadcast from every step of the serial recurrence).
    x_all = x_ref[...]                                          # (T*Bp, I)
    if I == 1:
        xproj = x_all * wih0_ref[...] + b0_ref[...]             # broadcast mul, VPU only
    else:
        xproj = (jnp.dot(x_all, wih0_ref[...], preferred_element_type=f32)
                 + b0_ref[...])                                 # (T*Bp, G)

    # Broadcast the layer-1 bias once (JAX does not CSE broadcast_in_dim).
    b1 = jnp.broadcast_to(b1_ref[...], (Bp, G))

    # Recurrent weights loaded + cast once for the MXU (f32 accumulation kept).
    whh0 = whh0_ref[...].astype(mxu_dtype)
    w1 = w1_ref[...].astype(mxu_dtype)

    def gate_act(g):                     # g: (Bp, 4*Hp), each slice lane-aligned
        i_g = jax.nn.sigmoid(g[:, 0 * Hp:1 * Hp])
        f_g = jax.nn.sigmoid(g[:, 1 * Hp:2 * Hp])
        g_g = jnp.tanh(g[:, 2 * Hp:3 * Hp])
        o_g = jax.nn.sigmoid(g[:, 3 * Hp:4 * Hp])
        return i_g, f_g, g_g, o_g

    z = jnp.zeros((Bp, Hp), f32)
    h0, c0, h1, c1 = z, z, z, z          # state lives in vregs, not VMEM

    # ------------- serial recurrence, fully unrolled over T -------------
    for t in range(T):
        # layer 0: one dependent MXU op per step (input proj precomputed)
        g0 = xproj[t * Bp:(t + 1) * Bp, :] + jnp.dot(
            h0.astype(mxu_dtype), whh0, preferred_element_type=f32)
        i0, f0, gg0, o0 = gate_act(g0)
        c0 = f0 * c0 + i0 * gg0
        h0 = o0 * jnp.tanh(c0)

        # layer 1: fused [Wih1; Whh1] -> one dependent MXU op per step
        hcat = jnp.concatenate([h0, h1], axis=1).astype(mxu_dtype)   # (Bp, 2*Hp)
        g1 = b1 + jnp.dot(hcat, w1, preferred_element_type=f32)
        i1, f1, gg1, o1 = gate_act(g1)
        c1 = f1 * c1 + i1 * gg1
        h1 = o1 * jnp.tanh(c1)

    # Final FC on the last-timestep hidden state of layer 2.
    out_ref[...] = (jnp.dot(h1, wfc_ref[...], preferred_element_type=f32)
                    + bfc_ref[...])


def lstm_model_forward(x, packed, *, mxu_dtype=jnp.float32):
    """x: (B, T, I) float32.  Returns (B,) float32 — matches out.view(-1).

    mxu_dtype=jnp.bfloat16 enables the bf16-weight MXU path (v6e/v7x); gate
    math and accumulation stay f32.
    """
    B, T, I = x.shape
    Bp = ((B + 7) // 8) * 8                      # pad batch to sublane multiple

    x_tb = jnp.transpose(x, (1, 0, 2))           # (T, B, I) time-major
    if Bp != B:
        x_tb = jnp.pad(x_tb, ((0, 0), (0, Bp - B), (0, 0)))
    x_flat = x_tb.reshape(T * Bp, I)             # static sublane-aligned slices in-kernel

    vmem = pl.BlockSpec(memory_space=pltpu.MemorySpace.VMEM)
    kernel = functools.partial(_lstm_kernel, mxu_dtype=mxu_dtype)
    out = pl.pallas_call(
        kernel,
        out_shape=jax.ShapeDtypeStruct((Bp, 1), jnp.float32),
        in_specs=[vmem] * 8,
        out_specs=vmem,
    )(x_flat,
      packed["wih0"], packed["whh0"], packed["b0"],
      packed["w1"], packed["b1"],
      packed["wfc"], packed["bfc"])
    return out.reshape(-1)[:B]


def make_params(key, hidden_size=HIDDEN, input_size=INPUT_SIZE):
    """Raw PyTorch-orientation parameters, U(-1/sqrt(H), 1/sqrt(H)) init."""
    H, I = hidden_size, input_size
    k = 1.0 / np.sqrt(H)
    keys = jax.random.split(key, 10)

    def u(kk, shape):
        return jax.random.uniform(kk, shape, jnp.float32, -k, k)

    return {
        "w_ih_l0": u(keys[0], (4 * H, I)),
        "w_hh_l0": u(keys[1], (4 * H, H)),
        "b_ih_l0": u(keys[2], (4 * H,)),
        "b_hh_l0": u(keys[3], (4 * H,)),
        "w_ih_l1": u(keys[4], (4 * H, H)),
        "w_hh_l1": u(keys[5], (4 * H, H)),
        "b_ih_l1": u(keys[6], (4 * H,)),
        "b_hh_l1": u(keys[7], (4 * H,)),
        "w_fc":    u(keys[8], (1, H)),
        "b_fc":    u(keys[9], (1,)),
    }


def pack_params(raw, hp=HIDDEN_PADDED):
    """Transpose to (in,out) orientation, fuse biases, zero-pad each gate block
    from H to hp so gate slices are exact 128-lane vregs, and stack the two
    layer-1 weight matrices for the fused per-step matmul."""
    H = raw["w_hh_l0"].shape[1]

    def pad_gate_cols(w_t):                       # (K, 4H) -> (K, 4*hp)
        K = w_t.shape[0]
        w4 = jnp.pad(w_t.reshape(K, 4, H), ((0, 0), (0, 0), (0, hp - H)))
        return w4.reshape(K, 4 * hp)

    def pad_rows(w, rows):                        # zero-pad K dim
        return jnp.pad(w, ((0, rows - w.shape[0]), (0, 0)))

    wih0 = pad_gate_cols(raw["w_ih_l0"].T)                            # (I, 4hp)
    whh0 = pad_rows(pad_gate_cols(raw["w_hh_l0"].T), hp)              # (hp, 4hp)
    b0 = pad_gate_cols((raw["b_ih_l0"] + raw["b_hh_l0"])[None, :])    # (1, 4hp)

    wih1 = pad_rows(pad_gate_cols(raw["w_ih_l1"].T), hp)              # (hp, 4hp)
    whh1 = pad_rows(pad_gate_cols(raw["w_hh_l1"].T), hp)              # (hp, 4hp)
    w1 = jnp.concatenate([wih1, whh1], axis=0)                        # (2hp, 4hp)
    b1 = pad_gate_cols((raw["b_ih_l1"] + raw["b_hh_l1"])[None, :])    # (1, 4hp)

    wfc = pad_rows(raw["w_fc"].T, hp)                                 # (hp, 1)
    bfc = raw["b_fc"][None, :]                                        # (1, 1)

    return {"wih0": wih0, "whh0": whh0, "b0": b0,
            "w1": w1, "b1": b1, "wfc": wfc, "bfc": bfc}


def lstm_model_ref(x, raw):
    """Pure-JAX reference on the raw (unpadded) PyTorch-orientation params."""
    B, T, I = x.shape
    H = raw["w_hh_l0"].shape[1]

    def cell(x_in, h, c, w_ih, w_hh, b_ih, b_hh):
        g = x_in @ w_ih.T + h @ w_hh.T + b_ih + b_hh
        i_g = jax.nn.sigmoid(g[:, 0 * H:1 * H])
        f_g = jax.nn.sigmoid(g[:, 1 * H:2 * H])
        g_g = jnp.tanh(g[:, 2 * H:3 * H])
        o_g = jax.nn.sigmoid(g[:, 3 * H:4 * H])
        c_new = f_g * c + i_g * g_g
        h_new = o_g * jnp.tanh(c_new)
        return h_new, c_new

    def step(carry, x_t):
        h0, c0, h1, c1 = carry
        h0, c0 = cell(x_t, h0, c0, raw["w_ih_l0"], raw["w_hh_l0"],
                      raw["b_ih_l0"], raw["b_hh_l0"])
        h1, c1 = cell(h0, h1, c1, raw["w_ih_l1"], raw["w_hh_l1"],
                      raw["b_ih_l1"], raw["b_hh_l1"])
        return (h0, c0, h1, c1), None

    z = jnp.zeros((B, H), jnp.float32)
    (h0, c0, h1, c1), _ = lax.scan(step, (z, z, z, z), jnp.transpose(x, (1, 0, 2)))
    out = h1 @ raw["w_fc"].T + raw["b_fc"]
    return out.reshape(-1)


if __name__ == "__main__":
    key = jax.random.PRNGKey(0)
    k_param, k_x = jax.random.split(key)

    B, T, I = 4, 8, INPUT_SIZE
    raw = make_params(k_param)
    packed = pack_params(raw)
    x = jax.random.normal(k_x, (B, T, I), jnp.float32)

    y_ref = lstm_model_ref(x, raw)

    # f32 path — exact w.r.t. the reference.
    y = jax.block_until_ready(lstm_model_forward(x, packed))
    np.testing.assert_allclose(np.asarray(y), np.asarray(y_ref),
                               rtol=1e-5, atol=1e-5)
    assert y.shape == (B,)

    # bf16-weight MXU path (v6e/v7x fast path) — f32 accumulation, looser tol.
    y_bf16 = jax.block_until_ready(
        lstm_model_forward(x, packed, mxu_dtype=jnp.bfloat16))
    np.testing.assert_allclose(np.asarray(y_bf16), np.asarray(y_ref),
                               rtol=5e-2, atol=5e-2)

    print("KERNEL_OK")
</pallas_src>

<mosaic_0001>
module attributes {stable_mosaic.version = 11 : i64} {
  func.func @_lstm_kernel(%arg0: memref<64x1xf32, #tpu.memory_space<vmem>>, %arg1: memref<1x512xf32, #tpu.memory_space<vmem>>, %arg2: memref<128x512xf32, #tpu.memory_space<vmem>>, %arg3: memref<1x512xf32, #tpu.memory_space<vmem>>, %arg4: memref<256x512xf32, #tpu.memory_space<vmem>>, %arg5: memref<1x512xf32, #tpu.memory_space<vmem>>, %arg6: memref<128x1xf32, #tpu.memory_space<vmem>>, %arg7: memref<1x1xf32, #tpu.memory_space<vmem>>, %arg8: memref<8x1xf32, #tpu.memory_space<vmem>>) attributes {dimension_semantics = [], scalar_prefetch = 0 : i64, scratch_operands = 0 : i64, tpu.core_type = #tpu.core_type<tc>} {
    %c0 = arith.constant 0 : index
    %c0_0 = arith.constant 0 : index
    %0 = vector.load %arg0[%c0, %c0_0] : memref<64x1xf32, #tpu.memory_space<vmem>>, vector<64x1xf32>
    %c0_1 = arith.constant 0 : index
    %c0_2 = arith.constant 0 : index
    %1 = vector.load %arg1[%c0_1, %c0_2] : memref<1x512xf32, #tpu.memory_space<vmem>>, vector<1x512xf32>
    %2 = vector.broadcast %0 : vector<64x1xf32> to vector<64x512xf32>
    %3 = vector.broadcast %1 : vector<1x512xf32> to vector<64x512xf32>
    %4 = arith.mulf %2, %3 : vector<64x512xf32>
    %c0_3 = arith.constant 0 : index
    %c0_4 = arith.constant 0 : index
    %5 = vector.load %arg3[%c0_3, %c0_4] : memref<1x512xf32, #tpu.memory_space<vmem>>, vector<1x512xf32>
    %6 = vector.broadcast %5 : vector<1x512xf32> to vector<64x512xf32>
    %7 = arith.addf %4, %6 : vector<64x512xf32>
    %c0_5 = arith.constant 0 : index
    %c0_6 = arith.constant 0 : index
    %8 = vector.load %arg5[%c0_5, %c0_6] : memref<1x512xf32, #tpu.memory_space<vmem>>, vector<1x512xf32>
    %9 = vector.shape_cast %8 : vector<1x512xf32> to vector<1x512xf32>
    %10 = vector.broadcast %9 : vector<1x512xf32> to vector<8x512xf32>
    %c0_7 = arith.constant 0 : index
    %c0_8 = arith.constant 0 : index
    %11 = vector.load %arg2[%c0_7, %c0_8] : memref<128x512xf32, #tpu.memory_space<vmem>>, vector<128x512xf32>
    %c0_9 = arith.constant 0 : index
    %c0_10 = arith.constant 0 : index
    %12 = vector.load %arg4[%c0_9, %c0_10] : memref<256x512xf32, #tpu.memory_space<vmem>>, vector<256x512xf32>
    %cst = arith.constant 0.000000e+00 : f32
    %13 = vector.broadcast %cst : f32 to vector<8x128xf32>
    %14 = vector.extract_strided_slice %7 {offsets = [0, 0], sizes = [8, 512], strides = [1, 1]} : vector<64x512xf32> to vector<8x512xf32>
    %cst_11 = arith.constant dense<0.000000e+00> : vector<8x512xf32>
    %15 = tpu.matmul %13, %11, %cst_11 {dimension_numbers = #tpu.dot_dimension_numbers<[1], [0], [0], [1], [0, 0, 1, 1], [], []>} : vector<8x128xf32>, vector<128x512xf32>, vector<8x512xf32> -> vector<8x512xf32>
    %16 = arith.addf %14, %15 : vector<8x512xf32>
    %17 = vector.extract_strided_slice %16 {offsets = [0, 0], sizes = [8, 128], strides = [1, 1]} : vector<8x512xf32> to vector<8x128xf32>
    %18 = arith.negf %17 : vector<8x128xf32>
    %19 = math.exp %18 : vector<8x128xf32>
    %cst_12 = arith.constant 1.000000e+00 : f32
    %20 = vector.broadcast %cst_12 : f32 to vector<8x128xf32>
    %21 = arith.addf %20, %19 : vector<8x128xf32>
    %22 = arith.divf %20, %21 : vector<8x128xf32>
    %23 = vector.extract_strided_slice %16 {offsets = [0, 128], sizes = [8, 128], strides = [1, 1]} : vector<8x512xf32> to vector<8x128xf32>
    %24 = arith.negf %23 : vector<8x128xf32>
    %25 = math.exp %24 : vector<8x128xf32>
    %cst_13 = arith.constant 1.000000e+00 : f32
    %26 = vector.broadcast %cst_13 : f32 to vector<8x128xf32>
    %27 = arith.addf %26, %25 : vector<8x128xf32>
    %28 = arith.divf %26, %27 : vector<8x128xf32>
    %29 = vector.extract_strided_slice %16 {offsets = [0, 256], sizes = [8, 128], strides = [1, 1]} : vector<8x512xf32> to vector<8x128xf32>
    %30 = math.tanh %29 : vector<8x128xf32>
    %31 = vector.extract_strided_slice %16 {offsets = [0, 384], sizes = [8, 128], strides = [1, 1]} : vector<8x512xf32> to vector<8x128xf32>
    %32 = arith.negf %31 : vector<8x128xf32>
    %33 = math.exp %32 : vector<8x128xf32>
    %cst_14 = arith.constant 1.000000e+00 : f32
    %34 = vector.broadcast %cst_14 : f32 to vector<8x128xf32>
    %35 = arith.addf %34, %33 : vector<8x128xf32>
    %36 = arith.divf %34, %35 : vector<8x128xf32>
    %37 = arith.mulf %28, %13 : vector<8x128xf32>
    %38 = arith.mulf %22, %30 : vector<8x128xf32>
    %39 = arith.addf %37, %38 : vector<8x128xf32>
    %40 = math.tanh %39 : vector<8x128xf32>
    %41 = arith.mulf %36, %40 : vector<8x128xf32>
    %42 = tpu.concatenate %41, %13 in 1 : vector<8x128xf32>, vector<8x128xf32> -> vector<8x256xf32>
    %cst_15 = arith.constant dense<0.000000e+00> : vector<8x512xf32>
    %43 = tpu.matmul %42, %12, %cst_15 {dimension_numbers = #tpu.dot_dimension_numbers<[1], [0], [0], [1], [0, 0, 1, 1], [], []>} : vector<8x256xf32>, vector<256x512xf32>, vector<8x512xf32> -> vector<8x512xf32>
    %44 = arith.addf %10, %43 : vector<8x512xf32>
    %45 = vector.extract_strided_slice %44 {offsets = [0, 0], sizes = [8, 128], strides = [1, 1]} : vector<8x512xf32> to vector<8x128xf32>
    %46 = arith.negf %45 : vector<8x128xf32>
    %47 = math.exp %46 : vector<8x128xf32>
    %cst_16 = arith.constant 1.000000e+00 : f32
    %48 = vector.broadcast %cst_16 : f32 to vector<8x128xf32>
    %49 = arith.addf %48, %47 : vector<8x128xf32>
    %50 = arith.divf %48, %49 : vector<8x128xf32>
    %51 = vector.extract_strided_slice %44 {offsets = [0, 128], sizes = [8, 128], strides = [1, 1]} : vector<8x512xf32> to vector<8x128xf32>
    %52 = arith.negf %51 : vector<8x128xf32>
    %53 = math.exp %52 : vector<8x128xf32>
    %cst_17 = arith.constant 1.000000e+00 : f32
    %54 = vector.broadcast %cst_17 : f32 to vector<8x128xf32>
    %55 = arith.addf %54, %53 : vector<8x128xf32>
    %56 = arith.divf %54, %55 : vector<8x128xf32>
    %57 = vector.extract_strided_slice %44 {offsets = [0, 256], sizes = [8, 128], strides = [1, 1]} : vector<8x512xf32> to vector<8x128xf32>
    %58 = math.tanh %57 : vector<8x128xf32>
    %59 = vector.extract_strided_slice %44 {offsets = [0, 384], sizes = [8, 128], strides = [1, 1]} : vector<8x512xf32> to vector<8x128xf32>
    %60 = arith.negf %59 : vector<8x128xf32>
    %61 = math.exp %60 : vector<8x128xf32>
    %cst_18 = arith.constant 1.000000e+00 : f32
    %62 = vector.broadcast %cst_18 : f32 to vector<8x128xf32>
    %63 = arith.addf %62, %61 : vector<8x128xf32>
    %64 = arith.divf %62, %63 : vector<8x128xf32>
    %65 = arith.mulf %56, %13 : vector<8x128xf32>
    %66 = arith.mulf %50, %58 : vector<8x128xf32>
    %67 = arith.addf %65, %66 : vector<8x128xf32>
    %68 = math.tanh %67 : vector<8x128xf32>
    %69 = arith.mulf %64, %68 : vector<8x128xf32>
    %70 = vector.extract_strided_slice %7 {offsets = [8, 0], sizes = [8, 512], strides = [1, 1]} : vector<64x512xf32> to vector<8x512xf32>
    %cst_19 = arith.constant dense<0.000000e+00> : vector<8x512xf32>
    %71 = tpu.matmul %41, %11, %cst_19 {dimension_numbers = #tpu.dot_dimension_numbers<[1], [0], [0], [1], [0, 0, 1, 1], [], []>} : vector<8x128xf32>, vector<128x512xf32>, vector<8x512xf32> -> vector<8x512xf32>
    %72 = arith.addf %70, %71 : vector<8x512xf32>
    %73 = vector.extract_strided_slice %72 {offsets = [0, 0], sizes = [8, 128], strides = [1, 1]} : vector<8x512xf32> to vector<8x128xf32>
    %74 = arith.negf %73 : vector<8x128xf32>
    %75 = math.exp %74 : vector<8x128xf32>
    %cst_20 = arith.constant 1.000000e+00 : f32
    %76 = vector.broadcast %cst_20 : f32 to vector<8x128xf32>
    %77 = arith.addf %76, %75 : vector<8x128xf32>
    %78 = arith.divf %76, %77 : vector<8x128xf32>
    %79 = vector.extract_strided_slice %72 {offsets = [0, 128], sizes = [8, 128], strides = [1, 1]} : vector<8x512xf32> to vector<8x128xf32>
    %80 = arith.negf %79 : vector<8x128xf32>
    %81 = math.exp %80 : vector<8x128xf32>
    %cst_21 = arith.constant 1.000000e+00 : f32
    %82 = vector.broadcast %cst_21 : f32 to vector<8x128xf32>
    %83 = arith.addf %82, %81 : vector<8x128xf32>
    %84 = arith.divf %82, %83 : vector<8x128xf32>
    %85 = vector.extract_strided_slice %72 {offsets = [0, 256], sizes = [8, 128], strides = [1, 1]} : vector<8x512xf32> to vector<8x128xf32>
    %86 = math.tanh %85 : vector<8x128xf32>
    %87 = vector.extract_strided_slice %72 {offsets = [0, 384], sizes = [8, 128], strides = [1, 1]} : vector<8x512xf32> to vector<8x128xf32>
    %88 = arith.negf %87 : vector<8x128xf32>
    %89 = math.exp %88 : vector<8x128xf32>
    %cst_22 = arith.constant 1.000000e+00 : f32
    %90 = vector.broadcast %cst_22 : f32 to vector<8x128xf32>
    %91 = arith.addf %90, %89 : vector<8x128xf32>
    %92 = arith.divf %90, %91 : vector<8x128xf32>
    %93 = arith.mulf %84, %39 : vector<8x128xf32>
    %94 = arith.mulf %78, %86 : vector<8x128xf32>
    %95 = arith.addf %93, %94 : vector<8x128xf32>
    %96 = math.tanh %95 : vector<8x128xf32>
    %97 = arith.mulf %92, %96 : vector<8x128xf32>
    %98 = tpu.concatenate %97, %69 in 1 : vector<8x128xf32>, vector<8x128xf32> -> vector<8x256xf32>
    %cst_23 = arith.constant dense<0.000000e+00> : vector<8x512xf32>
    %99 = tpu.matmul %98, %12, %cst_23 {dimension_numbers = #tpu.dot_dimension_numbers<[1], [0], [0], [1], [0, 0, 1, 1], [], []>} : vector<8x256xf32>, vector<256x512xf32>, vector<8x512xf32> -> vector<8x512xf32>
    %100 = arith.addf %10, %99 : vector<8x512xf32>
    %101 = vector.extract_strided_slice %100 {offsets = [0, 0], sizes = [8, 128], strides = [1, 1]} : vector<8x512xf32> to vector<8x128xf32>
    %102 = arith.negf %101 : vector<8x128xf32>
    %103 = math.exp %102 : vector<8x128xf32>
    %cst_24 = arith.constant 1.000000e+00 : f32
    %104 = vector.broadcast %cst_24 : f32 to vector<8x128xf32>
    %105 = arith.addf %104, %103 : vector<8x128xf32>
    %106 = arith.divf %104, %105 : vector<8x128xf32>
    %107 = vector.extract_strided_slice %100 {offsets = [0, 128], sizes = [8, 128], strides = [1, 1]} : vector<8x512xf32> to vector<8x128xf32>
    %108 = arith.negf %107 : vector<8x128xf32>
    %109 = math.exp %108 : vector<8x128xf32>
    %cst_25 = arith.constant 1.000000e+00 : f32
    %110 = vector.broadcast %cst_25 : f32 to vector<8x128xf32>
    %111 = arith.addf %110, %109 : vector<8x128xf32>
    %112 = arith.divf %110, %111 : vector<8x128xf32>
    %113 = vector.extract_strided_slice %100 {offsets = [0, 256], sizes = [8, 128], strides = [1, 1]} : vector<8x512xf32> to vector<8x128xf32>
    %114 = math.tanh %113 : vector<8x128xf32>
    %115 = vector.extract_strided_slice %100 {offsets = [0, 384], sizes = [8, 128], strides = [1, 1]} : vector<8x512xf32> to vector<8x128xf32>
    %116 = arith.negf %115 : vector<8x128xf32>
    %117 = math.exp %116 : vector<8x128xf32>
    %cst_26 = arith.constant 1.000000e+00 : f32
    %118 = vector.broadcast %cst_26 : f32 to vector<8x128xf32>
    %119 = arith.addf %118, %117 : vector<8x128xf32>
    %120 = arith.divf %118, %119 : vector<8x128xf32>
    %121 = arith.mulf %112, %67 : vector<8x128xf32>
    %122 = arith.mulf %106, %114 : vector<8x128xf32>
    %123 = arith.addf %121, %122 : vector<8x128xf32>
    %124 = math.tanh %123 : vector<8x128xf32>
    %125 = arith.mulf %120, %124 : vector<8x128xf32>
    %126 = vector.extract_strided_slice %7 {offsets = [16, 0], sizes = [8, 512], strides = [1, 1]} : vector<64x512xf32> to vector<8x512xf32>
    %cst_27 = arith.constant dense<0.000000e+00> : vector<8x512xf32>
    %127 = tpu.matmul %97, %11, %cst_27 {dimension_numbers = #tpu.dot_dimension_numbers<[1], [0], [0], [1], [0, 0, 1, 1], [], []>} : vector<8x128xf32>, vector<128x512xf32>, vector<8x512xf32> -> vector<8x512xf32>
    %128 = arith.addf %126, %127 : vector<8x512xf32>
    %129 = vector.extract_strided_slice %128 {offsets = [0, 0], sizes = [8, 128], strides = [1, 1]} : vector<8x512xf32> to vector<8x128xf32>
    %130 = arith.negf %129 : vector<8x128xf32>
    %131 = math.exp %130 : vector<8x128xf32>
    %cst_28 = arith.constant 1.000000e+00 : f32
    %132 = vector.broadcast %cst_28 : f32 to vector<8x128xf32>
    %133 = arith.addf %132, %131 : vector<8x128xf32>
    %134 = arith.divf %132, %133 : vector<8x128xf32>
    %135 = vector.extract_strided_slice %128 {offsets = [0, 128], sizes = [8, 128], strides = [1, 1]} : vector<8x512xf32> to vector<8x128xf32>
    %136 = arith.negf %135 : vector<8x128xf32>
    %137 = math.exp %136 : vector<8x128xf32>
    %cst_29 = arith.constant 1.000000e+00 : f32
    %138 = vector.broadcast %cst_29 : f32 to vector<8x128xf32>
    %139 = arith.addf %138, %137 : vector<8x128xf32>
    %140 = arith.divf %138, %139 : vector<8x128xf32>
    %141 = vector.extract_strided_slice %128 {offsets = [0, 256], sizes = [8, 128], strides = [1, 1]} : vector<8x512xf32> to vector<8x128xf32>
    %142 = math.tanh %141 : vector<8x128xf32>
    %143 = vector.extract_strided_slice %128 {offsets = [0, 384], sizes = [8, 128], strides = [1, 1]} : vector<8x512xf32> to vector<8x128xf32>
    %144 = arith.negf %143 : vector<8x128xf32>
    %145 = math.exp %144 : vector<8x128xf32>
    %cst_30 = arith.constant 1.000000e+00 : f32
    %146 = vector.broadcast %cst_30 : f32 to vector<8x128xf32>
    %147 = arith.addf %146, %145 : vector<8x128xf32>
    %148 = arith.divf %146, %147 : vector<8x128xf32>
    %149 = arith.mulf %140, %95 : vector<8x128xf32>
    %150 = arith.mulf %134, %142 : vector<8x128xf32>
    %151 = arith.addf %149, %150 : vector<8x128xf32>
    %152 = math.tanh %151 : vector<8x128xf32>
    %153 = arith.mulf %148, %152 : vector<8x128xf32>
    %154 = tpu.concatenate %153, %125 in 1 : vector<8x128xf32>, vector<8x128xf32> -> vector<8x256xf32>
    %cst_31 = arith.constant dense<0.000000e+00> : vector<8x512xf32>
    %155 = tpu.matmul %154, %12, %cst_31 {dimension_numbers = #tpu.dot_dimension_numbers<[1], [0], [0], [1], [0, 0, 1, 1], [], []>} : vector<8x256xf32>, vector<256x512xf32>, vector<8x512xf32> -> vector<8x512xf32>
    %156 = arith.addf %10, %155 : vector<8x512xf32>
    %157 = vector.extract_strided_slice %156 {offsets = [0, 0], sizes = [8, 128], strides = [1, 1]} : vector<8x512xf32> to vector<8x128xf32>
    %158 = arith.negf %157 : vector<8x128xf32>
    %159 = math.exp %158 : vector<8x128xf32>
    %cst_32 = arith.constant 1.000000e+00 : f32
    %160 = vector.broadcast %cst_32 : f32 to vector<8x128xf32>
    %161 = arith.addf %160, %159 : vector<8x128xf32>
    %162 = arith.divf %160, %161 : vector<8x128xf32>
    %163 = vector.extract_strided_slice %156 {offsets = [0, 128], sizes = [8, 128], strides = [1, 1]} : vector<8x512xf32> to vector<8x128xf32>
    %164 = arith.negf %163 : vector<8x128xf32>
    %165 = math.exp %164 : vector<8x128xf32>
    %cst_33 = arith.constant 1.000000e+00 : f32
    %166 = vector.broadcast %cst_33 : f32 to vector<8x128xf32>
    %167 = arith.addf %166, %165 : vector<8x128xf32>
    %168 = arith.divf %166, %167 : vector<8x128xf32>
    %169 = vector.extract_strided_slice %156 {offsets = [0, 256], sizes = [8, 128], strides = [1, 1]} : vector<8x512xf32> to vector<8x128xf32>
    %170 = math.tanh %169 : vector<8x128xf32>
    %171 = vector.extract_strided_slice %156 {offsets = [0, 384], sizes = [8, 128], strides = [1, 1]} : vector<8x512xf32> to vector<8x128xf32>
    %172 = arith.negf %171 : vector<8x128xf32>
    %173 = math.exp %172 : vector<8x128xf32>
    %cst_34 = arith.constant 1.000000e+00 : f32
    %174 = vector.broadcast %cst_34 : f32 to vector<8x128xf32>
    %175 = arith.addf %174, %173 : vector<8x128xf32>
    %176 = arith.divf %174, %175 : vector<8x128xf32>
    %177 = arith.mulf %168, %123 : vector<8x128xf32>
    %178 = arith.mulf %162, %170 : vector<8x128xf32>
    %179 = arith.addf %177, %178 : vector<8x128xf32>
    %180 = math.tanh %179 : vector<8x128xf32>
    %181 = arith.mulf %176, %180 : vector<8x128xf32>
    %182 = vector.extract_strided_slice %7 {offsets = [24, 0], sizes = [8, 512], strides = [1, 1]} : vector<64x512xf32> to vector<8x512xf32>
    %cst_35 = arith.constant dense<0.000000e+00> : vector<8x512xf32>
    %183 = tpu.matmul %153, %11, %cst_35 {dimension_numbers = #tpu.dot_dimension_numbers<[1], [0], [0], [1], [0, 0, 1, 1], [], []>} : vector<8x128xf32>, vector<128x512xf32>, vector<8x512xf32> -> vector<8x512xf32>
    %184 = arith.addf %182, %183 : vector<8x512xf32>
    %185 = vector.extract_strided_slice %184 {offsets = [0, 0], sizes = [8, 128], strides = [1, 1]} : vector<8x512xf32> to vector<8x128xf32>
    %186 = arith.negf %185 : vector<8x128xf32>
    %187 = math.exp %186 : vector<8x128xf32>
    %cst_36 = arith.constant 1.000000e+00 : f32
    %188 = vector.broadcast %cst_36 : f32 to vector<8x128xf32>
    %189 = arith.addf %188, %187 : vector<8x128xf32>
    %190 = arith.divf %188, %189 : vector<8x128xf32>
    %191 = vector.extract_strided_slice %184 {offsets = [0, 128], sizes = [8, 128], strides = [1, 1]} : vector<8x512xf32> to vector<8x128xf32>
    %192 = arith.negf %191 : vector<8x128xf32>
    %193 = math.exp %192 : vector<8x128xf32>
    %cst_37 = arith.constant 1.000000e+00 : f32
    %194 = vector.broadcast %cst_37 : f32 to vector<8x128xf32>
    %195 = arith.addf %194, %193 : vector<8x128xf32>
    %196 = arith.divf %194, %195 : vector<8x128xf32>
    %197 = vector.extract_strided_slice %184 {offsets = [0, 256], sizes = [8, 128], strides = [1, 1]} : vector<8x512xf32> to vector<8x128xf32>
    %198 = math.tanh %197 : vector<8x128xf32>
    %199 = vector.extract_strided_slice %184 {offsets = [0, 384], sizes = [8, 128], strides = [1, 1]} : vector<8x512xf32> to vector<8x128xf32>
    %200 = arith.negf %199 : vector<8x128xf32>
    %201 = math.exp %200 : vector<8x128xf32>
    %cst_38 = arith.constant 1.000000e+00 : f32
    %202 = vector.broadcast %cst_38 : f32 to vector<8x128xf32>
    %203 = arith.addf %202, %201 : vector<8x128xf32>
    %204 = arith.divf %202, %203 : vector<8x128xf32>
    %205 = arith.mulf %196, %151 : vector<8x128xf32>
    %206 = arith.mulf %190, %198 : vector<8x128xf32>
    %207 = arith.addf %205, %206 : vector<8x128xf32>
    %208 = math.tanh %207 : vector<8x128xf32>
    %209 = arith.mulf %204, %208 : vector<8x128xf32>
    %210 = tpu.concatenate %209, %181 in 1 : vector<8x128xf32>, vector<8x128xf32> -> vector<8x256xf32>
    %cst_39 = arith.constant dense<0.000000e+00> : vector<8x512xf32>
    %211 = tpu.matmul %210, %12, %cst_39 {dimension_numbers = #tpu.dot_dimension_numbers<[1], [0], [0], [1], [0, 0, 1, 1], [], []>} : vector<8x256xf32>, vector<256x512xf32>, vector<8x512xf32> -> vector<8x512xf32>
    %212 = arith.addf %10, %211 : vector<8x512xf32>
    %213 = vector.extract_strided_slice %212 {offsets = [0, 0], sizes = [8, 128], strides = [1, 1]} : vector<8x512xf32> to vector<8x128xf32>
    %214 = arith.negf %213 : vector<8x128xf32>
    %215 = math.exp %214 : vector<8x128xf32>
    %cst_40 = arith.constant 1.000000e+00 : f32
    %216 = vector.broadcast %cst_40 : f32 to vector<8x128xf32>
    %217 = arith.addf %216, %215 : vector<8x128xf32>
    %218 = arith.divf %216, %217 : vector<8x128xf32>
    %219 = vector.extract_strided_slice %212 {offsets = [0, 128], sizes = [8, 128], strides = [1, 1]} : vector<8x512xf32> to vector<8x128xf32>
    %220 = arith.negf %219 : vector<8x128xf32>
    %221 = math.exp %220 : vector<8x128xf32>
    %cst_41 = arith.constant 1.000000e+00 : f32
    %222 = vector.broadcast %cst_41 : f32 to vector<8x128xf32>
    %223 = arith.addf %222, %221 : vector<8x128xf32>
    %224 = arith.divf %222, %223 : vector<8x128xf32>
    %225 = vector.extract_strided_slice %212 {offsets = [0, 256], sizes = [8, 128], strides = [1, 1]} : vector<8x512xf32> to vector<8x128xf32>
    %226 = math.tanh %225 : vector<8x128xf32>
    %227 = vector.extract_strided_slice %212 {offsets = [0, 384], sizes = [8, 128], strides = [1, 1]} : vector<8x512xf32> to vector<8x128xf32>
    %228 = arith.negf %227 : vector<8x128xf32>
    %229 = math.exp %228 : vector<8x128xf32>
    %cst_42 = arith.constant 1.000000e+00 : f32
    %230 = vector.broadcast %cst_42 : f32 to vector<8x128xf32>
    %231 = arith.addf %230, %229 : vector<8x128xf32>
    %232 = arith.divf %230, %231 : vector<8x128xf32>
    %233 = arith.mulf %224, %179 : vector<8x128xf32>
    %234 = arith.mulf %218, %226 : vector<8x128xf32>
    %235 = arith.addf %233, %234 : vector<8x128xf32>
    %236 = math.tanh %235 : vector<8x128xf32>
    %237 = arith.mulf %232, %236 : vector<8x128xf32>
    %238 = vector.extract_strided_slice %7 {offsets = [32, 0], sizes = [8, 512], strides = [1, 1]} : vector<64x512xf32> to vector<8x512xf32>
    %cst_43 = arith.constant dense<0.000000e+00> : vector<8x512xf32>
    %239 = tpu.matmul %209, %11, %cst_43 {dimension_numbers = #tpu.dot_dimension_numbers<[1], [0], [0], [1], [0, 0, 1, 1], [], []>} : vector<8x128xf32>, vector<128x512xf32>, vector<8x512xf32> -> vector<8x512xf32>
    %240 = arith.addf %238, %239 : vector<8x512xf32>
    %241 = vector.extract_strided_slice %240 {offsets = [0, 0], sizes = [8, 128], strides = [1, 1]} : vector<8x512xf32> to vector<8x128xf32>
    %242 = arith.negf %241 : vector<8x128xf32>
    %243 = math.exp %242 : vector<8x128xf32>
    %cst_44 = arith.constant 1.000000e+00 : f32
    %244 = vector.broadcast %cst_44 : f32 to vector<8x128xf32>
    %245 = arith.addf %244, %243 : vector<8x128xf32>
    %246 = arith.divf %244, %245 : vector<8x128xf32>
    %247 = vector.extract_strided_slice %240 {offsets = [0, 128], sizes = [8, 128], strides = [1, 1]} : vector<8x512xf32> to vector<8x128xf32>
    %248 = arith.negf %247 : vector<8x128xf32>
    %249 = math.exp %248 : vector<8x128xf32>
    %cst_45 = arith.constant 1.000000e+00 : f32
    %250 = vector.broadcast %cst_45 : f32 to vector<8x128xf32>
    %251 = arith.addf %250, %249 : vector<8x128xf32>
    %252 = arith.divf %250, %251 : vector<8x128xf32>
    %253 = vector.extract_strided_slice %240 {offsets = [0, 256], sizes = [8, 128], strides = [1, 1]} : vector<8x512xf32> to vector<8x128xf32>
    %254 = math.tanh %253 : vector<8x128xf32>
    %255 = vector.extract_strided_slice %240 {offsets = [0, 384], sizes = [8, 128], strides = [1, 1]} : vector<8x512xf32> to vector<8x128xf32>
    %256 = arith.negf %255 : vector<8x128xf32>
    %257 = math.exp %256 : vector<8x128xf32>
    %cst_46 = arith.constant 1.000000e+00 : f32
    %258 = vector.broadcast %cst_46 : f32 to vector<8x128xf32>
    %259 = arith.addf %258, %257 : vector<8x128xf32>
    %260 = arith.divf %258, %259 : vector<8x128xf32>
    %261 = arith.mulf %252, %207 : vector<8x128xf32>
    %262 = arith.mulf %246, %254 : vector<8x128xf32>
    %263 = arith.addf %261, %262 : vector<8x128xf32>
    %264 = math.tanh %263 : vector<8x128xf32>
    %265 = arith.mulf %260, %264 : vector<8x128xf32>
    %266 = tpu.concatenate %265, %237 in 1 : vector<8x128xf32>, vector<8x128xf32> -> vector<8x256xf32>
    %cst_47 = arith.constant dense<0.000000e+00> : vector<8x512xf32>
    %267 = tpu.matmul %266, %12, %cst_47 {dimension_numbers = #tpu.dot_dimension_numbers<[1], [0], [0], [1], [0, 0, 1, 1], [], []>} : vector<8x256xf32>, vector<256x512xf32>, vector<8x512xf32> -> vector<8x512xf32>
    %268 = arith.addf %10, %267 : vector<8x512xf32>
    %269 = vector.extract_strided_slice %268 {offsets = [0, 0], sizes = [8, 128], strides = [1, 1]} : vector<8x512xf32> to vector<8x128xf32>
    %270 = arith.negf %269 : vector<8x128xf32>
    %271 = math.exp %270 : vector<8x128xf32>
    %cst_48 = arith.constant 1.000000e+00 : f32
    %272 = vector.broadcast %cst_48 : f32 to vector<8x128xf32>
    %273 = arith.addf %272, %271 : vector<8x128xf32>
    %274 = arith.divf %272, %273 : vector<8x128xf32>
    %275 = vector.extract_strided_slice %268 {offsets = [0, 128], sizes = [8, 128], strides = [1, 1]} : vector<8x512xf32> to vector<8x128xf32>
    %276 = arith.negf %275 : vector<8x128xf32>
    %277 = math.exp %276 : vector<8x128xf32>
    %cst_49 = arith.constant 1.000000e+00 : f32
    %278 = vector.broadcast %cst_49 : f32 to vector<8x128xf32>
    %279 = arith.addf %278, %277 : vector<8x128xf32>
    %280 = arith.divf %278, %279 : vector<8x128xf32>
    %281 = vector.extract_strided_slice %268 {offsets = [0, 256], sizes = [8, 128], strides = [1, 1]} : vector<8x512xf32> to vector<8x128xf32>
    %282 = math.tanh %281 : vector<8x128xf32>
    %283 = vector.extract_strided_slice %268 {offsets = [0, 384], sizes = [8, 128], strides = [1, 1]} : vector<8x512xf32> to vector<8x128xf32>
    %284 = arith.negf %283 : vector<8x128xf32>
    %285 = math.exp %284 : vector<8x128xf32>
    %cst_50 = arith.constant 1.000000e+00 : f32
    %286 = vector.broadcast %cst_50 : f32 to vector<8x128xf32>
    %287 = arith.addf %286, %285 : vector<8x128xf32>
    %288 = arith.divf %286, %287 : vector<8x128xf32>
    %289 = arith.mulf %280, %235 : vector<8x128xf32>
    %290 = arith.mulf %274, %282 : vector<8x128xf32>
    %291 = arith.addf %289, %290 : vector<8x128xf32>
    %292 = math.tanh %291 : vector<8x128xf32>
    %293 = arith.mulf %288, %292 : vector<8x128xf32>
    %294 = vector.extract_strided_slice %7 {offsets = [40, 0], sizes = [8, 512], strides = [1, 1]} : vector<64x512xf32> to vector<8x512xf32>
    %cst_51 = arith.constant dense<0.000000e+00> : vector<8x512xf32>
    %295 = tpu.matmul %265, %11, %cst_51 {dimension_numbers = #tpu.dot_dimension_numbers<[1], [0], [0], [1], [0, 0, 1, 1], [], []>} : vector<8x128xf32>, vector<128x512xf32>, vector<8x512xf32> -> vector<8x512xf32>
    %296 = arith.addf %294, %295 : vector<8x512xf32>
    %297 = vector.extract_strided_slice %296 {offsets = [0, 0], sizes = [8, 128], strides = [1, 1]} : vector<8x512xf32> to vector<8x128xf32>
    %298 = arith.negf %297 : vector<8x128xf32>
    %299 = math.exp %298 : vector<8x128xf32>
    %cst_52 = arith.constant 1.000000e+00 : f32
    %300 = vector.broadcast %cst_52 : f32 to vector<8x128xf32>
    %301 = arith.addf %300, %299 : vector<8x128xf32>
    %302 = arith.divf %300, %301 : vector<8x128xf32>
    %303 = vector.extract_strided_slice %296 {offsets = [0, 128], sizes = [8, 128], strides = [1, 1]} : vector<8x512xf32> to vector<8x128xf32>
    %304 = arith.negf %303 : vector<8x128xf32>
    %305 = math.exp %304 : vector<8x128xf32>
    %cst_53 = arith.constant 1.000000e+00 : f32
    %306 = vector.broadcast %cst_53 : f32 to vector<8x128xf32>
    %307 = arith.addf %306, %305 : vector<8x128xf32>
    %308 = arith.divf %306, %307 : vector<8x128xf32>
    %309 = vector.extract_strided_slice %296 {offsets = [0, 256], sizes = [8, 128], strides = [1, 1]} : vector<8x512xf32> to vector<8x128xf32>
    %310 = math.tanh %309 : vector<8x128xf32>
    %311 = vector.extract_strided_slice %296 {offsets = [0, 384], sizes = [8, 128], strides = [1, 1]} : vector<8x512xf32> to vector<8x128xf32>
    %312 = arith.negf %311 : vector<8x128xf32>
    %313 = math.exp %312 : vector<8x128xf32>
    %cst_54 = arith.constant 1.000000e+00 : f32
    %314 = vector.broadcast %cst_54 : f32 to vector<8x128xf32>
    %315 = arith.addf %314, %313 : vector<8x128xf32>
    %316 = arith.divf %314, %315 : vector<8x128xf32>
    %317 = arith.mulf %308, %263 : vector<8x128xf32>
    %318 = arith.mulf %302, %310 : vector<8x128xf32>
    %319 = arith.addf %317, %318 : vector<8x128xf32>
    %320 = math.tanh %319 : vector<8x128xf32>
    %321 = arith.mulf %316, %320 : vector<8x128xf32>
    %322 = tpu.concatenate %321, %293 in 1 : vector<8x128xf32>, vector<8x128xf32> -> vector<8x256xf32>
    %cst_55 = arith.constant dense<0.000000e+00> : vector<8x512xf32>
    %323 = tpu.matmul %322, %12, %cst_55 {dimension_numbers = #tpu.dot_dimension_numbers<[1], [0], [0], [1], [0, 0, 1, 1], [], []>} : vector<8x256xf32>, vector<256x512xf32>, vector<8x512xf32> -> vector<8x512xf32>
    %324 = arith.addf %10, %323 : vector<8x512xf32>
    %325 = vector.extract_strided_slice %324 {offsets = [0, 0], sizes = [8, 128], strides = [1, 1]} : vector<8x512xf32> to vector<8x128xf32>
    %326 = arith.negf %325 : vector<8x128xf32>
    %327 = math.exp %326 : vector<8x128xf32>
    %cst_56 = arith.constant 1.000000e+00 : f32
    %328 = vector.broadcast %cst_56 : f32 to vector<8x128xf32>
    %329 = arith.addf %328, %327 : vector<8x128xf32>
    %330 = arith.divf %328, %329 : vector<8x128xf32>
    %331 = vector.extract_strided_slice %324 {offsets = [0, 128], sizes = [8, 128], strides = [1, 1]} : vector<8x512xf32> to vector<8x128xf32>
    %332 = arith.negf %331 : vector<8x128xf32>
    %333 = math.exp %332 : vector<8x128xf32>
    %cst_57 = arith.constant 1.000000e+00 : f32
    %334 = vector.broadcast %cst_57 : f32 to vector<8x128xf32>
    %335 = arith.addf %334, %333 : vector<8x128xf32>
    %336 = arith.divf %334, %335 : vector<8x128xf32>
    %337 = vector.extract_strided_slice %324 {offsets = [0, 256], sizes = [8, 128], strides = [1, 1]} : vector<8x512xf32> to vector<8x128xf32>
    %338 = math.tanh %337 : vector<8x128xf32>
    %339 = vector.extract_strided_slice %324 {offsets = [0, 384], sizes = [8, 128], strides = [1, 1]} : vector<8x512xf32> to vector<8x128xf32>
    %340 = arith.negf %339 : vector<8x128xf32>
    %341 = math.exp %340 : vector<8x128xf32>
    %cst_58 = arith.constant 1.000000e+00 : f32
    %342 = vector.broadcast %cst_58 : f32 to vector<8x128xf32>
    %343 = arith.addf %342, %341 : vector<8x128xf32>
    %344 = arith.divf %342, %343 : vector<8x128xf32>
    %345 = arith.mulf %336, %291 : vector<8x128xf32>
    %346 = arith.mulf %330, %338 : vector<8x128xf32>
    %347 = arith.addf %345, %346 : vector<8x128xf32>
    %348 = math.tanh %347 : vector<8x128xf32>
    %349 = arith.mulf %344, %348 : vector<8x128xf32>
    %350 = vector.extract_strided_slice %7 {offsets = [48, 0], sizes = [8, 512], strides = [1, 1]} : vector<64x512xf32> to vector<8x512xf32>
    %cst_59 = arith.constant dense<0.000000e+00> : vector<8x512xf32>
    %351 = tpu.matmul %321, %11, %cst_59 {dimension_numbers = #tpu.dot_dimension_numbers<[1], [0], [0], [1], [0, 0, 1, 1], [], []>} : vector<8x128xf32>, vector<128x512xf32>, vector<8x512xf32> -> vector<8x512xf32>
    %352 = arith.addf %350, %351 : vector<8x512xf32>
    %353 = vector.extract_strided_slice %352 {offsets = [0, 0], sizes = [8, 128], strides = [1, 1]} : vector<8x512xf32> to vector<8x128xf32>
    %354 = arith.negf %353 : vector<8x128xf32>
    %355 = math.exp %354 : vector<8x128xf32>
    %cst_60 = arith.constant 1.000000e+00 : f32
    %356 = vector.broadcast %cst_60 : f32 to vector<8x128xf32>
    %357 = arith.addf %356, %355 : vector<8x128xf32>
    %358 = arith.divf %356, %357 : vector<8x128xf32>
    %359 = vector.extract_strided_slice %352 {offsets = [0, 128], sizes = [8, 128], strides = [1, 1]} : vector<8x512xf32> to vector<8x128xf32>
    %360 = arith.negf %359 : vector<8x128xf32>
    %361 = math.exp %360 : vector<8x128xf32>
    %cst_61 = arith.constant 1.000000e+00 : f32
    %362 = vector.broadcast %cst_61 : f32 to vector<8x128xf32>
    %363 = arith.addf %362, %361 : vector<8x128xf32>
    %364 = arith.divf %362, %363 : vector<8x128xf32>
    %365 = vector.extract_strided_slice %352 {offsets = [0, 256], sizes = [8, 128], strides = [1, 1]} : vector<8x512xf32> to vector<8x128xf32>
    %366 = math.tanh %365 : vector<8x128xf32>
    %367 = vector.extract_strided_slice %352 {offsets = [0, 384], sizes = [8, 128], strides = [1, 1]} : vector<8x512xf32> to vector<8x128xf32>
    %368 = arith.negf %367 : vector<8x128xf32>
    %369 = math.exp %368 : vector<8x128xf32>
    %cst_62 = arith.constant 1.000000e+00 : f32
    %370 = vector.broadcast %cst_62 : f32 to vector<8x128xf32>
    %371 = arith.addf %370, %369 : vector<8x128xf32>
    %372 = arith.divf %370, %371 : vector<8x128xf32>
    %373 = arith.mulf %364, %319 : vector<8x128xf32>
    %374 = arith.mulf %358, %366 : vector<8x128xf32>
    %375 = arith.addf %373, %374 : vector<8x128xf32>
    %376 = math.tanh %375 : vector<8x128xf32>
    %377 = arith.mulf %372, %376 : vector<8x128xf32>
    %378 = tpu.concatenate %377, %349 in 1 : vector<8x128xf32>, vector<8x128xf32> -> vector<8x256xf32>
    %cst_63 = arith.constant dense<0.000000e+00> : vector<8x512xf32>
    %379 = tpu.matmul %378, %12, %cst_63 {dimension_numbers = #tpu.dot_dimension_numbers<[1], [0], [0], [1], [0, 0, 1, 1], [], []>} : vector<8x256xf32>, vector<256x512xf32>, vector<8x512xf32> -> vector<8x512xf32>
    %380 = arith.addf %10, %379 : vector<8x512xf32>
    %381 = vector.extract_strided_slice %380 {offsets = [0, 0], sizes = [8, 128], strides = [1, 1]} : vector<8x512xf32> to vector<8x128xf32>
    %382 = arith.negf %381 : vector<8x128xf32>
    %383 = math.exp %382 : vector<8x128xf32>
    %cst_64 = arith.constant 1.000000e+00 : f32
    %384 = vector.broadcast %cst_64 : f32 to vector<8x128xf32>
    %385 = arith.addf %384, %383 : vector<8x128xf32>
    %386 = arith.divf %384, %385 : vector<8x128xf32>
    %387 = vector.extract_strided_slice %380 {offsets = [0, 128], sizes = [8, 128], strides = [1, 1]} : vector<8x512xf32> to vector<8x128xf32>
    %388 = arith.negf %387 : vector<8x128xf32>
    %389 = math.exp %388 : vector<8x128xf32>
    %cst_65 = arith.constant 1.000000e+00 : f32
    %390 = vector.broadcast %cst_65 : f32 to vector<8x128xf32>
    %391 = arith.addf %390, %389 : vector<8x128xf32>
    %392 = arith.divf %390, %391 : vector<8x128xf32>
    %393 = vector.extract_strided_slice %380 {offsets = [0, 256], sizes = [8, 128], strides = [1, 1]} : vector<8x512xf32> to vector<8x128xf32>
    %394 = math.tanh %393 : vector<8x128xf32>
    %395 = vector.extract_strided_slice %380 {offsets = [0, 384], sizes = [8, 128], strides = [1, 1]} : vector<8x512xf32> to vector<8x128xf32>
    %396 = arith.negf %395 : vector<8x128xf32>
    %397 = math.exp %396 : vector<8x128xf32>
    %cst_66 = arith.constant 1.000000e+00 : f32
    %398 = vector.broadcast %cst_66 : f32 to vector<8x128xf32>
    %399 = arith.addf %398, %397 : vector<8x128xf32>
    %400 = arith.divf %398, %399 : vector<8x128xf32>
    %401 = arith.mulf %392, %347 : vector<8x128xf32>
    %402 = arith.mulf %386, %394 : vector<8x128xf32>
    %403 = arith.addf %401, %402 : vector<8x128xf32>
    %404 = math.tanh %403 : vector<8x128xf32>
    %405 = arith.mulf %400, %404 : vector<8x128xf32>
    %406 = vector.extract_strided_slice %7 {offsets = [56, 0], sizes = [8, 512], strides = [1, 1]} : vector<64x512xf32> to vector<8x512xf32>
    %cst_67 = arith.constant dense<0.000000e+00> : vector<8x512xf32>
    %407 = tpu.matmul %377, %11, %cst_67 {dimension_numbers = #tpu.dot_dimension_numbers<[1], [0], [0], [1], [0, 0, 1, 1], [], []>} : vector<8x128xf32>, vector<128x512xf32>, vector<8x512xf32> -> vector<8x512xf32>
    %408 = arith.addf %406, %407 : vector<8x512xf32>
    %409 = vector.extract_strided_slice %408 {offsets = [0, 0], sizes = [8, 128], strides = [1, 1]} : vector<8x512xf32> to vector<8x128xf32>
    %410 = arith.negf %409 : vector<8x128xf32>
    %411 = math.exp %410 : vector<8x128xf32>
    %cst_68 = arith.constant 1.000000e+00 : f32
    %412 = vector.broadcast %cst_68 : f32 to vector<8x128xf32>
    %413 = arith.addf %412, %411 : vector<8x128xf32>
    %414 = arith.divf %412, %413 : vector<8x128xf32>
    %415 = vector.extract_strided_slice %408 {offsets = [0, 128], sizes = [8, 128], strides = [1, 1]} : vector<8x512xf32> to vector<8x128xf32>
    %416 = arith.negf %415 : vector<8x128xf32>
    %417 = math.exp %416 : vector<8x128xf32>
    %cst_69 = arith.constant 1.000000e+00 : f32
    %418 = vector.broadcast %cst_69 : f32 to vector<8x128xf32>
    %419 = arith.addf %418, %417 : vector<8x128xf32>
    %420 = arith.divf %418, %419 : vector<8x128xf32>
    %421 = vector.extract_strided_slice %408 {offsets = [0, 256], sizes = [8, 128], strides = [1, 1]} : vector<8x512xf32> to vector<8x128xf32>
    %422 = math.tanh %421 : vector<8x128xf32>
    %423 = vector.extract_strided_slice %408 {offsets = [0, 384], sizes = [8, 128], strides = [1, 1]} : vector<8x512xf32> to vector<8x128xf32>
    %424 = arith.negf %423 : vector<8x128xf32>
    %425 = math.exp %424 : vector<8x128xf32>
    %cst_70 = arith.constant 1.000000e+00 : f32
    %426 = vector.broadcast %cst_70 : f32 to vector<8x128xf32>
    %427 = arith.addf %426, %425 : vector<8x128xf32>
    %428 = arith.divf %426, %427 : vector<8x128xf32>
    %429 = arith.mulf %420, %375 : vector<8x128xf32>
    %430 = arith.mulf %414, %422 : vector<8x128xf32>
    %431 = arith.addf %429, %430 : vector<8x128xf32>
    %432 = math.tanh %431 : vector<8x128xf32>
    %433 = arith.mulf %428, %432 : vector<8x128xf32>
    %434 = tpu.concatenate %433, %405 in 1 : vector<8x128xf32>, vector<8x128xf32> -> vector<8x256xf32>
    %cst_71 = arith.constant dense<0.000000e+00> : vector<8x512xf32>
    %435 = tpu.matmul %434, %12, %cst_71 {dimension_numbers = #tpu.dot_dimension_numbers<[1], [0], [0], [1], [0, 0, 1, 1], [], []>} : vector<8x256xf32>, vector<256x512xf32>, vector<8x512xf32> -> vector<8x512xf32>
    %436 = arith.addf %10, %435 : vector<8x512xf32>
    %437 = vector.extract_strided_slice %436 {offsets = [0, 0], sizes = [8, 128], strides = [1, 1]} : vector<8x512xf32> to vector<8x128xf32>
    %438 = arith.negf %437 : vector<8x128xf32>
    %439 = math.exp %438 : vector<8x128xf32>
    %cst_72 = arith.constant 1.000000e+00 : f32
    %440 = vector.broadcast %cst_72 : f32 to vector<8x128xf32>
    %441 = arith.addf %440, %439 : vector<8x128xf32>
    %442 = arith.divf %440, %441 : vector<8x128xf32>
    %443 = vector.extract_strided_slice %436 {offsets = [0, 128], sizes = [8, 128], strides = [1, 1]} : vector<8x512xf32> to vector<8x128xf32>
    %444 = arith.negf %443 : vector<8x128xf32>
    %445 = math.exp %444 : vector<8x128xf32>
    %cst_73 = arith.constant 1.000000e+00 : f32
    %446 = vector.broadcast %cst_73 : f32 to vector<8x128xf32>
    %447 = arith.addf %446, %445 : vector<8x128xf32>
    %448 = arith.divf %446, %447 : vector<8x128xf32>
    %449 = vector.extract_strided_slice %436 {offsets = [0, 256], sizes = [8, 128], strides = [1, 1]} : vector<8x512xf32> to vector<8x128xf32>
    %450 = math.tanh %449 : vector<8x128xf32>
    %451 = vector.extract_strided_slice %436 {offsets = [0, 384], sizes = [8, 128], strides = [1, 1]} : vector<8x512xf32> to vector<8x128xf32>
    %452 = arith.negf %451 : vector<8x128xf32>
    %453 = math.exp %452 : vector<8x128xf32>
    %cst_74 = arith.constant 1.000000e+00 : f32
    %454 = vector.broadcast %cst_74 : f32 to vector<8x128xf32>
    %455 = arith.addf %454, %453 : vector<8x128xf32>
    %456 = arith.divf %454, %455 : vector<8x128xf32>
    %457 = arith.mulf %448, %403 : vector<8x128xf32>
    %458 = arith.mulf %442, %450 : vector<8x128xf32>
    %459 = arith.addf %457, %458 : vector<8x128xf32>
    %460 = math.tanh %459 : vector<8x128xf32>
    %461 = arith.mulf %456, %460 : vector<8x128xf32>
    %c0_75 = arith.constant 0 : index
    %c0_76 = arith.constant 0 : index
    %462 = vector.load %arg6[%c0_75, %c0_76] : memref<128x1xf32, #tpu.memory_space<vmem>>, vector<128x1xf32>
    %cst_77 = arith.constant dense<0.000000e+00> : vector<8x1xf32>
    %463 = tpu.matmul %461, %462, %cst_77 {dimension_numbers = #tpu.dot_dimension_numbers<[1], [0], [0], [1], [0, 0, 1, 1], [], []>} : vector<8x128xf32>, vector<128x1xf32>, vector<8x1xf32> -> vector<8x1xf32>
    %c0_78 = arith.constant 0 : index
    %c0_79 = arith.constant 0 : index
    %464 = vector.load %arg7[%c0_78, %c0_79] : memref<1x1xf32, #tpu.memory_space<vmem>>, vector<1x1xf32>
    %465 = vector.broadcast %464 : vector<1x1xf32> to vector<8x1xf32>
    %466 = arith.addf %463, %465 : vector<8x1xf32>
    %c0_80 = arith.constant 0 : index
    %c0_81 = arith.constant 0 : index
    %467 = vector.load %arg8[%c0_80, %c0_81] : memref<8x1xf32, #tpu.memory_space<vmem>>, vector<8x1xf32>
    tpu.vector_store %arg8[%c0_80, %c0_81], %466 {strides = array<i32>} : memref<8x1xf32, #tpu.memory_space<vmem>>, vector<8x1xf32>,
    return
  }
}

</mosaic_0001>

<bundles_post_ra>
// kernel: tpu_custom_call.1
= control target key start
LH: loop header
LB: loop body
LE: loop exit
PB: predicated region body
PF: predicated region fallthrough
CT: control target
= control target key end

     0   :  { %s8149_s0 = inlined_call_operand.vmem [shape: f32[64,1], index: 0, kind: input, shape index: {}]   ;;  %s8150_s1 = inlined_call_operand.vmem [shape: f32[1,512], index: 1, kind: input, shape index: {}]   ;;  %s8151_s2 = inlined_call_operand.hbm [shape: f32[128,512], index: 2, kind: input, shape index: {}]   ;;  %s8152_s3 = inlined_call_operand.vmem [shape: f32[1,512], index: 3, kind: input, shape index: {}]   ;;  %s8153_s4 = inlined_call_operand.hbm [shape: f32[256,512], index: 4, kind: input, shape index: {}]   ;;  %s8154_s5 = inlined_call_operand.vmem [shape: f32[1,512], index: 5, kind: input, shape index: {}]   ;;  %s8155_s6 = inlined_call_operand.vmem [shape: f32[128,1], index: 6, kind: input, shape index: {}]   ;;  %s8156_s7 = inlined_call_operand.<no memory space> [shape: f32[1,1], index: 7, kind: input, shape index: {}]   ;;  %s8157_s8 = inlined_call_operand.vmem [shape: f32[8,1], index: 8, kind: output, shape index: {}]  }
   0x1   :  { %v13_v0 = vstv %s8156_s7 }
   0x2   :  { %14 = vst [vmem:[#allocation2] sm:$0x1] %v13_v0 }
   0x3   :  { %15 = vsyncpa [#allocation4], 0  ;;  %s25_s9 = sshll.u32 %s8151_s2, 4  ;;  %s26_s9 = int_to_ptr.hbm [resolvable:$true] %s25_s9 }
   0x4   :  { %16 = vsyncpa [#allocation6], 0  ;;  %s4402_s10 = smov [#allocation3]   ;;  %s40_s14 = sshll.u32 %s8153_s4, 4  ;;  %s41_s14 = int_to_ptr.hbm [resolvable:$true] %s40_s14 }
   0x5   :  { %s27_s11 = sshll.u32 %s4402_s10, 4  ;;  %s4403_s15 = smov 512   ;;  %s28_s11 = int_to_ptr.vmem [resolvable:$true] %s27_s11 }
   0x6   :  { %s4404_s16 = smov 32   ;;  %s4405_s7 = smov [#allocation5]  }
   0x7   :  { %33 = dma.hbm_to_vmem [thread:$0]  %s26_s9, 8192, %s28_s11, [#allocation4], %s4403_s15, %s4403_s15, %s4404_s16  }
   0x8   :  { %s42_s17 = sshll.u32 %s4405_s7, 4  ;;  %s43_s17 = int_to_ptr.vmem [resolvable:$true] %s42_s17 }
   0x9   :  { %48 = dma.hbm_to_vmem [thread:$0]  %s41_s14, 16384, %s43_s17, [#allocation6], %s4403_s15, %s4403_s15, %s4404_s16  }
   0xa   :  { %4398 = dma.done.wait [#allocation4], 8192  }
   0xb   :  { %4399 = vsyncadd [#allocation4], 4294959104 }
   0xc   :  { %4400 = dma.done.wait [#allocation6], 16384  }
   0xd   :  { %4401 = vsyncadd [#allocation6], 4294950912  ;;  %v4406_v1 = vmov 0   ;;  %v265_v2 = vld [vmem:[#allocation3 + $0x1e0] sm:$0xff]  ;;  %v4462_v3 = vld [vmem:[#allocation3 + $0x1e8] sm:$0xff] }
   0xe   :  { %3491 = vset.pattern.permute.xlu0 %v4406_v1  ;;  %3492 = vset.pattern.permute.xlu1 %v4406_v1  ;;  %v267_v4 = vld [vmem:[#allocation3 + $0x1f0] sm:$0xff]  ;;  %v4465_v5 = vld [vmem:[#allocation3 + $0x1f8] sm:$0xff]  ;;  %v261_v6 = vld [vmem:[#allocation3 + $0x1c0] sm:$0xff] }
   0xf   :  { %3493 = vset.pattern.permute.xlu2 %v4406_v1  ;;  %397 = vmatpush.msra.mxu0 %v265_v2  ;;  %v4467_v7 = vld [vmem:[#allocation3 + $0x1c8] sm:$0xff]  ;;  %v263_v8 = vld [vmem:[#allocation3 + $0x1d0] sm:$0xff]  ;;  %v4470_v9 = vld [vmem:[#allocation3 + $0x1d8] sm:$0xff] }
  0x10   :  { %417 = vmatpush.msra.mxu1 %v4462_v3  ;;  %437 = vmatpush.msra.mxu2 %v267_v4  ;;  %v257_v10 = vld [vmem:[#allocation3 + $0x1a0] sm:$0xff]  ;;  %v4473_v11 = vld [vmem:[#allocation3 + $0x1a8] sm:$0xff]  ;;  %v259_v12 = vld [vmem:[#allocation3 + $0x1b0] sm:$0xff] }
  0x11   :  { %457 = vmatpush.msra.mxu3 %v4465_v5  ;;  %398 = vmatpush.msra.mxu0 %v261_v6  ;;  %v4475_v13 = vld [vmem:[#allocation3 + $0x1b8] sm:$0xff]  ;;  %v253_v14 = vld [vmem:[#allocation3 + $0x180] sm:$0xff]  ;;  %v4478_v15 = vld [vmem:[#allocation3 + $0x188] sm:$0xff] }
  0x12   :  { %418 = vmatpush.msra.mxu1 %v4467_v7  ;;  %438 = vmatpush.msra.mxu2 %v263_v8  ;;  %v255_v16 = vld [vmem:[#allocation3 + $0x190] sm:$0xff]  ;;  %v4481_v17 = vld [vmem:[#allocation3 + $0x198] sm:$0xff]  ;;  %v249_v18 = vld [vmem:[#allocation3 + $0x160] sm:$0xff] }
  0x13   :  { %458 = vmatpush.msra.mxu3 %v4470_v9  ;;  %399 = vmatpush.msra.mxu0 %v257_v10  ;;  %v4484_v19 = vld [vmem:[#allocation3 + $0x168] sm:$0xff]  ;;  %v251_v20 = vld [vmem:[#allocation3 + $0x170] sm:$0xff]  ;;  %v4487_v21 = vld [vmem:[#allocation3 + $0x178] sm:$0xff]  ;;  %v8158_v10 = vmov 0.0  }
  0x14   :  { %419 = vmatpush.msra.mxu1 %v4473_v11  ;;  %439 = vmatpush.msra.mxu2 %v259_v12  ;;  %v245_v22 = vld [vmem:[#allocation3 + $0x140] sm:$0xff]  ;;  %v4490_v23 = vld [vmem:[#allocation3 + $0x148] sm:$0xff]  ;;  %v247_v24 = vld [vmem:[#allocation3 + $0x150] sm:$0xff] }
  0x15   :  { %459 = vmatpush.msra.mxu3 %v4475_v13  ;;  %400 = vmatpush.msra.mxu0 %v253_v14  ;;  %v4493_v25 = vld [vmem:[#allocation3 + $0x158] sm:$0xff]  ;;  %v241_v26 = vld [vmem:[#allocation3 + $0x120] sm:$0xff]  ;;  %v4496_v27 = vld [vmem:[#allocation3 + $0x128] sm:$0xff] }
  0x16   :  { %420 = vmatpush.msra.mxu1 %v4478_v15  ;;  %440 = vmatpush.msra.mxu2 %v255_v16  ;;  %v243_v28 = vld [vmem:[#allocation3 + $0x130] sm:$0xff]  ;;  %v4499_v29 = vld [vmem:[#allocation3 + $0x138] sm:$0xff]  ;;  %v237_v30 = vld [vmem:[#allocation3 + $0x100] sm:$0xff] }
  0x17   :  { %460 = vmatpush.msra.mxu3 %v4481_v17  ;;  %401 = vmatpush.msra.mxu0 %v249_v18  ;;  %v4502_v31 = vld [vmem:[#allocation3 + $0x108] sm:$0xff]  ;;  %v239_v32 = vld [vmem:[#allocation3 + $0x110] sm:$0xff]  ;;  %v4505_v33 = vld [vmem:[#allocation3 + $0x118] sm:$0xff] }
  0x18   :  { %421 = vmatpush.msra.mxu1 %v4484_v19  ;;  %441 = vmatpush.msra.mxu2 %v251_v20  ;;  %v233_v34 = vld [vmem:[#allocation3 + $0xe0] sm:$0xff]  ;;  %v4508_v35 = vld [vmem:[#allocation3 + $0xe8] sm:$0xff]  ;;  %v235_v36 = vld [vmem:[#allocation3 + $0xf0] sm:$0xff] }
  0x19   :  { %461 = vmatpush.msra.mxu3 %v4487_v21  ;;  %402 = vmatpush.msra.mxu0 %v245_v22  ;;  %v4511_v37 = vld [vmem:[#allocation3 + $0xf8] sm:$0xff]  ;;  %v229_v38 = vld [vmem:[#allocation3 + $0xc0] sm:$0xff]  ;;  %v4514_v39 = vld [vmem:[#allocation3 + $0xc8] sm:$0xff] }
  0x1a   :  { %422 = vmatpush.msra.mxu1 %v4490_v23  ;;  %442 = vmatpush.msra.mxu2 %v247_v24  ;;  %v231_v40 = vld [vmem:[#allocation3 + $0xd0] sm:$0xff]  ;;  %v4517_v41 = vld [vmem:[#allocation3 + $0xd8] sm:$0xff]  ;;  %v225_v42 = vld [vmem:[#allocation3 + $0xa0] sm:$0xff] }
  0x1b   :  { %462 = vmatpush.msra.mxu3 %v4493_v25  ;;  %403 = vmatpush.msra.mxu0 %v241_v26  ;;  %v4520_v43 = vld [vmem:[#allocation3 + $0xa8] sm:$0xff]  ;;  %v227_v44 = vld [vmem:[#allocation3 + $0xb0] sm:$0xff]  ;;  %v4523_v45 = vld [vmem:[#allocation3 + $0xb8] sm:$0xff] }
  0x1c   :  { %423 = vmatpush.msra.mxu1 %v4496_v27  ;;  %443 = vmatpush.msra.mxu2 %v243_v28  ;;  %v221_v46 = vld [vmem:[#allocation3 + $0x80] sm:$0xff]  ;;  %v4526_v47 = vld [vmem:[#allocation3 + $0x88] sm:$0xff]  ;;  %v4529_v48 = vld [vmem:[#allocation3 + $0x90] sm:$0xff] }
  0x1d   :  { %463 = vmatpush.msra.mxu3 %v4499_v29  ;;  %404 = vmatpush.msra.mxu0 %v237_v30  ;;  %8704 = vst [vmem:[#allocation9_spill] sm:$0xff] %v4529_v48  ;;  %v4531_v49 = vld [vmem:[#allocation3 + $0x98] sm:$0xff]  ;;  %v4537_v51 = vld [vmem:[#allocation3 + $0x60] sm:$0xff]  ;;  %v4540_v52 = vld [vmem:[#allocation3 + $0x68] sm:$0xff] }
  0x1e   :  { %424 = vmatpush.msra.mxu1 %v4502_v31  ;;  %444 = vmatpush.msra.mxu2 %v239_v32  ;;  %v63_v50 = vld [vmem:[%s8149_s0] sm:$0xff]  ;;  %8705 = vst [vmem:[#allocation10_spill] sm:$0xff] %v4537_v51  ;;  %v4542_v53 = vld [vmem:[#allocation3 + $0x70] sm:$0xff]  ;;  %v4551_v56 = vld [vmem:[#allocation3 + $0x48] sm:$0xff] }
  0x1f   :  { %464 = vmatpush.msra.mxu3 %v4505_v33  ;;  %405 = vmatpush.msra.mxu0 %v233_v34  ;;  %8706 = vst [vmem:[#allocation11_spill] sm:$0xff] %v4542_v53  ;;  %v4546_v54 = vld [vmem:[#allocation3 + $0x78] sm:$0xff]  ;;  %v4548_v55 = vld [vmem:[#allocation3 + $0x40] sm:$0xff]  ;;  %v4553_v57 = vld [vmem:[#allocation3 + $0x50] sm:$0xff] }
  0x20   :  { %425 = vmatpush.msra.mxu1 %v4508_v35  ;;  %445 = vmatpush.msra.mxu2 %v235_v36  ;;  %8707 = vst [vmem:[#allocation12_spill] sm:$0xff] %v4548_v55  ;;  %v4557_v58 = vld [vmem:[#allocation3 + $0x58] sm:$0xff]  ;;  %v4559_v59 = vld [vmem:[#allocation3 + $0x20] sm:$0xff]  ;;  %v4563_v60 = vld [vmem:[#allocation3 + $0x28] sm:$0xff] }
  0x21   :  { %465 = vmatpush.msra.mxu3 %v4511_v37  ;;  %406 = vmatpush.msra.mxu0 %v229_v38  ;;  %8708 = vst [vmem:[#allocation13_spill] sm:$0xff] %v4553_v57  ;;  %v4565_v61 = vld [vmem:[#allocation3 + $0x30] sm:$0xff]  ;;  %v4569_v62 = vld [vmem:[#allocation3 + $0x38] sm:$0xff]  ;;  %v4571_v63 = vld [vmem:[#allocation3] sm:$0xff] }
  0x22   :  { %426 = vmatpush.msra.mxu1 %v4514_v39  ;;  %446 = vmatpush.msra.mxu2 %v231_v40  ;;  %8709 = vst [vmem:[#allocation14_spill] sm:$0xff] %v4559_v59  ;;  %v4575_v0 = vld [vmem:[#allocation3 + $0x8] sm:$0xff]  ;;  %v4577_v1 = vld [vmem:[#allocation3 + $0x10] sm:$0xff]  ;;  %v4581_v2 = vld [vmem:[#allocation3 + $0x18] sm:$0xff] }
  0x23   :  { %466 = vmatpush.msra.mxu3 %v4517_v41  ;;  %407 = vmatpush.msra.mxu0 %v225_v42  ;;  %8710 = vst [vmem:[#allocation15_spill] sm:$0xff] %v4565_v61  ;;  %v64_v4 = vld [vmem:[%s8149_s0 + $0x8] sm:$0xff]  ;;  %v69_v20 = vld [vmem:[%s8149_s0 + $0x30] sm:$0xff] }
  0x24   :  { %427 = vmatpush.msra.mxu1 %v4520_v43  ;;  %447 = vmatpush.msra.mxu2 %v227_v44  ;;  %8711 = vst [vmem:[#allocation16_spill] sm:$0xff] %v4571_v63  ;;  %v4591_v6 = vld [vmem:[#allocation5 + $0x3e0] sm:$0xff]  ;;  %v4593_v8 = vld [vmem:[#allocation5 + $0x3e8] sm:$0xff] }
  0x25   :  { %467 = vmatpush.msra.mxu3 %v4523_v45  ;;  %408 = vmatpush.msra.mxu0 %v221_v46  ;;  %8712 = vst [vmem:[#allocation17_spill] sm:$0xff] %v4577_v1  ;;  %v4599_v12 = vld [vmem:[#allocation5 + $0x3c0] sm:$0xff]  ;;  %v4601_v14 = vld [vmem:[#allocation5 + $0x3c8] sm:$0xff] }
  0x26   :  { %428 = vmatpush.msra.mxu1 %v4526_v47  ;;  %448 = vmatpush.msra.mxu2 %v4529_v48  ;;  %v4605_v16 = vld [vmem:[#allocation5 + $0x3a0] sm:$0xff]  ;;  %v4607_v18 = vld [vmem:[#allocation5 + $0x3a8] sm:$0xff] }
  0x27   :  { %468 = vmatpush.msra.mxu3 %v4531_v49  ;;  %74 = vperm.xlu0 %3491, %v63_v50   ;;  %v4614_v22 = vld [vmem:[#allocation5 + $0x380] sm:$0xff]  ;;  %v4616_v24 = vld [vmem:[#allocation5 + $0x388] sm:$0xff] }
  0x28   :  { %409 = vmatpush.msra.mxu0 %v4537_v51  ;;  %429 = vmatpush.msra.mxu1 %v4540_v52  ;;  %v4620_v26 = vld [vmem:[#allocation5 + $0x360] sm:$0xff]  ;;  %v4622_v28 = vld [vmem:[#allocation5 + $0x368] sm:$0xff] }
  0x29   :  { %449 = vmatpush.msra.mxu2 %v4542_v53  ;;  %469 = vmatpush.msra.mxu3 %v4546_v54  ;;  %v4626_v30 = vld [vmem:[#allocation5 + $0x340] sm:$0xff]  ;;  %v4628_v32 = vld [vmem:[#allocation5 + $0x348] sm:$0xff] }
  0x2a   :  { %410 = vmatpush.msra.mxu0 %v4548_v55  ;;  %430 = vmatpush.msra.mxu1 %v4551_v56  ;;  %v4632_v34 = vld [vmem:[#allocation5 + $0x320] sm:$0xff]  ;;  %v4634_v36 = vld [vmem:[#allocation5 + $0x328] sm:$0xff] }
  0x2b   :  { %450 = vmatpush.msra.mxu2 %v4553_v57  ;;  %470 = vmatpush.msra.mxu3 %v4557_v58  ;;  %v4638_v38 = vld [vmem:[#allocation5 + $0x300] sm:$0xff]  ;;  %v4640_v40 = vld [vmem:[#allocation5 + $0x308] sm:$0xff] }
  0x2c   :  { %411 = vmatpush.msra.mxu0 %v4559_v59  ;;  %431 = vmatpush.msra.mxu1 %v4563_v60  ;;  %v4644_v42 = vld [vmem:[#allocation5 + $0x2e0] sm:$0xff]  ;;  %v4646_v44 = vld [vmem:[#allocation5 + $0x2e8] sm:$0xff] }
  0x2d   :  { %451 = vmatpush.msra.mxu2 %v4565_v61  ;;  %471 = vmatpush.msra.mxu3 %v4569_v62  ;;  %v4650_v46 = vld [vmem:[#allocation5 + $0x2c0] sm:$0xff]  ;;  %v4652_v50 = vld [vmem:[#allocation5 + $0x2c8] sm:$0xff] }
  0x2e   :  { %412 = vmatpush.msra.mxu0 %v4571_v63  ;;  %432 = vmatpush.msra.mxu1 %v4575_v0  ;;  %v4668_v63 = vld [vmem:[#allocation5 + $0x260] sm:$0xff]  ;;  %v4670_v61 = vld [vmem:[#allocation5 + $0x268] sm:$0xff] }
  0x2f   :  { %452 = vmatpush.msra.mxu2 %v4577_v1  ;;  %472 = vmatpush.msra.mxu3 %v4581_v2  ;;  %v4664_v1 = vld [vmem:[#allocation5 + $0x288] sm:$0xff]  ;;  %8716 = vst [vmem:[#allocation21_spill] sm:$0xff] %v4668_v63  ;;  %v4674_v59 = vld [vmem:[#allocation5 + $0x240] sm:$0xff] }
  0x30   :  { %79 = vperm.xlu0 %3491, %v64_v4   ;;  %413 = vmatmul.f32.vlgmr.msra.gmra.mxu0 %v8158_v10  ;;  %v4656_v4 = vld [vmem:[#allocation5 + $0x2a0] sm:$0xff]  ;;  %8715 = vst [vmem:[#allocation20_spill] sm:$0xff] %v4664_v1  ;;  %v4676_v57 = vld [vmem:[#allocation5 + $0x248] sm:$0xff] }
  0x31   :  { %433 = vmatmul.f32.vlgmr.msra.gmra.mxu1 %v8158_v10  ;;  %453 = vmatmul.f32.vlgmr.msra.gmra.mxu2 %v8158_v10  ;;  %8717 = vst [vmem:[#allocation22_spill] sm:$0xff] %v4670_v61  ;;  %v4680_v55 = vld [vmem:[#allocation5 + $0x220] sm:$0xff]  ;;  %v4682_v53 = vld [vmem:[#allocation5 + $0x228] sm:$0xff] }
  0x32   :  { %473 = vmatmul.f32.vlgmr.msra.gmra.mxu3 %v8158_v10  ;;  %564 = vmatpush.msrb.mxu1 %v4591_v6  ;;  %v4662_v10 = vld [vmem:[#allocation5 + $0x280] sm:$0xff]  ;;  %8718 = vst [vmem:[#allocation23_spill] sm:$0xff] %v4674_v59  ;;  %v4690_v48 = vld [vmem:[#allocation5 + $0x208] sm:$0xff] }
  0x33   :  { %604 = vmatpush.msrb.mxu3 %v4593_v8  ;;  %8714 = vst [vmem:[#allocation19_spill] sm:$0xff] %v4662_v10  ;;  %v4688_v51 = vld [vmem:[#allocation5 + $0x200] sm:$0xff] }
  0x34   :  { %565 = vmatpush.msrb.mxu1 %v4599_v12  ;;  %8719 = vst [vmem:[#allocation24_spill] sm:$0xff] %v4676_v57 }
  0x35   :  { %605 = vmatpush.msrb.mxu3 %v4601_v14  ;;  %8720 = vst [vmem:[#allocation25_spill] sm:$0xff] %v4680_v55 }
  0x36   :  { %566 = vmatpush.msrb.mxu1 %v4605_v16  ;;  %8721 = vst [vmem:[#allocation26_spill] sm:$0xff] %v4682_v53 }
  0x37   :  { %606 = vmatpush.msrb.mxu3 %v4607_v18  ;;  %8722 = vst [vmem:[#allocation27_spill] sm:$0xff] %v4688_v51 }
  0x38   :  { %104 = vperm.xlu0 %3491, %v69_v20   ;;  %567 = vmatpush.msrb.mxu1 %v4614_v22  ;;  %v4658_v20 = vld [vmem:[#allocation5 + $0x2a8] sm:$0xff]  ;;  %8723 = vst [vmem:[#allocation28_spill] sm:$0xff] %v4690_v48 }
  0x39   :  { %607 = vmatpush.msrb.mxu3 %v4616_v24  ;;  %8713 = vst [vmem:[#allocation18_spill] sm:$0xff] %v4658_v20 }
  0x3a   :  { %568 = vmatpush.msrb.mxu1 %v4620_v26 }
  0x3b   :  { %608 = vmatpush.msrb.mxu3 %v4622_v28 }
  0x3c   :  { %569 = vmatpush.msrb.mxu1 %v4626_v30 }
  0x3d   :  { %609 = vmatpush.msrb.mxu3 %v4628_v32 }
  0x3e   :  { %570 = vmatpush.msrb.mxu1 %v4632_v34 }
  0x3f   :  { %610 = vmatpush.msrb.mxu3 %v4634_v36 }
  0x40   :  { %571 = vmatpush.msrb.mxu1 %v4638_v38 }
  0x41   :  { %611 = vmatpush.msrb.mxu3 %v4640_v40 }
  0x42   :  { %572 = vmatpush.msrb.mxu1 %v4644_v42 }
  0x43   :  { %612 = vmatpush.msrb.mxu3 %v4646_v44 }
  0x44   :  { %573 = vmatpush.msrb.mxu1 %v4650_v46 }
  0x45   :  { %613 = vmatpush.msrb.mxu3 %v4652_v50 }
  0x46   :  { %574 = vmatpush.msrb.mxu1 %v4656_v4 }
  0x47   :  { %614 = vmatpush.msrb.mxu3 %v4658_v20  ;;  %v4732_v20 = vld [vmem:[#allocation5 + $0x390] sm:$0xff] }
  0x48   :  { %575 = vmatpush.msrb.mxu1 %v4662_v10  ;;  %v4716_v10 = vld [vmem:[#allocation5 + $0x1a8] sm:$0xff]  ;;  %8738 = vst [vmem:[#allocation43_spill] sm:$0xff] %v4732_v20 }
  0x49   :  { %615 = vmatpush.msrb.mxu3 %v4664_v1  ;;  %v4692_v1 = vld [vmem:[#allocation5 + $0x1e0] sm:$0xff]  ;;  %8733 = vst [vmem:[#allocation38_spill] sm:$0xff] %v4716_v10 }
  0x4a   :  { %576 = vmatpush.msrb.mxu1 %v4668_v63  ;;  %8724 = vst [vmem:[#allocation29_spill] sm:$0xff] %v4692_v1  ;;  %v4698_v63 = vld [vmem:[#allocation5 + $0x3f0] sm:$0xff]  ;;  %544 = vmatpush.msrb.mxu0 %v4692_v1  ;;  %v4722_v1 = vld [vmem:[#allocation5 + $0x3b8] sm:$0xff] }
  0x4b   :  { %616 = vmatpush.msrb.mxu3 %v4670_v61  ;;  %v4696_v61 = vld [vmem:[#allocation5 + $0x1e8] sm:$0xff]  ;;  %8726 = vst [vmem:[#allocation31_spill] sm:$0xff] %v4698_v63 }
  0x4c   :  { %577 = vmatpush.msrb.mxu1 %v4674_v59  ;;  %8725 = vst [vmem:[#allocation30_spill] sm:$0xff] %v4696_v61  ;;  %v4700_v59 = vld [vmem:[#allocation5 + $0x3f8] sm:$0xff]  ;;  %584 = vmatpush.msrb.mxu2 %v4696_v61  ;;  %v4720_v61 = vld [vmem:[#allocation5 + $0x3b0] sm:$0xff] }
  0x4d   :  { %617 = vmatpush.msrb.mxu3 %v4676_v57  ;;  %8727 = vst [vmem:[#allocation32_spill] sm:$0xff] %v4700_v59  ;;  %v4708_v57 = vld [vmem:[#allocation5 + $0x3d0] sm:$0xff] }
  0x4e   :  { %578 = vmatpush.msrb.mxu1 %v4680_v55  ;;  %v4706_v55 = vld [vmem:[#allocation5 + $0x1c8] sm:$0xff]  ;;  %8730 = vst [vmem:[#allocation35_spill] sm:$0xff] %v4708_v57 }
  0x4f   :  { %618 = vmatpush.msrb.mxu3 %v4682_v53  ;;  %v4704_v53 = vld [vmem:[#allocation5 + $0x1c0] sm:$0xff]  ;;  %8729 = vst [vmem:[#allocation34_spill] sm:$0xff] %v4706_v55  ;;  %585 = vmatpush.msrb.mxu2 %v4706_v55 }
  0x50   :  { %579 = vmatpush.msrb.mxu1 %v4688_v51  ;;  %8728 = vst [vmem:[#allocation33_spill] sm:$0xff] %v4704_v53  ;;  %v4714_v51 = vld [vmem:[#allocation5 + $0x1a0] sm:$0xff]  ;;  %545 = vmatpush.msrb.mxu0 %v4704_v53  ;;  %v4734_v53 = vld [vmem:[#allocation5 + $0x398] sm:$0xff] }
  0x51   :  { %619 = vmatpush.msrb.mxu3 %v4690_v48  ;;  %v4712_v48 = vld [vmem:[#allocation5 + $0x3d8] sm:$0xff]  ;;  %8732 = vst [vmem:[#allocation37_spill] sm:$0xff] %v4714_v51  ;;  %586 = vmatpush.msrb.mxu2 %v4716_v10  ;;  %v4740_v55 = vld [vmem:[#allocation5 + $0x160] sm:$0xff] }
  0x52   :  { %644 = vmatpush.msra.mxu1 %v4698_v63  ;;  %8731 = vst [vmem:[#allocation36_spill] sm:$0xff] %v4712_v48  ;;  %v4726_v63 = vld [vmem:[#allocation5 + $0x180] sm:$0xff]  ;;  %546 = vmatpush.msrb.mxu0 %v4714_v51  ;;  %v4748_v10 = vld [vmem:[#allocation5 + $0x378] sm:$0xff] }
  0x53   :  { %684 = vmatpush.msra.mxu3 %v4700_v59  ;;  %8734 = vst [vmem:[#allocation39_spill] sm:$0xff] %v4720_v61  ;;  %v4728_v59 = vld [vmem:[#allocation5 + $0x188] sm:$0xff]  ;;  %v4750_v51 = vld [vmem:[#allocation5 + $0x140] sm:$0xff] }
  0x54   :  { %8735 = vst [vmem:[#allocation40_spill] sm:$0xff] %v4722_v1  ;;  %645 = vmatpush.msra.mxu1 %v4708_v57  ;;  %547 = vmatpush.msrb.mxu0 %v4726_v63  ;;  %v4744_v57 = vld [vmem:[#allocation5 + $0x370] sm:$0xff] }
  0x55   :  { %685 = vmatpush.msra.mxu3 %v4712_v48  ;;  %8736 = vst [vmem:[#allocation41_spill] sm:$0xff] %v4726_v63  ;;  %587 = vmatpush.msrb.mxu2 %v4728_v59  ;;  %v4742_v48 = vld [vmem:[#allocation5 + $0x168] sm:$0xff]  ;;  %v4758_v63 = vld [vmem:[#allocation5 + $0x358] sm:$0xff] }
  0x56   :  { %8737 = vst [vmem:[#allocation42_spill] sm:$0xff] %v4728_v59  ;;  %646 = vmatpush.msra.mxu1 %v4720_v61  ;;  %v4752_v61 = vld [vmem:[#allocation5 + $0x148] sm:$0xff]  ;;  %548 = vmatpush.msrb.mxu0 %v4740_v55  ;;  %v4756_v59 = vld [vmem:[#allocation5 + $0x350] sm:$0xff] }
  0x57   :  { %8739 = vst [vmem:[#allocation44_spill] sm:$0xff] %v4734_v53  ;;  %686 = vmatpush.msra.mxu3 %v4722_v1  ;;  %588 = vmatpush.msrb.mxu2 %v4742_v48  ;;  %v4768_v1 = vld [vmem:[#allocation5 + $0x330] sm:$0xff] }
  0x58   :  { %8740 = vst [vmem:[#allocation45_spill] sm:$0xff] %v4740_v55  ;;  %647 = vmatpush.msra.mxu1 %v4732_v20  ;;  %v4762_v20 = vld [vmem:[#allocation5 + $0x120] sm:$0xff]  ;;  %549 = vmatpush.msrb.mxu0 %v4750_v51  ;;  %v4770_v55 = vld [vmem:[#allocation5 + $0x338] sm:$0xff] }
  0x59   :  { %8741 = vst [vmem:[#allocation46_spill] sm:$0xff] %v4742_v48  ;;  %687 = vmatpush.msra.mxu3 %v4734_v53  ;;  %v4764_v53 = vld [vmem:[#allocation5 + $0x128] sm:$0xff]  ;;  %589 = vmatpush.msrb.mxu2 %v4752_v61  ;;  %v4774_v48 = vld [vmem:[#allocation5 + $0x100] sm:$0xff] }
  0x5a   :  { %8742 = vst [vmem:[#allocation47_spill] sm:$0xff] %v4744_v57  ;;  %648 = vmatpush.msra.mxu1 %v4744_v57  ;;  %v4776_v57 = vld [vmem:[#allocation5 + $0x108] sm:$0xff]  ;;  %550 = vmatpush.msrb.mxu0 %v4762_v20 }
  0x5b   :  { %8743 = vst [vmem:[#allocation48_spill] sm:$0xff] %v4748_v10  ;;  %688 = vmatpush.msra.mxu3 %v4748_v10  ;;  %590 = vmatpush.msrb.mxu2 %v4764_v53  ;;  %v4780_v10 = vld [vmem:[#allocation5 + $0x310] sm:$0xff] }
  0x5c   :  { %8744 = vst [vmem:[#allocation49_spill] sm:$0xff] %v4750_v51  ;;  %649 = vmatpush.msra.mxu1 %v4756_v59  ;;  %v4782_v51 = vld [vmem:[#allocation5 + $0x318] sm:$0xff]  ;;  %551 = vmatpush.msrb.mxu0 %v4774_v48 }
  0x5d   :  { %8745 = vst [vmem:[#allocation50_spill] sm:$0xff] %v4752_v61  ;;  %689 = vmatpush.msra.mxu3 %v4758_v63  ;;  %591 = vmatpush.msrb.mxu2 %v4776_v57  ;;  %v4790_v61 = vld [vmem:[#allocation5 + $0xe0] sm:$0xff] }
  0x5e   :  { %8746 = vst [vmem:[#allocation51_spill] sm:$0xff] %v4758_v63  ;;  %650 = vmatpush.msra.mxu1 %v4768_v1  ;;  %552 = vmatpush.msrb.mxu0 %v4790_v61  ;;  %v4885_v63 = vld [vmem:[#allocation5 + $0x1f0] sm:$0xff] }
  0x5f   :  { %8747 = vst [vmem:[#allocation52_spill] sm:$0xff] %v4762_v20  ;;  %690 = vmatpush.msra.mxu3 %v4770_v55  ;;  %v4792_v20 = vld [vmem:[#allocation5 + $0xe8] sm:$0xff] }
  0x60   :  { %8748 = vst [vmem:[#allocation53_spill] sm:$0xff] %v4764_v53  ;;  %651 = vmatpush.msra.mxu1 %v4780_v10  ;;  %v4794_v53 = vld [vmem:[#allocation5 + $0x2f0] sm:$0xff]  ;;  %592 = vmatpush.msrb.mxu2 %v4792_v20 }
  0x61   :  { %8749 = vst [vmem:[#allocation54_spill] sm:$0xff] %v4768_v1  ;;  %691 = vmatpush.msra.mxu3 %v4782_v51  ;;  %v4798_v1 = vld [vmem:[#allocation5 + $0x2f8] sm:$0xff] }
  0x62   :  { %8750 = vst [vmem:[#allocation55_spill] sm:$0xff] %v4770_v55  ;;  %652 = vmatpush.msra.mxu1 %v4794_v53  ;;  %v4824_v55 = vld [vmem:[#allocation5 + $0x2b8] sm:$0xff] }
  0x63   :  { %8751 = vst [vmem:[#allocation56_spill] sm:$0xff] %v4774_v48  ;;  %692 = vmatpush.msra.mxu3 %v4798_v1  ;;  %v4804_v48 = vld [vmem:[#allocation5 + $0xc8] sm:$0xff] }
  0x64   :  { %8752 = vst [vmem:[#allocation57_spill] sm:$0xff] %v4776_v57  ;;  %v4802_v57 = vld [vmem:[#allocation5 + $0xc0] sm:$0xff]  ;;  %593 = vmatpush.msrb.mxu2 %v4804_v48 }
  0x65   :  { %8753 = vst [vmem:[#allocation58_spill] sm:$0xff] %v4780_v10  ;;  %v8762_v10 = vmov 0.0   ;;  %553 = vmatpush.msrb.mxu0 %v4802_v57 }
  0x66   :  { %8754 = vst [vmem:[#allocation59_spill] sm:$0xff] %v4782_v51  ;;  %v4806_v51 = vld [vmem:[#allocation5 + $0x2d0] sm:$0xff]  ;;  %580 = vmatmul.f32.vlgmr.msrb.gmra.mxu1 %v8762_v10  ;;  %620 = vmatmul.f32.vlgmr.msrb.gmra.mxu3 %v8762_v10 }
  0x67   :  { %8755 = vst [vmem:[#allocation60_spill] sm:$0xff] %v4790_v61  ;;  %653 = vmatpush.msra.mxu1 %v4806_v51  ;;  %v4816_v61 = vld [vmem:[#allocation5 + $0xa0] sm:$0xff] }
  0x68   :  { %8756 = vst [vmem:[#allocation61_spill] sm:$0xff] %v4792_v20  ;;  %v4812_v20 = vld [vmem:[#allocation5 + $0x2d8] sm:$0xff]  ;;  %554 = vmatpush.msrb.mxu0 %v4816_v61 }
  0x69   :  { %8757 = vst [vmem:[#allocation62_spill] sm:$0xff] %v4794_v53  ;;  %693 = vmatpush.msra.mxu3 %v4812_v20  ;;  %v4820_v53 = vld [vmem:[#allocation5 + $0x2b0] sm:$0xff] }
  0x6a   :  { %8758 = vst [vmem:[#allocation63_spill] sm:$0xff] %v4798_v1  ;;  %v4818_v1 = vld [vmem:[#allocation5 + $0xa8] sm:$0xff]  ;;  %654 = vmatpush.msra.mxu1 %v4820_v53 }
  0x6b   :  { %8759 = vst [vmem:[#allocation64_spill] sm:$0xff] %v4802_v57  ;;  %594 = vmatpush.msrb.mxu2 %v4818_v1  ;;  %694 = vmatpush.msra.mxu3 %v4824_v55  ;;  %v4830_v57 = vld [vmem:[#allocation5 + $0x88] sm:$0xff] }
  0x6c   :  { %8760 = vst [vmem:[#allocation65_spill] sm:$0xff] %v4804_v48  ;;  %v4828_v48 = vld [vmem:[#allocation5 + $0x80] sm:$0xff] }
  0x6d   :  { %8761 = vst [vmem:[#allocation66_spill] sm:$0xff] %v4806_v51  ;;  %555 = vmatpush.msrb.mxu0 %v4828_v48  ;;  %595 = vmatpush.msrb.mxu2 %v4830_v57  ;;  %v4836_v51 = vld [vmem:[#allocation5 + $0x298] sm:$0xff] }
  0x6e   :  { %8763 = vst [vmem:[#allocation67_spill] sm:$0xff] %v4812_v20  ;;  %v4832_v20 = vld [vmem:[#allocation5 + $0x290] sm:$0xff]  ;;  %695 = vmatpush.msra.mxu3 %v4836_v51 }
  0x6f   :  { %8764 = vst [vmem:[#allocation68_spill] sm:$0xff] %v4816_v61  ;;  %655 = vmatpush.msra.mxu1 %v4832_v20  ;;  %v4842_v61 = vld [vmem:[#allocation5 + $0x68] sm:$0xff] }
  0x70   :  { %8765 = vst [vmem:[#allocation69_spill] sm:$0xff] %v4818_v1  ;;  %v4840_v1 = vld [vmem:[#allocation5 + $0x60] sm:$0xff]  ;;  %596 = vmatpush.msrb.mxu2 %v4842_v61 }
  0x71   :  { %8766 = vst [vmem:[#allocation70_spill] sm:$0xff] %v4820_v53  ;;  %556 = vmatpush.msrb.mxu0 %v4840_v1  ;;  %v4848_v53 = vld [vmem:[#allocation5 + $0x278] sm:$0xff] }
  0x72   :  { %8767 = vst [vmem:[#allocation71_spill] sm:$0xff] %v4824_v55  ;;  %v4844_v55 = vld [vmem:[#allocation5 + $0x270] sm:$0xff]  ;;  %696 = vmatpush.msra.mxu3 %v4848_v53 }
  0x73   :  { %8768 = vst [vmem:[#allocation72_spill] sm:$0xff] %v4828_v48  ;;  %656 = vmatpush.msra.mxu1 %v4844_v55  ;;  %v4854_v48 = vld [vmem:[#allocation5 + $0x48] sm:$0xff] }
  0x74   :  { %8769 = vst [vmem:[#allocation73_spill] sm:$0xff] %v4830_v57  ;;  %v4852_v57 = vld [vmem:[#allocation5 + $0x40] sm:$0xff]  ;;  %597 = vmatpush.msrb.mxu2 %v4854_v48 }
  0x75   :  { %8770 = vst [vmem:[#allocation74_spill] sm:$0xff] %v4832_v20  ;;  %557 = vmatpush.msrb.mxu0 %v4852_v57  ;;  %v4860_v20 = vld [vmem:[#allocation5 + $0x258] sm:$0xff] }
  0x76   :  { %8771 = vst [vmem:[#allocation75_spill] sm:$0xff] %v4836_v51  ;;  %v4856_v51 = vld [vmem:[#allocation5 + $0x250] sm:$0xff]  ;;  %697 = vmatpush.msra.mxu3 %v4860_v20 }
  0x77   :  { %8772 = vst [vmem:[#allocation76_spill] sm:$0xff] %v4840_v1  ;;  %657 = vmatpush.msra.mxu1 %v4856_v51  ;;  %v4866_v1 = vld [vmem:[#allocation5 + $0x28] sm:$0xff] }
  0x78   :  { %8773 = vst [vmem:[#allocation77_spill] sm:$0xff] %v4842_v61  ;;  %v4864_v61 = vld [vmem:[#allocation5 + $0x20] sm:$0xff]  ;;  %598 = vmatpush.msrb.mxu2 %v4866_v1 }
  0x79   :  { %8774 = vst [vmem:[#allocation78_spill] sm:$0xff] %v4844_v55  ;;  %558 = vmatpush.msrb.mxu0 %v4864_v61  ;;  %v4872_v55 = vld [vmem:[#allocation5 + $0x238] sm:$0xff] }
  0x7a   :  { %8775 = vst [vmem:[#allocation79_spill] sm:$0xff] %v4848_v53  ;;  %v4868_v53 = vld [vmem:[#allocation5 + $0x230] sm:$0xff]  ;;  %698 = vmatpush.msra.mxu3 %v4872_v55 }
  0x7b   :  { %8776 = vst [vmem:[#allocation80_spill] sm:$0xff] %v4852_v57  ;;  %658 = vmatpush.msra.mxu1 %v4868_v53  ;;  %v4877_v57 = vld [vmem:[#allocation5 + $0x8] sm:$0xff] }
  0x7c   :  { %8777 = vst [vmem:[#allocation81_spill] sm:$0xff] %v4854_v48  ;;  %v4875_v48 = vld [vmem:[#allocation5] sm:$0xff]  ;;  %599 = vmatpush.msrb.mxu2 %v4877_v57 }
  0x7d   :  { %8778 = vst [vmem:[#allocation82_spill] sm:$0xff] %v4856_v51  ;;  %v4879_v51 = vld [vmem:[#allocation5 + $0x210] sm:$0xff]  ;;  %559 = vmatpush.msrb.mxu0 %v4875_v48 }
  0x7e   :  { %8779 = vst [vmem:[#allocation83_spill] sm:$0xff] %v4860_v20  ;;  %v4883_v20 = vld [vmem:[#allocation5 + $0x218] sm:$0xff]  ;;  %659 = vmatpush.msra.mxu1 %v4879_v51 }
  0x7f   :  { %8780 = vst [vmem:[#allocation84_spill] sm:$0xff] %v4864_v61  ;;  %v4887_v61 = vld [vmem:[#allocation5 + $0x1f8] sm:$0xff]  ;;  %699 = vmatpush.msra.mxu3 %v4883_v20  ;;  %624 = vmatpush.msra.mxu0 %v4885_v63 }
  0x80   :  { %8781 = vst [vmem:[#allocation85_spill] sm:$0xff] %v4866_v1  ;;  %v4892_v1 = vld [vmem:[#allocation5 + $0x1d0] sm:$0xff]  ;;  %664 = vmatpush.msra.mxu2 %v4887_v61  ;;  %791 = vmatpush.msrb.mxu1 %v4462_v3 }
  0x81   :  { %8782 = vst [vmem:[#allocation86_spill] sm:$0xff] %v4868_v53  ;;  %v4894_v53 = vld [vmem:[#allocation5 + $0x1d8] sm:$0xff]  ;;  %831 = vmatpush.msrb.mxu3 %v4465_v5  ;;  %625 = vmatpush.msra.mxu0 %v4892_v1 }
  0x82   :  { %8783 = vst [vmem:[#allocation87_spill] sm:$0xff] %v4875_v48  ;;  %v4901_v48 = vld [vmem:[%s8150_s1] sm:$0xf]  ;;  %665 = vmatpush.msra.mxu2 %v4894_v53  ;;  %792 = vmatpush.msrb.mxu1 %v4467_v7 }
  0x83   :  { %8784 = vst [vmem:[#allocation88_spill] sm:$0xff] %v4877_v57  ;;  %v4905_v57 = vld [vmem:[#allocation5 + $0x1b0] sm:$0xff]  ;;  %832 = vmatpush.msrb.mxu3 %v4470_v9  ;;  %v4918_v3 = vperm.slane %v4901_v48, 0  ;;  %v4921_v5 = vperm.slane %v4901_v48, 1  ;;  %v4928_v7 = vld [vmem:[%s8152_s3] sm:$0xf]  ;;  %660 = vmatmul.f32.vlgmr.msra.gmra.mxu1 %v8762_v10 }
  0x84   :  { %8785 = vst [vmem:[#allocation89_spill] sm:$0xff] %v4883_v20  ;;  %v4907_v20 = vld [vmem:[#allocation5 + $0x1b8] sm:$0xff]  ;;  %626 = vmatpush.msra.mxu0 %v4905_v57  ;;  %793 = vmatpush.msrb.mxu1 %v4473_v11  ;;  %v4932_v9 = vld [vmem:[#allocation5 + $0x170] sm:$0xff] }
  0x85   :  { %8786 = vst [vmem:[#allocation90_spill] sm:$0xff] %v4885_v63  ;;  %v4915_v63 = vld [vmem:[#allocation5 + $0x198] sm:$0xff]  ;;  %666 = vmatpush.msra.mxu2 %v4907_v20  ;;  %833 = vmatpush.msrb.mxu3 %v4475_v13  ;;  %v4949_v13 = vperm.slane %v4928_v7, 0 }
  0x86   :  { %8787 = vst [vmem:[#allocation91_spill] sm:$0xff] %v4887_v61  ;;  %v4913_v61 = vld [vmem:[#allocation5 + $0x190] sm:$0xff]  ;;  %794 = vmatpush.msrb.mxu1 %v4478_v15  ;;  %700 = vmatmul.f32.vlgmr.msra.gmra.mxu3 %v8762_v10 }
  0x87   :  { %8788 = vst [vmem:[#allocation92_spill] sm:$0xff] %v4892_v1  ;;  %627 = vmatpush.msra.mxu0 %v4913_v61  ;;  %667 = vmatpush.msra.mxu2 %v4915_v63  ;;  %v4944_v1 = vld [vmem:[#allocation5 + $0x158] sm:$0xff]  ;;  %v4960_v15 = vld [vmem:[#allocation5 + $0x130] sm:$0xff] }
  0x88   :  { %8789 = vst [vmem:[#allocation93_spill] sm:$0xff] %v4894_v53  ;;  %v4934_v53 = vld [vmem:[#allocation5 + $0x178] sm:$0xff]  ;;  %834 = vmatpush.msrb.mxu3 %v4481_v17  ;;  %795 = vmatpush.msrb.mxu1 %v4484_v19 }
  0x89   :  { %8790 = vst [vmem:[#allocation94_spill] sm:$0xff] %v4905_v57  ;;  %628 = vmatpush.msra.mxu0 %v4932_v9  ;;  %668 = vmatpush.msra.mxu2 %v4934_v53  ;;  %v4964_v17 = vld [vmem:[#allocation5 + $0x138] sm:$0xff] }
  0x8a   :  { %8791 = vst [vmem:[#allocation95_spill] sm:$0xff] %v4907_v20  ;;  %v4942_v20 = vld [vmem:[#allocation5 + $0x150] sm:$0xff]  ;;  %835 = vmatpush.msrb.mxu3 %v4487_v21  ;;  %796 = vmatpush.msrb.mxu1 %v4490_v23  ;;  %v4973_v21 = vld [vmem:[#allocation5 + $0x118] sm:$0xff] }
  0x8b   :  { %8792 = vst [vmem:[#allocation96_spill] sm:$0xff] %v4913_v61  ;;  %629 = vmatpush.msra.mxu0 %v4942_v20  ;;  %669 = vmatpush.msra.mxu2 %v4944_v1  ;;  %v4980_v23 = vld [vmem:[#allocation5 + $0xf0] sm:$0xff] }
  0x8c   :  { %8793 = vst [vmem:[#allocation97_spill] sm:$0xff] %v4915_v63  ;;  %v4954_v63 = vperm.slane %v4928_v7, 1  ;;  %836 = vmatpush.msrb.mxu3 %v4493_v25  ;;  %797 = vmatpush.msrb.mxu1 %v4496_v27  ;;  %v4984_v25 = vld [vmem:[#allocation5 + $0xf8] sm:$0xff] }
  0x8d   :  { %8794 = vst [vmem:[#allocation98_spill] sm:$0xff] %v4918_v3  ;;  %630 = vmatpush.msra.mxu0 %v4960_v15  ;;  %670 = vmatpush.msra.mxu2 %v4964_v17  ;;  %v4992_v27 = vld [vmem:[#allocation5 + $0xd8] sm:$0xff] }
  0x8e   :  { %8795 = vst [vmem:[#allocation99_spill] sm:$0xff] %v4921_v5  ;;  %837 = vmatpush.msrb.mxu3 %v4499_v29  ;;  %798 = vmatpush.msrb.mxu1 %v4502_v31  ;;  %v5001_v31 = vld [vmem:[#allocation5 + $0xb0] sm:$0xff] }
  0x8f   :  { %8796 = vst [vmem:[#allocation100_spill] sm:$0xff] %v4942_v20  ;;  %v4976_v20 = vperm.slane %v4901_v48, 3  ;;  %671 = vmatpush.msra.mxu2 %v4973_v21 }
  0x90   :  { %8797 = vst [vmem:[#allocation101_spill] sm:$0xff] %v4949_v13  ;;  %838 = vmatpush.msrb.mxu3 %v4505_v33  ;;  %799 = vmatpush.msrb.mxu1 %v4508_v35  ;;  %v5005_v33 = vld [vmem:[#allocation5 + $0xb8] sm:$0xff] }
  0x91   :  { %8798 = vst [vmem:[#allocation102_spill] sm:$0xff] %v4954_v63  ;;  %672 = vmatpush.msra.mxu2 %v4984_v25  ;;  %v5013_v35 = vld [vmem:[#allocation5 + $0x98] sm:$0xff] }
  0x92   :  { %8799 = vst [vmem:[#allocation103_spill] sm:$0xff] %v4964_v17  ;;  %839 = vmatpush.msrb.mxu3 %v4511_v37  ;;  %800 = vmatpush.msrb.mxu1 %v4514_v39  ;;  %v5020_v39 = vld [vmem:[#allocation5 + $0x70] sm:$0xff] }
  0x93   :  { %8801 = vst [vmem:[#allocation105_spill] sm:$0xff] %v4976_v20  ;;  %673 = vmatpush.msra.mxu2 %v4992_v27 }
  0x94   :  { %840 = vmatpush.msrb.mxu3 %v4517_v41  ;;  %801 = vmatpush.msrb.mxu1 %v4520_v43  ;;  %v5024_v41 = vld [vmem:[#allocation5 + $0x78] sm:$0xff]  ;;  %v5031_v43 = vperm.slane %v4901_v48, 2 }
  0x95   :  { %674 = vmatpush.msra.mxu2 %v5005_v33  ;;  %v5045_v48 = vld [vmem:[#allocation5 + $0x38] sm:$0xff] }
  0x96   :  { %841 = vmatpush.msrb.mxu3 %v4523_v45  ;;  %802 = vmatpush.msrb.mxu1 %v4526_v47  ;;  %v5039_v47 = vld [vmem:[#allocation5 + $0x30] sm:$0xff] }
  0x97   :  { %675 = vmatpush.msra.mxu2 %v5013_v35 }
  0x98   :  { %842 = vmatpush.msrb.mxu3 %v4531_v49  ;;  %803 = vmatpush.msrb.mxu1 %v4540_v52 }
  0x99   :  { %v4938_v57 = vpop.permute.xlu0 %74  ;;  %676 = vmatpush.msra.mxu2 %v5024_v41 }
  0x9a   :  { %v121_v11 = vmul.f32 %v4918_v3, %v4938_v57  ;;  %v122_v61 = vmul.f32 %v4921_v5, %v4938_v57  ;;  %v4968_v3 = vld [vmem:[#allocation5 + $0x110] sm:$0xff]  ;;  %v124_v29 = vmul.f32 %v4976_v20, %v4938_v57  ;;  %843 = vmatpush.msrb.mxu3 %v4546_v54  ;;  %804 = vmatpush.msrb.mxu1 %v4551_v56  ;;  %v5061_v54 = vld [vmem:[#allocation5 + $0x18] sm:$0xff] }
  0x9b   :  { %8800 = vst [vmem:[#allocation104_spill] sm:$0xff] %v4968_v3  ;;  %631 = vmatpush.msra.mxu0 %v4968_v3  ;;  %v4997_v3 = vperm.slane %v4928_v7, 3  ;;  %v123_v52 = vmul.f32 %v5031_v43, %v4938_v57 }
  0x9c   :  { %v163_v5 = vadd.f32 %v4949_v13, %v121_v11  ;;  %v164_v19 = vadd.f32 %v4954_v63, %v122_v61  ;;  %v4988_v13 = vld [vmem:[#allocation5 + $0xd0] sm:$0xff]  ;;  %844 = vmatpush.msrb.mxu3 %v4557_v58  ;;  %805 = vmatpush.msrb.mxu1 %v4563_v60 }
  0x9d   :  { %632 = vmatpush.msra.mxu0 %v4980_v23  ;;  %8802 = vst [vmem:[#allocation106_spill] sm:$0xff] %v4997_v3  ;;  %v166_v37 = vadd.f32 %v4997_v3, %v124_v29  ;;  %v5035_v29 = vld [vmem:[#allocation5 + $0x58] sm:$0xff] }
  0x9e   :  { %677 = vmatpush.msra.mxu2 %v5035_v29  ;;  %845 = vmatpush.msrb.mxu3 %v4569_v62 }
  0x9f   :  { %633 = vmatpush.msra.mxu0 %v4988_v13  ;;  %806 = vmatpush.msrb.mxu1 %v4575_v0 }
  0xa0   :  { %678 = vmatpush.msra.mxu2 %v5045_v48  ;;  %846 = vmatpush.msrb.mxu3 %v4581_v2 }
  0xa1   :  { %634 = vmatpush.msra.mxu0 %v5001_v31  ;;  %938 = vmatpush.msra.mxu1 %v4591_v6 }
  0xa2   :  { %679 = vmatpush.msra.mxu2 %v5061_v54  ;;  %978 = vmatpush.msra.mxu3 %v4593_v8 }
  0xa3   :  { %939 = vmatpush.msra.mxu1 %v4599_v12 }
  0xa4   :  { %979 = vmatpush.msra.mxu3 %v4601_v14 }
  0xa5   :  { %940 = vmatpush.msra.mxu1 %v4605_v16 }
  0xa6   :  { %980 = vmatpush.msra.mxu3 %v4607_v18 }
  0xa7   :  { %941 = vmatpush.msra.mxu1 %v4614_v22 }
  0xa8   :  { %981 = vmatpush.msra.mxu3 %v4616_v24 }
  0xa9   :  { %942 = vmatpush.msra.mxu1 %v4620_v26 }
  0xaa   :  { %982 = vmatpush.msra.mxu3 %v4622_v28 }
  0xab   :  { %943 = vmatpush.msra.mxu1 %v4626_v30 }
  0xac   :  { %983 = vmatpush.msra.mxu3 %v4628_v32 }
  0xad   :  { %v414_v61 = vpop.f32.mrf.mxu0  ;;  %944 = vmatpush.msra.mxu1 %v4632_v34 }
  0xae   :  { %v434_v11 = vpop.f32.mrf.mxu1  ;;  %v477_v63 = vadd.f32 %v414_v61, %v163_v5  ;;  %v5009_v61 = vld [vmem:[#allocation5 + $0x90] sm:$0xff]  ;;  %984 = vmatpush.msra.mxu3 %v4634_v36 }
  0xaf   :  { %v478_v17 = vadd.f32 %v434_v11, %v164_v19  ;;  %635 = vmatpush.msra.mxu0 %v5009_v61  ;;  %v5028_v11 = vld [vmem:[#allocation5 + $0x50] sm:$0xff]  ;;  %945 = vmatpush.msra.mxu1 %v4638_v38 }
  0xb0   :  { %v3437_v5 = vmul.f32 -1.442695, %v477_v63  ;;  %985 = vmatpush.msra.mxu3 %v4640_v40  ;;  %v8803_v40 = vld [vmem:[#allocation18_spill] sm:$0xff] }
  0xb1   :  { %v3438_v19 = vmul.f32 -1.442695, %v478_v17  ;;  %636 = vmatpush.msra.mxu0 %v5020_v39  ;;  %946 = vmatpush.msra.mxu1 %v4644_v42 }
  0xb2   :  { %3495 = vpow2.f32 %v3437_v5  ;;  %986 = vmatpush.msra.mxu3 %v4646_v44  ;;  %v8804_v44 = vld [vmem:[#allocation19_spill] sm:$0xff] }
  0xb3   :  { %3497 = vpow2.f32 %v3438_v19  ;;  %637 = vmatpush.msra.mxu0 %v5028_v11  ;;  %947 = vmatpush.msra.mxu1 %v4650_v46 }
  0xb4   :  { %v454_v56 = vpop.f32.mrf.mxu2  ;;  %987 = vmatpush.msra.mxu3 %v4652_v50  ;;  %v8808_v50 = vld [vmem:[#allocation23_spill] sm:$0xff] }
  0xb5   :  { %v474_v63 = vpop.f32.mrf.mxu3  ;;  %638 = vmatpush.msra.mxu0 %v5039_v47  ;;  %948 = vmatpush.msra.mxu1 %v4656_v4  ;;  %v5122_v4 = vld [vmem:[#allocation3 + $0x1e0] sm:$0xff] }
  0xb6   :  { %v480_v17 = vadd.f32 %v474_v63, %v166_v37  ;;  %v5051_v37 = vld [vmem:[#allocation5 + $0x10] sm:$0xff]  ;;  %v5057_v63 = vperm.slane %v4928_v7, 2  ;;  %988 = vmatpush.msra.mxu3 %v8803_v40  ;;  %v8819_v40 = vld [vmem:[#allocation40_spill] sm:$0xff] }
  0xb7   :  { %639 = vmatpush.msra.mxu0 %v5051_v37  ;;  %949 = vmatpush.msra.mxu1 %v8804_v44  ;;  %v8820_v44 = vld [vmem:[#allocation43_spill] sm:$0xff] }
  0xb8   :  { %v3439_v45 = vmul.f32 -1.442695, %v480_v17  ;;  %v3496_v5 = vpop.eup %3495  ;;  %v165_v58 = vadd.f32 %v5057_v63, %v123_v52 }
  0xb9   :  { %v3498_v49 = vpop.eup %3497  ;;  %v5041_v19 = vadd.f32 1.0, %v3496_v5 }
  0xba   :  { %3499 = vpow2.f32 %v3439_v45  ;;  %v5047_v10 = vadd.f32 1.0, %v3498_v49  ;;  %v479_v62 = vadd.f32 %v454_v56, %v165_v58 }
  0xbb   :  { %3501 = vrcp.f32 %v5041_v19  ;;  %v496_v8 = vand.u32 2147483648, %v5041_v19  ;;  %v494_v49 = vand.u32 2147483647, %v5041_v19  ;;  %vm490_vm2 = vweird.f32 %v5041_v19 }
  0xbc   :  { %3503 = vrcp.f32 %v5047_v10  ;;  %v515_v12 = vand.u32 2147483648, %v5047_v10  ;;  %v513_v16 = vand.u32 2147483647, %v5047_v10  ;;  %vm509_vm3 = vweird.f32 %v5047_v10 }
  0xbd   :  { %v497_v22 = vor.u32 1.1754944e-38, %v496_v8  ;;  %vm495_vm5 = vcmp.eq.f32.partialorder %v494_v49, 8.507059e+37  ;;  %v8809_v49 = vld [vmem:[#allocation24_spill] sm:$0xff] }
  0xbe   :  { %v516_v24 = vor.u32 1.1754944e-38, %v515_v12  ;;  %vm514_vm7 = vcmp.eq.f32.partialorder %v513_v16, 8.507059e+37  ;;  %v5126_v12 = vld [vmem:[#allocation3 + $0x1f0] sm:$0xff]  ;;  %v8810_v16 = vld [vmem:[#allocation25_spill] sm:$0xff] }
  0xc0   :  { %v3500_v57 = vpop.eup %3499 }
  0xc1   :  { %v5073_v7 = vadd.f32 1.0, %v3500_v57  ;;  %v3502_v60 = vpop.eup %3501 }
  0xc2   :  { %v3504_v17 = vpop.eup %3503  ;;  %v486_v45 = vmul.f32 %v3502_v60, %v5041_v19  ;;  %vm491_vm0 = vweird.f32 %v3502_v60 }
  0xc3   :  { %3505 = vrcp.f32 %v5073_v7  ;;  %v505_v0 = vmul.f32 %v3504_v17, %v5047_v10  ;;  %vm510_vm1 = vweird.f32 %v3504_v17  ;;  %vm492_vm4 = vmor %vm490_vm2, %vm491_vm0  ;;  %v535_v34 = vand.u32 2147483648, %v5073_v7 }
  0xc4   :  { %v487_v2 = vsub.f32 1.0, %v486_v45  ;;  %3507 = vtanh.f32 %v479_v62  ;;  %vm511_vm6 = vmor %vm509_vm3, %vm510_vm1  ;;  %vm529_vm9 = vweird.f32 %v5073_v7  ;;  %v533_v36 = vand.u32 2147483647, %v5073_v7 }
  0xc5   :  { %v506_v6 = vsub.f32 1.0, %v505_v0  ;;  %v536_v42 = vor.u32 1.1754944e-38, %v535_v34  ;;  %v5174_v34 = vld [vmem:[#allocation3 + $0x130] sm:$0xff] }
  0xc6   :  { %v488_v5 = vmul.f32 %v3502_v60, %v487_v2  ;;  %vm534_vm11 = vcmp.eq.f32.partialorder %v533_v36, 8.507059e+37  ;;  %v8818_v36 = vld [vmem:[#allocation39_spill] sm:$0xff] }
  0xc7   :  { %v507_v14 = vmul.f32 %v3504_v17, %v506_v6  ;;  %v8806_v6 = vld [vmem:[#allocation21_spill] sm:$0xff] }
  0xc8   :  { %v489_v52 = vadd.f32 %v3502_v60, %v488_v5  ;;  %950 = vmatpush.msra.mxu1 %v8806_v6  ;;  %v5130_v5 = vld [vmem:[#allocation3 + $0x1c0] sm:$0xff]  ;;  %v8822_v6 = vld [vmem:[#allocation47_spill] sm:$0xff] }
  0xc9   :  { %v3506_v18 = vpop.eup %3505  ;;  %v508_v56 = vadd.f32 %v3504_v17, %v507_v14  ;;  %v5134_v14 = vld [vmem:[#allocation3 + $0x1d0] sm:$0xff] }
  0xca   :  { %v525_v57 = vmul.f32 %v3506_v18, %v5073_v7  ;;  %v493_v58 = vsel %vm492_vm4, %v3502_v60, %v489_v52  ;;  %v3508_v26 = vpop.eup %3507  ;;  %vm530_vm8 = vweird.f32 %v3506_v18  ;;  %v8807_v7 = vld [vmem:[#allocation22_spill] sm:$0xff]  ;;  %951 = vmatpush.msra.mxu1 %v8808_v50  ;;  %v8823_v50 = vld [vmem:[#allocation48_spill] sm:$0xff] }
  0xcb   :  { %v498_v19 = vsel %vm495_vm5, %v497_v22, %v493_v58  ;;  %v512_v62 = vsel %vm511_vm6, %v3504_v17, %v508_v56  ;;  %vm531_vm10 = vmor %vm529_vm9, %vm530_vm8  ;;  %v8805_v17 = vld [vmem:[#allocation20_spill] sm:$0xff]  ;;  %v8811_v52 = vld [vmem:[#allocation26_spill] sm:$0xff] }
  0xcc   :  { %v526_v28 = vsub.f32 1.0, %v525_v57  ;;  %v517_v10 = vsel %vm514_vm7, %v516_v24, %v512_v62  ;;  %v540_v45 = vmul.f32 %v3508_v26, %v498_v19  ;;  %989 = vmatpush.msra.mxu3 %v8805_v17  ;;  %952 = vmatpush.msra.mxu1 %v8810_v16  ;;  %v5142_v22 = vld [vmem:[#allocation3 + $0x1b0] sm:$0xff]  ;;  %v5146_v57 = vld [vmem:[#allocation3 + $0x180] sm:$0xff]  ;;  %v8813_v24 = vld [vmem:[#allocation28_spill] sm:$0xff] }
  0xcd   :  { %v539_v0 = vmul.f32 0.0, %v517_v10  ;;  %v8812_v56 = vld [vmem:[#allocation27_spill] sm:$0xff]  ;;  %v5155_v26 = vld [vmem:[#allocation3 + $0x160] sm:$0xff]  ;;  %v8815_v10 = vld [vmem:[#allocation32_spill] sm:$0xff] }
  0xce   :  { %v527_v30 = vmul.f32 %v3506_v18, %v526_v28  ;;  %990 = vmatpush.msra.mxu3 %v8807_v7  ;;  %953 = vmatpush.msra.mxu1 %v8812_v56  ;;  %v5150_v58 = vld [vmem:[#allocation3 + $0x190] sm:$0xff]  ;;  %v5162_v28 = vld [vmem:[#allocation3 + $0x140] sm:$0xff] }
  0xcf   :  { %v5101_v60 = vadd.f32 %v540_v45, %v539_v0  ;;  %v5158_v19 = vld [vmem:[#allocation3 + $0x170] sm:$0xff]  ;;  %v5186_v17 = vld [vmem:[#allocation3 + $0xe0] sm:$0xff] }
  0xd0   :  { %v528_v32 = vadd.f32 %v3506_v18, %v527_v30  ;;  %991 = vmatpush.msra.mxu3 %v8809_v49  ;;  %v8814_v62 = vld [vmem:[#allocation31_spill] sm:$0xff]  ;;  %v5170_v30 = vld [vmem:[#allocation3 + $0x120] sm:$0xff] }
  0xd1   :  { %3509 = vtanh.f32 %v5101_v60  ;;  %v5166_v45 = vld [vmem:[#allocation3 + $0x150] sm:$0xff]  ;;  %v5194_v7 = vld [vmem:[#allocation3 + $0xc0] sm:$0xff] }
  0xd2   :  { %v532_v38 = vsel %vm531_vm10, %v3506_v18, %v528_v32  ;;  %v5138_v18 = vld [vmem:[#allocation3 + $0x1a0] sm:$0xff]  ;;  %992 = vmatpush.msra.mxu3 %v8811_v52  ;;  %v8816_v0 = vld [vmem:[#allocation35_spill] sm:$0xff]  ;;  %v8817_v32 = vld [vmem:[#allocation36_spill] sm:$0xff] }
  0xd3   :  { %v537_v46 = vsel %vm534_vm11, %v536_v42, %v532_v38  ;;  %v5178_v38 = vld [vmem:[#allocation3 + $0x100] sm:$0xff]  ;;  %v5182_v42 = vld [vmem:[#allocation3 + $0x110] sm:$0xff] }
  0xd4   :  { %993 = vmatpush.msra.mxu3 %v8813_v24  ;;  %v5198_v49 = vld [vmem:[#allocation3 + $0xd0] sm:$0xff]  ;;  %v5202_v16 = vld [vmem:[#allocation3 + $0xa0] sm:$0xff]  ;;  %v8825_v24 = vld [vmem:[#allocation54_spill] sm:$0xff] }
  0xd5   :  { %v8824_v52 = vld [vmem:[#allocation51_spill] sm:$0xff] }
  0xd6   :  { %v5206_v56 = vld [vmem:[#allocation3 + $0xb0] sm:$0xff] }
  0xd7   :  { %v3510_v2 = vpop.eup %3509 }
  0xd8   :  { %v5116_v8 = vmul.f32 %v3510_v2, %v537_v46  ;;  %v8821_v2 = vld [vmem:[#allocation44_spill] sm:$0xff]  ;;  %v5190_v46 = vld [vmem:[#allocation3 + $0xf0] sm:$0xff] }
  0xda   :  { %560 = vmatmul.f32.vlgmr.msrb.gmra.mxu0 %v5116_v8  ;;  %600 = vmatmul.f32.vlgmr.msrb.gmra.mxu2 %v5116_v8 }
  0xdb   :  { %771 = vmatpush.msrb.mxu0 %v5122_v4  ;;  %807 = vmatmul.f32.vlgmr.msrb.gmra.mxu1 %v5116_v8 }
  0xdc   :  { %811 = vmatpush.msrb.mxu2 %v5126_v12  ;;  %847 = vmatmul.f32.vlgmr.msrb.gmra.mxu3 %v5116_v8 }
  0xdd   :  { %772 = vmatpush.msrb.mxu0 %v5130_v5  ;;  %1018 = vmatpush.msrb.mxu1 %v8814_v62  ;;  %v5210_v62 = vld [vmem:[#allocation3 + $0x80] sm:$0xff] }
  0xde   :  { %812 = vmatpush.msrb.mxu2 %v5134_v14  ;;  %1058 = vmatpush.msrb.mxu3 %v8815_v10  ;;  %v8826_v10 = vld [vmem:[#allocation55_spill] sm:$0xff] }
  0xdf   :  { %773 = vmatpush.msrb.mxu0 %v5138_v18  ;;  %1019 = vmatpush.msrb.mxu1 %v8816_v0  ;;  %v8827_v0 = vld [vmem:[#allocation9_spill] sm:$0xff] }
  0xe0   :  { %813 = vmatpush.msrb.mxu2 %v5142_v22  ;;  %1059 = vmatpush.msrb.mxu3 %v8817_v32  ;;  %v8829_v32 = vld [vmem:[#allocation10_spill] sm:$0xff] }
  0xe1   :  { %774 = vmatpush.msrb.mxu0 %v5146_v57  ;;  %1020 = vmatpush.msrb.mxu1 %v8818_v36  ;;  %v8830_v36 = vld [vmem:[#allocation59_spill] sm:$0xff] }
  0xe2   :  { %814 = vmatpush.msrb.mxu2 %v5150_v58  ;;  %640 = vmatmul.f32.vlgmr.msra.gmra.mxu0 %v5116_v8 }
  0xe3   :  { %680 = vmatmul.f32.vlgmr.msra.gmra.mxu2 %v5116_v8  ;;  %775 = vmatpush.msrb.mxu0 %v5155_v26 }
  0xe4   :  { %815 = vmatpush.msrb.mxu2 %v5158_v19  ;;  %1060 = vmatpush.msrb.mxu3 %v8819_v40  ;;  %v8831_v40 = vld [vmem:[#allocation11_spill] sm:$0xff] }
  0xe5   :  { %776 = vmatpush.msrb.mxu0 %v5162_v28  ;;  %1021 = vmatpush.msrb.mxu1 %v8820_v44  ;;  %v8832_v44 = vld [vmem:[#allocation62_spill] sm:$0xff] }
  0xe6   :  { %816 = vmatpush.msrb.mxu2 %v5166_v45  ;;  %1061 = vmatpush.msrb.mxu3 %v8821_v2  ;;  %v8833_v2 = vld [vmem:[#allocation12_spill] sm:$0xff] }
  0xe7   :  { %777 = vmatpush.msrb.mxu0 %v5170_v30  ;;  %1022 = vmatpush.msrb.mxu1 %v8822_v6  ;;  %v8834_v6 = vld [vmem:[#allocation63_spill] sm:$0xff] }
  0xe8   :  { %817 = vmatpush.msrb.mxu2 %v5174_v34  ;;  %1062 = vmatpush.msrb.mxu3 %v8823_v50  ;;  %v8835_v50 = vld [vmem:[#allocation13_spill] sm:$0xff] }
  0xe9   :  { %778 = vmatpush.msrb.mxu0 %v5178_v38  ;;  %1023 = vmatpush.msrb.mxu1 %v4756_v59  ;;  %v8828_v59 = vld [vmem:[#allocation58_spill] sm:$0xff] }
  0xea   :  { %818 = vmatpush.msrb.mxu2 %v5182_v42  ;;  %1063 = vmatpush.msrb.mxu3 %v8824_v52  ;;  %v8836_v52 = vld [vmem:[#allocation66_spill] sm:$0xff] }
  0xeb   :  { %779 = vmatpush.msrb.mxu0 %v5186_v17  ;;  %1024 = vmatpush.msrb.mxu1 %v8825_v24  ;;  %v8837_v24 = vld [vmem:[#allocation14_spill] sm:$0xff] }
  0xec   :  { %819 = vmatpush.msrb.mxu2 %v5190_v46  ;;  %1064 = vmatpush.msrb.mxu3 %v8826_v10  ;;  %v8838_v10 = vld [vmem:[#allocation67_spill] sm:$0xff] }
  0xed   :  { %780 = vmatpush.msrb.mxu0 %v5194_v7  ;;  %1025 = vmatpush.msrb.mxu1 %v8828_v59  ;;  %v8840_v59 = vld [vmem:[#allocation70_spill] sm:$0xff] }
  0xee   :  { %820 = vmatpush.msrb.mxu2 %v5198_v49  ;;  %1065 = vmatpush.msrb.mxu3 %v8830_v36  ;;  %v8842_v36 = vld [vmem:[#allocation71_spill] sm:$0xff] }
  0xef   :  { %781 = vmatpush.msrb.mxu0 %v5202_v16  ;;  %1026 = vmatpush.msrb.mxu1 %v8832_v44  ;;  %v8844_v44 = vld [vmem:[#allocation29_spill] sm:$0xff] }
  0xf0   :  { %821 = vmatpush.msrb.mxu2 %v5206_v56  ;;  %1066 = vmatpush.msrb.mxu3 %v8834_v6  ;;  %v8846_v6 = vld [vmem:[#allocation74_spill] sm:$0xff] }
  0xf1   :  { %782 = vmatpush.msrb.mxu0 %v5210_v62  ;;  %1027 = vmatpush.msrb.mxu1 %v8836_v52  ;;  %v8848_v52 = vld [vmem:[#allocation75_spill] sm:$0xff] }
  0xf2   :  { %822 = vmatpush.msrb.mxu2 %v8827_v0  ;;  %1067 = vmatpush.msrb.mxu3 %v8838_v10  ;;  %v8839_v0 = vld [vmem:[#allocation15_spill] sm:$0xff]  ;;  %v8850_v10 = vld [vmem:[#allocation78_spill] sm:$0xff] }
  0xf3   :  { %783 = vmatpush.msrb.mxu0 %v8829_v32  ;;  %1028 = vmatpush.msrb.mxu1 %v8840_v59  ;;  %v8841_v32 = vld [vmem:[#allocation16_spill] sm:$0xff]  ;;  %v8852_v59 = vld [vmem:[#allocation79_spill] sm:$0xff] }
  0xf4   :  { %823 = vmatpush.msrb.mxu2 %v8831_v40  ;;  %1068 = vmatpush.msrb.mxu3 %v8842_v36  ;;  %v8843_v40 = vld [vmem:[#allocation17_spill] sm:$0xff] }
  0xf5   :  { %784 = vmatpush.msrb.mxu0 %v8833_v2  ;;  %v8845_v2 = vld [vmem:[#allocation30_spill] sm:$0xff]  ;;  %1029 = vmatpush.msrb.mxu1 %v8846_v6  ;;  %v8855_v36 = vld [vmem:[#allocation41_spill] sm:$0xff] }
  0xf6   :  { %824 = vmatpush.msrb.mxu2 %v8835_v50  ;;  %v8847_v50 = vld [vmem:[#allocation33_spill] sm:$0xff]  ;;  %1069 = vmatpush.msrb.mxu3 %v8848_v52 }
  0xf7   :  { %785 = vmatpush.msrb.mxu0 %v8837_v24  ;;  %v8849_v24 = vld [vmem:[#allocation34_spill] sm:$0xff]  ;;  %1030 = vmatpush.msrb.mxu1 %v8850_v10  ;;  %v8859_v6 = vld [vmem:[#allocation45_spill] sm:$0xff] }
  0xf8   :  { %825 = vmatpush.msrb.mxu2 %v8839_v0  ;;  %v8851_v0 = vld [vmem:[#allocation37_spill] sm:$0xff]  ;;  %1070 = vmatpush.msrb.mxu3 %v8852_v59  ;;  %v8863_v10 = vld [vmem:[#allocation50_spill] sm:$0xff] }
  0xf9   :  { %786 = vmatpush.msrb.mxu0 %v8841_v32  ;;  %v8853_v32 = vld [vmem:[#allocation38_spill] sm:$0xff]  ;;  %v8861_v52 = vld [vmem:[#allocation49_spill] sm:$0xff] }
  0xfa   :  { %826 = vmatpush.msrb.mxu2 %v8843_v40  ;;  %787 = vmatmul.f32.vlgmr.msrb.gmra.mxu0 %v5116_v8  ;;  %v8856_v40 = vld [vmem:[#allocation83_spill] sm:$0xff]  ;;  %v8865_v59 = vld [vmem:[#allocation53_spill] sm:$0xff] }
  0xfb   :  { %827 = vmatmul.f32.vlgmr.msrb.gmra.mxu2 %v5116_v8  ;;  %918 = vmatpush.msra.mxu0 %v8844_v44  ;;  %v8854_v8 = vld [vmem:[#allocation82_spill] sm:$0xff] }
  0xfc   :  { %958 = vmatpush.msra.mxu2 %v8845_v2  ;;  %1031 = vmatpush.msrb.mxu1 %v8854_v8  ;;  %v8857_v44 = vld [vmem:[#allocation42_spill] sm:$0xff]  ;;  %v8867_v8 = vld [vmem:[#allocation57_spill] sm:$0xff] }
  0xfd   :  { %919 = vmatpush.msra.mxu0 %v8847_v50  ;;  %1071 = vmatpush.msrb.mxu3 %v8856_v40  ;;  %v8858_v2 = vld [vmem:[#allocation86_spill] sm:$0xff]  ;;  %v8870_v40 = vld [vmem:[#allocation64_spill] sm:$0xff] }
  0xfe   :  { %959 = vmatpush.msra.mxu2 %v8849_v24  ;;  %1032 = vmatpush.msrb.mxu1 %v8858_v2  ;;  %v8860_v50 = vld [vmem:[#allocation46_spill] sm:$0xff]  ;;  %v8862_v24 = vld [vmem:[#allocation89_spill] sm:$0xff] }
  0xff   :  { %920 = vmatpush.msra.mxu0 %v8851_v0  ;;  %1072 = vmatpush.msrb.mxu3 %v4872_v55  ;;  %v8864_v0 = vld [vmem:[#allocation52_spill] sm:$0xff]  ;;  %v8869_v55 = vld [vmem:[#allocation61_spill] sm:$0xff] }
 0x100   :  { %960 = vmatpush.msra.mxu2 %v8853_v32  ;;  %1033 = vmatpush.msrb.mxu1 %v4879_v51  ;;  %v8866_v32 = vld [vmem:[#allocation56_spill] sm:$0xff]  ;;  %v8871_v51 = vld [vmem:[#allocation65_spill] sm:$0xff] }
 0x101   :  { %921 = vmatpush.msra.mxu0 %v8855_v36  ;;  %1073 = vmatpush.msrb.mxu3 %v8862_v24  ;;  %v8868_v36 = vld [vmem:[#allocation60_spill] sm:$0xff]  ;;  %v8873_v2 = vld [vmem:[#allocation69_spill] sm:$0xff] }
 0x102   :  { %961 = vmatpush.msra.mxu2 %v8857_v44  ;;  %v8872_v44 = vld [vmem:[#allocation68_spill] sm:$0xff]  ;;  %v8877_v24 = vld [vmem:[#allocation77_spill] sm:$0xff] }
 0x103   :  { %922 = vmatpush.msra.mxu0 %v8859_v6  ;;  %v8874_v6 = vld [vmem:[#allocation72_spill] sm:$0xff] }
 0x104   :  { %962 = vmatpush.msra.mxu2 %v8860_v50  ;;  %v8875_v50 = vld [vmem:[#allocation73_spill] sm:$0xff] }
 0x105   :  { %923 = vmatpush.msra.mxu0 %v8861_v52  ;;  %v8876_v52 = vld [vmem:[#allocation76_spill] sm:$0xff] }
 0x106   :  { %963 = vmatpush.msra.mxu2 %v8863_v10  ;;  %v8878_v10 = vld [vmem:[#allocation80_spill] sm:$0xff] }
 0x107   :  { %924 = vmatpush.msra.mxu0 %v8864_v0  ;;  %v8879_v0 = vld [vmem:[#allocation81_spill] sm:$0xff] }
 0x108   :  { %964 = vmatpush.msra.mxu2 %v8865_v59  ;;  %v8880_v59 = vld [vmem:[#allocation84_spill] sm:$0xff] }
 0x109   :  { %925 = vmatpush.msra.mxu0 %v8866_v32  ;;  %v8881_v32 = vld [vmem:[#allocation85_spill] sm:$0xff] }
 0x10a   :  { %965 = vmatpush.msra.mxu2 %v8867_v8  ;;  %v8882_v8 = vld [vmem:[#allocation87_spill] sm:$0xff] }
 0x10b   :  { %926 = vmatpush.msra.mxu0 %v8868_v36  ;;  %v8883_v36 = vld [vmem:[#allocation88_spill] sm:$0xff] }
 0x10c   :  { %966 = vmatpush.msra.mxu2 %v8869_v55  ;;  %v8884_v55 = vld [vmem:[#allocation90_spill] sm:$0xff] }
 0x10d   :  { %927 = vmatpush.msra.mxu0 %v8870_v40  ;;  %v8885_v40 = vld [vmem:[#allocation91_spill] sm:$0xff] }
 0x10e   :  { %967 = vmatpush.msra.mxu2 %v8871_v51  ;;  %v8886_v51 = vld [vmem:[#allocation92_spill] sm:$0xff] }
 0x10f   :  { %928 = vmatpush.msra.mxu0 %v8872_v44  ;;  %v8887_v44 = vld [vmem:[#allocation93_spill] sm:$0xff] }
 0x110   :  { %968 = vmatpush.msra.mxu2 %v8873_v2  ;;  %v8888_v2 = vld [vmem:[#allocation94_spill] sm:$0xff] }
 0x111   :  { %929 = vmatpush.msra.mxu0 %v8874_v6  ;;  %v8889_v6 = vld [vmem:[#allocation95_spill] sm:$0xff] }
 0x112   :  { %969 = vmatpush.msra.mxu2 %v8875_v50  ;;  %v8890_v50 = vld [vmem:[#allocation96_spill] sm:$0xff] }
 0x113   :  { %930 = vmatpush.msra.mxu0 %v8876_v52  ;;  %v8891_v52 = vld [vmem:[#allocation97_spill] sm:$0xff] }
 0x114   :  { %970 = vmatpush.msra.mxu2 %v8877_v24  ;;  %v8892_v24 = vld [vmem:[#allocation100_spill] sm:$0xff] }
 0x115   :  { %931 = vmatpush.msra.mxu0 %v8878_v10  ;;  %v8893_v10 = vld [vmem:[#allocation103_spill] sm:$0xff] }
 0x116   :  { %971 = vmatpush.msra.mxu2 %v8879_v0  ;;  %v8894_v0 = vld [vmem:[#allocation104_spill] sm:$0xff] }
 0x117   :  { %932 = vmatpush.msra.mxu0 %v8880_v59 }
 0x118   :  { %972 = vmatpush.msra.mxu2 %v8881_v32 }
 0x119   :  { %933 = vmatpush.msra.mxu0 %v8882_v8 }
 0x11a   :  { %973 = vmatpush.msra.mxu2 %v8883_v36 }
 0x11b   :  { %998 = vmatpush.msrb.mxu0 %v8884_v55 }
 0x11c   :  { %1038 = vmatpush.msrb.mxu2 %v8885_v40 }
 0x11d   :  { %999 = vmatpush.msrb.mxu0 %v8886_v51 }
 0x11e   :  { %1039 = vmatpush.msrb.mxu2 %v8887_v44 }
 0x11f   :  { %1000 = vmatpush.msrb.mxu0 %v8888_v2 }
 0x120   :  { %1040 = vmatpush.msrb.mxu2 %v8889_v6 }
 0x121   :  { %1001 = vmatpush.msrb.mxu0 %v8890_v50 }
 0x122   :  { %1041 = vmatpush.msrb.mxu2 %v8891_v52 }
 0x123   :  { %1002 = vmatpush.msrb.mxu0 %v4932_v9 }
 0x124   :  { %1042 = vmatpush.msrb.mxu2 %v4934_v53  ;;  %v581_v53 = vpop.f32.mrf.mxu1 }
 0x125   :  { %1003 = vmatpush.msrb.mxu0 %v8892_v24 }
 0x126   :  { %1043 = vmatpush.msrb.mxu2 %v4944_v1  ;;  %v195_v1 = vld [vmem:[%s8154_s5] sm:$0xf] }
 0x127   :  { %1004 = vmatpush.msrb.mxu0 %v4960_v15  ;;  %v5310_v15 = vperm.slane %v195_v1, 0  ;;  %v5321_v55 = vperm.slane %v195_v1, 3 }
 0x128   :  { %1044 = vmatpush.msrb.mxu2 %v8893_v10 }
 0x129   :  { %1005 = vmatpush.msrb.mxu0 %v8894_v0  ;;  %8895 = vst [vmem:[#allocation18_spill] sm:$0xff] %v5310_v15 }
 0x12a   :  { %1045 = vmatpush.msrb.mxu2 %v4973_v21  ;;  %8899 = vst [vmem:[#allocation20_spill] sm:$0xff] %v5321_v55 }
 0x12b   :  { %1006 = vmatpush.msrb.mxu0 %v4980_v23 }
 0x12c   :  { %1046 = vmatpush.msrb.mxu2 %v4984_v25  ;;  %v661_v9 = vpop.f32.mrf.mxu1  ;;  %v5312_v25 = vpop.permute.xlu0 %79 }
 0x12d   :  { %1007 = vmatpush.msrb.mxu0 %v4988_v13  ;;  %v621_v13 = vpop.f32.mrf.mxu3  ;;  %v128_v51 = vmul.f32 %v4976_v20, %v5312_v25 }
 0x12e   :  { %1047 = vmatpush.msrb.mxu2 %v4992_v27 }
 0x12f   :  { %1008 = vmatpush.msrb.mxu0 %v5001_v31  ;;  %v8896_v31 = vld [vmem:[#allocation99_spill] sm:$0xff]  ;;  %v170_v24 = vadd.f32 %v4997_v3, %v128_v51 }
 0x130   :  { %1048 = vmatpush.msrb.mxu2 %v5005_v33  ;;  %v126_v33 = vmul.f32 %v8896_v31, %v5312_v25 }
 0x131   :  { %1009 = vmatpush.msrb.mxu0 %v5009_v61 }
 0x132   :  { %1049 = vmatpush.msrb.mxu2 %v5013_v35  ;;  %v5317_v35 = vperm.slane %v195_v1, 1 }
 0x133   :  { %1010 = vmatpush.msrb.mxu0 %v5020_v39 }
 0x134   :  { %1050 = vmatpush.msrb.mxu2 %v5024_v41  ;;  %8897 = vst [vmem:[#allocation19_spill] sm:$0xff] %v5317_v35 }
 0x135   :  { %1011 = vmatpush.msrb.mxu0 %v5028_v11 }
 0x136   :  { %1051 = vmatpush.msrb.mxu2 %v5035_v29  ;;  %v8898_v29 = vld [vmem:[#allocation102_spill] sm:$0xff] }
 0x137   :  { %1012 = vmatpush.msrb.mxu0 %v5039_v47  ;;  %v168_v47 = vadd.f32 %v8898_v29, %v126_v33 }
 0x138   :  { %1052 = vmatpush.msrb.mxu2 %v5045_v48  ;;  %v701_v48 = vpop.f32.mrf.mxu3 }
 0x139   :  { %1013 = vmatpush.msrb.mxu0 %v5051_v37 }
 0x13a   :  { %1053 = vmatpush.msrb.mxu2 %v5061_v54 }
 0x157   :  { %v561_v21 = vpop.f32.mrf.mxu0 }
 0x158   :  { %v582_v23 = vadd.f32 %v581_v53, %v561_v21  ;;  %v808_v41 = vpop.f32.mrf.mxu1 }
 0x159   :  { %v852_v54 = vadd.f32 %v808_v41, %v168_v47  ;;  %v8901_v41 = vld [vmem:[#allocation98_spill] sm:$0xff] }
 0x15a   :  { %v704_v27 = vadd.f32 %v582_v23, %v5310_v15 }
 0x15b   :  { %v3444_v36 = vmul.f32 -1.442695, %v852_v54 }
 0x15c   :  { %v3440_v61 = vmul.f32 -1.442695, %v704_v27  ;;  %v5327_v27 = vperm.slane %v195_v1, 2  ;;  %v8902_v1 = vld [vmem:[#allocation101_spill] sm:$0xff] }
 0x15d   :  { %v601_v39 = vpop.f32.mrf.mxu2 }
 0x15e   :  { %3511 = vpow2.f32 %v3440_v61  ;;  %v622_v11 = vadd.f32 %v621_v13, %v601_v39  ;;  %8900 = vst [vmem:[#allocation21_spill] sm:$0xff] %v5327_v27 }
 0x15f   :  { %v848_v6 = vpop.f32.mrf.mxu3  ;;  %v641_v10 = vpop.f32.mrf.mxu0 }
 0x160   :  { %v705_v37 = vadd.f32 %v622_v11, %v5317_v35  ;;  %v854_v13 = vadd.f32 %v848_v6, %v170_v24  ;;  %v662_v33 = vadd.f32 %v661_v9, %v641_v10  ;;  %v125_v11 = vmul.f32 %v8901_v41, %v5312_v25 }
 0x162   :  { %v3441_v59 = vmul.f32 -1.442695, %v705_v37  ;;  %v3445_v39 = vmul.f32 -1.442695, %v854_v13  ;;  %v706_v54 = vadd.f32 %v662_v33, %v5327_v27 }
 0x164   :  { %v3512_v32 = vpop.eup %3511  ;;  %3513 = vpow2.f32 %v3441_v59 }
 0x165   :  { %v711_v8 = vadd.f32 1.0, %v3512_v32 }
 0x166   :  { %v681_v40 = vpop.f32.mrf.mxu2 }
 0x167   :  { %3515 = vrcp.f32 %v711_v8  ;;  %v702_v44 = vadd.f32 %v701_v48, %v681_v40  ;;  %v167_v40 = vadd.f32 %v8902_v1, %v125_v11  ;;  %vm717_vm13 = vweird.f32 %v711_v8 }
 0x168   :  { %3517 = vpow2.f32 %v3444_v36  ;;  %v723_v36 = vand.u32 2147483648, %v711_v8 }
 0x169   :  { %v707_v50 = vadd.f32 %v702_v44, %v5321_v55  ;;  %v721_v44 = vand.u32 2147483647, %v711_v8 }
 0x16a   :  { %v3514_v2 = vpop.eup %3513 }
 0x16b   :  { %v730_v52 = vadd.f32 1.0, %v3514_v2  ;;  %v3442_v0 = vmul.f32 -1.442695, %v707_v50  ;;  %vm722_vm1 = vcmp.eq.f32.partialorder %v721_v44, 8.507059e+37 }
 0x16d   :  { %v3516_v53 = vpop.eup %3515  ;;  %3519 = vrcp.f32 %v730_v52  ;;  %v742_v2 = vand.u32 2147483648, %v730_v52  ;;  %v740_v50 = vand.u32 2147483647, %v730_v52  ;;  %vm736_vm0 = vweird.f32 %v730_v52 }
 0x16e   :  { %v713_v21 = vmul.f32 %v3516_v53, %v711_v8  ;;  %v3518_v23 = vpop.eup %3517  ;;  %3521 = vpow2.f32 %v3442_v0  ;;  %vm718_vm12 = vweird.f32 %v3516_v53 }
 0x16f   :  { %v5331_v47 = vadd.f32 1.0, %v3518_v23  ;;  %3523 = vpow2.f32 %v3445_v39  ;;  %vm5336_vm14 = vmor %vm717_vm13, %vm718_vm12  ;;  %v724_v23 = vor.u32 1.1754944e-38, %v723_v36  ;;  %v743_v39 = vor.u32 1.1754944e-38, %v742_v2 }
 0x170   :  { %v714_v61 = vsub.f32 1.0, %v713_v21  ;;  %vm741_vm3 = vcmp.eq.f32.partialorder %v740_v50, 8.507059e+37 }
 0x171   :  { %3525 = vrcp.f32 %v5331_v47  ;;  %vm883_vm9 = vweird.f32 %v5331_v47 }
 0x172   :  { %v715_v48 = vmul.f32 %v3516_v53, %v714_v61  ;;  %3527 = vtanh.f32 %v706_v54 }
 0x173   :  { %v3520_v37 = vpop.eup %3519 }
 0x174   :  { %v732_v59 = vmul.f32 %v3520_v37, %v730_v52  ;;  %v716_v32 = vadd.f32 %v3516_v53, %v715_v48  ;;  %v3522_v9 = vpop.eup %3521  ;;  %vm737_vm15 = vweird.f32 %v3520_v37 }
 0x175   :  { %v750_v24 = vadd.f32 1.0, %v3522_v9  ;;  %v3524_v61 = vpop.eup %3523  ;;  %vm738_vm2 = vmor %vm736_vm0, %vm737_vm15 }
 0x176   :  { %v733_v51 = vsub.f32 1.0, %v732_v59  ;;  %v720_v13 = vsel %vm5336_vm14, %v3516_v53, %v716_v32  ;;  %v5344_v36 = vadd.f32 1.0, %v3524_v61 }
 0x177   :  { %v788_v10 = vpop.f32.mrf.mxu0  ;;  %3529 = vrcp.f32 %v750_v24  ;;  %v725_v11 = vsel %vm722_vm1, %v724_v23, %v720_v13  ;;  %v5342_v48 = vpop.eup %3525  ;;  %v762_v50 = vand.u32 2147483648, %v750_v24  ;;  %v760_v13 = vand.u32 2147483647, %v750_v24 }
 0x178   :  { %v734_v0 = vmul.f32 %v3520_v37, %v733_v51  ;;  %v851_v21 = vadd.f32 %v788_v10, %v167_v40  ;;  %v3528_v59 = vpop.eup %3527  ;;  %v879_v52 = vmul.f32 %v5342_v48, %v5331_v47  ;;  %vm756_vm5 = vweird.f32 %v750_v24 }
 0x179   :  { %v767_v32 = vmul.f32 %v3528_v59, %v725_v11  ;;  %vm761_vm7 = vcmp.eq.f32.partialorder %v760_v13, 8.507059e+37  ;;  %vm884_vm8 = vweird.f32 %v5342_v48  ;;  %vm903_vm1 = vweird.f32 %v5344_v36 }
 0x17a   :  { %v735_v8 = vadd.f32 %v3520_v37, %v734_v0  ;;  %v3443_v33 = vmul.f32 -1.442695, %v851_v21  ;;  %v880_v10 = vsub.f32 1.0, %v879_v52  ;;  %v127_v21 = vmul.f32 %v5031_v43, %v5312_v25  ;;  %vm5375_vm10 = vmor %vm883_vm9, %vm884_vm8 }
 0x17c   :  { %v739_v54 = vsel %vm738_vm2, %v3520_v37, %v735_v8  ;;  %3531 = vpow2.f32 %v3443_v33  ;;  %v763_v8 = vor.u32 1.1754944e-38, %v762_v50  ;;  %v881_v61 = vmul.f32 %v5342_v48, %v880_v10 }
 0x17d   :  { %v744_v9 = vsel %vm741_vm3, %v743_v39, %v739_v54  ;;  %v3530_v40 = vpop.eup %3529  ;;  %v169_v59 = vadd.f32 %v5057_v63, %v127_v21  ;;  %v887_v10 = vand.u32 2147483647, %v5331_v47  ;;  %v5380_v21 = vld [vmem:[#allocation3 + $0x1c8] sm:$0xff] }
 0x17e   :  { %v766_v53 = vmul.f32 0.0, %v744_v9  ;;  %v752_v44 = vmul.f32 %v3530_v40, %v750_v24  ;;  %vm757_vm4 = vweird.f32 %v3530_v40  ;;  %v828_v39 = vpop.f32.mrf.mxu2  ;;  %v882_v24 = vadd.f32 %v5342_v48, %v881_v61 }
 0x17f   :  { %vm758_vm6 = vmor %vm756_vm5, %vm757_vm4  ;;  %v853_v52 = vadd.f32 %v828_v39, %v169_v59  ;;  %v5393_v59 = vld [vmem:[#allocation3 + $0x1b8] sm:$0xff]  ;;  %vm888_vm13 = vcmp.eq.f32.partialorder %v887_v10, 8.507059e+37  ;;  %v5404_v10 = vld [vmem:[#allocation3 + $0x168] sm:$0xff] }
 0x180   :  { %v5348_v51 = vadd.f32 %v767_v32, %v766_v53  ;;  %v753_v6 = vsub.f32 1.0, %v752_v44  ;;  %v889_v44 = vand.u32 2147483648, %v5331_v47  ;;  %v886_v47 = vsel %vm5375_vm10, %v5342_v48, %v882_v24  ;;  %v5400_v48 = vld [vmem:[#allocation3 + $0x198] sm:$0xff] }
 0x182   :  { %v3532_v2 = vpop.eup %3531  ;;  %3533 = vtanh.f32 %v5348_v51  ;;  %v754_v0 = vmul.f32 %v3530_v40, %v753_v6  ;;  %v5370_v6 = vld [vmem:[#allocation3 + $0x1f8] sm:$0xff]  ;;  %v890_v61 = vor.u32 1.1754944e-38, %v889_v44 }
 0x183   :  { %3535 = vrcp.f32 %v5344_v36  ;;  %v5352_v37 = vadd.f32 1.0, %v3532_v2  ;;  %v5367_v2 = vld [vmem:[#allocation3 + $0x1e8] sm:$0xff] }
 0x184   :  { %v755_v23 = vadd.f32 %v3530_v40, %v754_v0  ;;  %v5407_v0 = vld [vmem:[#allocation3 + $0x178] sm:$0xff] }
 0x185   :  { %3537 = vrcp.f32 %v5352_v37  ;;  %v870_v13 = vand.u32 2147483648, %v5352_v37  ;;  %vm864_vm12 = vweird.f32 %v5352_v37 }
 0x186   :  { %v759_v11 = vsel %vm758_vm6, %v3530_v40, %v755_v23  ;;  %3539 = vtanh.f32 %v853_v52  ;;  %v5383_v23 = vld [vmem:[#allocation3 + $0x1d8] sm:$0xff] }
 0x187   :  { %v764_v9 = vsel %vm761_vm7, %v763_v8, %v759_v11  ;;  %v5390_v11 = vld [vmem:[#allocation3 + $0x1a8] sm:$0xff]  ;;  %v871_v52 = vor.u32 1.1754944e-38, %v870_v13 }
 0x188   :  { %v3534_v33 = vpop.eup %3533  ;;  %v65_v13 = vld [vmem:[%s8149_s0 + $0x10] sm:$0xff] }
 0x189   :  { %v5358_v54 = vpop.eup %3535  ;;  %v770_v53 = vmul.f32 %v3534_v33, %v764_v9  ;;  %v868_v33 = vand.u32 2147483647, %v5352_v37  ;;  %84 = vperm.xlu1 %3492, %v65_v13   ;;  %v5447_v13 = vld [vmem:[#allocation3 + $0xc8] sm:$0xff] }
 0x18a   :  { %v899_v40 = vmul.f32 %v5358_v54, %v5344_v36  ;;  %vm904_vm0 = vweird.f32 %v5358_v54 }
 0x18b   :  { %v3538_v32 = vpop.eup %3537  ;;  %954 = vmatmul.f32.vlgmr.msra.gmra.mxu1 %v770_v53  ;;  %994 = vmatmul.f32.vlgmr.msra.gmra.mxu3 %v770_v53  ;;  %vm869_vm15 = vcmp.eq.f32.partialorder %v868_v33, 8.507059e+37  ;;  %v5417_v33 = vld [vmem:[#allocation3 + $0x158] sm:$0xff]  ;;  %vm905_vm2 = vmor %vm903_vm1, %vm904_vm0 }
 0x18c   :  { %v860_v25 = vmul.f32 %v3538_v32, %v5352_v37  ;;  %1165 = vmatpush.msra.mxu1 %v5367_v2  ;;  %1205 = vmatpush.msra.mxu3 %v5370_v6  ;;  %vm865_vm11 = vweird.f32 %v3538_v32  ;;  %v900_v39 = vsub.f32 1.0, %v899_v40  ;;  %v3540_v44 = vpop.eup %3539 }
 0x18d   :  { %vm866_vm14 = vmor %vm864_vm12, %vm865_vm11 }
 0x18e   :  { %v861_v50 = vsub.f32 1.0, %v860_v25  ;;  %1166 = vmatpush.msra.mxu1 %v5380_v21  ;;  %1206 = vmatpush.msra.mxu3 %v5383_v23  ;;  %v891_v25 = vsel %vm888_vm13, %v890_v61, %v886_v47  ;;  %v901_v40 = vmul.f32 %v5358_v54, %v900_v39  ;;  %v5424_v39 = vld [vmem:[#allocation3 + $0x128] sm:$0xff] }
 0x190   :  { %v862_v8 = vmul.f32 %v3538_v32, %v861_v50  ;;  %1167 = vmatpush.msra.mxu1 %v5390_v11  ;;  %1207 = vmatpush.msra.mxu3 %v5393_v59  ;;  %v5397_v50 = vld [vmem:[#allocation3 + $0x188] sm:$0xff]  ;;  %v902_v61 = vadd.f32 %v5358_v54, %v901_v40 }
 0x191   :  { %v5441_v40 = vld [vmem:[#allocation3 + $0xe8] sm:$0xff] }
 0x192   :  { %v863_v9 = vadd.f32 %v3538_v32, %v862_v8  ;;  %1168 = vmatpush.msra.mxu1 %v5397_v50  ;;  %1208 = vmatpush.msra.mxu3 %v5400_v48  ;;  %8908 = vst [vmem:[#allocation23_spill] sm:$0xff] %v5441_v40 }
 0x193   :  { %1034 = vmatmul.f32.vlgmr.msrb.gmra.mxu1 %v770_v53  ;;  %1074 = vmatmul.f32.vlgmr.msrb.gmra.mxu3 %v770_v53  ;;  %v5414_v53 = vld [vmem:[#allocation3 + $0x148] sm:$0xff] }
 0x194   :  { %v867_v24 = vsel %vm866_vm14, %v3538_v32, %v863_v9  ;;  %1169 = vmatpush.msra.mxu1 %v5404_v10  ;;  %1209 = vmatpush.msra.mxu3 %v5407_v0  ;;  %v913_v32 = vmul.f32 %v891_v25, %v5101_v60  ;;  %v5427_v60 = vld [vmem:[#allocation3 + $0x138] sm:$0xff]  ;;  %v909_v9 = vand.u32 2147483648, %v5344_v36  ;;  %v5434_v25 = vld [vmem:[#allocation3 + $0x108] sm:$0xff] }
 0x195   :  { %v872_v37 = vsel %vm869_vm15, %v871_v52, %v867_v24  ;;  %v907_v52 = vand.u32 2147483647, %v5344_v36  ;;  %v5437_v24 = vld [vmem:[#allocation3 + $0x118] sm:$0xff] }
 0x196   :  { %v914_v8 = vmul.f32 %v3540_v44, %v872_v37  ;;  %1170 = vmatpush.msra.mxu1 %v5414_v53  ;;  %1210 = vmatpush.msra.mxu3 %v5417_v33  ;;  %8907 = vst [vmem:[#allocation22_spill] sm:$0xff] %v5437_v24  ;;  %v906_v44 = vsel %vm905_vm2, %v5358_v54, %v902_v61  ;;  %v5444_v37 = vld [vmem:[#allocation3 + $0xf8] sm:$0xff]  ;;  %v910_v36 = vor.u32 1.1754944e-38, %v909_v9  ;;  %v5461_v9 = vld [vmem:[#allocation3 + $0x88] sm:$0xff] }
 0x197   :  { %vm908_vm3 = vcmp.eq.f32.partialorder %v907_v52, 8.507059e+37  ;;  %v5464_v52 = vld [vmem:[#allocation3 + $0x98] sm:$0xff] }
 0x198   :  { %v5420_v47 = vadd.f32 %v914_v8, %v913_v32  ;;  %1171 = vmatpush.msra.mxu1 %v5424_v39  ;;  %1211 = vmatpush.msra.mxu3 %v5427_v60  ;;  %v5450_v32 = vld [vmem:[#allocation3 + $0xd8] sm:$0xff]  ;;  %v911_v54 = vsel %vm908_vm3, %v910_v36, %v906_v44  ;;  %v5471_v44 = vld [vmem:[#allocation3 + $0x68] sm:$0xff] }
 0x199   :  { %v5474_v36 = vld [vmem:[#allocation3 + $0x78] sm:$0xff] }
 0x19a   :  { %3541 = vtanh.f32 %v5420_v47  ;;  %1172 = vmatpush.msra.mxu1 %v5434_v25  ;;  %1212 = vmatpush.msra.mxu3 %v5437_v24  ;;  %v5455_v24 = vld [vmem:[#allocation3 + $0xa8] sm:$0xff] }
 0x19c   :  { %1173 = vmatpush.msra.mxu1 %v5441_v40  ;;  %1213 = vmatpush.msra.mxu3 %v5444_v37  ;;  %v5458_v40 = vld [vmem:[#allocation3 + $0xb8] sm:$0xff] }
 0x19e   :  { %1174 = vmatpush.msra.mxu1 %v5447_v13  ;;  %1214 = vmatpush.msra.mxu3 %v5450_v32 }
 0x1a0   :  { %v3542_v8 = vpop.eup %3541  ;;  %1175 = vmatpush.msra.mxu1 %v5455_v24  ;;  %1215 = vmatpush.msra.mxu3 %v5458_v40 }
 0x1a1   :  { %v5453_v61 = vmul.f32 %v3542_v8, %v911_v54  ;;  %v5479_v8 = vld [vmem:[#allocation3 + $0x48] sm:$0xff]  ;;  %v5482_v54 = vld [vmem:[#allocation3 + $0x58] sm:$0xff] }
 0x1a2   :  { %1176 = vmatpush.msra.mxu1 %v5461_v9  ;;  %1216 = vmatpush.msra.mxu3 %v5464_v52 }
 0x1a3   :  { %934 = vmatmul.f32.vlgmr.msra.gmra.mxu0 %v5453_v61  ;;  %974 = vmatmul.f32.vlgmr.msra.gmra.mxu2 %v5453_v61 }
 0x1a4   :  { %1145 = vmatpush.msra.mxu0 %v5122_v4  ;;  %1185 = vmatpush.msra.mxu2 %v5126_v12  ;;  %v5487_v4 = vld [vmem:[#allocation3 + $0x28] sm:$0xff]  ;;  %v5490_v12 = vld [vmem:[#allocation3 + $0x38] sm:$0xff] }
 0x1a5   :  { %1177 = vmatpush.msra.mxu1 %v5471_v44  ;;  %1217 = vmatpush.msra.mxu3 %v5474_v36 }
 0x1a6   :  { %1146 = vmatpush.msra.mxu0 %v5130_v5  ;;  %1186 = vmatpush.msra.mxu2 %v5134_v14  ;;  %v5495_v5 = vld [vmem:[#allocation3 + $0x8] sm:$0xff]  ;;  %v5498_v14 = vld [vmem:[#allocation3 + $0x18] sm:$0xff] }
 0x1a7   :  { %1178 = vmatpush.msra.mxu1 %v5479_v8  ;;  %1218 = vmatpush.msra.mxu3 %v5482_v54 }
 0x1a8   :  { %1147 = vmatpush.msra.mxu0 %v5138_v18  ;;  %1187 = vmatpush.msra.mxu2 %v5142_v22  ;;  %v66_v18 = vld [vmem:[%s8149_s0 + $0x18] sm:$0xff]  ;;  %v5512_v22 = vld [vmem:[#allocation5 + $0x3e0] sm:$0xff] }
 0x1a9   :  { %1179 = vmatpush.msra.mxu1 %v5487_v4  ;;  %1219 = vmatpush.msra.mxu3 %v5490_v12 }
 0x1aa   :  { %1148 = vmatpush.msra.mxu0 %v5146_v57  ;;  %1188 = vmatpush.msra.mxu2 %v5150_v58  ;;  %v5516_v57 = vld [vmem:[#allocation5 + $0x3e8] sm:$0xff]  ;;  %v5520_v58 = vld [vmem:[#allocation5 + $0x3c0] sm:$0xff] }
 0x1ab   :  { %1180 = vmatpush.msra.mxu1 %v5495_v5  ;;  %1220 = vmatpush.msra.mxu3 %v5498_v14  ;;  %8909 = vst [vmem:[#allocation24_spill] sm:$0xff] %v5520_v58 }
 0x1ac   :  { %1014 = vmatmul.f32.vlgmr.msrb.gmra.mxu0 %v5453_v61  ;;  %1054 = vmatmul.f32.vlgmr.msrb.gmra.mxu2 %v5453_v61 }
 0x1ad   :  { %1149 = vmatpush.msra.mxu0 %v5155_v26  ;;  %1181 = vmatmul.f32.vlgmr.msra.gmra.mxu1 %v5453_v61  ;;  %v5524_v26 = vld [vmem:[#allocation5 + $0x3c8] sm:$0xff] }
 0x1ae   :  { %1189 = vmatpush.msra.mxu2 %v5158_v19  ;;  %1221 = vmatmul.f32.vlgmr.msra.gmra.mxu3 %v5453_v61  ;;  %8910 = vst [vmem:[#allocation25_spill] sm:$0xff] %v5524_v26  ;;  %v70_v19 = vld [vmem:[%s8149_s0 + $0x38] sm:$0xff] }
 0x1af   :  { %1150 = vmatpush.msra.mxu0 %v5162_v28  ;;  %89 = vperm.xlu1 %3492, %v66_v18   ;;  %v5531_v28 = vld [vmem:[#allocation5 + $0x3a0] sm:$0xff] }
 0x1b0   :  { %1190 = vmatpush.msra.mxu2 %v5166_v45  ;;  %1312 = vmatpush.msrb.mxu1 %v5512_v22  ;;  %8911 = vst [vmem:[#allocation26_spill] sm:$0xff] %v5531_v28  ;;  %v5535_v45 = vld [vmem:[#allocation5 + $0x3a8] sm:$0xff]  ;;  %v5577_v18 = vld [vmem:[#allocation3 + $0x40] sm:$0xff] }
 0x1b1   :  { %1151 = vmatpush.msra.mxu0 %v5170_v30  ;;  %1352 = vmatpush.msrb.mxu3 %v5516_v57  ;;  %8912 = vst [vmem:[#allocation27_spill] sm:$0xff] %v5535_v45  ;;  %v5539_v30 = vld [vmem:[#allocation5 + $0x380] sm:$0xff] }
 0x1b2   :  { %1191 = vmatpush.msra.mxu2 %v5174_v34  ;;  %1313 = vmatpush.msrb.mxu1 %v5520_v58  ;;  %8913 = vst [vmem:[#allocation28_spill] sm:$0xff] %v5539_v30  ;;  %v5544_v34 = vld [vmem:[#allocation5 + $0x388] sm:$0xff] }
 0x1b3   :  { %1152 = vmatpush.msra.mxu0 %v5178_v38  ;;  %1353 = vmatpush.msrb.mxu3 %v5524_v26  ;;  %8914 = vst [vmem:[#allocation31_spill] sm:$0xff] %v5544_v34  ;;  %v5548_v38 = vld [vmem:[#allocation5 + $0x360] sm:$0xff] }
 0x1b4   :  { %1192 = vmatpush.msra.mxu2 %v5182_v42  ;;  %1314 = vmatpush.msrb.mxu1 %v5531_v28  ;;  %8915 = vst [vmem:[#allocation32_spill] sm:$0xff] %v5548_v38  ;;  %v5552_v42 = vld [vmem:[#allocation5 + $0x368] sm:$0xff] }
 0x1b5   :  { %1153 = vmatpush.msra.mxu0 %v5186_v17  ;;  %1354 = vmatpush.msrb.mxu3 %v5535_v45  ;;  %8916 = vst [vmem:[#allocation35_spill] sm:$0xff] %v5552_v42  ;;  %v5556_v17 = vld [vmem:[#allocation5 + $0x340] sm:$0xff] }
 0x1b6   :  { %1193 = vmatpush.msra.mxu2 %v5190_v46  ;;  %1315 = vmatpush.msrb.mxu1 %v5539_v30  ;;  %8917 = vst [vmem:[#allocation36_spill] sm:$0xff] %v5556_v17  ;;  %v5559_v46 = vld [vmem:[#allocation3 + $0x90] sm:$0xff] }
 0x1b7   :  { %1154 = vmatpush.msra.mxu0 %v5194_v7  ;;  %109 = vperm.xlu1 %3492, %v70_v19   ;;  %8918 = vst [vmem:[#allocation39_spill] sm:$0xff] %v5559_v46  ;;  %v5562_v7 = vld [vmem:[#allocation5 + $0x348] sm:$0xff]  ;;  %v5580_v19 = vld [vmem:[#allocation5 + $0x300] sm:$0xff] }
 0x1b8   :  { %1194 = vmatpush.msra.mxu2 %v5198_v49  ;;  %1355 = vmatpush.msrb.mxu3 %v5544_v34  ;;  %8919 = vst [vmem:[#allocation40_spill] sm:$0xff] %v5562_v7  ;;  %v5565_v49 = vld [vmem:[#allocation3 + $0x60] sm:$0xff] }
 0x1b9   :  { %1155 = vmatpush.msra.mxu0 %v5202_v16  ;;  %1316 = vmatpush.msrb.mxu1 %v5548_v38  ;;  %8920 = vst [vmem:[#allocation43_spill] sm:$0xff] %v5565_v49  ;;  %v5568_v16 = vld [vmem:[#allocation5 + $0x320] sm:$0xff] }
 0x1ba   :  { %1195 = vmatpush.msra.mxu2 %v5206_v56  ;;  %1356 = vmatpush.msrb.mxu3 %v5552_v42  ;;  %8921 = vst [vmem:[#allocation44_spill] sm:$0xff] %v5568_v16  ;;  %v5571_v56 = vld [vmem:[#allocation3 + $0x70] sm:$0xff] }
 0x1bb   :  { %1156 = vmatpush.msra.mxu0 %v5210_v62  ;;  %1317 = vmatpush.msrb.mxu1 %v5556_v17  ;;  %8922 = vst [vmem:[#allocation47_spill] sm:$0xff] %v5571_v56  ;;  %v5574_v62 = vld [vmem:[#allocation5 + $0x328] sm:$0xff] }
 0x1bc   :  { %1196 = vmatpush.msra.mxu2 %v5559_v46  ;;  %1357 = vmatpush.msrb.mxu3 %v5562_v7  ;;  %8923 = vst [vmem:[#allocation48_spill] sm:$0xff] %v5574_v62  ;;  %v5586_v46 = vld [vmem:[#allocation5 + $0x308] sm:$0xff] }
 0x1bd   :  { %1157 = vmatpush.msra.mxu0 %v5565_v49  ;;  %1318 = vmatpush.msrb.mxu1 %v5568_v16  ;;  %8924 = vst [vmem:[#allocation51_spill] sm:$0xff] %v5577_v18  ;;  %v5583_v49 = vld [vmem:[#allocation3 + $0x50] sm:$0xff] }
 0x1be   :  { %1197 = vmatpush.msra.mxu2 %v5571_v56  ;;  %1358 = vmatpush.msrb.mxu3 %v5574_v62  ;;  %8925 = vst [vmem:[#allocation54_spill] sm:$0xff] %v5580_v19  ;;  %v5589_v56 = vld [vmem:[#allocation3 + $0x20] sm:$0xff] }
 0x1bf   :  { %1158 = vmatpush.msra.mxu0 %v5577_v18  ;;  %1319 = vmatpush.msrb.mxu1 %v5580_v19  ;;  %8926 = vst [vmem:[#allocation55_spill] sm:$0xff] %v5583_v49  ;;  %v5592_v62 = vld [vmem:[#allocation5 + $0x2e0] sm:$0xff]  ;;  %v5595_v18 = vld [vmem:[#allocation3 + $0x30] sm:$0xff]  ;;  %v5598_v19 = vld [vmem:[#allocation5 + $0x2e8] sm:$0xff] }
 0x1c0   :  { %1198 = vmatpush.msra.mxu2 %v5583_v49  ;;  %8927 = vst [vmem:[#allocation9_spill] sm:$0xff] %v5586_v46  ;;  %1359 = vmatpush.msrb.mxu3 %v5586_v46  ;;  %v5601_v49 = vld [vmem:[#allocation3] sm:$0xff] }
 0x1c1   :  { %8928 = vst [vmem:[#allocation58_spill] sm:$0xff] %v5589_v56  ;;  %1159 = vmatpush.msra.mxu0 %v5589_v56  ;;  %1320 = vmatpush.msrb.mxu1 %v5592_v62  ;;  %v5604_v46 = vld [vmem:[#allocation5 + $0x2c0] sm:$0xff]  ;;  %v5607_v56 = vld [vmem:[#allocation3 + $0x10] sm:$0xff] }
 0x1c2   :  { %8929 = vst [vmem:[#allocation10_spill] sm:$0xff] %v5592_v62  ;;  %1199 = vmatpush.msra.mxu2 %v5595_v18  ;;  %1360 = vmatpush.msrb.mxu3 %v5598_v19 }
 0x1c3   :  { %8930 = vst [vmem:[#allocation59_spill] sm:$0xff] %v5595_v18  ;;  %1160 = vmatpush.msra.mxu0 %v5601_v49  ;;  %1321 = vmatpush.msrb.mxu1 %v5604_v46  ;;  %v5612_v18 = vld [vmem:[#allocation5 + $0x2c8] sm:$0xff] }
 0x1c4   :  { %8931 = vst [vmem:[#allocation11_spill] sm:$0xff] %v5598_v19  ;;  %1200 = vmatpush.msra.mxu2 %v5607_v56  ;;  %1161 = vmatmul.f32.vlgmr.msra.gmra.mxu0 %v5453_v61  ;;  %v5615_v19 = vld [vmem:[#allocation5 + $0x2a0] sm:$0xff] }
 0x1c5   :  { %8932 = vst [vmem:[#allocation62_spill] sm:$0xff] %v5601_v49  ;;  %1201 = vmatmul.f32.vlgmr.msra.gmra.mxu2 %v5453_v61  ;;  %1361 = vmatpush.msrb.mxu3 %v5612_v18  ;;  %v5618_v49 = vld [vmem:[#allocation5 + $0x1e0] sm:$0xff] }
 0x1c6   :  { %8933 = vst [vmem:[#allocation12_spill] sm:$0xff] %v5604_v46  ;;  %1322 = vmatpush.msrb.mxu1 %v5615_v19  ;;  %1292 = vmatpush.msrb.mxu0 %v5618_v49  ;;  %v5621_v46 = vld [vmem:[#allocation5 + $0x2a8] sm:$0xff]  ;;  %v5627_v61 = vld [vmem:[#allocation5 + $0x280] sm:$0xff] }
 0x1c7   :  { %8934 = vst [vmem:[#allocation63_spill] sm:$0xff] %v5607_v56  ;;  %1362 = vmatpush.msrb.mxu3 %v5621_v46  ;;  %v5624_v56 = vld [vmem:[#allocation5 + $0x1e8] sm:$0xff] }
 0x1c8   :  { %8935 = vst [vmem:[#allocation13_spill] sm:$0xff] %v5612_v18  ;;  %1332 = vmatpush.msrb.mxu2 %v5624_v56  ;;  %1323 = vmatpush.msrb.mxu1 %v5627_v61  ;;  %v5630_v18 = vld [vmem:[#allocation5 + $0x1c0] sm:$0xff] }
 0x1c9   :  { %8936 = vst [vmem:[#allocation66_spill] sm:$0xff] %v5615_v19  ;;  %1293 = vmatpush.msrb.mxu0 %v5630_v18  ;;  %v5633_v19 = vld [vmem:[#allocation5 + $0x288] sm:$0xff] }
 0x1ca   :  { %8937 = vst [vmem:[#allocation14_spill] sm:$0xff] %v5618_v49  ;;  %1363 = vmatpush.msrb.mxu3 %v5633_v19  ;;  %v5636_v49 = vld [vmem:[#allocation5 + $0x1c8] sm:$0xff] }
 0x1cb   :  { %8938 = vst [vmem:[#allocation67_spill] sm:$0xff] %v5621_v46  ;;  %1333 = vmatpush.msrb.mxu2 %v5636_v49  ;;  %v5639_v46 = vld [vmem:[#allocation5 + $0x260] sm:$0xff] }
 0x1cc   :  { %8939 = vst [vmem:[#allocation15_spill] sm:$0xff] %v5624_v56  ;;  %1324 = vmatpush.msrb.mxu1 %v5639_v46  ;;  %v5642_v56 = vld [vmem:[#allocation5 + $0x1a0] sm:$0xff] }
 0x1cd   :  { %8940 = vst [vmem:[#allocation70_spill] sm:$0xff] %v5627_v61  ;;  %1294 = vmatpush.msrb.mxu0 %v5642_v56  ;;  %v5645_v61 = vld [vmem:[#allocation5 + $0x268] sm:$0xff] }
 0x1ce   :  { %8941 = vst [vmem:[#allocation16_spill] sm:$0xff] %v5630_v18  ;;  %1364 = vmatpush.msrb.mxu3 %v5645_v61  ;;  %v5648_v18 = vld [vmem:[#allocation5 + $0x1a8] sm:$0xff] }
 0x1cf   :  { %8942 = vst [vmem:[#allocation71_spill] sm:$0xff] %v5633_v19  ;;  %1334 = vmatpush.msrb.mxu2 %v5648_v18  ;;  %v5651_v19 = vld [vmem:[#allocation5 + $0x240] sm:$0xff] }
 0x1d0   :  { %8943 = vst [vmem:[#allocation17_spill] sm:$0xff] %v5636_v49  ;;  %1325 = vmatpush.msrb.mxu1 %v5651_v19  ;;  %v5654_v49 = vld [vmem:[#allocation5 + $0x180] sm:$0xff] }
 0x1d1   :  { %8944 = vst [vmem:[#allocation29_spill] sm:$0xff] %v5639_v46  ;;  %1295 = vmatpush.msrb.mxu0 %v5654_v49  ;;  %v5657_v46 = vld [vmem:[#allocation5 + $0x248] sm:$0xff] }
 0x1d2   :  { %8945 = vst [vmem:[#allocation30_spill] sm:$0xff] %v5642_v56  ;;  %1365 = vmatpush.msrb.mxu3 %v5657_v46  ;;  %v5660_v56 = vld [vmem:[#allocation5 + $0x188] sm:$0xff] }
 0x1d3   :  { %8946 = vst [vmem:[#allocation74_spill] sm:$0xff] %v5645_v61  ;;  %1335 = vmatpush.msrb.mxu2 %v5660_v56  ;;  %v5663_v61 = vld [vmem:[#allocation5 + $0x220] sm:$0xff] }
 0x1d4   :  { %8947 = vst [vmem:[#allocation33_spill] sm:$0xff] %v5648_v18  ;;  %1326 = vmatpush.msrb.mxu1 %v5663_v61  ;;  %v5666_v18 = vld [vmem:[#allocation5 + $0x160] sm:$0xff] }
 0x1d5   :  { %8948 = vst [vmem:[#allocation75_spill] sm:$0xff] %v5651_v19  ;;  %1296 = vmatpush.msrb.mxu0 %v5666_v18  ;;  %v5669_v19 = vld [vmem:[#allocation5 + $0x228] sm:$0xff] }
 0x1d6   :  { %8949 = vst [vmem:[#allocation34_spill] sm:$0xff] %v5654_v49  ;;  %1366 = vmatpush.msrb.mxu3 %v5669_v19  ;;  %v5672_v49 = vld [vmem:[#allocation5 + $0x168] sm:$0xff] }
 0x1d7   :  { %8950 = vst [vmem:[#allocation78_spill] sm:$0xff] %v5657_v46  ;;  %1336 = vmatpush.msrb.mxu2 %v5672_v49  ;;  %v5675_v46 = vld [vmem:[#allocation5 + $0x200] sm:$0xff] }
 0x1d8   :  { %8951 = vst [vmem:[#allocation37_spill] sm:$0xff] %v5660_v56  ;;  %1327 = vmatpush.msrb.mxu1 %v5675_v46  ;;  %v5678_v56 = vld [vmem:[#allocation5 + $0x140] sm:$0xff] }
 0x1d9   :  { %8952 = vst [vmem:[#allocation79_spill] sm:$0xff] %v5663_v61  ;;  %1297 = vmatpush.msrb.mxu0 %v5678_v56  ;;  %v5681_v61 = vld [vmem:[#allocation5 + $0x208] sm:$0xff] }
 0x1da   :  { %8953 = vst [vmem:[#allocation38_spill] sm:$0xff] %v5666_v18  ;;  %1367 = vmatpush.msrb.mxu3 %v5681_v61  ;;  %v5684_v18 = vld [vmem:[#allocation5 + $0x3f0] sm:$0xff] }
 0x1db   :  { %8954 = vst [vmem:[#allocation82_spill] sm:$0xff] %v5669_v19  ;;  %1392 = vmatpush.msra.mxu1 %v5684_v18  ;;  %v5687_v19 = vld [vmem:[#allocation5 + $0x3f8] sm:$0xff] }
 0x1dc   :  { %8955 = vst [vmem:[#allocation41_spill] sm:$0xff] %v5672_v49  ;;  %1432 = vmatpush.msra.mxu3 %v5687_v19  ;;  %v5690_v49 = vld [vmem:[#allocation5 + $0x148] sm:$0xff] }
 0x1dd   :  { %8956 = vst [vmem:[#allocation83_spill] sm:$0xff] %v5675_v46  ;;  %1337 = vmatpush.msrb.mxu2 %v5690_v49  ;;  %v5693_v46 = vld [vmem:[#allocation5 + $0x3d0] sm:$0xff] }
 0x1de   :  { %8957 = vst [vmem:[#allocation42_spill] sm:$0xff] %v5678_v56  ;;  %1393 = vmatpush.msra.mxu1 %v5693_v46  ;;  %v5696_v56 = vld [vmem:[#allocation5 + $0x120] sm:$0xff] }
 0x1df   :  { %8958 = vst [vmem:[#allocation86_spill] sm:$0xff] %v5681_v61  ;;  %1298 = vmatpush.msrb.mxu0 %v5696_v56  ;;  %v5699_v61 = vld [vmem:[#allocation5 + $0x3d8] sm:$0xff] }
 0x1e0   :  { %8959 = vst [vmem:[#allocation45_spill] sm:$0xff] %v5684_v18  ;;  %1433 = vmatpush.msra.mxu3 %v5699_v61  ;;  %v5702_v18 = vld [vmem:[#allocation5 + $0x128] sm:$0xff] }
 0x1e1   :  { %8960 = vst [vmem:[#allocation46_spill] sm:$0xff] %v5687_v19  ;;  %1338 = vmatpush.msrb.mxu2 %v5702_v18  ;;  %v5705_v19 = vld [vmem:[#allocation5 + $0x3b0] sm:$0xff] }
 0x1e2   :  { %8961 = vst [vmem:[#allocation49_spill] sm:$0xff] %v5690_v49  ;;  %1394 = vmatpush.msra.mxu1 %v5705_v19  ;;  %v5708_v49 = vld [vmem:[#allocation5 + $0x100] sm:$0xff] }
 0x1e3   :  { %8962 = vst [vmem:[#allocation89_spill] sm:$0xff] %v5693_v46  ;;  %1299 = vmatpush.msrb.mxu0 %v5708_v49  ;;  %v5711_v46 = vld [vmem:[#allocation5 + $0x3b8] sm:$0xff] }
 0x1e4   :  { %8963 = vst [vmem:[#allocation50_spill] sm:$0xff] %v5696_v56  ;;  %1434 = vmatpush.msra.mxu3 %v5711_v46  ;;  %v5714_v56 = vld [vmem:[#allocation5 + $0x108] sm:$0xff] }
 0x1e5   :  { %8964 = vst [vmem:[#allocation52_spill] sm:$0xff] %v5699_v61  ;;  %1339 = vmatpush.msrb.mxu2 %v5714_v56  ;;  %v5717_v61 = vld [vmem:[#allocation5 + $0x390] sm:$0xff] }
 0x1e6   :  { %8965 = vst [vmem:[#allocation53_spill] sm:$0xff] %v5702_v18  ;;  %1395 = vmatpush.msra.mxu1 %v5717_v61  ;;  %v5720_v18 = vld [vmem:[#allocation5 + $0xe0] sm:$0xff] }
 0x1e7   :  { %8966 = vst [vmem:[#allocation56_spill] sm:$0xff] %v5705_v19  ;;  %1300 = vmatpush.msrb.mxu0 %v5720_v18  ;;  %v5723_v19 = vld [vmem:[#allocation5 + $0x398] sm:$0xff] }
 0x1e8   :  { %8967 = vst [vmem:[#allocation57_spill] sm:$0xff] %v5708_v49  ;;  %1435 = vmatpush.msra.mxu3 %v5723_v19  ;;  %v5726_v49 = vld [vmem:[#allocation5 + $0xe8] sm:$0xff] }
 0x1e9   :  { %8968 = vst [vmem:[#allocation60_spill] sm:$0xff] %v5711_v46  ;;  %1340 = vmatpush.msrb.mxu2 %v5726_v49  ;;  %v5729_v46 = vld [vmem:[#allocation5 + $0x370] sm:$0xff] }
 0x1ea   :  { %8969 = vst [vmem:[#allocation61_spill] sm:$0xff] %v5714_v56  ;;  %1396 = vmatpush.msra.mxu1 %v5729_v46  ;;  %v5732_v56 = vld [vmem:[#allocation5 + $0xc0] sm:$0xff] }
 0x1eb   :  { %8970 = vst [vmem:[#allocation64_spill] sm:$0xff] %v5717_v61  ;;  %1301 = vmatpush.msrb.mxu0 %v5732_v56  ;;  %v5735_v61 = vld [vmem:[#allocation5 + $0x378] sm:$0xff] }
 0x1ec   :  { %8971 = vst [vmem:[#allocation65_spill] sm:$0xff] %v5720_v18  ;;  %1436 = vmatpush.msra.mxu3 %v5735_v61  ;;  %v5738_v18 = vld [vmem:[#allocation5 + $0xc8] sm:$0xff] }
 0x1ed   :  { %8972 = vst [vmem:[#allocation68_spill] sm:$0xff] %v5723_v19  ;;  %1341 = vmatpush.msrb.mxu2 %v5738_v18  ;;  %v5741_v19 = vld [vmem:[#allocation5 + $0x350] sm:$0xff] }
 0x1ee   :  { %8973 = vst [vmem:[#allocation69_spill] sm:$0xff] %v5726_v49  ;;  %1397 = vmatpush.msra.mxu1 %v5741_v19  ;;  %v5744_v49 = vld [vmem:[#allocation5 + $0xa0] sm:$0xff] }
 0x1ef   :  { %8974 = vst [vmem:[#allocation72_spill] sm:$0xff] %v5729_v46  ;;  %1302 = vmatpush.msrb.mxu0 %v5744_v49  ;;  %v5747_v46 = vld [vmem:[#allocation5 + $0x358] sm:$0xff] }
 0x1f0   :  { %8975 = vst [vmem:[#allocation73_spill] sm:$0xff] %v5732_v56  ;;  %1437 = vmatpush.msra.mxu3 %v5747_v46  ;;  %v5750_v56 = vld [vmem:[#allocation5 + $0xa8] sm:$0xff] }
 0x1f1   :  { %8976 = vst [vmem:[#allocation76_spill] sm:$0xff] %v5735_v61  ;;  %1342 = vmatpush.msrb.mxu2 %v5750_v56  ;;  %v5753_v61 = vld [vmem:[#allocation5 + $0x330] sm:$0xff] }
 0x1f2   :  { %8977 = vst [vmem:[#allocation77_spill] sm:$0xff] %v5738_v18  ;;  %1398 = vmatpush.msra.mxu1 %v5753_v61  ;;  %v5756_v18 = vld [vmem:[#allocation5 + $0x80] sm:$0xff] }
 0x1f3   :  { %8978 = vst [vmem:[#allocation80_spill] sm:$0xff] %v5741_v19  ;;  %1303 = vmatpush.msrb.mxu0 %v5756_v18  ;;  %v5759_v19 = vld [vmem:[#allocation5 + $0x338] sm:$0xff] }
 0x1f4   :  { %8979 = vst [vmem:[#allocation81_spill] sm:$0xff] %v5744_v49  ;;  %1438 = vmatpush.msra.mxu3 %v5759_v19  ;;  %v5762_v49 = vld [vmem:[#allocation5 + $0x88] sm:$0xff] }
 0x1f5   :  { %8980 = vst [vmem:[#allocation84_spill] sm:$0xff] %v5747_v46  ;;  %1343 = vmatpush.msrb.mxu2 %v5762_v49  ;;  %v5765_v46 = vld [vmem:[#allocation5 + $0x310] sm:$0xff] }
 0x1f6   :  { %8981 = vst [vmem:[#allocation85_spill] sm:$0xff] %v5750_v56  ;;  %1399 = vmatpush.msra.mxu1 %v5765_v46  ;;  %v5768_v56 = vld [vmem:[#allocation5 + $0x60] sm:$0xff] }
 0x1f7   :  { %8982 = vst [vmem:[#allocation87_spill] sm:$0xff] %v5753_v61  ;;  %1304 = vmatpush.msrb.mxu0 %v5768_v56  ;;  %v5771_v61 = vld [vmem:[#allocation5 + $0x318] sm:$0xff] }
 0x1f8   :  { %8983 = vst [vmem:[#allocation88_spill] sm:$0xff] %v5756_v18  ;;  %1439 = vmatpush.msra.mxu3 %v5771_v61  ;;  %v5774_v18 = vld [vmem:[#allocation5 + $0x68] sm:$0xff] }
 0x1f9   :  { %8984 = vst [vmem:[#allocation90_spill] sm:$0xff] %v5759_v19  ;;  %1344 = vmatpush.msrb.mxu2 %v5774_v18  ;;  %v5777_v19 = vld [vmem:[#allocation5 + $0x2f0] sm:$0xff] }
 0x1fa   :  { %8985 = vst [vmem:[#allocation91_spill] sm:$0xff] %v5762_v49  ;;  %1400 = vmatpush.msra.mxu1 %v5777_v19  ;;  %v5780_v49 = vld [vmem:[#allocation5 + $0x40] sm:$0xff] }
 0x1fb   :  { %8986 = vst [vmem:[#allocation92_spill] sm:$0xff] %v5765_v46  ;;  %1305 = vmatpush.msrb.mxu0 %v5780_v49  ;;  %v5783_v46 = vld [vmem:[#allocation5 + $0x2f8] sm:$0xff] }
 0x1fc   :  { %8987 = vst [vmem:[#allocation93_spill] sm:$0xff] %v5768_v56  ;;  %1440 = vmatpush.msra.mxu3 %v5783_v46  ;;  %v5786_v56 = vld [vmem:[#allocation5 + $0x48] sm:$0xff] }
 0x1fd   :  { %8988 = vst [vmem:[#allocation94_spill] sm:$0xff] %v5771_v61  ;;  %1345 = vmatpush.msrb.mxu2 %v5786_v56  ;;  %v5789_v61 = vld [vmem:[#allocation5 + $0x2d0] sm:$0xff] }
 0x1fe   :  { %8989 = vst [vmem:[#allocation95_spill] sm:$0xff] %v5774_v18  ;;  %1401 = vmatpush.msra.mxu1 %v5789_v61  ;;  %v5792_v18 = vld [vmem:[#allocation5 + $0x20] sm:$0xff] }
 0x1ff   :  { %8990 = vst [vmem:[#allocation96_spill] sm:$0xff] %v5777_v19  ;;  %1306 = vmatpush.msrb.mxu0 %v5792_v18  ;;  %v5795_v19 = vld [vmem:[#allocation5 + $0x2d8] sm:$0xff] }
 0x200   :  { %8991 = vst [vmem:[#allocation97_spill] sm:$0xff] %v5780_v49  ;;  %1441 = vmatpush.msra.mxu3 %v5795_v19  ;;  %v5798_v49 = vld [vmem:[#allocation5 + $0x28] sm:$0xff] }
 0x201   :  { %8992 = vst [vmem:[#allocation100_spill] sm:$0xff] %v5783_v46  ;;  %1346 = vmatpush.msrb.mxu2 %v5798_v49  ;;  %v5801_v46 = vld [vmem:[#allocation5 + $0x2b0] sm:$0xff] }
 0x202   :  { %8993 = vst [vmem:[#allocation103_spill] sm:$0xff] %v5786_v56  ;;  %1402 = vmatpush.msra.mxu1 %v5801_v46  ;;  %v5804_v56 = vld [vmem:[#allocation5] sm:$0xff] }
 0x203   :  { %8994 = vst [vmem:[#allocation104_spill] sm:$0xff] %v5789_v61  ;;  %1307 = vmatpush.msrb.mxu0 %v5804_v56  ;;  %v5807_v61 = vld [vmem:[#allocation5 + $0x2b8] sm:$0xff] }
 0x204   :  { %8995 = vst [vmem:[#allocation107_spill] sm:$0xff] %v5792_v18  ;;  %1442 = vmatpush.msra.mxu3 %v5807_v61  ;;  %v5810_v18 = vld [vmem:[#allocation5 + $0x8] sm:$0xff] }
 0x205   :  { %8996 = vst [vmem:[#allocation108_spill] sm:$0xff] %v5795_v19  ;;  %1347 = vmatpush.msrb.mxu2 %v5810_v18  ;;  %v5813_v19 = vld [vmem:[#allocation5 + $0x290] sm:$0xff] }
 0x206   :  { %8997 = vst [vmem:[#allocation109_spill] sm:$0xff] %v5798_v49  ;;  %1403 = vmatpush.msra.mxu1 %v5813_v19  ;;  %v5816_v49 = vld [vmem:[#allocation5 + $0x1f0] sm:$0xff] }
 0x207   :  { %8998 = vst [vmem:[#allocation110_spill] sm:$0xff] %v5801_v46  ;;  %1372 = vmatpush.msra.mxu0 %v5816_v49  ;;  %v5819_v46 = vld [vmem:[#allocation5 + $0x298] sm:$0xff] }
 0x208   :  { %8999 = vst [vmem:[#allocation111_spill] sm:$0xff] %v5804_v56  ;;  %1443 = vmatpush.msra.mxu3 %v5819_v46  ;;  %v5822_v56 = vld [vmem:[#allocation5 + $0x1f8] sm:$0xff] }
 0x209   :  { %9000 = vst [vmem:[#allocation112_spill] sm:$0xff] %v5807_v61  ;;  %1412 = vmatpush.msra.mxu2 %v5822_v56  ;;  %v5825_v61 = vld [vmem:[#allocation5 + $0x270] sm:$0xff] }
 0x20a   :  { %9001 = vst [vmem:[#allocation113_spill] sm:$0xff] %v5810_v18  ;;  %1404 = vmatpush.msra.mxu1 %v5825_v61  ;;  %v5828_v18 = vld [vmem:[#allocation5 + $0x1d0] sm:$0xff] }
 0x20b   :  { %9002 = vst [vmem:[#allocation114_spill] sm:$0xff] %v5813_v19  ;;  %1373 = vmatpush.msra.mxu0 %v5828_v18  ;;  %v5831_v19 = vld [vmem:[#allocation5 + $0x278] sm:$0xff] }
 0x20c   :  { %9003 = vst [vmem:[#allocation115_spill] sm:$0xff] %v5816_v49  ;;  %1444 = vmatpush.msra.mxu3 %v5831_v19  ;;  %v5834_v49 = vld [vmem:[#allocation5 + $0x1d8] sm:$0xff] }
 0x20d   :  { %9004 = vst [vmem:[#allocation116_spill] sm:$0xff] %v5819_v46  ;;  %1413 = vmatpush.msra.mxu2 %v5834_v49  ;;  %v5837_v46 = vld [vmem:[#allocation5 + $0x250] sm:$0xff] }
 0x20e   :  { %9005 = vst [vmem:[#allocation117_spill] sm:$0xff] %v5822_v56  ;;  %1405 = vmatpush.msra.mxu1 %v5837_v46  ;;  %v5840_v56 = vld [vmem:[#allocation5 + $0x1b0] sm:$0xff]  ;;  %v995_v7 = vpop.f32.mrf.mxu3 }
 0x20f   :  { %9006 = vst [vmem:[#allocation118_spill] sm:$0xff] %v5825_v61  ;;  %1374 = vmatpush.msra.mxu0 %v5840_v56  ;;  %v5843_v61 = vld [vmem:[#allocation5 + $0x258] sm:$0xff] }
 0x210   :  { %9007 = vst [vmem:[#allocation119_spill] sm:$0xff] %v5828_v18  ;;  %1445 = vmatpush.msra.mxu3 %v5843_v61  ;;  %v5846_v18 = vld [vmem:[#allocation5 + $0x1b8] sm:$0xff] }
 0x211   :  { %9008 = vst [vmem:[#allocation120_spill] sm:$0xff] %v5831_v19  ;;  %1414 = vmatpush.msra.mxu2 %v5846_v18  ;;  %v5849_v19 = vld [vmem:[#allocation5 + $0x230] sm:$0xff] }
 0x212   :  { %9009 = vst [vmem:[#allocation121_spill] sm:$0xff] %v5834_v49  ;;  %1406 = vmatpush.msra.mxu1 %v5849_v19  ;;  %v5852_v49 = vld [vmem:[#allocation5 + $0x190] sm:$0xff] }
 0x213   :  { %9010 = vst [vmem:[#allocation122_spill] sm:$0xff] %v5837_v46  ;;  %1375 = vmatpush.msra.mxu0 %v5852_v49  ;;  %v5855_v46 = vld [vmem:[#allocation5 + $0x238] sm:$0xff] }
 0x214   :  { %9011 = vst [vmem:[#allocation123_spill] sm:$0xff] %v5840_v56  ;;  %1446 = vmatpush.msra.mxu3 %v5855_v46  ;;  %v5858_v56 = vld [vmem:[#allocation5 + $0x198] sm:$0xff] }
 0x215   :  { %9012 = vst [vmem:[#allocation124_spill] sm:$0xff] %v5843_v61  ;;  %1415 = vmatpush.msra.mxu2 %v5858_v56  ;;  %v5861_v61 = vld [vmem:[#allocation5 + $0x210] sm:$0xff] }
 0x216   :  { %9013 = vst [vmem:[#allocation125_spill] sm:$0xff] %v5846_v18  ;;  %1407 = vmatpush.msra.mxu1 %v5861_v61  ;;  %v5864_v18 = vld [vmem:[#allocation5 + $0x170] sm:$0xff] }
 0x217   :  { %9014 = vst [vmem:[#allocation126_spill] sm:$0xff] %v5849_v19  ;;  %1376 = vmatpush.msra.mxu0 %v5864_v18  ;;  %v5867_v19 = vld [vmem:[#allocation5 + $0x218] sm:$0xff] }
 0x218   :  { %9015 = vst [vmem:[#allocation127_spill] sm:$0xff] %v5852_v49  ;;  %1447 = vmatpush.msra.mxu3 %v5867_v19  ;;  %v5870_v49 = vld [vmem:[#allocation5 + $0x178] sm:$0xff] }
 0x219   :  { %9016 = vst [vmem:[#allocation128_spill] sm:$0xff] %v5855_v46  ;;  %1416 = vmatpush.msra.mxu2 %v5870_v49  ;;  %v5873_v46 = vld [vmem:[#allocation5 + $0x150] sm:$0xff] }
 0x21a   :  { %9017 = vst [vmem:[#allocation129_spill] sm:$0xff] %v5858_v56  ;;  %1377 = vmatpush.msra.mxu0 %v5873_v46  ;;  %v5876_v56 = vld [vmem:[#allocation5 + $0x158] sm:$0xff] }
 0x21b   :  { %9018 = vst [vmem:[#allocation130_spill] sm:$0xff] %v5861_v61  ;;  %1417 = vmatpush.msra.mxu2 %v5876_v56  ;;  %v5879_v61 = vld [vmem:[#allocation5 + $0x130] sm:$0xff] }
 0x21c   :  { %9019 = vst [vmem:[#allocation131_spill] sm:$0xff] %v5864_v18  ;;  %1378 = vmatpush.msra.mxu0 %v5879_v61  ;;  %v5882_v18 = vld [vmem:[#allocation5 + $0x138] sm:$0xff] }
 0x21d   :  { %9020 = vst [vmem:[#allocation132_spill] sm:$0xff] %v5867_v19  ;;  %1418 = vmatpush.msra.mxu2 %v5882_v18  ;;  %v5885_v19 = vld [vmem:[#allocation5 + $0x110] sm:$0xff] }
 0x21e   :  { %9021 = vst [vmem:[#allocation133_spill] sm:$0xff] %v5870_v49  ;;  %1379 = vmatpush.msra.mxu0 %v5885_v19  ;;  %v5888_v49 = vld [vmem:[#allocation5 + $0x118] sm:$0xff] }
 0x21f   :  { %9022 = vst [vmem:[#allocation134_spill] sm:$0xff] %v5873_v46  ;;  %1419 = vmatpush.msra.mxu2 %v5888_v49  ;;  %v5891_v46 = vld [vmem:[#allocation5 + $0xf0] sm:$0xff] }
 0x220   :  { %9023 = vst [vmem:[#allocation135_spill] sm:$0xff] %v5876_v56  ;;  %1380 = vmatpush.msra.mxu0 %v5891_v46  ;;  %v5894_v56 = vld [vmem:[#allocation5 + $0xf8] sm:$0xff]  ;;  %v935_v62 = vpop.f32.mrf.mxu0 }
 0x221   :  { %9024 = vst [vmem:[#allocation136_spill] sm:$0xff] %v5879_v61  ;;  %1420 = vmatpush.msra.mxu2 %v5894_v56  ;;  %v5897_v61 = vld [vmem:[#allocation5 + $0xd0] sm:$0xff] }
 0x222   :  { %9025 = vst [vmem:[#allocation137_spill] sm:$0xff] %v5882_v18  ;;  %1381 = vmatpush.msra.mxu0 %v5897_v61  ;;  %v5900_v18 = vld [vmem:[#allocation5 + $0xd8] sm:$0xff] }
 0x223   :  { %9026 = vst [vmem:[#allocation138_spill] sm:$0xff] %v5885_v19  ;;  %1421 = vmatpush.msra.mxu2 %v5900_v18  ;;  %v5903_v19 = vld [vmem:[#allocation5 + $0xb0] sm:$0xff] }
 0x224   :  { %9027 = vst [vmem:[#allocation139_spill] sm:$0xff] %v5888_v49  ;;  %1382 = vmatpush.msra.mxu0 %v5903_v19  ;;  %v5906_v49 = vld [vmem:[#allocation5 + $0xb8] sm:$0xff] }
 0x225   :  { %9028 = vst [vmem:[#allocation140_spill] sm:$0xff] %v5891_v46  ;;  %1422 = vmatpush.msra.mxu2 %v5906_v49  ;;  %v5909_v46 = vld [vmem:[#allocation5 + $0x90] sm:$0xff] }
 0x226   :  { %9029 = vst [vmem:[#allocation141_spill] sm:$0xff] %v5894_v56  ;;  %1383 = vmatpush.msra.mxu0 %v5909_v46  ;;  %v5912_v56 = vld [vmem:[#allocation5 + $0x98] sm:$0xff]  ;;  %v975_v38 = vpop.f32.mrf.mxu2 }
 0x227   :  { %9030 = vst [vmem:[#allocation142_spill] sm:$0xff] %v5897_v61  ;;  %1423 = vmatpush.msra.mxu2 %v5912_v56  ;;  %v5915_v61 = vld [vmem:[#allocation5 + $0x70] sm:$0xff] }
 0x228   :  { %9031 = vst [vmem:[#allocation143_spill] sm:$0xff] %v5900_v18  ;;  %1384 = vmatpush.msra.mxu0 %v5915_v61  ;;  %v5918_v18 = vld [vmem:[#allocation5 + $0x78] sm:$0xff] }
 0x229   :  { %9032 = vst [vmem:[#allocation144_spill] sm:$0xff] %v5903_v19  ;;  %1424 = vmatpush.msra.mxu2 %v5918_v18  ;;  %v5921_v19 = vld [vmem:[#allocation5 + $0x50] sm:$0xff] }
 0x22a   :  { %9033 = vst [vmem:[#allocation145_spill] sm:$0xff] %v5906_v49  ;;  %1385 = vmatpush.msra.mxu0 %v5921_v19  ;;  %v5924_v49 = vld [vmem:[#allocation5 + $0x58] sm:$0xff] }
 0x22b   :  { %9034 = vst [vmem:[#allocation146_spill] sm:$0xff] %v5909_v46  ;;  %1425 = vmatpush.msra.mxu2 %v5924_v49  ;;  %v5927_v46 = vld [vmem:[#allocation5 + $0x30] sm:$0xff] }
 0x22c   :  { %9035 = vst [vmem:[#allocation147_spill] sm:$0xff] %v5912_v56  ;;  %1386 = vmatpush.msra.mxu0 %v5927_v46  ;;  %v5930_v56 = vld [vmem:[#allocation5 + $0x38] sm:$0xff] }
 0x22d   :  { %9036 = vst [vmem:[#allocation148_spill] sm:$0xff] %v5915_v61  ;;  %1426 = vmatpush.msra.mxu2 %v5930_v56  ;;  %v5933_v61 = vld [vmem:[#allocation5 + $0x10] sm:$0xff] }
 0x22e   :  { %9037 = vst [vmem:[#allocation149_spill] sm:$0xff] %v5918_v18  ;;  %1387 = vmatpush.msra.mxu0 %v5933_v61  ;;  %v5936_v18 = vld [vmem:[#allocation5 + $0x18] sm:$0xff] }
 0x22f   :  { %9038 = vst [vmem:[#allocation150_spill] sm:$0xff] %v5921_v19  ;;  %1427 = vmatpush.msra.mxu2 %v5936_v18  ;;  %v955_v19 = vpop.f32.mrf.mxu1  ;;  %v1055_v58 = vpop.f32.mrf.mxu2 }
 0x230   :  { %9039 = vst [vmem:[#allocation151_spill] sm:$0xff] %v5924_v49  ;;  %v956_v16 = vadd.f32 %v955_v19, %v935_v62  ;;  %v5939_v49 = vpop.permute.xlu1 %84  ;;  %v1075_v62 = vpop.f32.mrf.mxu3 }
 0x231   :  { %9040 = vst [vmem:[#allocation152_spill] sm:$0xff] %v5927_v46 }
 0x232   :  { %9041 = vst [vmem:[#allocation153_spill] sm:$0xff] %v5930_v56  ;;  %v1078_v46 = vadd.f32 %v956_v16, %v5310_v15  ;;  %v130_v56 = vmul.f32 %v8896_v31, %v5939_v49  ;;  %v132_v16 = vmul.f32 %v4976_v20, %v5939_v49  ;;  %v1076_v31 = vadd.f32 %v1075_v62, %v1055_v58 }
 0x233   :  { %9042 = vst [vmem:[#allocation154_spill] sm:$0xff] %v5933_v61  ;;  %v996_v61 = vadd.f32 %v995_v7, %v975_v38  ;;  %v1015_v38 = vpop.f32.mrf.mxu0  ;;  %v129_v62 = vmul.f32 %v8901_v41, %v5939_v49 }
 0x234   :  { %9043 = vst [vmem:[#allocation155_spill] sm:$0xff] %v5936_v18  ;;  %v3446_v42 = vmul.f32 -1.442695, %v1078_v46  ;;  %v172_v34 = vadd.f32 %v8898_v29, %v130_v56  ;;  %v1081_v7 = vadd.f32 %v1076_v31, %v5321_v55  ;;  %v174_v56 = vadd.f32 %v4997_v3, %v132_v16 }
 0x235   :  { %v1079_v18 = vadd.f32 %v996_v61, %v5317_v35 }
 0x236   :  { %3543 = vpow2.f32 %v3446_v42 }
 0x237   :  { %v1035_v17 = vpop.f32.mrf.mxu1  ;;  %v3447_v45 = vmul.f32 -1.442695, %v1079_v18 }
 0x238   :  { %v1222_v18 = vpop.f32.mrf.mxu3 }
 0x239   :  { %3545 = vpow2.f32 %v3447_v45  ;;  %v1228_v29 = vadd.f32 %v1222_v18, %v174_v56  ;;  %v171_v56 = vadd.f32 %v8902_v1, %v129_v62 }
 0x23c   :  { %v3544_v28 = vpop.eup %3543 }
 0x23d   :  { %v1085_v26 = vadd.f32 1.0, %v3544_v28  ;;  %v1036_v28 = vadd.f32 %v1035_v17, %v1015_v38 }
 0x23f   :  { %v1182_v30 = vpop.f32.mrf.mxu1  ;;  %3547 = vrcp.f32 %v1085_v26  ;;  %v3546_v42 = vpop.eup %3545  ;;  %v1080_v58 = vadd.f32 %v1036_v28, %v5327_v27  ;;  %v1097_v17 = vand.u32 2147483648, %v1085_v26  ;;  %vm1091_vm5 = vweird.f32 %v1085_v26 }
 0x240   :  { %v1226_v19 = vadd.f32 %v1182_v30, %v172_v34  ;;  %v1104_v61 = vadd.f32 1.0, %v3546_v42  ;;  %v3448_v30 = vmul.f32 -1.442695, %v1081_v7 }
 0x241   :  { %v1098_v62 = vor.u32 1.1754944e-38, %v1097_v17 }
 0x242   :  { %v3450_v46 = vmul.f32 -1.442695, %v1226_v19  ;;  %v3451_v19 = vmul.f32 -1.442695, %v1228_v29  ;;  %v1116_v28 = vand.u32 2147483648, %v1104_v61  ;;  %vm1110_vm8 = vweird.f32 %v1104_v61 }
 0x243   :  { %v1114_v29 = vand.u32 2147483647, %v1104_v61 }
 0x244   :  { %3549 = vpow2.f32 %v3450_v46 }
 0x245   :  { %v3548_v34 = vpop.eup %3547  ;;  %3551 = vrcp.f32 %v1104_v61  ;;  %vm1115_vm11 = vcmp.eq.f32.partialorder %v1114_v29, 8.507059e+37 }
 0x246   :  { %v1087_v45 = vmul.f32 %v3548_v34, %v1085_v26  ;;  %3553 = vpow2.f32 %v3448_v30  ;;  %vm1092_vm4 = vweird.f32 %v3548_v34  ;;  %v1095_v30 = vand.u32 2147483647, %v1085_v26 }
 0x247   :  { %3555 = vtanh.f32 %v1080_v58  ;;  %vm5956_vm6 = vmor %vm1091_vm5, %vm1092_vm4  ;;  %v1162_v58 = vpop.f32.mrf.mxu0 }
 0x248   :  { %v1088_v20 = vsub.f32 1.0, %v1087_v45  ;;  %3557 = vpow2.f32 %v3451_v19  ;;  %vm1096_vm9 = vcmp.eq.f32.partialorder %v1095_v30, 8.507059e+37 }
 0x24a   :  { %v3550_v35 = vpop.eup %3549  ;;  %v1089_v31 = vmul.f32 %v3548_v34, %v1088_v20 }
 0x24b   :  { %v3552_v16 = vpop.eup %3551  ;;  %v5953_v7 = vadd.f32 1.0, %v3550_v35 }
 0x24c   :  { %v3554_v42 = vpop.eup %3553  ;;  %v1106_v46 = vmul.f32 %v3552_v16, %v1104_v61  ;;  %v1090_v3 = vadd.f32 %v3548_v34, %v1089_v31  ;;  %vm1111_vm7 = vweird.f32 %v3552_v16  ;;  %v1225_v31 = vadd.f32 %v1162_v58, %v171_v56 }
 0x24d   :  { %v1124_v38 = vadd.f32 1.0, %v3554_v42  ;;  %v3556_v19 = vpop.eup %3555  ;;  %vm1112_vm10 = vmor %vm1110_vm8, %vm1111_vm7  ;;  %v1117_v42 = vor.u32 1.1754944e-38, %v1116_v28  ;;  %vm1257_vm1 = vweird.f32 %v5953_v7 }
 0x24e   :  { %v1107_v18 = vsub.f32 1.0, %v1106_v46  ;;  %v1094_v35 = vsel %vm5956_vm6, %v3548_v34, %v1090_v3  ;;  %v3449_v1 = vmul.f32 -1.442695, %v1225_v31  ;;  %v3558_v41 = vpop.eup %3557 }
 0x24f   :  { %3559 = vrcp.f32 %v1124_v38  ;;  %v1099_v46 = vsel %vm1096_vm9, %v1098_v62, %v1094_v35  ;;  %v5970_v20 = vadd.f32 1.0, %v3558_v41  ;;  %v1136_v29 = vand.u32 2147483648, %v1124_v38 }
 0x250   :  { %v1108_v45 = vmul.f32 %v3552_v16, %v1107_v18  ;;  %3561 = vrcp.f32 %v5953_v7  ;;  %v1141_v17 = vmul.f32 %v3556_v19, %v1099_v46  ;;  %vm1130_vm13 = vweird.f32 %v1124_v38  ;;  %v1202_v19 = vpop.f32.mrf.mxu2 }
 0x251   :  { %3563 = vpow2.f32 %v3449_v1  ;;  %v1134_v1 = vand.u32 2147483647, %v1124_v38  ;;  %v1137_v41 = vor.u32 1.1754944e-38, %v1136_v29  ;;  %vm1277_vm9 = vweird.f32 %v5970_v20 }
 0x252   :  { %v1109_v26 = vadd.f32 %v3552_v16, %v1108_v45 }
 0x253   :  { %vm1135_vm15 = vcmp.eq.f32.partialorder %v1134_v1, 8.507059e+37 }
 0x254   :  { %v1113_v27 = vsel %vm1112_vm10, %v3552_v16, %v1109_v26 }
 0x255   :  { %v3560_v18 = vpop.eup %3559  ;;  %v1118_v55 = vsel %vm1115_vm11, %v1117_v42, %v1113_v27 }
 0x256   :  { %v5963_v3 = vpop.eup %3561  ;;  %v1140_v34 = vmul.f32 %v1118_v55, %v5348_v51  ;;  %v1126_v56 = vmul.f32 %v3560_v18, %v1124_v38  ;;  %vm1131_vm12 = vweird.f32 %v3560_v18  ;;  %v131_v51 = vmul.f32 %v5031_v43, %v5939_v49 }
 0x257   :  { %v1253_v28 = vmul.f32 %v5963_v3, %v5953_v7  ;;  %v3564_v27 = vpop.eup %3563  ;;  %vm1132_vm14 = vmor %vm1130_vm13, %vm1131_vm12  ;;  %vm1258_vm0 = vweird.f32 %v5963_v3 }
 0x258   :  { %v5966_v61 = vadd.f32 %v1141_v17, %v1140_v34  ;;  %v1127_v30 = vsub.f32 1.0, %v1126_v56  ;;  %v1232_v45 = vadd.f32 1.0, %v3564_v27  ;;  %v173_v46 = vadd.f32 %v5057_v63, %v131_v51  ;;  %vm5991_vm2 = vmor %vm1257_vm1, %vm1258_vm0  ;;  %v9048_v51 = vld [vmem:[#allocation22_spill] sm:$0xff] }
 0x259   :  { %v1254_v55 = vsub.f32 1.0, %v1253_v28  ;;  %v1263_v56 = vand.u32 2147483648, %v5953_v7 }
 0x25a   :  { %3565 = vtanh.f32 %v5966_v61  ;;  %v1128_v16 = vmul.f32 %v3560_v18, %v1127_v30  ;;  %v1227_v17 = vadd.f32 %v1202_v19, %v173_v46  ;;  %vm1238_vm4 = vweird.f32 %v1232_v45  ;;  %v9054_v19 = vld [vmem:[#allocation28_spill] sm:$0xff]  ;;  %v9055_v46 = vld [vmem:[#allocation31_spill] sm:$0xff] }
 0x25b   :  { %3567 = vrcp.f32 %v5970_v20  ;;  %v1255_v26 = vmul.f32 %v5963_v3, %v1254_v55  ;;  %v1264_v27 = vor.u32 1.1754944e-38, %v1263_v56  ;;  %v9058_v56 = vld [vmem:[#allocation36_spill] sm:$0xff] }
 0x25c   :  { %v1129_v35 = vadd.f32 %v3560_v18, %v1128_v16  ;;  %3569 = vrcp.f32 %v1232_v45  ;;  %v1244_v16 = vand.u32 2147483648, %v1232_v45 }
 0x25d   :  { %3571 = vtanh.f32 %v1227_v17  ;;  %v6111_v17 = vld [vmem:[#allocation3 + $0xd0] sm:$0xff] }
 0x25e   :  { %v1133_v58 = vsel %vm1132_vm14, %v3560_v18, %v1129_v35  ;;  %v1256_v18 = vadd.f32 %v5963_v3, %v1255_v26  ;;  %v6099_v26 = vld [vmem:[#allocation3 + $0xe0] sm:$0xff] }
 0x25f   :  { %v1138_v31 = vsel %vm1135_vm15, %v1137_v41, %v1133_v58  ;;  %v9051_v58 = vld [vmem:[#allocation25_spill] sm:$0xff] }
 0x260   :  { %v3566_v62 = vpop.eup %3565 }
 0x261   :  { %v1144_v42 = vmul.f32 %v3566_v62, %v1138_v31  ;;  %v5978_v34 = vpop.eup %3567  ;;  %v6091_v62 = vld [vmem:[#allocation3 + $0x100] sm:$0xff]  ;;  %v6095_v31 = vld [vmem:[#allocation3 + $0x110] sm:$0xff] }
 0x262   :  { %v3570_v38 = vpop.eup %3569  ;;  %v1273_v30 = vmul.f32 %v5978_v34, %v5970_v20  ;;  %vm1278_vm8 = vweird.f32 %v5978_v34 }
 0x263   :  { %1328 = vmatmul.f32.vlgmr.msrb.gmra.mxu1 %v1144_v42  ;;  %1368 = vmatmul.f32.vlgmr.msrb.gmra.mxu3 %v1144_v42  ;;  %v1234_v49 = vmul.f32 %v3570_v38, %v1232_v45  ;;  %vm1239_vm3 = vweird.f32 %v3570_v38  ;;  %vm1279_vm10 = vmor %vm1277_vm9, %vm1278_vm8 }
 0x264   :  { %1539 = vmatpush.msrb.mxu1 %v5367_v2  ;;  %1579 = vmatpush.msrb.mxu3 %v5370_v6  ;;  %v1261_v2 = vand.u32 2147483647, %v5953_v7  ;;  %v1274_v1 = vsub.f32 1.0, %v1273_v30  ;;  %vm1240_vm6 = vmor %vm1238_vm4, %vm1239_vm3  ;;  %v6119_v30 = vld [vmem:[#allocation3 + $0xb0] sm:$0xff]  ;;  %v9060_v6 = vld [vmem:[#allocation44_spill] sm:$0xff] }
 0x265   :  { %v1235_v28 = vsub.f32 1.0, %v1234_v49  ;;  %v9057_v49 = vld [vmem:[#allocation35_spill] sm:$0xff] }
 0x266   :  { %1540 = vmatpush.msrb.mxu1 %v5380_v21  ;;  %1580 = vmatpush.msrb.mxu3 %v5383_v23  ;;  %v1242_v21 = vand.u32 2147483647, %v1232_v45  ;;  %v1260_v23 = vsel %vm5991_vm2, %v5963_v3, %v1256_v18  ;;  %vm1262_vm5 = vcmp.eq.f32.partialorder %v1261_v2, 8.507059e+37  ;;  %v3572_v3 = vpop.eup %3571  ;;  %v1275_v55 = vmul.f32 %v5978_v34, %v1274_v1  ;;  %v6115_v18 = vld [vmem:[#allocation3 + $0xa0] sm:$0xff] }
 0x267   :  { %v1236_v29 = vmul.f32 %v3570_v38, %v1235_v28  ;;  %v9059_v28 = vld [vmem:[#allocation40_spill] sm:$0xff]  ;;  %v6123_v2 = vld [vmem:[#allocation3 + $0x80] sm:$0xff] }
 0x268   :  { %1541 = vmatpush.msrb.mxu1 %v5390_v11  ;;  %1581 = vmatpush.msrb.mxu3 %v5393_v59  ;;  %v1245_v11 = vor.u32 1.1754944e-38, %v1244_v16  ;;  %v1265_v59 = vsel %vm1262_vm5, %v1264_v27, %v1260_v23  ;;  %vm1243_vm7 = vcmp.eq.f32.partialorder %v1242_v21, 8.507059e+37  ;;  %v9061_v16 = vld [vmem:[#allocation39_spill] sm:$0xff]  ;;  %v9064_v23 = vld [vmem:[#allocation54_spill] sm:$0xff]  ;;  %v9066_v1 = vld [vmem:[#allocation9_spill] sm:$0xff] }
 0x269   :  { %v1237_v7 = vadd.f32 %v3570_v38, %v1236_v29  ;;  %v9062_v29 = vld [vmem:[#allocation48_spill] sm:$0xff]  ;;  %v9063_v21 = vld [vmem:[#allocation43_spill] sm:$0xff] }
 0x26a   :  { %1542 = vmatpush.msrb.mxu1 %v5397_v50  ;;  %1582 = vmatpush.msrb.mxu3 %v5400_v48  ;;  %v1287_v48 = vmul.f32 %v1265_v59, %v5420_v47  ;;  %v9049_v47 = vld [vmem:[#allocation23_spill] sm:$0xff] }
 0x26b   :  { %1408 = vmatmul.f32.vlgmr.msra.gmra.mxu1 %v1144_v42  ;;  %1448 = vmatmul.f32.vlgmr.msra.gmra.mxu3 %v1144_v42  ;;  %v1241_v35 = vsel %vm1240_vm6, %v3570_v38, %v1237_v7  ;;  %v6103_v42 = vld [vmem:[#allocation3 + $0xf0] sm:$0xff]  ;;  %v9056_v38 = vld [vmem:[#allocation32_spill] sm:$0xff] }
 0x26c   :  { %1543 = vmatpush.msrb.mxu1 %v5404_v10  ;;  %1583 = vmatpush.msrb.mxu3 %v5407_v0  ;;  %v1246_v50 = vsel %vm1243_vm7, %v1245_v11, %v1241_v35  ;;  %v1276_v0 = vadd.f32 %v5978_v34, %v1275_v55  ;;  %v9065_v27 = vld [vmem:[#allocation47_spill] sm:$0xff]  ;;  %v9068_v11 = vld [vmem:[#allocation10_spill] sm:$0xff]  ;;  %v9072_v55 = vld [vmem:[#allocation12_spill] sm:$0xff] }
 0x26d   :  { %v1288_v45 = vmul.f32 %v3572_v3, %v1246_v50  ;;  %v9067_v7 = vld [vmem:[#allocation51_spill] sm:$0xff]  ;;  %v9071_v3 = vld [vmem:[#allocation58_spill] sm:$0xff] }
 0x26e   :  { %1544 = vmatpush.msrb.mxu1 %v5414_v53  ;;  %1584 = vmatpush.msrb.mxu3 %v5417_v33  ;;  %v1283_v53 = vand.u32 2147483648, %v5970_v20  ;;  %v1281_v33 = vand.u32 2147483647, %v5970_v20  ;;  %v9069_v59 = vld [vmem:[#allocation55_spill] sm:$0xff] }
 0x26f   :  { %v6010_v10 = vadd.f32 %v1288_v45, %v1287_v48  ;;  %v9070_v35 = vld [vmem:[#allocation11_spill] sm:$0xff]  ;;  %v9074_v48 = vld [vmem:[#allocation13_spill] sm:$0xff]  ;;  %v9075_v45 = vld [vmem:[#allocation62_spill] sm:$0xff] }
 0x270   :  { %1545 = vmatpush.msrb.mxu1 %v5424_v39  ;;  %1585 = vmatpush.msrb.mxu3 %v5427_v60  ;;  %v1280_v39 = vsel %vm1279_vm10, %v5978_v34, %v1276_v0  ;;  %v1284_v60 = vor.u32 1.1754944e-38, %v1283_v53  ;;  %vm1282_vm11 = vcmp.eq.f32.partialorder %v1281_v33, 8.507059e+37  ;;  %v6107_v34 = vld [vmem:[#allocation3 + $0xc0] sm:$0xff]  ;;  %v9073_v50 = vld [vmem:[#allocation59_spill] sm:$0xff]  ;;  %v9076_v0 = vld [vmem:[#allocation66_spill] sm:$0xff] }
 0x271   :  { %3573 = vtanh.f32 %v6010_v10  ;;  %v9078_v53 = vld [vmem:[#allocation67_spill] sm:$0xff]  ;;  %v9079_v33 = vld [vmem:[#allocation70_spill] sm:$0xff] }
 0x272   :  { %1546 = vmatpush.msrb.mxu1 %v5434_v25  ;;  %1586 = vmatpush.msrb.mxu3 %v9048_v51  ;;  %v1285_v41 = vsel %vm1282_vm11, %v1284_v60, %v1280_v39  ;;  %v9077_v51 = vld [vmem:[#allocation63_spill] sm:$0xff] }
 0x273   :  { %v9081_v39 = vld [vmem:[#allocation71_spill] sm:$0xff] }
 0x274   :  { %1547 = vmatpush.msrb.mxu1 %v9049_v47  ;;  %1587 = vmatpush.msrb.mxu3 %v5444_v37  ;;  %v6033_v37 = vld [vmem:[#allocation3 + $0x1e0] sm:$0xff]  ;;  %v9080_v47 = vld [vmem:[#allocation14_spill] sm:$0xff]  ;;  %v9082_v60 = vld [vmem:[#allocation15_spill] sm:$0xff] }
 0x276   :  { %1548 = vmatpush.msrb.mxu1 %v5447_v13  ;;  %1588 = vmatpush.msrb.mxu3 %v5450_v32  ;;  %v6036_v13 = vld [vmem:[#allocation3 + $0x1f0] sm:$0xff]  ;;  %v6049_v32 = vld [vmem:[#allocation3 + $0x1a0] sm:$0xff] }
 0x277   :  { %v3574_v25 = vpop.eup %3573 }
 0x278   :  { %1549 = vmatpush.msrb.mxu1 %v5455_v24  ;;  %1589 = vmatpush.msrb.mxu3 %v5458_v40  ;;  %v6027_v20 = vmul.f32 %v3574_v25, %v1285_v41  ;;  %v6041_v24 = vld [vmem:[#allocation3 + $0x1c0] sm:$0xff]  ;;  %v6044_v40 = vld [vmem:[#allocation3 + $0x1d0] sm:$0xff]  ;;  %v9084_v41 = vld [vmem:[#allocation16_spill] sm:$0xff] }
 0x279   :  { %v9083_v25 = vld [vmem:[#allocation29_spill] sm:$0xff] }
 0x27a   :  { %1550 = vmatpush.msrb.mxu1 %v5461_v9  ;;  %1590 = vmatpush.msrb.mxu3 %v5464_v52  ;;  %v6052_v9 = vld [vmem:[#allocation3 + $0x1b0] sm:$0xff]  ;;  %v6057_v52 = vld [vmem:[#allocation3 + $0x180] sm:$0xff] }
 0x27b   :  { %1308 = vmatmul.f32.vlgmr.msrb.gmra.mxu0 %v6027_v20  ;;  %1348 = vmatmul.f32.vlgmr.msrb.gmra.mxu2 %v6027_v20 }
 0x27c   :  { %1519 = vmatpush.msrb.mxu0 %v6033_v37  ;;  %1559 = vmatpush.msrb.mxu2 %v6036_v13 }
 0x27d   :  { %1551 = vmatpush.msrb.mxu1 %v5471_v44  ;;  %1591 = vmatpush.msrb.mxu3 %v5474_v36  ;;  %v6060_v44 = vld [vmem:[#allocation3 + $0x190] sm:$0xff]  ;;  %v6067_v36 = vld [vmem:[#allocation3 + $0x160] sm:$0xff] }
 0x27e   :  { %1520 = vmatpush.msrb.mxu0 %v6041_v24  ;;  %1560 = vmatpush.msrb.mxu2 %v6044_v40 }
 0x27f   :  { %1552 = vmatpush.msrb.mxu1 %v5479_v8  ;;  %1592 = vmatpush.msrb.mxu3 %v5482_v54  ;;  %v6071_v8 = vld [vmem:[#allocation3 + $0x170] sm:$0xff]  ;;  %v6075_v54 = vld [vmem:[#allocation3 + $0x140] sm:$0xff] }
 0x280   :  { %1521 = vmatpush.msrb.mxu0 %v6049_v32  ;;  %1561 = vmatpush.msrb.mxu2 %v6052_v9 }
 0x281   :  { %1553 = vmatpush.msrb.mxu1 %v5487_v4  ;;  %1593 = vmatpush.msrb.mxu3 %v5490_v12  ;;  %v6079_v4 = vld [vmem:[#allocation3 + $0x150] sm:$0xff]  ;;  %v6083_v12 = vld [vmem:[#allocation3 + $0x120] sm:$0xff] }
 0x282   :  { %1522 = vmatpush.msrb.mxu0 %v6057_v52  ;;  %1562 = vmatpush.msrb.mxu2 %v6060_v44 }
 0x283   :  { %1554 = vmatpush.msrb.mxu1 %v5495_v5  ;;  %1594 = vmatpush.msrb.mxu3 %v5498_v14  ;;  %v9050_v5 = vld [vmem:[#allocation24_spill] sm:$0xff]  ;;  %v6087_v14 = vld [vmem:[#allocation3 + $0x130] sm:$0xff] }
 0x284   :  { %1388 = vmatmul.f32.vlgmr.msra.gmra.mxu0 %v6027_v20  ;;  %1428 = vmatmul.f32.vlgmr.msra.gmra.mxu2 %v6027_v20 }
 0x285   :  { %1523 = vmatpush.msrb.mxu0 %v6067_v36  ;;  %1555 = vmatmul.f32.vlgmr.msrb.gmra.mxu1 %v6027_v20 }
 0x286   :  { %1563 = vmatpush.msrb.mxu2 %v6071_v8  ;;  %1595 = vmatmul.f32.vlgmr.msrb.gmra.mxu3 %v6027_v20 }
 0x287   :  { %1524 = vmatpush.msrb.mxu0 %v6075_v54  ;;  %1686 = vmatpush.msra.mxu1 %v5512_v22  ;;  %v9052_v22 = vld [vmem:[#allocation26_spill] sm:$0xff] }
 0x288   :  { %1564 = vmatpush.msrb.mxu2 %v6079_v4  ;;  %1726 = vmatpush.msra.mxu3 %v5516_v57  ;;  %v9053_v57 = vld [vmem:[#allocation27_spill] sm:$0xff] }
 0x289   :  { %1525 = vmatpush.msrb.mxu0 %v6083_v12  ;;  %1687 = vmatpush.msra.mxu1 %v9050_v5  ;;  %v9085_v5 = vld [vmem:[#allocation74_spill] sm:$0xff] }
 0x28a   :  { %1565 = vmatpush.msrb.mxu2 %v6087_v14  ;;  %1727 = vmatpush.msra.mxu3 %v9051_v58  ;;  %v9086_v58 = vld [vmem:[#allocation17_spill] sm:$0xff] }
 0x28b   :  { %1526 = vmatpush.msrb.mxu0 %v6091_v62  ;;  %1688 = vmatpush.msra.mxu1 %v9052_v22  ;;  %v9087_v22 = vld [vmem:[#allocation75_spill] sm:$0xff] }
 0x28c   :  { %1566 = vmatpush.msrb.mxu2 %v6095_v31  ;;  %1728 = vmatpush.msra.mxu3 %v9053_v57  ;;  %v9089_v57 = vld [vmem:[#allocation78_spill] sm:$0xff] }
 0x28d   :  { %1527 = vmatpush.msrb.mxu0 %v6099_v26  ;;  %1689 = vmatpush.msra.mxu1 %v9054_v19  ;;  %v9090_v19 = vld [vmem:[#allocation33_spill] sm:$0xff] }
 0x28e   :  { %1567 = vmatpush.msrb.mxu2 %v6103_v42  ;;  %1729 = vmatpush.msra.mxu3 %v9055_v46  ;;  %v9091_v46 = vld [vmem:[#allocation79_spill] sm:$0xff] }
 0x28f   :  { %1528 = vmatpush.msrb.mxu0 %v6107_v34  ;;  %1690 = vmatpush.msra.mxu1 %v9056_v38  ;;  %v9092_v38 = vld [vmem:[#allocation34_spill] sm:$0xff] }
 0x290   :  { %1568 = vmatpush.msrb.mxu2 %v6111_v17  ;;  %1730 = vmatpush.msra.mxu3 %v9057_v49  ;;  %v9093_v49 = vld [vmem:[#allocation82_spill] sm:$0xff] }
 0x291   :  { %1529 = vmatpush.msrb.mxu0 %v6115_v18  ;;  %1691 = vmatpush.msra.mxu1 %v9058_v56  ;;  %v9094_v56 = vld [vmem:[#allocation37_spill] sm:$0xff] }
 0x292   :  { %1569 = vmatpush.msrb.mxu2 %v6119_v30  ;;  %1731 = vmatpush.msra.mxu3 %v9059_v28  ;;  %v9095_v28 = vld [vmem:[#allocation83_spill] sm:$0xff] }
 0x293   :  { %1530 = vmatpush.msrb.mxu0 %v6123_v2  ;;  %1692 = vmatpush.msra.mxu1 %v9060_v6  ;;  %v9096_v6 = vld [vmem:[#allocation38_spill] sm:$0xff] }
 0x294   :  { %1570 = vmatpush.msrb.mxu2 %v9061_v16  ;;  %1732 = vmatpush.msra.mxu3 %v9062_v29  ;;  %v9097_v16 = vld [vmem:[#allocation86_spill] sm:$0xff]  ;;  %v9098_v29 = vld [vmem:[#allocation41_spill] sm:$0xff] }
 0x295   :  { %1531 = vmatpush.msrb.mxu0 %v9063_v21  ;;  %1693 = vmatpush.msra.mxu1 %v9064_v23  ;;  %v9099_v21 = vld [vmem:[#allocation45_spill] sm:$0xff]  ;;  %v9100_v23 = vld [vmem:[#allocation46_spill] sm:$0xff] }
 0x296   :  { %1571 = vmatpush.msrb.mxu2 %v9065_v27  ;;  %1733 = vmatpush.msra.mxu3 %v9066_v1  ;;  %v9101_v27 = vld [vmem:[#allocation42_spill] sm:$0xff]  ;;  %v9102_v1 = vld [vmem:[#allocation49_spill] sm:$0xff] }
 0x297   :  { %1532 = vmatpush.msrb.mxu0 %v9067_v7  ;;  %1694 = vmatpush.msra.mxu1 %v9068_v11  ;;  %v9103_v7 = vld [vmem:[#allocation89_spill] sm:$0xff]  ;;  %v9104_v11 = vld [vmem:[#allocation52_spill] sm:$0xff] }
 0x298   :  { %1572 = vmatpush.msrb.mxu2 %v9069_v59  ;;  %1734 = vmatpush.msra.mxu3 %v9070_v35  ;;  %v9105_v59 = vld [vmem:[#allocation50_spill] sm:$0xff]  ;;  %v9106_v35 = vld [vmem:[#allocation53_spill] sm:$0xff] }
 0x299   :  { %1533 = vmatpush.msrb.mxu0 %v9071_v3  ;;  %1695 = vmatpush.msra.mxu1 %v9072_v55  ;;  %v9107_v3 = vld [vmem:[#allocation56_spill] sm:$0xff] }
 0x29a   :  { %1573 = vmatpush.msrb.mxu2 %v9073_v50  ;;  %1735 = vmatpush.msra.mxu3 %v9074_v48  ;;  %v9108_v55 = vld [vmem:[#allocation60_spill] sm:$0xff]  ;;  %v9109_v50 = vld [vmem:[#allocation57_spill] sm:$0xff] }
 0x29b   :  { %1534 = vmatpush.msrb.mxu0 %v9075_v45  ;;  %1696 = vmatpush.msra.mxu1 %v9076_v0  ;;  %v9110_v48 = vld [vmem:[#allocation61_spill] sm:$0xff]  ;;  %v9111_v45 = vld [vmem:[#allocation64_spill] sm:$0xff] }
 0x29c   :  { %1574 = vmatpush.msrb.mxu2 %v9077_v51  ;;  %1535 = vmatmul.f32.vlgmr.msrb.gmra.mxu0 %v6027_v20  ;;  %v9112_v0 = vld [vmem:[#allocation68_spill] sm:$0xff]  ;;  %v9113_v51 = vld [vmem:[#allocation65_spill] sm:$0xff] }
 0x29d   :  { %1575 = vmatmul.f32.vlgmr.msrb.gmra.mxu2 %v6027_v20  ;;  %1736 = vmatpush.msra.mxu3 %v9078_v53  ;;  %v9088_v20 = vld [vmem:[#allocation30_spill] sm:$0xff]  ;;  %v9114_v53 = vld [vmem:[#allocation69_spill] sm:$0xff] }
 0x29e   :  { %1697 = vmatpush.msra.mxu1 %v9079_v33  ;;  %1666 = vmatpush.msra.mxu0 %v9080_v47  ;;  %v9115_v33 = vld [vmem:[#allocation72_spill] sm:$0xff] }
 0x29f   :  { %1737 = vmatpush.msra.mxu3 %v9081_v39  ;;  %1706 = vmatpush.msra.mxu2 %v9082_v60  ;;  %v9116_v47 = vld [vmem:[#allocation76_spill] sm:$0xff]  ;;  %v9117_v39 = vld [vmem:[#allocation73_spill] sm:$0xff] }
 0x2a0   :  { %1698 = vmatpush.msra.mxu1 %v9083_v25  ;;  %1667 = vmatpush.msra.mxu0 %v9084_v41  ;;  %v9118_v60 = vld [vmem:[#allocation77_spill] sm:$0xff]  ;;  %v9119_v25 = vld [vmem:[#allocation80_spill] sm:$0xff] }
 0x2a1   :  { %1738 = vmatpush.msra.mxu3 %v9085_v5  ;;  %1707 = vmatpush.msra.mxu2 %v9086_v58  ;;  %v9120_v41 = vld [vmem:[#allocation84_spill] sm:$0xff]  ;;  %v9121_v5 = vld [vmem:[#allocation81_spill] sm:$0xff] }
 0x2a2   :  { %1699 = vmatpush.msra.mxu1 %v9087_v22  ;;  %1668 = vmatpush.msra.mxu0 %v9088_v20  ;;  %v9122_v58 = vld [vmem:[#allocation85_spill] sm:$0xff]  ;;  %v9123_v22 = vld [vmem:[#allocation87_spill] sm:$0xff]  ;;  %v9124_v20 = vld [vmem:[#allocation90_spill] sm:$0xff] }
 0x2a3   :  { %1739 = vmatpush.msra.mxu3 %v9089_v57  ;;  %1708 = vmatpush.msra.mxu2 %v9090_v19  ;;  %v9125_v57 = vld [vmem:[#allocation88_spill] sm:$0xff]  ;;  %v9126_v19 = vld [vmem:[#allocation91_spill] sm:$0xff] }
 0x2a4   :  { %1700 = vmatpush.msra.mxu1 %v9091_v46  ;;  %1669 = vmatpush.msra.mxu0 %v9092_v38  ;;  %v9127_v46 = vld [vmem:[#allocation92_spill] sm:$0xff]  ;;  %v9128_v38 = vld [vmem:[#allocation94_spill] sm:$0xff] }
 0x2a5   :  { %1740 = vmatpush.msra.mxu3 %v9093_v49  ;;  %1709 = vmatpush.msra.mxu2 %v9094_v56  ;;  %v9129_v49 = vld [vmem:[#allocation93_spill] sm:$0xff]  ;;  %v9130_v56 = vld [vmem:[#allocation95_spill] sm:$0xff] }
 0x2a6   :  { %1701 = vmatpush.msra.mxu1 %v9095_v28  ;;  %1670 = vmatpush.msra.mxu0 %v9096_v6  ;;  %v9131_v28 = vld [vmem:[#allocation96_spill] sm:$0xff] }
 0x2a7   :  { %1741 = vmatpush.msra.mxu3 %v9097_v16  ;;  %1710 = vmatpush.msra.mxu2 %v9098_v29  ;;  %v9132_v6 = vld [vmem:[#allocation100_spill] sm:$0xff]  ;;  %v9133_v16 = vld [vmem:[#allocation97_spill] sm:$0xff]  ;;  %v9134_v29 = vld [vmem:[#allocation103_spill] sm:$0xff] }
 0x2a8   :  { %1766 = vmatpush.msrb.mxu1 %v9099_v21  ;;  %1671 = vmatpush.msra.mxu0 %v9101_v27  ;;  %v9135_v21 = vld [vmem:[#allocation104_spill] sm:$0xff]  ;;  %v9137_v27 = vld [vmem:[#allocation107_spill] sm:$0xff] }
 0x2a9   :  { %1806 = vmatpush.msrb.mxu3 %v9100_v23  ;;  %1711 = vmatpush.msra.mxu2 %v9102_v1  ;;  %v9136_v23 = vld [vmem:[#allocation108_spill] sm:$0xff]  ;;  %v9138_v1 = vld [vmem:[#allocation109_spill] sm:$0xff] }
 0x2aa   :  { %1767 = vmatpush.msrb.mxu1 %v9103_v7  ;;  %1672 = vmatpush.msra.mxu0 %v9105_v59  ;;  %v9139_v7 = vld [vmem:[#allocation110_spill] sm:$0xff]  ;;  %v9141_v59 = vld [vmem:[#allocation111_spill] sm:$0xff] }
 0x2ab   :  { %1807 = vmatpush.msrb.mxu3 %v9104_v11  ;;  %1712 = vmatpush.msra.mxu2 %v9106_v35  ;;  %v9140_v11 = vld [vmem:[#allocation112_spill] sm:$0xff]  ;;  %v9142_v35 = vld [vmem:[#allocation113_spill] sm:$0xff] }
 0x2ac   :  { %1768 = vmatpush.msrb.mxu1 %v9107_v3  ;;  %1673 = vmatpush.msra.mxu0 %v9109_v50  ;;  %v9143_v3 = vld [vmem:[#allocation114_spill] sm:$0xff]  ;;  %v9145_v50 = vld [vmem:[#allocation115_spill] sm:$0xff] }
 0x2ad   :  { %1808 = vmatpush.msrb.mxu3 %v9108_v55  ;;  %1713 = vmatpush.msra.mxu2 %v9110_v48  ;;  %v9144_v55 = vld [vmem:[#allocation116_spill] sm:$0xff]  ;;  %v9146_v48 = vld [vmem:[#allocation117_spill] sm:$0xff] }
 0x2ae   :  { %1769 = vmatpush.msrb.mxu1 %v9111_v45  ;;  %1674 = vmatpush.msra.mxu0 %v9113_v51  ;;  %v9147_v45 = vld [vmem:[#allocation118_spill] sm:$0xff]  ;;  %v9149_v51 = vld [vmem:[#allocation119_spill] sm:$0xff] }
 0x2af   :  { %1809 = vmatpush.msrb.mxu3 %v9112_v0  ;;  %1714 = vmatpush.msra.mxu2 %v9114_v53  ;;  %v9148_v0 = vld [vmem:[#allocation120_spill] sm:$0xff]  ;;  %v9150_v53 = vld [vmem:[#allocation121_spill] sm:$0xff] }
 0x2b0   :  { %1770 = vmatpush.msrb.mxu1 %v9115_v33  ;;  %1675 = vmatpush.msra.mxu0 %v9117_v39  ;;  %v9151_v33 = vld [vmem:[#allocation122_spill] sm:$0xff]  ;;  %v9153_v39 = vld [vmem:[#allocation123_spill] sm:$0xff] }
 0x2b1   :  { %1810 = vmatpush.msrb.mxu3 %v9116_v47  ;;  %1715 = vmatpush.msra.mxu2 %v9118_v60  ;;  %v9152_v47 = vld [vmem:[#allocation124_spill] sm:$0xff]  ;;  %v9154_v60 = vld [vmem:[#allocation125_spill] sm:$0xff] }
 0x2b2   :  { %1771 = vmatpush.msrb.mxu1 %v9119_v25  ;;  %1676 = vmatpush.msra.mxu0 %v9121_v5  ;;  %v9155_v25 = vld [vmem:[#allocation126_spill] sm:$0xff]  ;;  %v9157_v5 = vld [vmem:[#allocation127_spill] sm:$0xff] }
 0x2b3   :  { %1811 = vmatpush.msrb.mxu3 %v9120_v41  ;;  %1716 = vmatpush.msra.mxu2 %v9122_v58  ;;  %v9156_v41 = vld [vmem:[#allocation128_spill] sm:$0xff]  ;;  %v9158_v58 = vld [vmem:[#allocation129_spill] sm:$0xff] }
 0x2b4   :  { %1772 = vmatpush.msrb.mxu1 %v9123_v22  ;;  %1677 = vmatpush.msra.mxu0 %v9125_v57  ;;  %v9159_v22 = vld [vmem:[#allocation130_spill] sm:$0xff]  ;;  %v9161_v57 = vld [vmem:[#allocation131_spill] sm:$0xff] }
 0x2b5   :  { %1812 = vmatpush.msrb.mxu3 %v9124_v20  ;;  %1717 = vmatpush.msra.mxu2 %v9126_v19  ;;  %v9160_v20 = vld [vmem:[#allocation132_spill] sm:$0xff]  ;;  %v9162_v19 = vld [vmem:[#allocation133_spill] sm:$0xff] }
 0x2b6   :  { %1773 = vmatpush.msrb.mxu1 %v9127_v46  ;;  %1678 = vmatpush.msra.mxu0 %v9129_v49  ;;  %v9163_v46 = vld [vmem:[#allocation134_spill] sm:$0xff]  ;;  %v9165_v49 = vld [vmem:[#allocation136_spill] sm:$0xff] }
 0x2b7   :  { %1813 = vmatpush.msrb.mxu3 %v9128_v38  ;;  %1718 = vmatpush.msra.mxu2 %v9130_v56  ;;  %v9164_v38 = vld [vmem:[#allocation135_spill] sm:$0xff]  ;;  %v9166_v56 = vld [vmem:[#allocation137_spill] sm:$0xff] }
 0x2b8   :  { %1774 = vmatpush.msrb.mxu1 %v9131_v28  ;;  %1679 = vmatpush.msra.mxu0 %v9133_v16  ;;  %v9167_v28 = vld [vmem:[#allocation138_spill] sm:$0xff]  ;;  %v9169_v16 = vld [vmem:[#allocation140_spill] sm:$0xff] }
 0x2b9   :  { %1814 = vmatpush.msrb.mxu3 %v9132_v6  ;;  %1719 = vmatpush.msra.mxu2 %v9134_v29  ;;  %v9168_v6 = vld [vmem:[#allocation139_spill] sm:$0xff]  ;;  %v9170_v29 = vld [vmem:[#allocation141_spill] sm:$0xff] }
 0x2ba   :  { %1775 = vmatpush.msrb.mxu1 %v9135_v21  ;;  %1680 = vmatpush.msra.mxu0 %v9137_v27  ;;  %v9171_v21 = vld [vmem:[#allocation142_spill] sm:$0xff]  ;;  %v9173_v27 = vld [vmem:[#allocation144_spill] sm:$0xff] }
 0x2bb   :  { %1815 = vmatpush.msrb.mxu3 %v9136_v23  ;;  %1720 = vmatpush.msra.mxu2 %v9138_v1  ;;  %v9172_v23 = vld [vmem:[#allocation143_spill] sm:$0xff]  ;;  %v9174_v1 = vld [vmem:[#allocation145_spill] sm:$0xff] }
 0x2bc   :  { %1776 = vmatpush.msrb.mxu1 %v9139_v7  ;;  %1681 = vmatpush.msra.mxu0 %v9141_v59  ;;  %v9175_v7 = vld [vmem:[#allocation146_spill] sm:$0xff]  ;;  %v9177_v59 = vld [vmem:[#allocation148_spill] sm:$0xff] }
 0x2bd   :  { %1816 = vmatpush.msrb.mxu3 %v9140_v11  ;;  %1721 = vmatpush.msra.mxu2 %v9142_v35  ;;  %v9176_v11 = vld [vmem:[#allocation147_spill] sm:$0xff]  ;;  %v9178_v35 = vld [vmem:[#allocation149_spill] sm:$0xff] }
 0x2be   :  { %1777 = vmatpush.msrb.mxu1 %v9143_v3  ;;  %1746 = vmatpush.msrb.mxu0 %v9145_v50  ;;  %v9179_v3 = vld [vmem:[#allocation150_spill] sm:$0xff]  ;;  %v9181_v50 = vld [vmem:[#allocation152_spill] sm:$0xff] }
 0x2bf   :  { %1817 = vmatpush.msrb.mxu3 %v9144_v55  ;;  %1786 = vmatpush.msrb.mxu2 %v9146_v48  ;;  %v9180_v55 = vld [vmem:[#allocation151_spill] sm:$0xff]  ;;  %v9182_v48 = vld [vmem:[#allocation153_spill] sm:$0xff] }
 0x2c0   :  { %1778 = vmatpush.msrb.mxu1 %v9147_v45  ;;  %1747 = vmatpush.msrb.mxu0 %v9149_v51  ;;  %v9183_v45 = vld [vmem:[#allocation154_spill] sm:$0xff] }
 0x2c1   :  { %1818 = vmatpush.msrb.mxu3 %v9148_v0  ;;  %1787 = vmatpush.msrb.mxu2 %v9150_v53  ;;  %v9184_v0 = vld [vmem:[#allocation155_spill] sm:$0xff] }
 0x2c2   :  { %1779 = vmatpush.msrb.mxu1 %v9151_v33  ;;  %1748 = vmatpush.msrb.mxu0 %v9153_v39 }
 0x2c3   :  { %1819 = vmatpush.msrb.mxu3 %v9152_v47  ;;  %1788 = vmatpush.msrb.mxu2 %v9154_v60 }
 0x2c4   :  { %1780 = vmatpush.msrb.mxu1 %v9155_v25  ;;  %1749 = vmatpush.msrb.mxu0 %v9157_v5  ;;  %v6254_v25 = vpop.permute.xlu1 %89 }
 0x2c5   :  { %1820 = vmatpush.msrb.mxu3 %v9156_v41  ;;  %1789 = vmatpush.msrb.mxu2 %v9158_v58  ;;  %v9185_v58 = vld [vmem:[#allocation99_spill] sm:$0xff] }
 0x2c6   :  { %1781 = vmatpush.msrb.mxu1 %v9159_v22  ;;  %1750 = vmatpush.msrb.mxu0 %v9161_v57  ;;  %v134_v22 = vmul.f32 %v9185_v58, %v6254_v25  ;;  %v9186_v57 = vld [vmem:[#allocation19_spill] sm:$0xff] }
 0x2c7   :  { %1821 = vmatpush.msrb.mxu3 %v9160_v20  ;;  %1790 = vmatpush.msrb.mxu2 %v9162_v19 }
 0x2c8   :  { %1751 = vmatpush.msrb.mxu0 %v9163_v46  ;;  %v9187_v46 = vld [vmem:[#allocation102_spill] sm:$0xff] }
 0x2c9   :  { %1791 = vmatpush.msrb.mxu2 %v9164_v38  ;;  %v176_v38 = vadd.f32 %v9187_v46, %v134_v22 }
 0x2ca   :  { %1752 = vmatpush.msrb.mxu0 %v9165_v49 }
 0x2cb   :  { %1792 = vmatpush.msrb.mxu2 %v9166_v56 }
 0x2cc   :  { %1753 = vmatpush.msrb.mxu0 %v9167_v28 }
 0x2cd   :  { %1793 = vmatpush.msrb.mxu2 %v9168_v6 }
 0x2ce   :  { %1754 = vmatpush.msrb.mxu0 %v9169_v16 }
 0x2cf   :  { %1794 = vmatpush.msrb.mxu2 %v9170_v29 }
 0x2d0   :  { %1755 = vmatpush.msrb.mxu0 %v9171_v21 }
 0x2d1   :  { %1795 = vmatpush.msrb.mxu2 %v9172_v23 }
 0x2d2   :  { %1756 = vmatpush.msrb.mxu0 %v9173_v27 }
 0x2d3   :  { %1796 = vmatpush.msrb.mxu2 %v9174_v1  ;;  %v9188_v1 = vld [vmem:[#allocation105_spill] sm:$0xff] }
 0x2d4   :  { %1757 = vmatpush.msrb.mxu0 %v9175_v7  ;;  %v136_v7 = vmul.f32 %v9188_v1, %v6254_v25 }
 0x2d5   :  { %1797 = vmatpush.msrb.mxu2 %v9176_v11 }
 0x2d6   :  { %1758 = vmatpush.msrb.mxu0 %v9177_v59 }
 0x2d7   :  { %1798 = vmatpush.msrb.mxu2 %v9178_v35  ;;  %v9189_v35 = vld [vmem:[#allocation20_spill] sm:$0xff] }
 0x2d8   :  { %1759 = vmatpush.msrb.mxu0 %v9179_v3 }
 0x2d9   :  { %1799 = vmatpush.msrb.mxu2 %v9180_v55 }
 0x2da   :  { %1760 = vmatpush.msrb.mxu0 %v9181_v50 }
 0x2db   :  { %1800 = vmatpush.msrb.mxu2 %v9182_v48 }
 0x2dc   :  { %1761 = vmatpush.msrb.mxu0 %v9183_v45  ;;  %v9190_v45 = vld [vmem:[#allocation106_spill] sm:$0xff] }
 0x2dd   :  { %1801 = vmatpush.msrb.mxu2 %v9184_v0  ;;  %v178_v0 = vadd.f32 %v9190_v45, %v136_v7 }
 0x2e0   :  { %v1329_v51 = vpop.f32.mrf.mxu1 }
 0x2e6   :  { %v1369_v47 = vpop.f32.mrf.mxu3 }
 0x2e8   :  { %v1409_v39 = vpop.f32.mrf.mxu1 }
 0x2ee   :  { %v1449_v28 = vpop.f32.mrf.mxu3 }
 0x2f8   :  { %v1309_v53 = vpop.f32.mrf.mxu0 }
 0x2f9   :  { %v1330_v33 = vadd.f32 %v1329_v51, %v1309_v53 }
 0x2fb   :  { %v1452_v60 = vadd.f32 %v1330_v33, %v5310_v15 }
 0x2fd   :  { %v3452_v41 = vmul.f32 -1.442695, %v1452_v60 }
 0x2fe   :  { %v1349_v5 = vpop.f32.mrf.mxu2 }
 0x2ff   :  { %3575 = vpow2.f32 %v3452_v41  ;;  %v1370_v20 = vadd.f32 %v1369_v47, %v1349_v5  ;;  %v9191_v5 = vld [vmem:[#allocation21_spill] sm:$0xff] }
 0x301   :  { %v1453_v19 = vadd.f32 %v1370_v20, %v9186_v57  ;;  %v1389_v59 = vpop.f32.mrf.mxu0 }
 0x302   :  { %v1556_v49 = vpop.f32.mrf.mxu1  ;;  %v1410_v53 = vadd.f32 %v1409_v39, %v1389_v59 }
 0x303   :  { %v3453_v56 = vmul.f32 -1.442695, %v1453_v19  ;;  %v1600_v6 = vadd.f32 %v1556_v49, %v176_v38  ;;  %v9192_v49 = vld [vmem:[#allocation98_spill] sm:$0xff] }
 0x304   :  { %v1454_v22 = vadd.f32 %v1410_v53, %v9191_v5 }
 0x305   :  { %v3576_v16 = vpop.eup %3575  ;;  %3577 = vpow2.f32 %v3453_v56  ;;  %v3456_v23 = vmul.f32 -1.442695, %v1600_v6  ;;  %v133_v56 = vmul.f32 %v9192_v49, %v6254_v25 }
 0x306   :  { %v1459_v29 = vadd.f32 1.0, %v3576_v16 }
 0x307   :  { %v1429_v21 = vpop.f32.mrf.mxu2 }
 0x308   :  { %3579 = vrcp.f32 %v1459_v29  ;;  %v1450_v27 = vadd.f32 %v1449_v28, %v1429_v21  ;;  %v1471_v39 = vand.u32 2147483648, %v1459_v29  ;;  %vm1465_vm13 = vweird.f32 %v1459_v29 }
 0x309   :  { %3581 = vpow2.f32 %v3456_v23  ;;  %v1596_v50 = vpop.f32.mrf.mxu3  ;;  %v1469_v7 = vand.u32 2147483647, %v1459_v29 }
 0x30a   :  { %v1455_v3 = vadd.f32 %v1450_v27, %v9189_v35  ;;  %v1602_v47 = vadd.f32 %v1596_v50, %v178_v0  ;;  %v9195_v50 = vld [vmem:[#allocation101_spill] sm:$0xff] }
 0x30b   :  { %v3578_v11 = vpop.eup %3577  ;;  %vm1470_vm1 = vcmp.eq.f32.partialorder %v1469_v7, 8.507059e+37 }
 0x30c   :  { %v1478_v55 = vadd.f32 1.0, %v3578_v11  ;;  %v3454_v48 = vmul.f32 -1.442695, %v1455_v3  ;;  %v3457_v19 = vmul.f32 -1.442695, %v1602_v47  ;;  %v1472_v47 = vor.u32 1.1754944e-38, %v1471_v39 }
 0x30e   :  { %v3580_v51 = vpop.eup %3579  ;;  %3583 = vrcp.f32 %v1478_v55  ;;  %v1490_v11 = vand.u32 2147483648, %v1478_v55  ;;  %v1488_v3 = vand.u32 2147483647, %v1478_v55  ;;  %vm1484_vm0 = vweird.f32 %v1478_v55 }
 0x30f   :  { %v1461_v33 = vmul.f32 %v3580_v51, %v1459_v29  ;;  %3585 = vpow2.f32 %v3454_v48  ;;  %v3582_v41 = vpop.eup %3581  ;;  %vm1466_vm12 = vweird.f32 %v3580_v51  ;;  %v175_v48 = vadd.f32 %v9195_v50, %v133_v56 }
 0x310   :  { %v6267_v21 = vadd.f32 1.0, %v3582_v41  ;;  %3587 = vtanh.f32 %v1454_v22  ;;  %vm6269_vm14 = vmor %vm1465_vm13, %vm1466_vm12  ;;  %v1491_v22 = vor.u32 1.1754944e-38, %v1490_v11  ;;  %vm1489_vm3 = vcmp.eq.f32.partialorder %v1488_v3, 8.507059e+37 }
 0x311   :  { %v1462_v60 = vsub.f32 1.0, %v1461_v33  ;;  %3589 = vpow2.f32 %v3457_v19 }
 0x312   :  { %vm1631_vm9 = vweird.f32 %v6267_v21 }
 0x313   :  { %v1463_v20 = vmul.f32 %v3580_v51, %v1462_v60 }
 0x314   :  { %v3584_v38 = vpop.eup %3583 }
 0x315   :  { %v3586_v28 = vpop.eup %3585  ;;  %v1480_v6 = vmul.f32 %v3584_v38, %v1478_v55  ;;  %v1464_v16 = vadd.f32 %v3580_v51, %v1463_v20  ;;  %vm1485_vm15 = vweird.f32 %v3584_v38 }
 0x316   :  { %v1498_v23 = vadd.f32 1.0, %v3586_v28  ;;  %v3588_v41 = vpop.eup %3587  ;;  %vm1486_vm2 = vmor %vm1484_vm0, %vm1485_vm15 }
 0x317   :  { %v1481_v27 = vsub.f32 1.0, %v1480_v6  ;;  %v1468_v53 = vsel %vm6269_vm14, %v3580_v51, %v1464_v16  ;;  %v3590_v28 = vpop.eup %3589 }
 0x318   :  { %3591 = vrcp.f32 %v1498_v23  ;;  %v1473_v20 = vsel %vm1470_vm1, %v1472_v47, %v1468_v53  ;;  %v1510_v3 = vand.u32 2147483648, %v1498_v23  ;;  %v1508_v53 = vand.u32 2147483647, %v1498_v23 }
 0x319   :  { %v1482_v0 = vmul.f32 %v3584_v38, %v1481_v27  ;;  %3593 = vrcp.f32 %v6267_v21  ;;  %v1536_v33 = vpop.f32.mrf.mxu0  ;;  %v1515_v39 = vmul.f32 %v3588_v41, %v1473_v20  ;;  %vm1504_vm5 = vweird.f32 %v1498_v23 }
 0x31a   :  { %v1599_v29 = vadd.f32 %v1536_v33, %v175_v48  ;;  %v6284_v48 = vadd.f32 1.0, %v3590_v28  ;;  %vm1509_vm7 = vcmp.eq.f32.partialorder %v1508_v53, 8.507059e+37 }
 0x31b   :  { %v1483_v60 = vadd.f32 %v3584_v38, %v1482_v0 }
 0x31c   :  { %v3455_v19 = vmul.f32 -1.442695, %v1599_v29  ;;  %v135_v29 = vmul.f32 %v5031_v43, %v6254_v25  ;;  %v6300_v25 = vld [vmem:[#allocation3 + $0x1f8] sm:$0xff]  ;;  %vm1651_vm1 = vweird.f32 %v6284_v48 }
 0x31d   :  { %v1487_v56 = vsel %vm1486_vm2, %v3584_v38, %v1483_v60  ;;  %v1511_v60 = vor.u32 1.1754944e-38, %v1510_v3  ;;  %v6309_v3 = vld [vmem:[#allocation3 + $0x1c8] sm:$0xff] }
 0x31e   :  { %v3592_v6 = vpop.eup %3591  ;;  %v1492_v27 = vsel %vm1489_vm3, %v1491_v22, %v1487_v56  ;;  %3595 = vpow2.f32 %v3455_v19 }
 0x31f   :  { %v6277_v51 = vpop.eup %3593  ;;  %v1514_v16 = vmul.f32 %v1492_v27, %v5966_v61  ;;  %v1500_v59 = vmul.f32 %v3592_v6, %v1498_v23  ;;  %vm1505_vm4 = vweird.f32 %v3592_v6  ;;  %v177_v27 = vadd.f32 %v5057_v63, %v135_v29 }
 0x320   :  { %v1627_v11 = vmul.f32 %v6277_v51, %v6267_v21  ;;  %vm1506_vm6 = vmor %vm1504_vm5, %vm1505_vm4  ;;  %v1576_v28 = vpop.f32.mrf.mxu2  ;;  %vm1632_vm8 = vweird.f32 %v6277_v51 }
 0x321   :  { %v6280_v55 = vadd.f32 %v1515_v39, %v1514_v16  ;;  %v1501_v7 = vsub.f32 1.0, %v1500_v59  ;;  %v1601_v39 = vadd.f32 %v1576_v28, %v177_v27  ;;  %v6297_v59 = vld [vmem:[#allocation3 + $0x1e8] sm:$0xff]  ;;  %vm6317_vm10 = vmor %vm1631_vm9, %vm1632_vm8 }
 0x322   :  { %v1628_v47 = vsub.f32 1.0, %v1627_v11  ;;  %v1637_v11 = vand.u32 2147483648, %v6267_v21  ;;  %v6332_v27 = vld [vmem:[#allocation3 + $0x188] sm:$0xff] }
 0x323   :  { %3597 = vtanh.f32 %v6280_v55  ;;  %v1502_v38 = vmul.f32 %v3592_v6, %v1501_v7 }
 0x324   :  { %v3596_v0 = vpop.eup %3595  ;;  %3599 = vrcp.f32 %v6284_v48  ;;  %v1629_v19 = vmul.f32 %v6277_v51, %v1628_v47 }
 0x325   :  { %v6287_v33 = vadd.f32 1.0, %v3596_v0  ;;  %v1503_v61 = vadd.f32 %v3592_v6, %v1502_v38  ;;  %v6312_v0 = vld [vmem:[#allocation3 + $0x1d8] sm:$0xff] }
 0x326   :  { %v1630_v7 = vadd.f32 %v6277_v51, %v1629_v19  ;;  %v1638_v19 = vor.u32 1.1754944e-38, %v1637_v11 }
 0x327   :  { %3601 = vrcp.f32 %v6287_v33  ;;  %v1507_v41 = vsel %vm1506_vm6, %v3592_v6, %v1503_v61  ;;  %v1635_v61 = vand.u32 2147483647, %v6267_v21  ;;  %v1618_v29 = vand.u32 2147483648, %v6287_v33 }
 0x328   :  { %v1512_v20 = vsel %vm1509_vm7, %v1511_v60, %v1507_v41  ;;  %3603 = vtanh.f32 %v1601_v39  ;;  %v6322_v60 = vld [vmem:[#allocation3 + $0x1a8] sm:$0xff]  ;;  %v6325_v41 = vld [vmem:[#allocation3 + $0x1b8] sm:$0xff]  ;;  %v1634_v21 = vsel %vm6317_vm10, %v6277_v51, %v1630_v7  ;;  %vm1612_vm12 = vweird.f32 %v6287_v33 }
 0x329   :  { %v3598_v22 = vpop.eup %3597  ;;  %v6335_v39 = vld [vmem:[#allocation3 + $0x198] sm:$0xff]  ;;  %vm1636_vm13 = vcmp.eq.f32.partialorder %v1635_v61, 8.507059e+37  ;;  %v6339_v51 = vld [vmem:[#allocation3 + $0x168] sm:$0xff] }
 0x32a   :  { %v1518_v56 = vmul.f32 %v3598_v22, %v1512_v20  ;;  %v6295_v16 = vpop.eup %3599  ;;  %v1616_v20 = vand.u32 2147483647, %v6287_v33  ;;  %v1639_v47 = vsel %vm1636_vm13, %v1638_v19, %v1634_v21  ;;  %v6342_v7 = vld [vmem:[#allocation3 + $0x178] sm:$0xff]  ;;  %v6346_v61 = vld [vmem:[#allocation3 + $0x148] sm:$0xff] }
 0x32b   :  { %v1647_v38 = vmul.f32 %v6295_v16, %v6284_v48  ;;  %v6353_v19 = vld [vmem:[#allocation3 + $0x128] sm:$0xff]  ;;  %vm1652_vm0 = vweird.f32 %v6295_v16 }
 0x32c   :  { %1702 = vmatmul.f32.vlgmr.msra.gmra.mxu1 %v1518_v56  ;;  %1742 = vmatmul.f32.vlgmr.msra.gmra.mxu3 %v1518_v56  ;;  %vm1617_vm15 = vcmp.eq.f32.partialorder %v1616_v20, 8.507059e+37  ;;  %vm1653_vm2 = vmor %vm1651_vm1, %vm1652_vm0 }
 0x32d   :  { %v3602_v23 = vpop.eup %3601  ;;  %1913 = vmatpush.msra.mxu1 %v6297_v59  ;;  %1953 = vmatpush.msra.mxu3 %v6300_v25  ;;  %v1648_v28 = vsub.f32 1.0, %v1647_v38 }
 0x32e   :  { %v1608_v6 = vmul.f32 %v3602_v23, %v6287_v33  ;;  %vm1613_vm11 = vweird.f32 %v3602_v23  ;;  %v3604_v38 = vpop.eup %3603 }
 0x32f   :  { %1914 = vmatpush.msra.mxu1 %v6309_v3  ;;  %1954 = vmatpush.msra.mxu3 %v6312_v0  ;;  %vm1614_vm14 = vmor %vm1612_vm12, %vm1613_vm11 }
 0x330   :  { %v1609_v53 = vsub.f32 1.0, %v1608_v6 }
 0x331   :  { %1915 = vmatpush.msra.mxu1 %v6322_v60  ;;  %1955 = vmatpush.msra.mxu3 %v6325_v41 }
 0x332   :  { %v1610_v22 = vmul.f32 %v3602_v23, %v1609_v53  ;;  %v1619_v53 = vor.u32 1.1754944e-38, %v1618_v29  ;;  %v1661_v29 = vmul.f32 %v1639_v47, %v6010_v10  ;;  %v6366_v10 = vld [vmem:[#allocation3 + $0x118] sm:$0xff]  ;;  %v1655_v47 = vand.u32 2147483647, %v6284_v48 }
 0x333   :  { %1916 = vmatpush.msra.mxu1 %v6332_v27  ;;  %1956 = vmatpush.msra.mxu3 %v6335_v39  ;;  %9198 = vst [vmem:[#allocation22_spill] sm:$0xff] %v6366_v10 }
 0x334   :  { %v1611_v6 = vadd.f32 %v3602_v23, %v1610_v22  ;;  %1782 = vmatmul.f32.vlgmr.msrb.gmra.mxu1 %v1518_v56  ;;  %1822 = vmatmul.f32.vlgmr.msrb.gmra.mxu3 %v1518_v56  ;;  %v1649_v22 = vmul.f32 %v6295_v16, %v1648_v28  ;;  %v6349_v56 = vld [vmem:[#allocation3 + $0x158] sm:$0xff]  ;;  %vm1656_vm3 = vcmp.eq.f32.partialorder %v1655_v47, 8.507059e+37 }
 0x335   :  { %1917 = vmatpush.msra.mxu1 %v6339_v51  ;;  %1957 = vmatpush.msra.mxu3 %v6342_v7  ;;  %v6407_v47 = vld [vmem:[#allocation3 + $0x78] sm:$0xff] }
 0x336   :  { %v1615_v11 = vsel %vm1614_vm14, %v3602_v23, %v1611_v6  ;;  %v6356_v23 = vld [vmem:[#allocation3 + $0x138] sm:$0xff]  ;;  %v1650_v28 = vadd.f32 %v6295_v16, %v1649_v22  ;;  %v6363_v6 = vld [vmem:[#allocation3 + $0x108] sm:$0xff] }
 0x337   :  { %v1620_v33 = vsel %vm1617_vm15, %v1619_v53, %v1615_v11  ;;  %1918 = vmatpush.msra.mxu1 %v6346_v61  ;;  %1958 = vmatpush.msra.mxu3 %v6349_v56  ;;  %v1657_v53 = vand.u32 2147483648, %v6284_v48  ;;  %v6373_v11 = vld [vmem:[#allocation3 + $0xe8] sm:$0xff] }
 0x338   :  { %v1662_v21 = vmul.f32 %v3604_v38, %v1620_v33  ;;  %9199 = vst [vmem:[#allocation23_spill] sm:$0xff] %v6373_v11  ;;  %v6376_v38 = vld [vmem:[#allocation3 + $0xf8] sm:$0xff]  ;;  %v1654_v22 = vsel %vm1653_vm2, %v6295_v16, %v1650_v28  ;;  %v6380_v33 = vld [vmem:[#allocation3 + $0xc8] sm:$0xff] }
 0x339   :  { %1919 = vmatpush.msra.mxu1 %v6353_v19  ;;  %1959 = vmatpush.msra.mxu3 %v6356_v23  ;;  %9200 = vst [vmem:[#allocation24_spill] sm:$0xff] %v6376_v38  ;;  %v1658_v48 = vor.u32 1.1754944e-38, %v1657_v53  ;;  %v6404_v53 = vld [vmem:[#allocation3 + $0x68] sm:$0xff] }
 0x33a   :  { %v6359_v20 = vadd.f32 %v1662_v21, %v1661_v29  ;;  %9201 = vst [vmem:[#allocation25_spill] sm:$0xff] %v6380_v33  ;;  %v6383_v29 = vld [vmem:[#allocation3 + $0xd8] sm:$0xff]  ;;  %v6386_v21 = vld [vmem:[#allocation3 + $0xa8] sm:$0xff] }
 0x33b   :  { %1920 = vmatpush.msra.mxu1 %v6363_v6  ;;  %1960 = vmatpush.msra.mxu3 %v6366_v10  ;;  %v1659_v16 = vsel %vm1656_vm3, %v1658_v48, %v1654_v22  ;;  %v6394_v10 = vld [vmem:[#allocation3 + $0x88] sm:$0xff]  ;;  %v6415_v22 = vld [vmem:[#allocation3 + $0x58] sm:$0xff]  ;;  %v6510_v48 = vld [vmem:[#allocation3 + $0x40] sm:$0xff] }
 0x33c   :  { %3605 = vtanh.f32 %v6359_v20  ;;  %9215 = vst [vmem:[#allocation47_spill] sm:$0xff] %v6510_v48 }
 0x33d   :  { %1921 = vmatpush.msra.mxu1 %v6373_v11  ;;  %1961 = vmatpush.msra.mxu3 %v6376_v38  ;;  %v6389_v11 = vld [vmem:[#allocation3 + $0xb8] sm:$0xff] }
 0x33f   :  { %1922 = vmatpush.msra.mxu1 %v6380_v33  ;;  %1962 = vmatpush.msra.mxu3 %v6383_v29  ;;  %v6397_v33 = vld [vmem:[#allocation3 + $0x98] sm:$0xff] }
 0x341   :  { %1923 = vmatpush.msra.mxu1 %v6386_v21  ;;  %1963 = vmatpush.msra.mxu3 %v6389_v11 }
 0x342   :  { %v3606_v38 = vpop.eup %3605 }
 0x343   :  { %v6392_v28 = vmul.f32 %v3606_v38, %v1659_v16  ;;  %1924 = vmatpush.msra.mxu1 %v6394_v10  ;;  %1964 = vmatpush.msra.mxu3 %v6397_v33  ;;  %v6412_v38 = vld [vmem:[#allocation3 + $0x48] sm:$0xff]  ;;  %v6513_v16 = vld [vmem:[#allocation5 + $0x300] sm:$0xff] }
 0x344   :  { %9216 = vst [vmem:[#allocation9_spill] sm:$0xff] %v6513_v16 }
 0x345   :  { %1682 = vmatmul.f32.vlgmr.msra.gmra.mxu0 %v6392_v28  ;;  %1722 = vmatmul.f32.vlgmr.msra.gmra.mxu2 %v6392_v28 }
 0x346   :  { %1893 = vmatpush.msra.mxu0 %v6033_v37  ;;  %1933 = vmatpush.msra.mxu2 %v6036_v13  ;;  %v6420_v37 = vld [vmem:[#allocation3 + $0x28] sm:$0xff]  ;;  %v6423_v13 = vld [vmem:[#allocation3 + $0x38] sm:$0xff] }
 0x347   :  { %1925 = vmatpush.msra.mxu1 %v6404_v53  ;;  %1965 = vmatpush.msra.mxu3 %v6407_v47 }
 0x348   :  { %1894 = vmatpush.msra.mxu0 %v6041_v24  ;;  %1934 = vmatpush.msra.mxu2 %v6044_v40  ;;  %v6428_v24 = vld [vmem:[#allocation3 + $0x8] sm:$0xff]  ;;  %v6431_v40 = vld [vmem:[#allocation3 + $0x18] sm:$0xff] }
 0x349   :  { %1926 = vmatpush.msra.mxu1 %v6412_v38  ;;  %1966 = vmatpush.msra.mxu3 %v6415_v22 }
 0x34a   :  { %1895 = vmatpush.msra.mxu0 %v6049_v32  ;;  %1935 = vmatpush.msra.mxu2 %v6052_v9  ;;  %v67_v32 = vld [vmem:[%s8149_s0 + $0x20] sm:$0xff] }
 0x34b   :  { %1927 = vmatpush.msra.mxu1 %v6420_v37  ;;  %1967 = vmatpush.msra.mxu3 %v6423_v13  ;;  %v6445_v9 = vld [vmem:[#allocation5 + $0x3e0] sm:$0xff] }
 0x34c   :  { %1896 = vmatpush.msra.mxu0 %v6057_v52  ;;  %1936 = vmatpush.msra.mxu2 %v6060_v44  ;;  %v6449_v52 = vld [vmem:[#allocation5 + $0x3e8] sm:$0xff]  ;;  %v6453_v44 = vld [vmem:[#allocation5 + $0x3c0] sm:$0xff] }
 0x34d   :  { %1928 = vmatpush.msra.mxu1 %v6428_v24  ;;  %1968 = vmatpush.msra.mxu3 %v6431_v40 }
 0x34e   :  { %1762 = vmatmul.f32.vlgmr.msrb.gmra.mxu0 %v6392_v28  ;;  %1802 = vmatmul.f32.vlgmr.msrb.gmra.mxu2 %v6392_v28 }
 0x34f   :  { %1897 = vmatpush.msra.mxu0 %v6067_v36  ;;  %1929 = vmatmul.f32.vlgmr.msra.gmra.mxu1 %v6392_v28  ;;  %v6457_v36 = vld [vmem:[#allocation5 + $0x3c8] sm:$0xff] }
 0x350   :  { %1937 = vmatpush.msra.mxu2 %v6071_v8  ;;  %1969 = vmatmul.f32.vlgmr.msra.gmra.mxu3 %v6392_v28  ;;  %v68_v8 = vld [vmem:[%s8149_s0 + $0x28] sm:$0xff] }
 0x351   :  { %1898 = vmatpush.msra.mxu0 %v6075_v54  ;;  %94 = vperm.xlu2 %3493, %v67_v32   ;;  %v6464_v54 = vld [vmem:[#allocation5 + $0x3a0] sm:$0xff]  ;;  %v6516_v32 = vld [vmem:[#allocation3 + $0x50] sm:$0xff] }
 0x352   :  { %1938 = vmatpush.msra.mxu2 %v6079_v4  ;;  %2060 = vmatpush.msrb.mxu1 %v6445_v9  ;;  %9202 = vst [vmem:[#allocation26_spill] sm:$0xff] %v6464_v54  ;;  %v6468_v4 = vld [vmem:[#allocation5 + $0x3a8] sm:$0xff] }
 0x353   :  { %1899 = vmatpush.msra.mxu0 %v6083_v12  ;;  %2100 = vmatpush.msrb.mxu3 %v6449_v52  ;;  %9203 = vst [vmem:[#allocation27_spill] sm:$0xff] %v6468_v4  ;;  %v6472_v12 = vld [vmem:[#allocation5 + $0x380] sm:$0xff] }
 0x354   :  { %1939 = vmatpush.msra.mxu2 %v6087_v14  ;;  %2061 = vmatpush.msrb.mxu1 %v6453_v44  ;;  %9204 = vst [vmem:[#allocation28_spill] sm:$0xff] %v6472_v12  ;;  %v6477_v14 = vld [vmem:[#allocation5 + $0x388] sm:$0xff] }
 0x355   :  { %1900 = vmatpush.msra.mxu0 %v6091_v62  ;;  %2101 = vmatpush.msrb.mxu3 %v6457_v36  ;;  %9205 = vst [vmem:[#allocation31_spill] sm:$0xff] %v6477_v14  ;;  %v6481_v62 = vld [vmem:[#allocation5 + $0x360] sm:$0xff] }
 0x356   :  { %1940 = vmatpush.msra.mxu2 %v6095_v31  ;;  %2062 = vmatpush.msrb.mxu1 %v6464_v54  ;;  %9206 = vst [vmem:[#allocation32_spill] sm:$0xff] %v6481_v62  ;;  %v6485_v31 = vld [vmem:[#allocation5 + $0x368] sm:$0xff] }
 0x357   :  { %1901 = vmatpush.msra.mxu0 %v6099_v26  ;;  %2102 = vmatpush.msrb.mxu3 %v6468_v4  ;;  %9207 = vst [vmem:[#allocation35_spill] sm:$0xff] %v6485_v31  ;;  %v6489_v26 = vld [vmem:[#allocation5 + $0x340] sm:$0xff] }
 0x358   :  { %1941 = vmatpush.msra.mxu2 %v6103_v42  ;;  %2063 = vmatpush.msrb.mxu1 %v6472_v12  ;;  %9208 = vst [vmem:[#allocation36_spill] sm:$0xff] %v6489_v26  ;;  %v6492_v42 = vld [vmem:[#allocation3 + $0x90] sm:$0xff] }
 0x359   :  { %1902 = vmatpush.msra.mxu0 %v6107_v34  ;;  %99 = vperm.xlu2 %3493, %v68_v8   ;;  %9209 = vst [vmem:[#allocation40_spill] sm:$0xff] %v6492_v42  ;;  %v6495_v34 = vld [vmem:[#allocation5 + $0x348] sm:$0xff] }
 0x35a   :  { %1942 = vmatpush.msra.mxu2 %v6111_v17  ;;  %2103 = vmatpush.msrb.mxu3 %v6477_v14  ;;  %9210 = vst [vmem:[#allocation44_spill] sm:$0xff] %v6495_v34  ;;  %v6498_v17 = vld [vmem:[#allocation3 + $0x60] sm:$0xff]  ;;  %v6519_v8 = vld [vmem:[#allocation5 + $0x308] sm:$0xff] }
 0x35b   :  { %1903 = vmatpush.msra.mxu0 %v6115_v18  ;;  %2064 = vmatpush.msrb.mxu1 %v6481_v62  ;;  %9211 = vst [vmem:[#allocation39_spill] sm:$0xff] %v6498_v17  ;;  %v6501_v18 = vld [vmem:[#allocation5 + $0x320] sm:$0xff] }
 0x35c   :  { %1943 = vmatpush.msra.mxu2 %v6119_v30  ;;  %2104 = vmatpush.msrb.mxu3 %v6485_v31  ;;  %9212 = vst [vmem:[#allocation48_spill] sm:$0xff] %v6501_v18  ;;  %v6504_v30 = vld [vmem:[#allocation3 + $0x70] sm:$0xff] }
 0x35d   :  { %1904 = vmatpush.msra.mxu0 %v6123_v2  ;;  %2065 = vmatpush.msrb.mxu1 %v6489_v26  ;;  %9213 = vst [vmem:[#allocation43_spill] sm:$0xff] %v6504_v30  ;;  %v6507_v2 = vld [vmem:[#allocation5 + $0x328] sm:$0xff] }
 0x35e   :  { %1944 = vmatpush.msra.mxu2 %v6492_v42  ;;  %2105 = vmatpush.msrb.mxu3 %v6495_v34  ;;  %9214 = vst [vmem:[#allocation54_spill] sm:$0xff] %v6507_v2 }
 0x35f   :  { %1905 = vmatpush.msra.mxu0 %v6498_v17  ;;  %2066 = vmatpush.msrb.mxu1 %v6501_v18  ;;  %9217 = vst [vmem:[#allocation51_spill] sm:$0xff] %v6516_v32  ;;  %v6525_v17 = vld [vmem:[#allocation5 + $0x2e0] sm:$0xff] }
 0x360   :  { %1945 = vmatpush.msra.mxu2 %v6504_v30  ;;  %2106 = vmatpush.msrb.mxu3 %v6507_v2  ;;  %9218 = vst [vmem:[#allocation10_spill] sm:$0xff] %v6519_v8  ;;  %v6522_v30 = vld [vmem:[#allocation3 + $0x20] sm:$0xff] }
 0x361   :  { %1906 = vmatpush.msra.mxu0 %v6510_v48  ;;  %2067 = vmatpush.msrb.mxu1 %v6513_v16  ;;  %9219 = vst [vmem:[#allocation55_spill] sm:$0xff] %v6522_v30  ;;  %v6528_v48 = vld [vmem:[#allocation3 + $0x30] sm:$0xff]  ;;  %v6531_v16 = vld [vmem:[#allocation5 + $0x2e8] sm:$0xff] }
 0x362   :  { %1946 = vmatpush.msra.mxu2 %v6516_v32  ;;  %2107 = vmatpush.msrb.mxu3 %v6519_v8  ;;  %9220 = vst [vmem:[#allocation11_spill] sm:$0xff] %v6525_v17  ;;  %v6534_v32 = vld [vmem:[#allocation3] sm:$0xff] }
 0x363   :  { %1907 = vmatpush.msra.mxu0 %v6522_v30  ;;  %2068 = vmatpush.msrb.mxu1 %v6525_v17  ;;  %9221 = vst [vmem:[#allocation58_spill] sm:$0xff] %v6528_v48  ;;  %v6537_v8 = vld [vmem:[#allocation5 + $0x2c0] sm:$0xff]  ;;  %v6540_v30 = vld [vmem:[#allocation3 + $0x10] sm:$0xff] }
 0x364   :  { %1947 = vmatpush.msra.mxu2 %v6528_v48  ;;  %9222 = vst [vmem:[#allocation12_spill] sm:$0xff] %v6531_v16  ;;  %2108 = vmatpush.msrb.mxu3 %v6531_v16  ;;  %v6545_v48 = vld [vmem:[#allocation5 + $0x2c8] sm:$0xff]  ;;  %v6548_v16 = vld [vmem:[#allocation5 + $0x2a0] sm:$0xff] }
 0x365   :  { %9223 = vst [vmem:[#allocation59_spill] sm:$0xff] %v6534_v32  ;;  %1908 = vmatpush.msra.mxu0 %v6534_v32  ;;  %2069 = vmatpush.msrb.mxu1 %v6537_v8  ;;  %v6551_v32 = vld [vmem:[#allocation5 + $0x1e0] sm:$0xff] }
 0x366   :  { %9224 = vst [vmem:[#allocation13_spill] sm:$0xff] %v6537_v8  ;;  %1948 = vmatpush.msra.mxu2 %v6540_v30  ;;  %1909 = vmatmul.f32.vlgmr.msra.gmra.mxu0 %v6392_v28  ;;  %v6554_v8 = vld [vmem:[#allocation5 + $0x2a8] sm:$0xff] }
 0x367   :  { %9225 = vst [vmem:[#allocation62_spill] sm:$0xff] %v6540_v30  ;;  %1949 = vmatmul.f32.vlgmr.msra.gmra.mxu2 %v6392_v28  ;;  %2109 = vmatpush.msrb.mxu3 %v6545_v48  ;;  %v6557_v30 = vld [vmem:[#allocation5 + $0x1e8] sm:$0xff]  ;;  %v6560_v28 = vld [vmem:[#allocation5 + $0x280] sm:$0xff] }
 0x368   :  { %9226 = vst [vmem:[#allocation66_spill] sm:$0xff] %v6545_v48  ;;  %2070 = vmatpush.msrb.mxu1 %v6548_v16  ;;  %2040 = vmatpush.msrb.mxu0 %v6551_v32  ;;  %v6563_v48 = vld [vmem:[#allocation5 + $0x1c0] sm:$0xff] }
 0x369   :  { %9227 = vst [vmem:[#allocation63_spill] sm:$0xff] %v6548_v16  ;;  %2110 = vmatpush.msrb.mxu3 %v6554_v8  ;;  %2080 = vmatpush.msrb.mxu2 %v6557_v30  ;;  %v6566_v16 = vld [vmem:[#allocation5 + $0x288] sm:$0xff] }
 0x36a   :  { %9228 = vst [vmem:[#allocation67_spill] sm:$0xff] %v6551_v32  ;;  %2071 = vmatpush.msrb.mxu1 %v6560_v28  ;;  %2041 = vmatpush.msrb.mxu0 %v6563_v48  ;;  %v6569_v32 = vld [vmem:[#allocation5 + $0x1c8] sm:$0xff] }
 0x36b   :  { %9229 = vst [vmem:[#allocation70_spill] sm:$0xff] %v6554_v8  ;;  %2111 = vmatpush.msrb.mxu3 %v6566_v16  ;;  %2081 = vmatpush.msrb.mxu2 %v6569_v32  ;;  %v6572_v8 = vld [vmem:[#allocation5 + $0x260] sm:$0xff] }
 0x36c   :  { %9230 = vst [vmem:[#allocation14_spill] sm:$0xff] %v6557_v30  ;;  %2072 = vmatpush.msrb.mxu1 %v6572_v8  ;;  %v6575_v30 = vld [vmem:[#allocation5 + $0x1a0] sm:$0xff] }
 0x36d   :  { %9231 = vst [vmem:[#allocation71_spill] sm:$0xff] %v6560_v28  ;;  %2042 = vmatpush.msrb.mxu0 %v6575_v30  ;;  %v6578_v28 = vld [vmem:[#allocation5 + $0x268] sm:$0xff] }
 0x36e   :  { %9232 = vst [vmem:[#allocation15_spill] sm:$0xff] %v6563_v48  ;;  %2112 = vmatpush.msrb.mxu3 %v6578_v28  ;;  %v6581_v48 = vld [vmem:[#allocation5 + $0x1a8] sm:$0xff] }
 0x36f   :  { %9233 = vst [vmem:[#allocation29_spill] sm:$0xff] %v6566_v16  ;;  %2082 = vmatpush.msrb.mxu2 %v6581_v48  ;;  %v6584_v16 = vld [vmem:[#allocation5 + $0x240] sm:$0xff] }
 0x370   :  { %9234 = vst [vmem:[#allocation16_spill] sm:$0xff] %v6569_v32  ;;  %2073 = vmatpush.msrb.mxu1 %v6584_v16  ;;  %v6587_v32 = vld [vmem:[#allocation5 + $0x180] sm:$0xff] }
 0x371   :  { %9235 = vst [vmem:[#allocation74_spill] sm:$0xff] %v6572_v8  ;;  %2043 = vmatpush.msrb.mxu0 %v6587_v32  ;;  %v6590_v8 = vld [vmem:[#allocation5 + $0x248] sm:$0xff] }
 0x372   :  { %9236 = vst [vmem:[#allocation17_spill] sm:$0xff] %v6575_v30  ;;  %2113 = vmatpush.msrb.mxu3 %v6590_v8  ;;  %v6593_v30 = vld [vmem:[#allocation5 + $0x188] sm:$0xff] }
 0x373   :  { %9237 = vst [vmem:[#allocation75_spill] sm:$0xff] %v6578_v28  ;;  %2083 = vmatpush.msrb.mxu2 %v6593_v30  ;;  %v6596_v28 = vld [vmem:[#allocation5 + $0x220] sm:$0xff] }
 0x374   :  { %9238 = vst [vmem:[#allocation30_spill] sm:$0xff] %v6581_v48  ;;  %2074 = vmatpush.msrb.mxu1 %v6596_v28  ;;  %v6599_v48 = vld [vmem:[#allocation5 + $0x160] sm:$0xff] }
 0x375   :  { %9239 = vst [vmem:[#allocation78_spill] sm:$0xff] %v6584_v16  ;;  %2044 = vmatpush.msrb.mxu0 %v6599_v48  ;;  %v6602_v16 = vld [vmem:[#allocation5 + $0x228] sm:$0xff] }
 0x376   :  { %9240 = vst [vmem:[#allocation33_spill] sm:$0xff] %v6587_v32  ;;  %2114 = vmatpush.msrb.mxu3 %v6602_v16  ;;  %v6605_v32 = vld [vmem:[#allocation5 + $0x168] sm:$0xff] }
 0x377   :  { %9241 = vst [vmem:[#allocation79_spill] sm:$0xff] %v6590_v8  ;;  %2084 = vmatpush.msrb.mxu2 %v6605_v32  ;;  %v6608_v8 = vld [vmem:[#allocation5 + $0x200] sm:$0xff] }
 0x378   :  { %9242 = vst [vmem:[#allocation34_spill] sm:$0xff] %v6593_v30  ;;  %2075 = vmatpush.msrb.mxu1 %v6608_v8  ;;  %v6611_v30 = vld [vmem:[#allocation5 + $0x140] sm:$0xff] }
 0x379   :  { %9243 = vst [vmem:[#allocation82_spill] sm:$0xff] %v6596_v28  ;;  %2045 = vmatpush.msrb.mxu0 %v6611_v30  ;;  %v6614_v28 = vld [vmem:[#allocation5 + $0x208] sm:$0xff] }
 0x37a   :  { %9244 = vst [vmem:[#allocation37_spill] sm:$0xff] %v6599_v48  ;;  %2115 = vmatpush.msrb.mxu3 %v6614_v28  ;;  %v6617_v48 = vld [vmem:[#allocation5 + $0x3f0] sm:$0xff] }
 0x37b   :  { %9245 = vst [vmem:[#allocation83_spill] sm:$0xff] %v6602_v16  ;;  %2140 = vmatpush.msra.mxu1 %v6617_v48  ;;  %v6620_v16 = vld [vmem:[#allocation5 + $0x3f8] sm:$0xff] }
 0x37c   :  { %9246 = vst [vmem:[#allocation38_spill] sm:$0xff] %v6605_v32  ;;  %2180 = vmatpush.msra.mxu3 %v6620_v16  ;;  %v6623_v32 = vld [vmem:[#allocation5 + $0x148] sm:$0xff] }
 0x37d   :  { %9247 = vst [vmem:[#allocation86_spill] sm:$0xff] %v6608_v8  ;;  %2085 = vmatpush.msrb.mxu2 %v6623_v32  ;;  %v6626_v8 = vld [vmem:[#allocation5 + $0x3d0] sm:$0xff] }
 0x37e   :  { %9248 = vst [vmem:[#allocation41_spill] sm:$0xff] %v6611_v30  ;;  %2141 = vmatpush.msra.mxu1 %v6626_v8  ;;  %v6629_v30 = vld [vmem:[#allocation5 + $0x120] sm:$0xff] }
 0x37f   :  { %9249 = vst [vmem:[#allocation45_spill] sm:$0xff] %v6614_v28  ;;  %2046 = vmatpush.msrb.mxu0 %v6629_v30  ;;  %v6632_v28 = vld [vmem:[#allocation5 + $0x3d8] sm:$0xff] }
 0x380   :  { %9250 = vst [vmem:[#allocation46_spill] sm:$0xff] %v6617_v48  ;;  %2181 = vmatpush.msra.mxu3 %v6632_v28  ;;  %v6635_v48 = vld [vmem:[#allocation5 + $0x128] sm:$0xff] }
 0x381   :  { %9251 = vst [vmem:[#allocation42_spill] sm:$0xff] %v6620_v16  ;;  %2086 = vmatpush.msrb.mxu2 %v6635_v48  ;;  %v6638_v16 = vld [vmem:[#allocation5 + $0x3b0] sm:$0xff] }
 0x382   :  { %9252 = vst [vmem:[#allocation49_spill] sm:$0xff] %v6623_v32  ;;  %2142 = vmatpush.msra.mxu1 %v6638_v16  ;;  %v6641_v32 = vld [vmem:[#allocation5 + $0x100] sm:$0xff] }
 0x383   :  { %9253 = vst [vmem:[#allocation89_spill] sm:$0xff] %v6626_v8  ;;  %2047 = vmatpush.msrb.mxu0 %v6641_v32  ;;  %v6644_v8 = vld [vmem:[#allocation5 + $0x3b8] sm:$0xff] }
 0x384   :  { %9254 = vst [vmem:[#allocation52_spill] sm:$0xff] %v6629_v30  ;;  %2182 = vmatpush.msra.mxu3 %v6644_v8  ;;  %v6647_v30 = vld [vmem:[#allocation5 + $0x108] sm:$0xff] }
 0x385   :  { %9255 = vst [vmem:[#allocation50_spill] sm:$0xff] %v6632_v28  ;;  %2087 = vmatpush.msrb.mxu2 %v6647_v30  ;;  %v6650_v28 = vld [vmem:[#allocation5 + $0x390] sm:$0xff] }
 0x386   :  { %9256 = vst [vmem:[#allocation53_spill] sm:$0xff] %v6635_v48  ;;  %2143 = vmatpush.msra.mxu1 %v6650_v28  ;;  %v6653_v48 = vld [vmem:[#allocation5 + $0xe0] sm:$0xff] }
 0x387   :  { %9257 = vst [vmem:[#allocation56_spill] sm:$0xff] %v6638_v16  ;;  %2048 = vmatpush.msrb.mxu0 %v6653_v48  ;;  %v6656_v16 = vld [vmem:[#allocation5 + $0x398] sm:$0xff] }
 0x388   :  { %9258 = vst [vmem:[#allocation60_spill] sm:$0xff] %v6641_v32  ;;  %2183 = vmatpush.msra.mxu3 %v6656_v16  ;;  %v6659_v32 = vld [vmem:[#allocation5 + $0xe8] sm:$0xff] }
 0x389   :  { %9259 = vst [vmem:[#allocation57_spill] sm:$0xff] %v6644_v8  ;;  %2088 = vmatpush.msrb.mxu2 %v6659_v32  ;;  %v6662_v8 = vld [vmem:[#allocation5 + $0x370] sm:$0xff] }
 0x38a   :  { %9260 = vst [vmem:[#allocation61_spill] sm:$0xff] %v6647_v30  ;;  %2144 = vmatpush.msra.mxu1 %v6662_v8  ;;  %v6665_v30 = vld [vmem:[#allocation5 + $0xc0] sm:$0xff] }
 0x38b   :  { %9261 = vst [vmem:[#allocation64_spill] sm:$0xff] %v6650_v28  ;;  %2049 = vmatpush.msrb.mxu0 %v6665_v30  ;;  %v6668_v28 = vld [vmem:[#allocation5 + $0x378] sm:$0xff] }
 0x38c   :  { %9262 = vst [vmem:[#allocation68_spill] sm:$0xff] %v6653_v48  ;;  %2184 = vmatpush.msra.mxu3 %v6668_v28  ;;  %v6671_v48 = vld [vmem:[#allocation5 + $0xc8] sm:$0xff] }
 0x38d   :  { %9263 = vst [vmem:[#allocation65_spill] sm:$0xff] %v6656_v16  ;;  %2089 = vmatpush.msrb.mxu2 %v6671_v48  ;;  %v6674_v16 = vld [vmem:[#allocation5 + $0x350] sm:$0xff] }
 0x38e   :  { %9264 = vst [vmem:[#allocation69_spill] sm:$0xff] %v6659_v32  ;;  %2145 = vmatpush.msra.mxu1 %v6674_v16  ;;  %v6677_v32 = vld [vmem:[#allocation5 + $0xa0] sm:$0xff] }
 0x38f   :  { %9265 = vst [vmem:[#allocation72_spill] sm:$0xff] %v6662_v8  ;;  %2050 = vmatpush.msrb.mxu0 %v6677_v32  ;;  %v6680_v8 = vld [vmem:[#allocation5 + $0x358] sm:$0xff] }
 0x390   :  { %9266 = vst [vmem:[#allocation76_spill] sm:$0xff] %v6665_v30  ;;  %2185 = vmatpush.msra.mxu3 %v6680_v8  ;;  %v6683_v30 = vld [vmem:[#allocation5 + $0xa8] sm:$0xff] }
 0x391   :  { %9267 = vst [vmem:[#allocation73_spill] sm:$0xff] %v6668_v28  ;;  %2090 = vmatpush.msrb.mxu2 %v6683_v30  ;;  %v6686_v28 = vld [vmem:[#allocation5 + $0x330] sm:$0xff] }
 0x392   :  { %9268 = vst [vmem:[#allocation77_spill] sm:$0xff] %v6671_v48  ;;  %2146 = vmatpush.msra.mxu1 %v6686_v28  ;;  %v6689_v48 = vld [vmem:[#allocation5 + $0x80] sm:$0xff] }
 0x393   :  { %9269 = vst [vmem:[#allocation80_spill] sm:$0xff] %v6674_v16  ;;  %2051 = vmatpush.msrb.mxu0 %v6689_v48  ;;  %v6692_v16 = vld [vmem:[#allocation5 + $0x338] sm:$0xff] }
 0x394   :  { %9270 = vst [vmem:[#allocation84_spill] sm:$0xff] %v6677_v32  ;;  %2186 = vmatpush.msra.mxu3 %v6692_v16  ;;  %v6695_v32 = vld [vmem:[#allocation5 + $0x88] sm:$0xff] }
 0x395   :  { %9271 = vst [vmem:[#allocation81_spill] sm:$0xff] %v6680_v8  ;;  %2091 = vmatpush.msrb.mxu2 %v6695_v32  ;;  %v6698_v8 = vld [vmem:[#allocation5 + $0x310] sm:$0xff] }
 0x396   :  { %9272 = vst [vmem:[#allocation85_spill] sm:$0xff] %v6683_v30  ;;  %2147 = vmatpush.msra.mxu1 %v6698_v8  ;;  %v6701_v30 = vld [vmem:[#allocation5 + $0x60] sm:$0xff] }
 0x397   :  { %9273 = vst [vmem:[#allocation87_spill] sm:$0xff] %v6686_v28  ;;  %2052 = vmatpush.msrb.mxu0 %v6701_v30  ;;  %v6704_v28 = vld [vmem:[#allocation5 + $0x318] sm:$0xff] }
 0x398   :  { %9274 = vst [vmem:[#allocation90_spill] sm:$0xff] %v6689_v48  ;;  %2187 = vmatpush.msra.mxu3 %v6704_v28  ;;  %v6707_v48 = vld [vmem:[#allocation5 + $0x68] sm:$0xff] }
 0x399   :  { %9275 = vst [vmem:[#allocation88_spill] sm:$0xff] %v6692_v16  ;;  %2092 = vmatpush.msrb.mxu2 %v6707_v48  ;;  %v6710_v16 = vld [vmem:[#allocation5 + $0x2f0] sm:$0xff] }
 0x39a   :  { %9276 = vst [vmem:[#allocation91_spill] sm:$0xff] %v6695_v32  ;;  %2148 = vmatpush.msra.mxu1 %v6710_v16  ;;  %v6713_v32 = vld [vmem:[#allocation5 + $0x40] sm:$0xff] }
 0x39b   :  { %9277 = vst [vmem:[#allocation92_spill] sm:$0xff] %v6698_v8  ;;  %2053 = vmatpush.msrb.mxu0 %v6713_v32  ;;  %v6716_v8 = vld [vmem:[#allocation5 + $0x2f8] sm:$0xff] }
 0x39c   :  { %9278 = vst [vmem:[#allocation94_spill] sm:$0xff] %v6701_v30  ;;  %2188 = vmatpush.msra.mxu3 %v6716_v8  ;;  %v6719_v30 = vld [vmem:[#allocation5 + $0x48] sm:$0xff] }
 0x39d   :  { %9279 = vst [vmem:[#allocation93_spill] sm:$0xff] %v6704_v28  ;;  %2093 = vmatpush.msrb.mxu2 %v6719_v30  ;;  %v6722_v28 = vld [vmem:[#allocation5 + $0x2d0] sm:$0xff] }
 0x39e   :  { %9280 = vst [vmem:[#allocation95_spill] sm:$0xff] %v6707_v48  ;;  %2149 = vmatpush.msra.mxu1 %v6722_v28  ;;  %v6725_v48 = vld [vmem:[#allocation5 + $0x20] sm:$0xff] }
 0x39f   :  { %9281 = vst [vmem:[#allocation96_spill] sm:$0xff] %v6710_v16  ;;  %2054 = vmatpush.msrb.mxu0 %v6725_v48  ;;  %v6728_v16 = vld [vmem:[#allocation5 + $0x2d8] sm:$0xff] }
 0x3a0   :  { %9282 = vst [vmem:[#allocation100_spill] sm:$0xff] %v6713_v32  ;;  %2189 = vmatpush.msra.mxu3 %v6728_v16  ;;  %v6731_v32 = vld [vmem:[#allocation5 + $0x28] sm:$0xff] }
 0x3a1   :  { %9283 = vst [vmem:[#allocation97_spill] sm:$0xff] %v6716_v8  ;;  %2094 = vmatpush.msrb.mxu2 %v6731_v32  ;;  %v6734_v8 = vld [vmem:[#allocation5 + $0x2b0] sm:$0xff] }
 0x3a2   :  { %9284 = vst [vmem:[#allocation103_spill] sm:$0xff] %v6719_v30  ;;  %2150 = vmatpush.msra.mxu1 %v6734_v8  ;;  %v6737_v30 = vld [vmem:[#allocation5] sm:$0xff] }
 0x3a3   :  { %9285 = vst [vmem:[#allocation104_spill] sm:$0xff] %v6722_v28  ;;  %2055 = vmatpush.msrb.mxu0 %v6737_v30  ;;  %v6740_v28 = vld [vmem:[#allocation5 + $0x2b8] sm:$0xff] }
 0x3a4   :  { %9286 = vst [vmem:[#allocation108_spill] sm:$0xff] %v6725_v48  ;;  %2190 = vmatpush.msra.mxu3 %v6740_v28  ;;  %v6743_v48 = vld [vmem:[#allocation5 + $0x8] sm:$0xff] }
 0x3a5   :  { %9287 = vst [vmem:[#allocation107_spill] sm:$0xff] %v6728_v16  ;;  %2095 = vmatpush.msrb.mxu2 %v6743_v48  ;;  %v6746_v16 = vld [vmem:[#allocation5 + $0x290] sm:$0xff] }
 0x3a6   :  { %9288 = vst [vmem:[#allocation109_spill] sm:$0xff] %v6731_v32  ;;  %2151 = vmatpush.msra.mxu1 %v6746_v16  ;;  %v6749_v32 = vld [vmem:[#allocation5 + $0x1f0] sm:$0xff] }
 0x3a7   :  { %9289 = vst [vmem:[#allocation110_spill] sm:$0xff] %v6734_v8  ;;  %2120 = vmatpush.msra.mxu0 %v6749_v32  ;;  %v6752_v8 = vld [vmem:[#allocation5 + $0x298] sm:$0xff] }
 0x3a8   :  { %9290 = vst [vmem:[#allocation112_spill] sm:$0xff] %v6737_v30  ;;  %2191 = vmatpush.msra.mxu3 %v6752_v8  ;;  %v6755_v30 = vld [vmem:[#allocation5 + $0x1f8] sm:$0xff] }
 0x3a9   :  { %9291 = vst [vmem:[#allocation111_spill] sm:$0xff] %v6740_v28  ;;  %2160 = vmatpush.msra.mxu2 %v6755_v30  ;;  %v6758_v28 = vld [vmem:[#allocation5 + $0x270] sm:$0xff] }
 0x3aa   :  { %9292 = vst [vmem:[#allocation113_spill] sm:$0xff] %v6743_v48  ;;  %2152 = vmatpush.msra.mxu1 %v6758_v28  ;;  %v6761_v48 = vld [vmem:[#allocation5 + $0x1d0] sm:$0xff] }
 0x3ab   :  { %9293 = vst [vmem:[#allocation114_spill] sm:$0xff] %v6746_v16  ;;  %2121 = vmatpush.msra.mxu0 %v6761_v48  ;;  %v6764_v16 = vld [vmem:[#allocation5 + $0x278] sm:$0xff] }
 0x3ac   :  { %9294 = vst [vmem:[#allocation116_spill] sm:$0xff] %v6749_v32  ;;  %2192 = vmatpush.msra.mxu3 %v6764_v16  ;;  %v6767_v32 = vld [vmem:[#allocation5 + $0x1d8] sm:$0xff] }
 0x3ad   :  { %9295 = vst [vmem:[#allocation115_spill] sm:$0xff] %v6752_v8  ;;  %2161 = vmatpush.msra.mxu2 %v6767_v32  ;;  %v6770_v8 = vld [vmem:[#allocation5 + $0x250] sm:$0xff] }
 0x3ae   :  { %9296 = vst [vmem:[#allocation117_spill] sm:$0xff] %v6755_v30  ;;  %2153 = vmatpush.msra.mxu1 %v6770_v8  ;;  %v6773_v30 = vld [vmem:[#allocation5 + $0x1b0] sm:$0xff] }
 0x3af   :  { %9297 = vst [vmem:[#allocation118_spill] sm:$0xff] %v6758_v28  ;;  %2122 = vmatpush.msra.mxu0 %v6773_v30  ;;  %v6776_v28 = vld [vmem:[#allocation5 + $0x258] sm:$0xff]  ;;  %v1743_v42 = vpop.f32.mrf.mxu3 }
 0x3b0   :  { %9298 = vst [vmem:[#allocation120_spill] sm:$0xff] %v6761_v48  ;;  %2193 = vmatpush.msra.mxu3 %v6776_v28  ;;  %v6779_v48 = vld [vmem:[#allocation5 + $0x1b8] sm:$0xff] }
 0x3b1   :  { %9299 = vst [vmem:[#allocation119_spill] sm:$0xff] %v6764_v16  ;;  %2162 = vmatpush.msra.mxu2 %v6779_v48  ;;  %v6782_v16 = vld [vmem:[#allocation5 + $0x230] sm:$0xff] }
 0x3b2   :  { %9300 = vst [vmem:[#allocation121_spill] sm:$0xff] %v6767_v32  ;;  %2154 = vmatpush.msra.mxu1 %v6782_v16  ;;  %v6785_v32 = vld [vmem:[#allocation5 + $0x190] sm:$0xff] }
 0x3b3   :  { %9301 = vst [vmem:[#allocation122_spill] sm:$0xff] %v6770_v8  ;;  %2123 = vmatpush.msra.mxu0 %v6785_v32  ;;  %v6788_v8 = vld [vmem:[#allocation5 + $0x238] sm:$0xff] }
 0x3b4   :  { %9302 = vst [vmem:[#allocation124_spill] sm:$0xff] %v6773_v30  ;;  %2194 = vmatpush.msra.mxu3 %v6788_v8  ;;  %v6791_v30 = vld [vmem:[#allocation5 + $0x198] sm:$0xff] }
 0x3b5   :  { %9303 = vst [vmem:[#allocation123_spill] sm:$0xff] %v6776_v28  ;;  %2163 = vmatpush.msra.mxu2 %v6791_v30  ;;  %v6794_v28 = vld [vmem:[#allocation5 + $0x210] sm:$0xff] }
 0x3b6   :  { %9304 = vst [vmem:[#allocation125_spill] sm:$0xff] %v6779_v48  ;;  %2155 = vmatpush.msra.mxu1 %v6794_v28  ;;  %v6797_v48 = vld [vmem:[#allocation5 + $0x170] sm:$0xff] }
 0x3b7   :  { %9305 = vst [vmem:[#allocation126_spill] sm:$0xff] %v6782_v16  ;;  %2124 = vmatpush.msra.mxu0 %v6797_v48  ;;  %v6800_v16 = vld [vmem:[#allocation5 + $0x218] sm:$0xff] }
 0x3b8   :  { %9306 = vst [vmem:[#allocation128_spill] sm:$0xff] %v6785_v32  ;;  %2195 = vmatpush.msra.mxu3 %v6800_v16  ;;  %v6803_v32 = vld [vmem:[#allocation5 + $0x178] sm:$0xff] }
 0x3b9   :  { %9307 = vst [vmem:[#allocation127_spill] sm:$0xff] %v6788_v8  ;;  %2164 = vmatpush.msra.mxu2 %v6803_v32  ;;  %v6806_v8 = vld [vmem:[#allocation5 + $0x150] sm:$0xff] }
 0x3ba   :  { %9308 = vst [vmem:[#allocation129_spill] sm:$0xff] %v6791_v30  ;;  %2125 = vmatpush.msra.mxu0 %v6806_v8  ;;  %v6809_v30 = vld [vmem:[#allocation5 + $0x158] sm:$0xff] }
 0x3bb   :  { %9309 = vst [vmem:[#allocation130_spill] sm:$0xff] %v6794_v28  ;;  %2165 = vmatpush.msra.mxu2 %v6809_v30  ;;  %v6812_v28 = vld [vmem:[#allocation5 + $0x130] sm:$0xff] }
 0x3bc   :  { %9310 = vst [vmem:[#allocation132_spill] sm:$0xff] %v6797_v48  ;;  %2126 = vmatpush.msra.mxu0 %v6812_v28  ;;  %v6815_v48 = vld [vmem:[#allocation5 + $0x138] sm:$0xff] }
 0x3bd   :  { %9311 = vst [vmem:[#allocation131_spill] sm:$0xff] %v6800_v16  ;;  %2166 = vmatpush.msra.mxu2 %v6815_v48  ;;  %v6818_v16 = vld [vmem:[#allocation5 + $0x110] sm:$0xff] }
 0x3be   :  { %9312 = vst [vmem:[#allocation133_spill] sm:$0xff] %v6803_v32  ;;  %2127 = vmatpush.msra.mxu0 %v6818_v16  ;;  %v6821_v32 = vld [vmem:[#allocation5 + $0x118] sm:$0xff] }
 0x3bf   :  { %9313 = vst [vmem:[#allocation134_spill] sm:$0xff] %v6806_v8  ;;  %2167 = vmatpush.msra.mxu2 %v6821_v32  ;;  %v6824_v8 = vld [vmem:[#allocation5 + $0xf0] sm:$0xff] }
 0x3c0   :  { %9314 = vst [vmem:[#allocation135_spill] sm:$0xff] %v6809_v30  ;;  %2128 = vmatpush.msra.mxu0 %v6824_v8  ;;  %v6827_v30 = vld [vmem:[#allocation5 + $0xf8] sm:$0xff] }
 0x3c1   :  { %9315 = vst [vmem:[#allocation136_spill] sm:$0xff] %v6812_v28  ;;  %2168 = vmatpush.msra.mxu2 %v6827_v30  ;;  %v6830_v28 = vld [vmem:[#allocation5 + $0xd0] sm:$0xff] }
 0x3c2   :  { %9316 = vst [vmem:[#allocation137_spill] sm:$0xff] %v6815_v48  ;;  %2129 = vmatpush.msra.mxu0 %v6830_v28  ;;  %v6833_v48 = vld [vmem:[#allocation5 + $0xd8] sm:$0xff]  ;;  %v1683_v17 = vpop.f32.mrf.mxu0 }
 0x3c3   :  { %9317 = vst [vmem:[#allocation138_spill] sm:$0xff] %v6818_v16  ;;  %2169 = vmatpush.msra.mxu2 %v6833_v48  ;;  %v6836_v16 = vld [vmem:[#allocation5 + $0xb0] sm:$0xff] }
 0x3c4   :  { %9318 = vst [vmem:[#allocation139_spill] sm:$0xff] %v6821_v32  ;;  %2130 = vmatpush.msra.mxu0 %v6836_v16  ;;  %v6839_v32 = vld [vmem:[#allocation5 + $0xb8] sm:$0xff] }
 0x3c5   :  { %9319 = vst [vmem:[#allocation140_spill] sm:$0xff] %v6824_v8  ;;  %2170 = vmatpush.msra.mxu2 %v6839_v32  ;;  %v6842_v8 = vld [vmem:[#allocation5 + $0x90] sm:$0xff] }
 0x3c6   :  { %9320 = vst [vmem:[#allocation141_spill] sm:$0xff] %v6827_v30  ;;  %2131 = vmatpush.msra.mxu0 %v6842_v8  ;;  %v6845_v30 = vld [vmem:[#allocation5 + $0x98] sm:$0xff] }
 0x3c7   :  { %9321 = vst [vmem:[#allocation142_spill] sm:$0xff] %v6830_v28  ;;  %2171 = vmatpush.msra.mxu2 %v6845_v30  ;;  %v6848_v28 = vld [vmem:[#allocation5 + $0x70] sm:$0xff] }
 0x3c8   :  { %9322 = vst [vmem:[#allocation143_spill] sm:$0xff] %v6833_v48  ;;  %2132 = vmatpush.msra.mxu0 %v6848_v28  ;;  %v6851_v48 = vld [vmem:[#allocation5 + $0x78] sm:$0xff]  ;;  %v1723_v26 = vpop.f32.mrf.mxu2 }
 0x3c9   :  { %9323 = vst [vmem:[#allocation144_spill] sm:$0xff] %v6836_v16  ;;  %2172 = vmatpush.msra.mxu2 %v6851_v48  ;;  %v6854_v16 = vld [vmem:[#allocation5 + $0x50] sm:$0xff] }
 0x3ca   :  { %9324 = vst [vmem:[#allocation145_spill] sm:$0xff] %v6839_v32  ;;  %2133 = vmatpush.msra.mxu0 %v6854_v16  ;;  %v6857_v32 = vld [vmem:[#allocation5 + $0x58] sm:$0xff] }
 0x3cb   :  { %9325 = vst [vmem:[#allocation146_spill] sm:$0xff] %v6842_v8  ;;  %2173 = vmatpush.msra.mxu2 %v6857_v32  ;;  %v6860_v8 = vld [vmem:[#allocation5 + $0x30] sm:$0xff] }
 0x3cc   :  { %9326 = vst [vmem:[#allocation147_spill] sm:$0xff] %v6845_v30  ;;  %2134 = vmatpush.msra.mxu0 %v6860_v8  ;;  %v6863_v30 = vld [vmem:[#allocation5 + $0x38] sm:$0xff] }
 0x3cd   :  { %9327 = vst [vmem:[#allocation148_spill] sm:$0xff] %v6848_v28  ;;  %2174 = vmatpush.msra.mxu2 %v6863_v30  ;;  %v6866_v28 = vld [vmem:[#allocation5 + $0x10] sm:$0xff] }
 0x3ce   :  { %9328 = vst [vmem:[#allocation149_spill] sm:$0xff] %v6851_v48  ;;  %2135 = vmatpush.msra.mxu0 %v6866_v28  ;;  %v6869_v48 = vld [vmem:[#allocation5 + $0x18] sm:$0xff] }
 0x3cf   :  { %9329 = vst [vmem:[#allocation150_spill] sm:$0xff] %v6854_v16  ;;  %2175 = vmatpush.msra.mxu2 %v6869_v48  ;;  %v1703_v16 = vpop.f32.mrf.mxu1 }
 0x3d0   :  { %9330 = vst [vmem:[#allocation151_spill] sm:$0xff] %v6857_v32  ;;  %v1704_v2 = vadd.f32 %v1703_v16, %v1683_v17  ;;  %v6872_v32 = vpop.permute.xlu2 %94  ;;  %v1823_v17 = vpop.f32.mrf.mxu3 }
 0x3d1   :  { %9331 = vst [vmem:[#allocation152_spill] sm:$0xff] %v6860_v8  ;;  %v1803_v54 = vpop.f32.mrf.mxu2 }
 0x3d2   :  { %9332 = vst [vmem:[#allocation153_spill] sm:$0xff] %v6863_v30  ;;  %v1826_v8 = vadd.f32 %v1704_v2, %v5310_v15  ;;  %v138_v30 = vmul.f32 %v9185_v58, %v6872_v32  ;;  %v140_v2 = vmul.f32 %v9188_v1, %v6872_v32  ;;  %v1824_v58 = vadd.f32 %v1823_v17, %v1803_v54 }
 0x3d3   :  { %9333 = vst [vmem:[#allocation154_spill] sm:$0xff] %v6866_v28  ;;  %v1744_v28 = vadd.f32 %v1743_v42, %v1723_v26  ;;  %v1763_v26 = vpop.f32.mrf.mxu0  ;;  %v137_v17 = vmul.f32 %v9192_v49, %v6872_v32 }
 0x3d4   :  { %9334 = vst [vmem:[#allocation155_spill] sm:$0xff] %v6869_v48  ;;  %v3458_v34 = vmul.f32 -1.442695, %v1826_v8  ;;  %v180_v31 = vadd.f32 %v9187_v46, %v138_v30  ;;  %v1829_v42 = vadd.f32 %v1824_v58, %v9189_v35  ;;  %v182_v30 = vadd.f32 %v9190_v45, %v140_v2 }
 0x3d5   :  { %v1827_v48 = vadd.f32 %v1744_v28, %v9186_v57 }
 0x3d6   :  { %3607 = vpow2.f32 %v3458_v34 }
 0x3d7   :  { %v1783_v18 = vpop.f32.mrf.mxu1  ;;  %v3459_v14 = vmul.f32 -1.442695, %v1827_v48 }
 0x3d8   :  { %v1970_v48 = vpop.f32.mrf.mxu3 }
 0x3d9   :  { %3609 = vpow2.f32 %v3459_v14  ;;  %v1976_v46 = vadd.f32 %v1970_v48, %v182_v30  ;;  %v179_v30 = vadd.f32 %v9195_v50, %v137_v17 }
 0x3dc   :  { %v3608_v12 = vpop.eup %3607 }
 0x3dd   :  { %v1833_v4 = vadd.f32 1.0, %v3608_v12  ;;  %v1784_v12 = vadd.f32 %v1783_v18, %v1763_v26 }
 0x3df   :  { %v1930_v62 = vpop.f32.mrf.mxu1  ;;  %3611 = vrcp.f32 %v1833_v4  ;;  %v3610_v34 = vpop.eup %3609  ;;  %v1828_v54 = vadd.f32 %v1784_v12, %v9191_v5  ;;  %v1845_v18 = vand.u32 2147483648, %v1833_v4  ;;  %vm1839_vm5 = vweird.f32 %v1833_v4 }
 0x3e0   :  { %v1974_v16 = vadd.f32 %v1930_v62, %v180_v31  ;;  %v1852_v28 = vadd.f32 1.0, %v3610_v34  ;;  %v3460_v62 = vmul.f32 -1.442695, %v1829_v42 }
 0x3e1   :  { %v1846_v17 = vor.u32 1.1754944e-38, %v1845_v18 }
 0x3e2   :  { %v3462_v8 = vmul.f32 -1.442695, %v1974_v16  ;;  %v3463_v16 = vmul.f32 -1.442695, %v1976_v46  ;;  %v1864_v12 = vand.u32 2147483648, %v1852_v28  ;;  %vm1858_vm8 = vweird.f32 %v1852_v28 }
 0x3e3   :  { %v1862_v46 = vand.u32 2147483647, %v1852_v28 }
 0x3e4   :  { %3613 = vpow2.f32 %v3462_v8 }
 0x3e5   :  { %v3612_v31 = vpop.eup %3611  ;;  %3615 = vrcp.f32 %v1852_v28  ;;  %vm1863_vm11 = vcmp.eq.f32.partialorder %v1862_v46, 8.507059e+37 }
 0x3e6   :  { %v1835_v14 = vmul.f32 %v3612_v31, %v1833_v4  ;;  %3617 = vpow2.f32 %v3460_v62  ;;  %vm1840_vm4 = vweird.f32 %v3612_v31  ;;  %v1843_v62 = vand.u32 2147483647, %v1833_v4 }
 0x3e7   :  { %3619 = vtanh.f32 %v1828_v54  ;;  %vm6889_vm6 = vmor %vm1839_vm5, %vm1840_vm4  ;;  %v1910_v54 = vpop.f32.mrf.mxu0 }
 0x3e8   :  { %v1836_v1 = vsub.f32 1.0, %v1835_v14  ;;  %3621 = vpow2.f32 %v3463_v16  ;;  %vm1844_vm9 = vcmp.eq.f32.partialorder %v1843_v62, 8.507059e+37 }
 0x3ea   :  { %v3614_v57 = vpop.eup %3613  ;;  %v1837_v58 = vmul.f32 %v3612_v31, %v1836_v1 }
 0x3eb   :  { %v3616_v2 = vpop.eup %3615  ;;  %v6886_v42 = vadd.f32 1.0, %v3614_v57 }
 0x3ec   :  { %v3618_v34 = vpop.eup %3617  ;;  %v1854_v8 = vmul.f32 %v3616_v2, %v1852_v28  ;;  %v1838_v45 = vadd.f32 %v3612_v31, %v1837_v58  ;;  %vm1859_vm7 = vweird.f32 %v3616_v2  ;;  %v1973_v58 = vadd.f32 %v1910_v54, %v179_v30 }
 0x3ed   :  { %v1872_v26 = vadd.f32 1.0, %v3618_v34  ;;  %v3620_v16 = vpop.eup %3619  ;;  %vm1860_vm10 = vmor %vm1858_vm8, %vm1859_vm7  ;;  %v1865_v34 = vor.u32 1.1754944e-38, %v1864_v12  ;;  %vm2005_vm1 = vweird.f32 %v6886_v42 }
 0x3ee   :  { %v1855_v48 = vsub.f32 1.0, %v1854_v8  ;;  %v1842_v57 = vsel %vm6889_vm6, %v3612_v31, %v1838_v45  ;;  %v3461_v50 = vmul.f32 -1.442695, %v1973_v58  ;;  %v3622_v49 = vpop.eup %3621 }
 0x3ef   :  { %3623 = vrcp.f32 %v1872_v26  ;;  %v1847_v8 = vsel %vm1844_vm9, %v1846_v17, %v1842_v57  ;;  %v6903_v1 = vadd.f32 1.0, %v3622_v49  ;;  %v1884_v46 = vand.u32 2147483648, %v1872_v26 }
 0x3f0   :  { %v1856_v14 = vmul.f32 %v3616_v2, %v1855_v48  ;;  %3625 = vrcp.f32 %v6886_v42  ;;  %v1889_v18 = vmul.f32 %v3620_v16, %v1847_v8  ;;  %vm1878_vm13 = vweird.f32 %v1872_v26  ;;  %v1950_v16 = vpop.f32.mrf.mxu2 }
 0x3f1   :  { %3627 = vpow2.f32 %v3461_v50  ;;  %v1882_v50 = vand.u32 2147483647, %v1872_v26  ;;  %v1885_v49 = vor.u32 1.1754944e-38, %v1884_v46  ;;  %vm2025_vm9 = vweird.f32 %v6903_v1 }
 0x3f2   :  { %v1857_v4 = vadd.f32 %v3616_v2, %v1856_v14 }
 0x3f3   :  { %vm1883_vm15 = vcmp.eq.f32.partialorder %v1882_v50, 8.507059e+37 }
 0x3f4   :  { %v1861_v5 = vsel %vm1860_vm10, %v3616_v2, %v1857_v4 }
 0x3f5   :  { %v3624_v48 = vpop.eup %3623  ;;  %v1866_v35 = vsel %vm1863_vm11, %v1865_v34, %v1861_v5 }
 0x3f6   :  { %v6896_v45 = vpop.eup %3625  ;;  %v1888_v31 = vmul.f32 %v1866_v35, %v6280_v55  ;;  %v1874_v30 = vmul.f32 %v3624_v48, %v1872_v26  ;;  %vm1879_vm12 = vweird.f32 %v3624_v48  ;;  %v139_v55 = vmul.f32 %v5031_v43, %v6872_v32 }
 0x3f7   :  { %v2001_v12 = vmul.f32 %v6896_v45, %v6886_v42  ;;  %v3628_v5 = vpop.eup %3627  ;;  %vm1880_vm14 = vmor %vm1878_vm13, %vm1879_vm12  ;;  %vm2006_vm0 = vweird.f32 %v6896_v45 }
 0x3f8   :  { %v6899_v28 = vadd.f32 %v1889_v18, %v1888_v31  ;;  %v1875_v62 = vsub.f32 1.0, %v1874_v30  ;;  %v1980_v14 = vadd.f32 1.0, %v3628_v5  ;;  %v181_v8 = vadd.f32 %v5057_v63, %v139_v55  ;;  %vm6924_vm2 = vmor %vm2005_vm1, %vm2006_vm0  ;;  %v9339_v55 = vld [vmem:[#allocation22_spill] sm:$0xff] }
 0x3f9   :  { %v2002_v35 = vsub.f32 1.0, %v2001_v12  ;;  %v2011_v30 = vand.u32 2147483648, %v6886_v42 }
 0x3fa   :  { %3629 = vtanh.f32 %v6899_v28  ;;  %v1876_v2 = vmul.f32 %v3624_v48, %v1875_v62  ;;  %v1975_v18 = vadd.f32 %v1950_v16, %v181_v8  ;;  %vm1986_vm4 = vweird.f32 %v1980_v14  ;;  %v7028_v16 = vld [vmem:[#allocation3 + $0x110] sm:$0xff] }
 0x3fb   :  { %3631 = vrcp.f32 %v6903_v1  ;;  %v2003_v4 = vmul.f32 %v6896_v45, %v2002_v35  ;;  %v2012_v5 = vor.u32 1.1754944e-38, %v2011_v30  ;;  %v7036_v8 = vld [vmem:[#allocation3 + $0xf0] sm:$0xff]  ;;  %v9349_v30 = vld [vmem:[#allocation36_spill] sm:$0xff] }
 0x3fc   :  { %v1877_v57 = vadd.f32 %v3624_v48, %v1876_v2  ;;  %3633 = vrcp.f32 %v1980_v14  ;;  %v1992_v2 = vand.u32 2147483648, %v1980_v14 }
 0x3fd   :  { %3635 = vtanh.f32 %v1975_v18  ;;  %v7044_v18 = vld [vmem:[#allocation3 + $0xd0] sm:$0xff] }
 0x3fe   :  { %v1881_v54 = vsel %vm1880_vm14, %v3624_v48, %v1877_v57  ;;  %v2004_v48 = vadd.f32 %v6896_v45, %v2003_v4  ;;  %v7024_v4 = vld [vmem:[#allocation3 + $0x100] sm:$0xff] }
 0x3ff   :  { %v1886_v58 = vsel %vm1883_vm15, %v1885_v49, %v1881_v54  ;;  %v9342_v49 = vld [vmem:[#allocation25_spill] sm:$0xff] }
 0x400   :  { %v3630_v17 = vpop.eup %3629 }
 0x401   :  { %v1892_v34 = vmul.f32 %v3630_v17, %v1886_v58  ;;  %v6911_v31 = vpop.eup %3631  ;;  %v6966_v58 = vld [vmem:[#allocation3 + $0x1e0] sm:$0xff] }
 0x402   :  { %v3634_v26 = vpop.eup %3633  ;;  %v2021_v62 = vmul.f32 %v6911_v31, %v6903_v1  ;;  %vm2026_vm8 = vweird.f32 %v6911_v31 }
 0x403   :  { %2076 = vmatmul.f32.vlgmr.msrb.gmra.mxu1 %v1892_v34  ;;  %2116 = vmatmul.f32.vlgmr.msrb.gmra.mxu3 %v1892_v34  ;;  %v1982_v32 = vmul.f32 %v3634_v26, %v1980_v14  ;;  %vm1987_vm3 = vweird.f32 %v3634_v26  ;;  %vm2027_vm10 = vmor %vm2025_vm9, %vm2026_vm8 }
 0x404   :  { %2287 = vmatpush.msrb.mxu1 %v6297_v59  ;;  %2327 = vmatpush.msrb.mxu3 %v6300_v25  ;;  %v2009_v59 = vand.u32 2147483647, %v6886_v42  ;;  %v2022_v50 = vsub.f32 1.0, %v2021_v62  ;;  %vm1988_vm6 = vmor %vm1986_vm4, %vm1987_vm3  ;;  %v7052_v62 = vld [vmem:[#allocation3 + $0xb0] sm:$0xff]  ;;  %v9351_v25 = vld [vmem:[#allocation48_spill] sm:$0xff] }
 0x405   :  { %v1983_v12 = vsub.f32 1.0, %v1982_v32  ;;  %v9348_v32 = vld [vmem:[#allocation35_spill] sm:$0xff] }
 0x406   :  { %2288 = vmatpush.msrb.mxu1 %v6309_v3  ;;  %2328 = vmatpush.msrb.mxu3 %v6312_v0  ;;  %v1990_v3 = vand.u32 2147483647, %v1980_v14  ;;  %v2008_v0 = vsel %vm6924_vm2, %v6896_v45, %v2004_v48  ;;  %vm2010_vm5 = vcmp.eq.f32.partialorder %v2009_v59, 8.507059e+37  ;;  %v3636_v45 = vpop.eup %3635  ;;  %v2023_v35 = vmul.f32 %v6911_v31, %v2022_v50  ;;  %v7048_v48 = vld [vmem:[#allocation3 + $0xa0] sm:$0xff]  ;;  %v9357_v50 = vld [vmem:[#allocation10_spill] sm:$0xff] }
 0x407   :  { %v1984_v46 = vmul.f32 %v3634_v26, %v1983_v12  ;;  %v9350_v12 = vld [vmem:[#allocation44_spill] sm:$0xff]  ;;  %v7056_v59 = vld [vmem:[#allocation3 + $0x80] sm:$0xff] }
 0x408   :  { %2289 = vmatpush.msrb.mxu1 %v6322_v60  ;;  %2329 = vmatpush.msrb.mxu3 %v6325_v41  ;;  %v1993_v60 = vor.u32 1.1754944e-38, %v1992_v2  ;;  %v2013_v41 = vsel %vm2010_vm5, %v2012_v5, %v2008_v0  ;;  %vm1991_vm7 = vcmp.eq.f32.partialorder %v1990_v3, 8.507059e+37  ;;  %v9352_v2 = vld [vmem:[#allocation40_spill] sm:$0xff]  ;;  %v9354_v3 = vld [vmem:[#allocation39_spill] sm:$0xff]  ;;  %v9355_v0 = vld [vmem:[#allocation9_spill] sm:$0xff] }
 0x409   :  { %v1985_v42 = vadd.f32 %v3634_v26, %v1984_v46  ;;  %v9353_v46 = vld [vmem:[#allocation54_spill] sm:$0xff]  ;;  %v9356_v5 = vld [vmem:[#allocation43_spill] sm:$0xff] }
 0x40a   :  { %2290 = vmatpush.msrb.mxu1 %v6332_v27  ;;  %2330 = vmatpush.msrb.mxu3 %v6335_v39  ;;  %v2035_v39 = vmul.f32 %v2013_v41, %v6359_v20  ;;  %v9360_v41 = vld [vmem:[#allocation51_spill] sm:$0xff] }
 0x40b   :  { %2156 = vmatmul.f32.vlgmr.msra.gmra.mxu1 %v1892_v34  ;;  %2196 = vmatmul.f32.vlgmr.msra.gmra.mxu3 %v1892_v34  ;;  %v1989_v57 = vsel %vm1988_vm6, %v3634_v26, %v1985_v42  ;;  %v7032_v34 = vld [vmem:[#allocation3 + $0xe0] sm:$0xff]  ;;  %v9347_v26 = vld [vmem:[#allocation32_spill] sm:$0xff]  ;;  %v9358_v42 = vld [vmem:[#allocation47_spill] sm:$0xff] }
 0x40c   :  { %2291 = vmatpush.msrb.mxu1 %v6339_v51  ;;  %2331 = vmatpush.msrb.mxu3 %v6342_v7  ;;  %v1994_v27 = vsel %vm1991_vm7, %v1993_v60, %v1989_v57  ;;  %v2024_v7 = vadd.f32 %v6911_v31, %v2023_v35  ;;  %v9359_v60 = vld [vmem:[#allocation11_spill] sm:$0xff]  ;;  %v9361_v57 = vld [vmem:[#allocation12_spill] sm:$0xff]  ;;  %v9363_v35 = vld [vmem:[#allocation13_spill] sm:$0xff] }
 0x40d   :  { %v2036_v14 = vmul.f32 %v3636_v45, %v1994_v27  ;;  %v9362_v45 = vld [vmem:[#allocation55_spill] sm:$0xff]  ;;  %v9364_v27 = vld [vmem:[#allocation58_spill] sm:$0xff] }
 0x40e   :  { %2292 = vmatpush.msrb.mxu1 %v6346_v61  ;;  %2332 = vmatpush.msrb.mxu3 %v6349_v56  ;;  %v2031_v61 = vand.u32 2147483648, %v6903_v1  ;;  %v2029_v56 = vand.u32 2147483647, %v6903_v1  ;;  %v2028_v20 = vsel %vm2027_vm10, %v6911_v31, %v2024_v7  ;;  %v7040_v31 = vld [vmem:[#allocation3 + $0xc0] sm:$0xff]  ;;  %v9367_v7 = vld [vmem:[#allocation63_spill] sm:$0xff] }
 0x40f   :  { %v6943_v51 = vadd.f32 %v2036_v14, %v2035_v39  ;;  %v9365_v39 = vld [vmem:[#allocation66_spill] sm:$0xff]  ;;  %v9366_v14 = vld [vmem:[#allocation59_spill] sm:$0xff] }
 0x410   :  { %2293 = vmatpush.msrb.mxu1 %v6353_v19  ;;  %2333 = vmatpush.msrb.mxu3 %v6356_v23  ;;  %v9340_v19 = vld [vmem:[#allocation23_spill] sm:$0xff]  ;;  %v9341_v23 = vld [vmem:[#allocation24_spill] sm:$0xff]  ;;  %vm2030_vm11 = vcmp.eq.f32.partialorder %v2029_v56, 8.507059e+37 }
 0x411   :  { %3637 = vtanh.f32 %v6943_v51  ;;  %v9370_v56 = vld [vmem:[#allocation71_spill] sm:$0xff] }
 0x412   :  { %2294 = vmatpush.msrb.mxu1 %v6363_v6  ;;  %2334 = vmatpush.msrb.mxu3 %v9339_v55  ;;  %v2032_v6 = vor.u32 1.1754944e-38, %v2031_v61  ;;  %v9368_v55 = vld [vmem:[#allocation62_spill] sm:$0xff] }
 0x413   :  { %v9369_v61 = vld [vmem:[#allocation70_spill] sm:$0xff] }
 0x414   :  { %2295 = vmatpush.msrb.mxu1 %v9340_v19  ;;  %2335 = vmatpush.msrb.mxu3 %v9341_v23  ;;  %v2033_v17 = vsel %vm2030_vm11, %v2032_v6, %v2028_v20  ;;  %v9371_v19 = vld [vmem:[#allocation67_spill] sm:$0xff]  ;;  %v9372_v23 = vld [vmem:[#allocation29_spill] sm:$0xff]  ;;  %v9373_v20 = vld [vmem:[#allocation14_spill] sm:$0xff] }
 0x415   :  { %v9375_v6 = vld [vmem:[#allocation15_spill] sm:$0xff] }
 0x416   :  { %2296 = vmatpush.msrb.mxu1 %v9342_v49  ;;  %2336 = vmatpush.msrb.mxu3 %v6383_v29  ;;  %v6969_v29 = vld [vmem:[#allocation3 + $0x1f0] sm:$0xff]  ;;  %v9374_v49 = vld [vmem:[#allocation74_spill] sm:$0xff] }
 0x417   :  { %v3638_v54 = vpop.eup %3637 }
 0x418   :  { %2297 = vmatpush.msrb.mxu1 %v6386_v21  ;;  %2337 = vmatpush.msrb.mxu3 %v6389_v11  ;;  %v6960_v1 = vmul.f32 %v3638_v54, %v2033_v17  ;;  %v6974_v11 = vld [vmem:[#allocation3 + $0x1c0] sm:$0xff]  ;;  %v6985_v21 = vld [vmem:[#allocation3 + $0x1b0] sm:$0xff]  ;;  %v9377_v17 = vld [vmem:[#allocation16_spill] sm:$0xff] }
 0x419   :  { %v9376_v54 = vld [vmem:[#allocation75_spill] sm:$0xff] }
 0x41a   :  { %2298 = vmatpush.msrb.mxu1 %v6394_v10  ;;  %2338 = vmatpush.msrb.mxu3 %v6397_v33  ;;  %v6977_v10 = vld [vmem:[#allocation3 + $0x1d0] sm:$0xff]  ;;  %v6982_v33 = vld [vmem:[#allocation3 + $0x1a0] sm:$0xff] }
 0x41b   :  { %2056 = vmatmul.f32.vlgmr.msrb.gmra.mxu0 %v6960_v1  ;;  %2096 = vmatmul.f32.vlgmr.msrb.gmra.mxu2 %v6960_v1 }
 0x41c   :  { %2267 = vmatpush.msrb.mxu0 %v6966_v58  ;;  %2307 = vmatpush.msrb.mxu2 %v6969_v29 }
 0x41d   :  { %2299 = vmatpush.msrb.mxu1 %v6404_v53  ;;  %2339 = vmatpush.msrb.mxu3 %v6407_v47  ;;  %v6990_v53 = vld [vmem:[#allocation3 + $0x180] sm:$0xff]  ;;  %v6993_v47 = vld [vmem:[#allocation3 + $0x190] sm:$0xff] }
 0x41e   :  { %2268 = vmatpush.msrb.mxu0 %v6974_v11  ;;  %2308 = vmatpush.msrb.mxu2 %v6977_v10 }
 0x41f   :  { %2300 = vmatpush.msrb.mxu1 %v6412_v38  ;;  %2340 = vmatpush.msrb.mxu3 %v6415_v22  ;;  %v7000_v38 = vld [vmem:[#allocation3 + $0x160] sm:$0xff]  ;;  %v7004_v22 = vld [vmem:[#allocation3 + $0x170] sm:$0xff] }
 0x420   :  { %2269 = vmatpush.msrb.mxu0 %v6982_v33  ;;  %2309 = vmatpush.msrb.mxu2 %v6985_v21 }
 0x421   :  { %2301 = vmatpush.msrb.mxu1 %v6420_v37  ;;  %2341 = vmatpush.msrb.mxu3 %v6423_v13  ;;  %v7008_v37 = vld [vmem:[#allocation3 + $0x140] sm:$0xff]  ;;  %v7012_v13 = vld [vmem:[#allocation3 + $0x150] sm:$0xff] }
 0x422   :  { %2270 = vmatpush.msrb.mxu0 %v6990_v53  ;;  %2310 = vmatpush.msrb.mxu2 %v6993_v47 }
 0x423   :  { %2302 = vmatpush.msrb.mxu1 %v6428_v24  ;;  %2342 = vmatpush.msrb.mxu3 %v6431_v40  ;;  %v7016_v24 = vld [vmem:[#allocation3 + $0x120] sm:$0xff]  ;;  %v7020_v40 = vld [vmem:[#allocation3 + $0x130] sm:$0xff] }
 0x424   :  { %2136 = vmatmul.f32.vlgmr.msra.gmra.mxu0 %v6960_v1  ;;  %2176 = vmatmul.f32.vlgmr.msra.gmra.mxu2 %v6960_v1 }
 0x425   :  { %2271 = vmatpush.msrb.mxu0 %v7000_v38  ;;  %2303 = vmatmul.f32.vlgmr.msrb.gmra.mxu1 %v6960_v1 }
 0x426   :  { %2311 = vmatpush.msrb.mxu2 %v7004_v22  ;;  %2343 = vmatmul.f32.vlgmr.msrb.gmra.mxu3 %v6960_v1 }
 0x427   :  { %2272 = vmatpush.msrb.mxu0 %v7008_v37  ;;  %2434 = vmatpush.msra.mxu1 %v6445_v9  ;;  %v9343_v9 = vld [vmem:[#allocation26_spill] sm:$0xff] }
 0x428   :  { %2312 = vmatpush.msrb.mxu2 %v7012_v13  ;;  %2474 = vmatpush.msra.mxu3 %v6449_v52  ;;  %v9344_v52 = vld [vmem:[#allocation27_spill] sm:$0xff] }
 0x429   :  { %2273 = vmatpush.msrb.mxu0 %v7016_v24  ;;  %2435 = vmatpush.msra.mxu1 %v6453_v44  ;;  %v9345_v44 = vld [vmem:[#allocation28_spill] sm:$0xff] }
 0x42a   :  { %2313 = vmatpush.msrb.mxu2 %v7020_v40  ;;  %2475 = vmatpush.msra.mxu3 %v6457_v36  ;;  %v9346_v36 = vld [vmem:[#allocation31_spill] sm:$0xff] }
 0x42b   :  { %2274 = vmatpush.msrb.mxu0 %v7024_v4  ;;  %2436 = vmatpush.msra.mxu1 %v9343_v9  ;;  %v9378_v9 = vld [vmem:[#allocation78_spill] sm:$0xff] }
 0x42c   :  { %2314 = vmatpush.msrb.mxu2 %v7028_v16  ;;  %2476 = vmatpush.msra.mxu3 %v9344_v52  ;;  %v9380_v52 = vld [vmem:[#allocation79_spill] sm:$0xff] }
 0x42d   :  { %2275 = vmatpush.msrb.mxu0 %v7032_v34  ;;  %2437 = vmatpush.msra.mxu1 %v9345_v44  ;;  %v9381_v44 = vld [vmem:[#allocation30_spill] sm:$0xff] }
 0x42e   :  { %2315 = vmatpush.msrb.mxu2 %v7036_v8  ;;  %2477 = vmatpush.msra.mxu3 %v9346_v36  ;;  %v9382_v36 = vld [vmem:[#allocation82_spill] sm:$0xff] }
 0x42f   :  { %2276 = vmatpush.msrb.mxu0 %v7040_v31  ;;  %2438 = vmatpush.msra.mxu1 %v9347_v26  ;;  %v9383_v26 = vld [vmem:[#allocation33_spill] sm:$0xff] }
 0x430   :  { %2316 = vmatpush.msrb.mxu2 %v7044_v18  ;;  %2478 = vmatpush.msra.mxu3 %v9348_v32  ;;  %v9384_v32 = vld [vmem:[#allocation83_spill] sm:$0xff] }
 0x431   :  { %2277 = vmatpush.msrb.mxu0 %v7048_v48  ;;  %2439 = vmatpush.msra.mxu1 %v9349_v30  ;;  %v9385_v30 = vld [vmem:[#allocation34_spill] sm:$0xff] }
 0x432   :  { %2317 = vmatpush.msrb.mxu2 %v7052_v62  ;;  %2479 = vmatpush.msra.mxu3 %v9350_v12  ;;  %v9386_v12 = vld [vmem:[#allocation86_spill] sm:$0xff] }
 0x433   :  { %2278 = vmatpush.msrb.mxu0 %v7056_v59  ;;  %2440 = vmatpush.msra.mxu1 %v9351_v25  ;;  %v9387_v25 = vld [vmem:[#allocation37_spill] sm:$0xff] }
 0x434   :  { %2318 = vmatpush.msrb.mxu2 %v9352_v2  ;;  %2480 = vmatpush.msra.mxu3 %v9353_v46  ;;  %v9388_v2 = vld [vmem:[#allocation45_spill] sm:$0xff]  ;;  %v9389_v46 = vld [vmem:[#allocation38_spill] sm:$0xff] }
 0x435   :  { %2279 = vmatpush.msrb.mxu0 %v9354_v3  ;;  %2441 = vmatpush.msra.mxu1 %v9355_v0  ;;  %v9390_v3 = vld [vmem:[#allocation46_spill] sm:$0xff] }
 0x436   :  { %2319 = vmatpush.msrb.mxu2 %v9356_v5  ;;  %2481 = vmatpush.msra.mxu3 %v9357_v50  ;;  %v9391_v0 = vld [vmem:[#allocation42_spill] sm:$0xff]  ;;  %v9392_v5 = vld [vmem:[#allocation41_spill] sm:$0xff] }
 0x437   :  { %2280 = vmatpush.msrb.mxu0 %v9358_v42  ;;  %2442 = vmatpush.msra.mxu1 %v9359_v60  ;;  %v9393_v50 = vld [vmem:[#allocation49_spill] sm:$0xff]  ;;  %v9395_v60 = vld [vmem:[#allocation50_spill] sm:$0xff] }
 0x438   :  { %2320 = vmatpush.msrb.mxu2 %v9360_v41  ;;  %2482 = vmatpush.msra.mxu3 %v9361_v57  ;;  %v9394_v42 = vld [vmem:[#allocation89_spill] sm:$0xff]  ;;  %v9396_v41 = vld [vmem:[#allocation52_spill] sm:$0xff] }
 0x439   :  { %2281 = vmatpush.msrb.mxu0 %v9362_v45  ;;  %2443 = vmatpush.msra.mxu1 %v9363_v35  ;;  %v9397_v57 = vld [vmem:[#allocation53_spill] sm:$0xff]  ;;  %v9398_v45 = vld [vmem:[#allocation56_spill] sm:$0xff] }
 0x43a   :  { %2321 = vmatpush.msrb.mxu2 %v9364_v27  ;;  %2483 = vmatpush.msra.mxu3 %v9365_v39  ;;  %v9399_v35 = vld [vmem:[#allocation57_spill] sm:$0xff]  ;;  %v9400_v27 = vld [vmem:[#allocation60_spill] sm:$0xff] }
 0x43b   :  { %2282 = vmatpush.msrb.mxu0 %v9366_v14  ;;  %2444 = vmatpush.msra.mxu1 %v9367_v7  ;;  %v9401_v39 = vld [vmem:[#allocation61_spill] sm:$0xff]  ;;  %v9402_v14 = vld [vmem:[#allocation64_spill] sm:$0xff] }
 0x43c   :  { %2322 = vmatpush.msrb.mxu2 %v9368_v55  ;;  %2283 = vmatmul.f32.vlgmr.msrb.gmra.mxu0 %v6960_v1  ;;  %v9403_v7 = vld [vmem:[#allocation65_spill] sm:$0xff]  ;;  %v9404_v55 = vld [vmem:[#allocation68_spill] sm:$0xff] }
 0x43d   :  { %2323 = vmatmul.f32.vlgmr.msrb.gmra.mxu2 %v6960_v1  ;;  %2484 = vmatpush.msra.mxu3 %v9369_v61  ;;  %v9379_v1 = vld [vmem:[#allocation17_spill] sm:$0xff] }
 0x43e   :  { %2445 = vmatpush.msra.mxu1 %v9370_v56  ;;  %2414 = vmatpush.msra.mxu0 %v9371_v19  ;;  %v9405_v61 = vld [vmem:[#allocation69_spill] sm:$0xff]  ;;  %v9406_v56 = vld [vmem:[#allocation72_spill] sm:$0xff] }
 0x43f   :  { %2485 = vmatpush.msra.mxu3 %v9372_v23  ;;  %2454 = vmatpush.msra.mxu2 %v9373_v20  ;;  %v9407_v19 = vld [vmem:[#allocation73_spill] sm:$0xff]  ;;  %v9408_v23 = vld [vmem:[#allocation76_spill] sm:$0xff] }
 0x440   :  { %2446 = vmatpush.msra.mxu1 %v9374_v49  ;;  %2415 = vmatpush.msra.mxu0 %v9375_v6  ;;  %v9409_v20 = vld [vmem:[#allocation77_spill] sm:$0xff]  ;;  %v9410_v49 = vld [vmem:[#allocation80_spill] sm:$0xff] }
 0x441   :  { %2486 = vmatpush.msra.mxu3 %v9376_v54  ;;  %2455 = vmatpush.msra.mxu2 %v9377_v17  ;;  %v9411_v6 = vld [vmem:[#allocation81_spill] sm:$0xff]  ;;  %v9412_v54 = vld [vmem:[#allocation84_spill] sm:$0xff] }
 0x442   :  { %2447 = vmatpush.msra.mxu1 %v9378_v9  ;;  %2416 = vmatpush.msra.mxu0 %v9379_v1  ;;  %v9413_v17 = vld [vmem:[#allocation85_spill] sm:$0xff]  ;;  %v9414_v9 = vld [vmem:[#allocation87_spill] sm:$0xff]  ;;  %v9415_v1 = vld [vmem:[#allocation88_spill] sm:$0xff] }
 0x443   :  { %2487 = vmatpush.msra.mxu3 %v9380_v52  ;;  %2456 = vmatpush.msra.mxu2 %v9381_v44  ;;  %v9416_v52 = vld [vmem:[#allocation90_spill] sm:$0xff]  ;;  %v9417_v44 = vld [vmem:[#allocation91_spill] sm:$0xff] }
 0x444   :  { %2448 = vmatpush.msra.mxu1 %v9382_v36  ;;  %2417 = vmatpush.msra.mxu0 %v9383_v26  ;;  %v9418_v36 = vld [vmem:[#allocation92_spill] sm:$0xff]  ;;  %v9419_v26 = vld [vmem:[#allocation93_spill] sm:$0xff] }
 0x445   :  { %2488 = vmatpush.msra.mxu3 %v9384_v32  ;;  %2457 = vmatpush.msra.mxu2 %v9385_v30  ;;  %v9420_v32 = vld [vmem:[#allocation94_spill] sm:$0xff]  ;;  %v9421_v30 = vld [vmem:[#allocation95_spill] sm:$0xff] }
 0x446   :  { %2449 = vmatpush.msra.mxu1 %v9386_v12  ;;  %2418 = vmatpush.msra.mxu0 %v9387_v25  ;;  %v9422_v12 = vld [vmem:[#allocation96_spill] sm:$0xff]  ;;  %v9423_v25 = vld [vmem:[#allocation97_spill] sm:$0xff] }
 0x447   :  { %2489 = vmatpush.msra.mxu3 %v9388_v2  ;;  %2458 = vmatpush.msra.mxu2 %v9389_v46  ;;  %v9424_v2 = vld [vmem:[#allocation100_spill] sm:$0xff]  ;;  %v9425_v46 = vld [vmem:[#allocation103_spill] sm:$0xff] }
 0x448   :  { %2514 = vmatpush.msrb.mxu1 %v9390_v3  ;;  %2419 = vmatpush.msra.mxu0 %v9392_v5  ;;  %v9426_v3 = vld [vmem:[#allocation104_spill] sm:$0xff] }
 0x449   :  { %2554 = vmatpush.msrb.mxu3 %v9391_v0  ;;  %2459 = vmatpush.msra.mxu2 %v9393_v50  ;;  %v9427_v0 = vld [vmem:[#allocation107_spill] sm:$0xff]  ;;  %v9428_v5 = vld [vmem:[#allocation108_spill] sm:$0xff]  ;;  %v9429_v50 = vld [vmem:[#allocation109_spill] sm:$0xff] }
 0x44a   :  { %2515 = vmatpush.msrb.mxu1 %v9394_v42  ;;  %2420 = vmatpush.msra.mxu0 %v9396_v41  ;;  %v9430_v42 = vld [vmem:[#allocation110_spill] sm:$0xff]  ;;  %v9432_v41 = vld [vmem:[#allocation112_spill] sm:$0xff] }
 0x44b   :  { %2555 = vmatpush.msrb.mxu3 %v9395_v60  ;;  %2460 = vmatpush.msra.mxu2 %v9397_v57  ;;  %v9431_v60 = vld [vmem:[#allocation111_spill] sm:$0xff]  ;;  %v9433_v57 = vld [vmem:[#allocation113_spill] sm:$0xff] }
 0x44c   :  { %2516 = vmatpush.msrb.mxu1 %v9398_v45  ;;  %2421 = vmatpush.msra.mxu0 %v9400_v27  ;;  %v9434_v45 = vld [vmem:[#allocation114_spill] sm:$0xff]  ;;  %v9436_v27 = vld [vmem:[#allocation116_spill] sm:$0xff] }
 0x44d   :  { %2556 = vmatpush.msrb.mxu3 %v9399_v35  ;;  %2461 = vmatpush.msra.mxu2 %v9401_v39  ;;  %v9435_v35 = vld [vmem:[#allocation115_spill] sm:$0xff]  ;;  %v9437_v39 = vld [vmem:[#allocation117_spill] sm:$0xff] }
 0x44e   :  { %2517 = vmatpush.msrb.mxu1 %v9402_v14  ;;  %2422 = vmatpush.msra.mxu0 %v9404_v55  ;;  %v9438_v14 = vld [vmem:[#allocation118_spill] sm:$0xff]  ;;  %v9440_v55 = vld [vmem:[#allocation120_spill] sm:$0xff] }
 0x44f   :  { %2557 = vmatpush.msrb.mxu3 %v9403_v7  ;;  %2462 = vmatpush.msra.mxu2 %v9405_v61  ;;  %v9439_v7 = vld [vmem:[#allocation119_spill] sm:$0xff]  ;;  %v9441_v61 = vld [vmem:[#allocation121_spill] sm:$0xff] }
 0x450   :  { %2518 = vmatpush.msrb.mxu1 %v9406_v56  ;;  %2423 = vmatpush.msra.mxu0 %v9408_v23  ;;  %v9442_v56 = vld [vmem:[#allocation122_spill] sm:$0xff]  ;;  %v9444_v23 = vld [vmem:[#allocation124_spill] sm:$0xff] }
 0x451   :  { %2558 = vmatpush.msrb.mxu3 %v9407_v19  ;;  %2463 = vmatpush.msra.mxu2 %v9409_v20  ;;  %v9443_v19 = vld [vmem:[#allocation123_spill] sm:$0xff]  ;;  %v9445_v20 = vld [vmem:[#allocation125_spill] sm:$0xff] }
 0x452   :  { %2519 = vmatpush.msrb.mxu1 %v9410_v49  ;;  %2424 = vmatpush.msra.mxu0 %v9412_v54  ;;  %v9446_v49 = vld [vmem:[#allocation126_spill] sm:$0xff]  ;;  %v9448_v54 = vld [vmem:[#allocation128_spill] sm:$0xff] }
 0x453   :  { %2559 = vmatpush.msrb.mxu3 %v9411_v6  ;;  %2464 = vmatpush.msra.mxu2 %v9413_v17  ;;  %v9447_v6 = vld [vmem:[#allocation127_spill] sm:$0xff]  ;;  %v9449_v17 = vld [vmem:[#allocation129_spill] sm:$0xff] }
 0x454   :  { %2520 = vmatpush.msrb.mxu1 %v9414_v9  ;;  %2425 = vmatpush.msra.mxu0 %v9416_v52  ;;  %v9450_v9 = vld [vmem:[#allocation130_spill] sm:$0xff]  ;;  %v9452_v52 = vld [vmem:[#allocation132_spill] sm:$0xff] }
 0x455   :  { %2560 = vmatpush.msrb.mxu3 %v9415_v1  ;;  %2465 = vmatpush.msra.mxu2 %v9417_v44  ;;  %v9451_v1 = vld [vmem:[#allocation131_spill] sm:$0xff]  ;;  %v9453_v44 = vld [vmem:[#allocation133_spill] sm:$0xff] }
 0x456   :  { %2521 = vmatpush.msrb.mxu1 %v9418_v36  ;;  %2426 = vmatpush.msra.mxu0 %v9420_v32  ;;  %v9454_v36 = vld [vmem:[#allocation134_spill] sm:$0xff]  ;;  %v9456_v32 = vld [vmem:[#allocation136_spill] sm:$0xff] }
 0x457   :  { %2561 = vmatpush.msrb.mxu3 %v9419_v26  ;;  %2466 = vmatpush.msra.mxu2 %v9421_v30  ;;  %v9455_v26 = vld [vmem:[#allocation135_spill] sm:$0xff]  ;;  %v9457_v30 = vld [vmem:[#allocation137_spill] sm:$0xff] }
 0x458   :  { %2522 = vmatpush.msrb.mxu1 %v9422_v12  ;;  %2427 = vmatpush.msra.mxu0 %v9424_v2  ;;  %v9458_v12 = vld [vmem:[#allocation138_spill] sm:$0xff]  ;;  %v9460_v2 = vld [vmem:[#allocation140_spill] sm:$0xff] }
 0x459   :  { %2562 = vmatpush.msrb.mxu3 %v9423_v25  ;;  %2467 = vmatpush.msra.mxu2 %v9425_v46  ;;  %v9459_v25 = vld [vmem:[#allocation139_spill] sm:$0xff]  ;;  %v9461_v46 = vld [vmem:[#allocation141_spill] sm:$0xff] }
 0x45a   :  { %2523 = vmatpush.msrb.mxu1 %v9426_v3  ;;  %2428 = vmatpush.msra.mxu0 %v9428_v5  ;;  %v9462_v3 = vld [vmem:[#allocation142_spill] sm:$0xff]  ;;  %v9464_v5 = vld [vmem:[#allocation144_spill] sm:$0xff] }
 0x45b   :  { %2563 = vmatpush.msrb.mxu3 %v9427_v0  ;;  %2468 = vmatpush.msra.mxu2 %v9429_v50  ;;  %v9463_v0 = vld [vmem:[#allocation143_spill] sm:$0xff]  ;;  %v9465_v50 = vld [vmem:[#allocation145_spill] sm:$0xff] }
 0x45c   :  { %2524 = vmatpush.msrb.mxu1 %v9430_v42  ;;  %2429 = vmatpush.msra.mxu0 %v9432_v41  ;;  %v9466_v42 = vld [vmem:[#allocation146_spill] sm:$0xff]  ;;  %v9468_v41 = vld [vmem:[#allocation148_spill] sm:$0xff] }
 0x45d   :  { %2564 = vmatpush.msrb.mxu3 %v9431_v60  ;;  %2469 = vmatpush.msra.mxu2 %v9433_v57  ;;  %v9467_v60 = vld [vmem:[#allocation147_spill] sm:$0xff]  ;;  %v9469_v57 = vld [vmem:[#allocation149_spill] sm:$0xff] }
 0x45e   :  { %2525 = vmatpush.msrb.mxu1 %v9434_v45  ;;  %2494 = vmatpush.msrb.mxu0 %v9436_v27  ;;  %v9470_v45 = vld [vmem:[#allocation150_spill] sm:$0xff]  ;;  %v9472_v27 = vld [vmem:[#allocation152_spill] sm:$0xff] }
 0x45f   :  { %2565 = vmatpush.msrb.mxu3 %v9435_v35  ;;  %2534 = vmatpush.msrb.mxu2 %v9437_v39  ;;  %v9471_v35 = vld [vmem:[#allocation151_spill] sm:$0xff]  ;;  %v9473_v39 = vld [vmem:[#allocation153_spill] sm:$0xff] }
 0x460   :  { %2526 = vmatpush.msrb.mxu1 %v9438_v14  ;;  %2495 = vmatpush.msrb.mxu0 %v9440_v55  ;;  %v9474_v14 = vld [vmem:[#allocation154_spill] sm:$0xff] }
 0x461   :  { %2566 = vmatpush.msrb.mxu3 %v9439_v7  ;;  %2535 = vmatpush.msrb.mxu2 %v9441_v61  ;;  %v9475_v7 = vld [vmem:[#allocation155_spill] sm:$0xff] }
 0x462   :  { %2527 = vmatpush.msrb.mxu1 %v9442_v56  ;;  %2496 = vmatpush.msrb.mxu0 %v9444_v23 }
 0x463   :  { %2567 = vmatpush.msrb.mxu3 %v9443_v19  ;;  %2536 = vmatpush.msrb.mxu2 %v9445_v20  ;;  %v7186_v20 = vpop.permute.xlu2 %99 }
 0x464   :  { %2528 = vmatpush.msrb.mxu1 %v9446_v49  ;;  %2497 = vmatpush.msrb.mxu0 %v9448_v54  ;;  %v9476_v54 = vld [vmem:[#allocation99_spill] sm:$0xff] }
 0x465   :  { %2568 = vmatpush.msrb.mxu3 %v9447_v6  ;;  %2537 = vmatpush.msrb.mxu2 %v9449_v17  ;;  %v142_v17 = vmul.f32 %v9476_v54, %v7186_v20 }
 0x466   :  { %2529 = vmatpush.msrb.mxu1 %v9450_v9  ;;  %2498 = vmatpush.msrb.mxu0 %v9452_v52  ;;  %v9477_v52 = vld [vmem:[#allocation19_spill] sm:$0xff] }
 0x467   :  { %2569 = vmatpush.msrb.mxu3 %v9451_v1  ;;  %2538 = vmatpush.msrb.mxu2 %v9453_v44 }
 0x468   :  { %2499 = vmatpush.msrb.mxu0 %v9454_v36  ;;  %v9478_v36 = vld [vmem:[#allocation102_spill] sm:$0xff] }
 0x469   :  { %2539 = vmatpush.msrb.mxu2 %v9455_v26  ;;  %v184_v26 = vadd.f32 %v9478_v36, %v142_v17  ;;  %v9482_v17 = vld [vmem:[#allocation21_spill] sm:$0xff] }
 0x46a   :  { %2500 = vmatpush.msrb.mxu0 %v9456_v32 }
 0x46b   :  { %2540 = vmatpush.msrb.mxu2 %v9457_v30 }
 0x46c   :  { %2501 = vmatpush.msrb.mxu0 %v9458_v12 }
 0x46d   :  { %2541 = vmatpush.msrb.mxu2 %v9459_v25 }
 0x46e   :  { %2502 = vmatpush.msrb.mxu0 %v9460_v2 }
 0x46f   :  { %2542 = vmatpush.msrb.mxu2 %v9461_v46 }
 0x470   :  { %2503 = vmatpush.msrb.mxu0 %v9462_v3 }
 0x471   :  { %2543 = vmatpush.msrb.mxu2 %v9463_v0 }
 0x472   :  { %2504 = vmatpush.msrb.mxu0 %v9464_v5  ;;  %v9479_v5 = vld [vmem:[#allocation105_spill] sm:$0xff] }
 0x473   :  { %2544 = vmatpush.msrb.mxu2 %v9465_v50  ;;  %v144_v50 = vmul.f32 %v9479_v5, %v7186_v20 }
 0x474   :  { %2505 = vmatpush.msrb.mxu0 %v9466_v42 }
 0x475   :  { %2545 = vmatpush.msrb.mxu2 %v9467_v60 }
 0x476   :  { %2506 = vmatpush.msrb.mxu0 %v9468_v41 }
 0x477   :  { %2546 = vmatpush.msrb.mxu2 %v9469_v57  ;;  %v9480_v57 = vld [vmem:[#allocation20_spill] sm:$0xff] }
 0x478   :  { %2507 = vmatpush.msrb.mxu0 %v9470_v45 }
 0x479   :  { %2547 = vmatpush.msrb.mxu2 %v9471_v35 }
 0x47a   :  { %2508 = vmatpush.msrb.mxu0 %v9472_v27 }
 0x47b   :  { %2548 = vmatpush.msrb.mxu2 %v9473_v39 }
 0x47c   :  { %2509 = vmatpush.msrb.mxu0 %v9474_v14  ;;  %v9481_v14 = vld [vmem:[#allocation106_spill] sm:$0xff] }
 0x47d   :  { %2549 = vmatpush.msrb.mxu2 %v9475_v7  ;;  %v186_v7 = vadd.f32 %v9481_v14, %v144_v50 }
 0x480   :  { %v2077_v55 = vpop.f32.mrf.mxu1 }
 0x486   :  { %v2117_v19 = vpop.f32.mrf.mxu3 }
 0x488   :  { %v2157_v23 = vpop.f32.mrf.mxu1 }
 0x48e   :  { %v2197_v12 = vpop.f32.mrf.mxu3 }
 0x498   :  { %v2057_v61 = vpop.f32.mrf.mxu0 }
 0x499   :  { %v2078_v56 = vadd.f32 %v2077_v55, %v2057_v61 }
 0x49b   :  { %v2200_v49 = vadd.f32 %v2078_v56, %v5310_v15 }
 0x49d   :  { %v3464_v6 = vmul.f32 -1.442695, %v2200_v49 }
 0x49e   :  { %v2097_v9 = vpop.f32.mrf.mxu2 }
 0x49f   :  { %3639 = vpow2.f32 %v3464_v6  ;;  %v2118_v1 = vadd.f32 %v2117_v19, %v2097_v9 }
 0x4a1   :  { %v2201_v44 = vadd.f32 %v2118_v1, %v9477_v52  ;;  %v2137_v41 = vpop.f32.mrf.mxu0 }
 0x4a2   :  { %v2304_v32 = vpop.f32.mrf.mxu1  ;;  %v2158_v61 = vadd.f32 %v2157_v23, %v2137_v41 }
 0x4a3   :  { %v3465_v30 = vmul.f32 -1.442695, %v2201_v44  ;;  %v2348_v25 = vadd.f32 %v2304_v32, %v184_v26  ;;  %v9483_v32 = vld [vmem:[#allocation98_spill] sm:$0xff] }
 0x4a4   :  { %v2202_v9 = vadd.f32 %v2158_v61, %v9482_v17 }
 0x4a5   :  { %v3640_v2 = vpop.eup %3639  ;;  %3641 = vpow2.f32 %v3465_v30  ;;  %v3468_v0 = vmul.f32 -1.442695, %v2348_v25  ;;  %v141_v30 = vmul.f32 %v9483_v32, %v7186_v20 }
 0x4a6   :  { %v2207_v46 = vadd.f32 1.0, %v3640_v2 }
 0x4a7   :  { %v2177_v3 = vpop.f32.mrf.mxu2 }
 0x4a8   :  { %3643 = vrcp.f32 %v2207_v46  ;;  %v2198_v42 = vadd.f32 %v2197_v12, %v2177_v3  ;;  %v2219_v23 = vand.u32 2147483648, %v2207_v46  ;;  %vm2213_vm13 = vweird.f32 %v2207_v46 }
 0x4a9   :  { %3645 = vpow2.f32 %v3468_v0  ;;  %v2344_v27 = vpop.f32.mrf.mxu3 }
 0x4aa   :  { %v2203_v45 = vadd.f32 %v2198_v42, %v9480_v57  ;;  %v2350_v19 = vadd.f32 %v2344_v27, %v186_v7  ;;  %v2217_v42 = vand.u32 2147483647, %v2207_v46  ;;  %v9486_v27 = vld [vmem:[#allocation101_spill] sm:$0xff] }
 0x4ab   :  { %v3642_v60 = vpop.eup %3641 }
 0x4ac   :  { %v2226_v35 = vadd.f32 1.0, %v3642_v60  ;;  %v3466_v39 = vmul.f32 -1.442695, %v2203_v45  ;;  %v3469_v44 = vmul.f32 -1.442695, %v2350_v19  ;;  %v2220_v19 = vor.u32 1.1754944e-38, %v2219_v23 }
 0x4ad   :  { %vm2218_vm1 = vcmp.eq.f32.partialorder %v2217_v42, 8.507059e+37 }
 0x4ae   :  { %v3644_v55 = vpop.eup %3643  ;;  %3647 = vrcp.f32 %v2226_v35  ;;  %v2238_v60 = vand.u32 2147483648, %v2226_v35  ;;  %v2236_v45 = vand.u32 2147483647, %v2226_v35  ;;  %vm2232_vm0 = vweird.f32 %v2226_v35 }
 0x4af   :  { %v2209_v56 = vmul.f32 %v3644_v55, %v2207_v46  ;;  %3649 = vpow2.f32 %v3466_v39  ;;  %v3646_v6 = vpop.eup %3645  ;;  %vm2214_vm12 = vweird.f32 %v3644_v55  ;;  %v183_v39 = vadd.f32 %v9486_v27, %v141_v30 }
 0x4b0   :  { %v7200_v3 = vadd.f32 1.0, %v3646_v6  ;;  %3651 = vtanh.f32 %v2202_v9  ;;  %vm7202_vm14 = vmor %vm2213_vm13, %vm2214_vm12  ;;  %v2239_v9 = vor.u32 1.1754944e-38, %v2238_v60  ;;  %vm2237_vm3 = vcmp.eq.f32.partialorder %v2236_v45, 8.507059e+37 }
 0x4b1   :  { %v2210_v49 = vsub.f32 1.0, %v2209_v56  ;;  %3653 = vpow2.f32 %v3469_v44 }
 0x4b2   :  { %vm2379_vm9 = vweird.f32 %v7200_v3 }
 0x4b3   :  { %v2211_v1 = vmul.f32 %v3644_v55, %v2210_v49 }
 0x4b4   :  { %v3648_v26 = vpop.eup %3647 }
 0x4b5   :  { %v3650_v12 = vpop.eup %3649  ;;  %v2228_v25 = vmul.f32 %v3648_v26, %v2226_v35  ;;  %v2212_v2 = vadd.f32 %v3644_v55, %v2211_v1  ;;  %vm2233_vm15 = vweird.f32 %v3648_v26 }
 0x4b6   :  { %v2246_v0 = vadd.f32 1.0, %v3650_v12  ;;  %v3652_v6 = vpop.eup %3651  ;;  %vm2234_vm2 = vmor %vm2232_vm0, %vm2233_vm15 }
 0x4b7   :  { %v2229_v50 = vsub.f32 1.0, %v2228_v25  ;;  %v2216_v61 = vsel %vm7202_vm14, %v3644_v55, %v2212_v2  ;;  %v3654_v12 = vpop.eup %3653 }
 0x4b8   :  { %3655 = vrcp.f32 %v2246_v0  ;;  %v2221_v1 = vsel %vm2218_vm1, %v2220_v19, %v2216_v61  ;;  %v2258_v45 = vand.u32 2147483648, %v2246_v0  ;;  %v2256_v61 = vand.u32 2147483647, %v2246_v0 }
 0x4b9   :  { %v2230_v7 = vmul.f32 %v3648_v26, %v2229_v50  ;;  %3657 = vrcp.f32 %v7200_v3  ;;  %v2284_v56 = vpop.f32.mrf.mxu0  ;;  %v2263_v23 = vmul.f32 %v3652_v6, %v2221_v1  ;;  %vm2252_vm5 = vweird.f32 %v2246_v0 }
 0x4ba   :  { %v2347_v46 = vadd.f32 %v2284_v56, %v183_v39  ;;  %v7217_v39 = vadd.f32 1.0, %v3654_v12  ;;  %vm2257_vm7 = vcmp.eq.f32.partialorder %v2256_v61, 8.507059e+37 }
 0x4bb   :  { %v2231_v49 = vadd.f32 %v3648_v26, %v2230_v7 }
 0x4bc   :  { %v3467_v44 = vmul.f32 -1.442695, %v2347_v46  ;;  %v143_v46 = vmul.f32 %v5031_v43, %v7186_v20  ;;  %vm2399_vm1 = vweird.f32 %v7217_v39 }
 0x4bd   :  { %v2235_v30 = vsel %vm2234_vm2, %v3648_v26, %v2231_v49  ;;  %v2259_v49 = vor.u32 1.1754944e-38, %v2258_v45  ;;  %v7242_v45 = vld [vmem:[#allocation3 + $0x1c8] sm:$0xff] }
 0x4be   :  { %v3656_v25 = vpop.eup %3655  ;;  %v2240_v50 = vsel %vm2237_vm3, %v2239_v9, %v2235_v30  ;;  %3659 = vpow2.f32 %v3467_v44 }
 0x4bf   :  { %v7210_v55 = vpop.eup %3657  ;;  %v2262_v2 = vmul.f32 %v2240_v50, %v6899_v28  ;;  %v2248_v41 = vmul.f32 %v3656_v25, %v2246_v0  ;;  %vm2253_vm4 = vweird.f32 %v3656_v25  ;;  %v185_v50 = vadd.f32 %v5057_v63, %v143_v46 }
 0x4c0   :  { %v2375_v60 = vmul.f32 %v7210_v55, %v7200_v3  ;;  %vm2254_vm6 = vmor %vm2252_vm5, %vm2253_vm4  ;;  %v2324_v12 = vpop.f32.mrf.mxu2  ;;  %vm2380_vm8 = vweird.f32 %v7210_v55 }
 0x4c1   :  { %v7213_v35 = vadd.f32 %v2263_v23, %v2262_v2  ;;  %v2249_v42 = vsub.f32 1.0, %v2248_v41  ;;  %v2349_v20 = vadd.f32 %v2324_v12, %v185_v50  ;;  %v7230_v23 = vld [vmem:[#allocation3 + $0x1e8] sm:$0xff]  ;;  %vm7250_vm10 = vmor %vm2379_vm9, %vm2380_vm8 }
 0x4c2   :  { %v2376_v19 = vsub.f32 1.0, %v2375_v60  ;;  %v2385_v60 = vand.u32 2147483648, %v7200_v3  ;;  %v7265_v50 = vld [vmem:[#allocation3 + $0x188] sm:$0xff] }
 0x4c3   :  { %3661 = vtanh.f32 %v7213_v35  ;;  %v2250_v26 = vmul.f32 %v3656_v25, %v2249_v42 }
 0x4c4   :  { %v3660_v7 = vpop.eup %3659  ;;  %3663 = vrcp.f32 %v7217_v39  ;;  %v2377_v44 = vmul.f32 %v7210_v55, %v2376_v19 }
 0x4c5   :  { %v7220_v56 = vadd.f32 1.0, %v3660_v7  ;;  %v2251_v28 = vadd.f32 %v3656_v25, %v2250_v26  ;;  %v7245_v7 = vld [vmem:[#allocation3 + $0x1d8] sm:$0xff] }
 0x4c6   :  { %v2378_v42 = vadd.f32 %v7210_v55, %v2377_v44  ;;  %v2386_v44 = vor.u32 1.1754944e-38, %v2385_v60 }
 0x4c7   :  { %3665 = vrcp.f32 %v7220_v56  ;;  %v2255_v6 = vsel %vm2254_vm6, %v3656_v25, %v2251_v28  ;;  %v7233_v25 = vld [vmem:[#allocation3 + $0x1f8] sm:$0xff]  ;;  %v2383_v28 = vand.u32 2147483647, %v7200_v3  ;;  %v2366_v46 = vand.u32 2147483648, %v7220_v56 }
 0x4c8   :  { %v2260_v1 = vsel %vm2257_vm7, %v2259_v49, %v2255_v6  ;;  %3667 = vtanh.f32 %v2349_v20  ;;  %v7255_v49 = vld [vmem:[#allocation3 + $0x1a8] sm:$0xff]  ;;  %v7258_v6 = vld [vmem:[#allocation3 + $0x1b8] sm:$0xff]  ;;  %v2382_v3 = vsel %vm7250_vm10, %v7210_v55, %v2378_v42  ;;  %vm2360_vm12 = vweird.f32 %v7220_v56 }
 0x4c9   :  { %v3662_v9 = vpop.eup %3661  ;;  %v7268_v20 = vld [vmem:[#allocation3 + $0x198] sm:$0xff]  ;;  %vm2384_vm13 = vcmp.eq.f32.partialorder %v2383_v28, 8.507059e+37  ;;  %v7272_v55 = vld [vmem:[#allocation3 + $0x168] sm:$0xff] }
 0x4ca   :  { %v2266_v30 = vmul.f32 %v3662_v9, %v2260_v1  ;;  %v7228_v2 = vpop.eup %3663  ;;  %v2364_v1 = vand.u32 2147483647, %v7220_v56  ;;  %v2387_v19 = vsel %vm2384_vm13, %v2386_v44, %v2382_v3  ;;  %v7275_v42 = vld [vmem:[#allocation3 + $0x178] sm:$0xff]  ;;  %v7279_v28 = vld [vmem:[#allocation3 + $0x148] sm:$0xff] }
 0x4cb   :  { %v2395_v26 = vmul.f32 %v7228_v2, %v7217_v39  ;;  %v7286_v44 = vld [vmem:[#allocation3 + $0x128] sm:$0xff]  ;;  %vm2400_vm0 = vweird.f32 %v7228_v2 }
 0x4cc   :  { %2450 = vmatmul.f32.vlgmr.msra.gmra.mxu1 %v2266_v30  ;;  %2490 = vmatmul.f32.vlgmr.msra.gmra.mxu3 %v2266_v30  ;;  %vm2365_vm15 = vcmp.eq.f32.partialorder %v2364_v1, 8.507059e+37  ;;  %vm2401_vm2 = vmor %vm2399_vm1, %vm2400_vm0 }
 0x4cd   :  { %v3666_v0 = vpop.eup %3665  ;;  %2661 = vmatpush.msra.mxu1 %v7230_v23  ;;  %2701 = vmatpush.msra.mxu3 %v7233_v25  ;;  %v2396_v12 = vsub.f32 1.0, %v2395_v26 }
 0x4ce   :  { %v2356_v41 = vmul.f32 %v3666_v0, %v7220_v56  ;;  %vm2361_vm11 = vweird.f32 %v3666_v0  ;;  %v3668_v26 = vpop.eup %3667 }
 0x4cf   :  { %2662 = vmatpush.msra.mxu1 %v7242_v45  ;;  %2702 = vmatpush.msra.mxu3 %v7245_v7  ;;  %vm2362_vm14 = vmor %vm2360_vm12, %vm2361_vm11 }
 0x4d0   :  { %v2357_v61 = vsub.f32 1.0, %v2356_v41 }
 0x4d1   :  { %2663 = vmatpush.msra.mxu1 %v7255_v49  ;;  %2703 = vmatpush.msra.mxu3 %v7258_v6 }
 0x4d2   :  { %v2358_v9 = vmul.f32 %v3666_v0, %v2357_v61  ;;  %v2367_v61 = vor.u32 1.1754944e-38, %v2366_v46  ;;  %v2409_v46 = vmul.f32 %v2387_v19, %v6943_v51  ;;  %v7299_v51 = vld [vmem:[#allocation3 + $0x118] sm:$0xff]  ;;  %v2403_v19 = vand.u32 2147483647, %v7217_v39 }
 0x4d3   :  { %2664 = vmatpush.msra.mxu1 %v7265_v50  ;;  %2704 = vmatpush.msra.mxu3 %v7268_v20  ;;  %9489 = vst [vmem:[#allocation22_spill] sm:$0xff] %v7299_v51 }
 0x4d4   :  { %v2359_v41 = vadd.f32 %v3666_v0, %v2358_v9  ;;  %2530 = vmatmul.f32.vlgmr.msrb.gmra.mxu1 %v2266_v30  ;;  %2570 = vmatmul.f32.vlgmr.msrb.gmra.mxu3 %v2266_v30  ;;  %v2397_v9 = vmul.f32 %v7228_v2, %v2396_v12  ;;  %v7282_v30 = vld [vmem:[#allocation3 + $0x158] sm:$0xff]  ;;  %vm2404_vm3 = vcmp.eq.f32.partialorder %v2403_v19, 8.507059e+37 }
 0x4d5   :  { %2665 = vmatpush.msra.mxu1 %v7272_v55  ;;  %2705 = vmatpush.msra.mxu3 %v7275_v42  ;;  %v7340_v19 = vld [vmem:[#allocation3 + $0x78] sm:$0xff] }
 0x4d6   :  { %v2363_v60 = vsel %vm2362_vm14, %v3666_v0, %v2359_v41  ;;  %v7289_v0 = vld [vmem:[#allocation3 + $0x138] sm:$0xff]  ;;  %v2398_v12 = vadd.f32 %v7228_v2, %v2397_v9  ;;  %v7296_v41 = vld [vmem:[#allocation3 + $0x108] sm:$0xff] }
 0x4d7   :  { %v2368_v56 = vsel %vm2365_vm15, %v2367_v61, %v2363_v60  ;;  %2666 = vmatpush.msra.mxu1 %v7279_v28  ;;  %2706 = vmatpush.msra.mxu3 %v7282_v30  ;;  %v2405_v61 = vand.u32 2147483648, %v7217_v39  ;;  %v7306_v60 = vld [vmem:[#allocation3 + $0xe8] sm:$0xff] }
 0x4d8   :  { %v2410_v3 = vmul.f32 %v3668_v26, %v2368_v56  ;;  %9490 = vst [vmem:[#allocation23_spill] sm:$0xff] %v7306_v60  ;;  %v7309_v26 = vld [vmem:[#allocation3 + $0xf8] sm:$0xff]  ;;  %v2402_v9 = vsel %vm2401_vm2, %v7228_v2, %v2398_v12  ;;  %v7313_v56 = vld [vmem:[#allocation3 + $0xc8] sm:$0xff] }
 0x4d9   :  { %2667 = vmatpush.msra.mxu1 %v7286_v44  ;;  %2707 = vmatpush.msra.mxu3 %v7289_v0  ;;  %9491 = vst [vmem:[#allocation24_spill] sm:$0xff] %v7309_v26  ;;  %v2406_v39 = vor.u32 1.1754944e-38, %v2405_v61  ;;  %v7337_v61 = vld [vmem:[#allocation3 + $0x68] sm:$0xff] }
 0x4da   :  { %v7292_v1 = vadd.f32 %v2410_v3, %v2409_v46  ;;  %9492 = vst [vmem:[#allocation25_spill] sm:$0xff] %v7313_v56  ;;  %v7316_v46 = vld [vmem:[#allocation3 + $0xd8] sm:$0xff]  ;;  %v7319_v3 = vld [vmem:[#allocation3 + $0xa8] sm:$0xff] }
 0x4db   :  { %2668 = vmatpush.msra.mxu1 %v7296_v41  ;;  %2708 = vmatpush.msra.mxu3 %v7299_v51  ;;  %v2407_v2 = vsel %vm2404_vm3, %v2406_v39, %v2402_v9  ;;  %v7327_v51 = vld [vmem:[#allocation3 + $0x88] sm:$0xff]  ;;  %v7348_v9 = vld [vmem:[#allocation3 + $0x58] sm:$0xff]  ;;  %v7443_v39 = vld [vmem:[#allocation3 + $0x40] sm:$0xff] }
 0x4dc   :  { %3669 = vtanh.f32 %v7292_v1  ;;  %9508 = vst [vmem:[#allocation47_spill] sm:$0xff] %v7443_v39 }
 0x4dd   :  { %2669 = vmatpush.msra.mxu1 %v7306_v60  ;;  %2709 = vmatpush.msra.mxu3 %v7309_v26  ;;  %v7322_v60 = vld [vmem:[#allocation3 + $0xb8] sm:$0xff] }
 0x4df   :  { %2670 = vmatpush.msra.mxu1 %v7313_v56  ;;  %2710 = vmatpush.msra.mxu3 %v7316_v46  ;;  %v7330_v56 = vld [vmem:[#allocation3 + $0x98] sm:$0xff] }
 0x4e1   :  { %2671 = vmatpush.msra.mxu1 %v7319_v3  ;;  %2711 = vmatpush.msra.mxu3 %v7322_v60 }
 0x4e2   :  { %v3670_v26 = vpop.eup %3669 }
 0x4e3   :  { %v7325_v12 = vmul.f32 %v3670_v26, %v2407_v2  ;;  %2672 = vmatpush.msra.mxu1 %v7327_v51  ;;  %2712 = vmatpush.msra.mxu3 %v7330_v56  ;;  %v7345_v26 = vld [vmem:[#allocation3 + $0x48] sm:$0xff]  ;;  %v7446_v2 = vld [vmem:[#allocation5 + $0x2e0] sm:$0xff] }
 0x4e4   :  { %9509 = vst [vmem:[#allocation11_spill] sm:$0xff] %v7446_v2 }
 0x4e5   :  { %2430 = vmatmul.f32.vlgmr.msra.gmra.mxu0 %v7325_v12  ;;  %2470 = vmatmul.f32.vlgmr.msra.gmra.mxu2 %v7325_v12 }
 0x4e6   :  { %2641 = vmatpush.msra.mxu0 %v6966_v58  ;;  %2681 = vmatpush.msra.mxu2 %v6969_v29  ;;  %v7353_v58 = vld [vmem:[#allocation3 + $0x28] sm:$0xff]  ;;  %v7356_v29 = vld [vmem:[#allocation3 + $0x38] sm:$0xff] }
 0x4e7   :  { %2673 = vmatpush.msra.mxu1 %v7337_v61  ;;  %2713 = vmatpush.msra.mxu3 %v7340_v19 }
 0x4e8   :  { %2642 = vmatpush.msra.mxu0 %v6974_v11  ;;  %2682 = vmatpush.msra.mxu2 %v6977_v10  ;;  %v7361_v11 = vld [vmem:[#allocation3 + $0x8] sm:$0xff]  ;;  %v7364_v10 = vld [vmem:[#allocation3 + $0x18] sm:$0xff] }
 0x4e9   :  { %2674 = vmatpush.msra.mxu1 %v7345_v26  ;;  %2714 = vmatpush.msra.mxu3 %v7348_v9 }
 0x4ea   :  { %2643 = vmatpush.msra.mxu0 %v6982_v33  ;;  %2683 = vmatpush.msra.mxu2 %v6985_v21  ;;  %v7374_v33 = vld [vmem:[#allocation5 + $0x3e0] sm:$0xff]  ;;  %v7378_v21 = vld [vmem:[#allocation5 + $0x3e8] sm:$0xff] }
 0x4eb   :  { %2675 = vmatpush.msra.mxu1 %v7353_v58  ;;  %2715 = vmatpush.msra.mxu3 %v7356_v29 }
 0x4ec   :  { %2644 = vmatpush.msra.mxu0 %v6990_v53  ;;  %2684 = vmatpush.msra.mxu2 %v6993_v47  ;;  %v7382_v53 = vld [vmem:[#allocation5 + $0x3c0] sm:$0xff]  ;;  %v7386_v47 = vld [vmem:[#allocation5 + $0x3c8] sm:$0xff] }
 0x4ed   :  { %2676 = vmatpush.msra.mxu1 %v7361_v11  ;;  %2716 = vmatpush.msra.mxu3 %v7364_v10 }
 0x4ee   :  { %2510 = vmatmul.f32.vlgmr.msrb.gmra.mxu0 %v7325_v12  ;;  %2550 = vmatmul.f32.vlgmr.msrb.gmra.mxu2 %v7325_v12 }
 0x4ef   :  { %2645 = vmatpush.msra.mxu0 %v7000_v38  ;;  %2677 = vmatmul.f32.vlgmr.msra.gmra.mxu1 %v7325_v12  ;;  %v7390_v38 = vld [vmem:[#allocation5 + $0x3a0] sm:$0xff] }
 0x4f0   :  { %2685 = vmatpush.msra.mxu2 %v7004_v22  ;;  %2717 = vmatmul.f32.vlgmr.msra.gmra.mxu3 %v7325_v12  ;;  %9493 = vst [vmem:[#allocation26_spill] sm:$0xff] %v7390_v38  ;;  %v7394_v22 = vld [vmem:[#allocation5 + $0x3a8] sm:$0xff] }
 0x4f1   :  { %2646 = vmatpush.msra.mxu0 %v7008_v37  ;;  %2808 = vmatpush.msrb.mxu1 %v7374_v33  ;;  %9494 = vst [vmem:[#allocation27_spill] sm:$0xff] %v7394_v22  ;;  %v7398_v37 = vld [vmem:[#allocation5 + $0x380] sm:$0xff] }
 0x4f2   :  { %2686 = vmatpush.msra.mxu2 %v7012_v13  ;;  %2848 = vmatpush.msrb.mxu3 %v7378_v21  ;;  %9495 = vst [vmem:[#allocation28_spill] sm:$0xff] %v7398_v37  ;;  %v7402_v13 = vld [vmem:[#allocation5 + $0x388] sm:$0xff] }
 0x4f3   :  { %2647 = vmatpush.msra.mxu0 %v7016_v24  ;;  %2809 = vmatpush.msrb.mxu1 %v7382_v53  ;;  %9496 = vst [vmem:[#allocation31_spill] sm:$0xff] %v7402_v13  ;;  %v7406_v24 = vld [vmem:[#allocation5 + $0x360] sm:$0xff] }
 0x4f4   :  { %2687 = vmatpush.msra.mxu2 %v7020_v40  ;;  %2849 = vmatpush.msrb.mxu3 %v7386_v47  ;;  %9497 = vst [vmem:[#allocation32_spill] sm:$0xff] %v7406_v24  ;;  %v7410_v40 = vld [vmem:[#allocation5 + $0x368] sm:$0xff] }
 0x4f5   :  { %2648 = vmatpush.msra.mxu0 %v7024_v4  ;;  %2810 = vmatpush.msrb.mxu1 %v7390_v38  ;;  %9498 = vst [vmem:[#allocation35_spill] sm:$0xff] %v7410_v40  ;;  %v7414_v4 = vld [vmem:[#allocation5 + $0x340] sm:$0xff] }
 0x4f6   :  { %2688 = vmatpush.msra.mxu2 %v7028_v16  ;;  %2850 = vmatpush.msrb.mxu3 %v7394_v22  ;;  %9499 = vst [vmem:[#allocation36_spill] sm:$0xff] %v7414_v4  ;;  %v7418_v16 = vld [vmem:[#allocation5 + $0x348] sm:$0xff] }
 0x4f7   :  { %2649 = vmatpush.msra.mxu0 %v7032_v34  ;;  %2811 = vmatpush.msrb.mxu1 %v7398_v37  ;;  %9500 = vst [vmem:[#allocation44_spill] sm:$0xff] %v7418_v16  ;;  %v7422_v34 = vld [vmem:[#allocation5 + $0x320] sm:$0xff] }
 0x4f8   :  { %2689 = vmatpush.msra.mxu2 %v7036_v8  ;;  %2851 = vmatpush.msrb.mxu3 %v7402_v13  ;;  %9501 = vst [vmem:[#allocation48_spill] sm:$0xff] %v7422_v34  ;;  %v7425_v8 = vld [vmem:[#allocation3 + $0x90] sm:$0xff] }
 0x4f9   :  { %2650 = vmatpush.msra.mxu0 %v7040_v31  ;;  %2812 = vmatpush.msrb.mxu1 %v7406_v24  ;;  %9502 = vst [vmem:[#allocation40_spill] sm:$0xff] %v7425_v8  ;;  %v7428_v31 = vld [vmem:[#allocation5 + $0x328] sm:$0xff] }
 0x4fa   :  { %2690 = vmatpush.msra.mxu2 %v7044_v18  ;;  %2852 = vmatpush.msrb.mxu3 %v7410_v40  ;;  %9503 = vst [vmem:[#allocation54_spill] sm:$0xff] %v7428_v31  ;;  %v7431_v18 = vld [vmem:[#allocation3 + $0x60] sm:$0xff] }
 0x4fb   :  { %2651 = vmatpush.msra.mxu0 %v7048_v48  ;;  %2813 = vmatpush.msrb.mxu1 %v7414_v4  ;;  %9504 = vst [vmem:[#allocation39_spill] sm:$0xff] %v7431_v18  ;;  %v7434_v48 = vld [vmem:[#allocation5 + $0x300] sm:$0xff] }
 0x4fc   :  { %2691 = vmatpush.msra.mxu2 %v7052_v62  ;;  %2853 = vmatpush.msrb.mxu3 %v7418_v16  ;;  %9505 = vst [vmem:[#allocation9_spill] sm:$0xff] %v7434_v48  ;;  %v7437_v62 = vld [vmem:[#allocation3 + $0x70] sm:$0xff] }
 0x4fd   :  { %2652 = vmatpush.msra.mxu0 %v7056_v59  ;;  %2814 = vmatpush.msrb.mxu1 %v7422_v34  ;;  %9506 = vst [vmem:[#allocation43_spill] sm:$0xff] %v7437_v62  ;;  %v7440_v59 = vld [vmem:[#allocation5 + $0x308] sm:$0xff]  ;;  %v7799_v34 = vpop.permute.xlu0 %104 }
 0x4fe   :  { %2692 = vmatpush.msra.mxu2 %v7425_v8  ;;  %2854 = vmatpush.msrb.mxu3 %v7428_v31  ;;  %9507 = vst [vmem:[#allocation10_spill] sm:$0xff] %v7440_v59 }
 0x4ff   :  { %2653 = vmatpush.msra.mxu0 %v7431_v18  ;;  %2815 = vmatpush.msrb.mxu1 %v7434_v48  ;;  %v7449_v18 = vld [vmem:[#allocation3 + $0x50] sm:$0xff]  ;;  %v7452_v48 = vld [vmem:[#allocation5 + $0x2e8] sm:$0xff] }
 0x500   :  { %2693 = vmatpush.msra.mxu2 %v7437_v62  ;;  %2855 = vmatpush.msrb.mxu3 %v7440_v59  ;;  %9510 = vst [vmem:[#allocation51_spill] sm:$0xff] %v7449_v18  ;;  %v7455_v62 = vld [vmem:[#allocation3 + $0x20] sm:$0xff] }
 0x501   :  { %2654 = vmatpush.msra.mxu0 %v7443_v39  ;;  %2816 = vmatpush.msrb.mxu1 %v7446_v2  ;;  %9511 = vst [vmem:[#allocation12_spill] sm:$0xff] %v7452_v48  ;;  %v7458_v59 = vld [vmem:[#allocation5 + $0x2c0] sm:$0xff]  ;;  %v7461_v39 = vld [vmem:[#allocation3 + $0x30] sm:$0xff]  ;;  %v7464_v2 = vld [vmem:[#allocation5 + $0x2c8] sm:$0xff] }
 0x502   :  { %2694 = vmatpush.msra.mxu2 %v7449_v18  ;;  %2856 = vmatpush.msrb.mxu3 %v7452_v48  ;;  %9512 = vst [vmem:[#allocation55_spill] sm:$0xff] %v7455_v62  ;;  %v7467_v18 = vld [vmem:[#allocation3] sm:$0xff] }
 0x503   :  { %2655 = vmatpush.msra.mxu0 %v7455_v62  ;;  %9513 = vst [vmem:[#allocation13_spill] sm:$0xff] %v7458_v59  ;;  %2817 = vmatpush.msrb.mxu1 %v7458_v59  ;;  %v7470_v48 = vld [vmem:[#allocation5 + $0x2a0] sm:$0xff]  ;;  %v7473_v62 = vld [vmem:[#allocation3 + $0x10] sm:$0xff] }
 0x504   :  { %9514 = vst [vmem:[#allocation58_spill] sm:$0xff] %v7461_v39  ;;  %2695 = vmatpush.msra.mxu2 %v7461_v39  ;;  %2857 = vmatpush.msrb.mxu3 %v7464_v2  ;;  %v7478_v39 = vld [vmem:[#allocation5 + $0x2a8] sm:$0xff] }
 0x505   :  { %9515 = vst [vmem:[#allocation66_spill] sm:$0xff] %v7464_v2  ;;  %2656 = vmatpush.msra.mxu0 %v7467_v18  ;;  %2818 = vmatpush.msrb.mxu1 %v7470_v48  ;;  %v7481_v2 = vld [vmem:[#allocation5 + $0x280] sm:$0xff] }
 0x506   :  { %9516 = vst [vmem:[#allocation59_spill] sm:$0xff] %v7467_v18  ;;  %2696 = vmatpush.msra.mxu2 %v7473_v62  ;;  %2657 = vmatmul.f32.vlgmr.msra.gmra.mxu0 %v7325_v12  ;;  %v7484_v18 = vld [vmem:[#allocation5 + $0x1e0] sm:$0xff] }
 0x507   :  { %9517 = vst [vmem:[#allocation63_spill] sm:$0xff] %v7470_v48  ;;  %2697 = vmatmul.f32.vlgmr.msra.gmra.mxu2 %v7325_v12  ;;  %2858 = vmatpush.msrb.mxu3 %v7478_v39  ;;  %v7487_v48 = vld [vmem:[#allocation5 + $0x288] sm:$0xff]  ;;  %v7493_v12 = vld [vmem:[#allocation5 + $0x260] sm:$0xff] }
 0x508   :  { %9518 = vst [vmem:[#allocation62_spill] sm:$0xff] %v7473_v62  ;;  %2819 = vmatpush.msrb.mxu1 %v7481_v2  ;;  %2788 = vmatpush.msrb.mxu0 %v7484_v18  ;;  %v7490_v62 = vld [vmem:[#allocation5 + $0x1e8] sm:$0xff] }
 0x509   :  { %9519 = vst [vmem:[#allocation70_spill] sm:$0xff] %v7478_v39  ;;  %2859 = vmatpush.msrb.mxu3 %v7487_v48  ;;  %2828 = vmatpush.msrb.mxu2 %v7490_v62  ;;  %v7496_v39 = vld [vmem:[#allocation5 + $0x1c0] sm:$0xff] }
 0x50a   :  { %9520 = vst [vmem:[#allocation71_spill] sm:$0xff] %v7481_v2  ;;  %2820 = vmatpush.msrb.mxu1 %v7493_v12  ;;  %2789 = vmatpush.msrb.mxu0 %v7496_v39  ;;  %v7499_v2 = vld [vmem:[#allocation5 + $0x268] sm:$0xff] }
 0x50b   :  { %9521 = vst [vmem:[#allocation67_spill] sm:$0xff] %v7484_v18  ;;  %2860 = vmatpush.msrb.mxu3 %v7499_v2  ;;  %v7502_v18 = vld [vmem:[#allocation5 + $0x1c8] sm:$0xff] }
 0x50c   :  { %9522 = vst [vmem:[#allocation29_spill] sm:$0xff] %v7487_v48  ;;  %2829 = vmatpush.msrb.mxu2 %v7502_v18  ;;  %v7505_v48 = vld [vmem:[#allocation5 + $0x240] sm:$0xff] }
 0x50d   :  { %9523 = vst [vmem:[#allocation14_spill] sm:$0xff] %v7490_v62  ;;  %2821 = vmatpush.msrb.mxu1 %v7505_v48  ;;  %v7508_v62 = vld [vmem:[#allocation5 + $0x1a0] sm:$0xff] }
 0x50e   :  { %9524 = vst [vmem:[#allocation74_spill] sm:$0xff] %v7493_v12  ;;  %2790 = vmatpush.msrb.mxu0 %v7508_v62  ;;  %v7511_v12 = vld [vmem:[#allocation5 + $0x248] sm:$0xff] }
 0x50f   :  { %9525 = vst [vmem:[#allocation15_spill] sm:$0xff] %v7496_v39  ;;  %2861 = vmatpush.msrb.mxu3 %v7511_v12  ;;  %v7514_v39 = vld [vmem:[#allocation5 + $0x1a8] sm:$0xff] }
 0x510   :  { %9526 = vst [vmem:[#allocation75_spill] sm:$0xff] %v7499_v2  ;;  %2830 = vmatpush.msrb.mxu2 %v7514_v39  ;;  %v7517_v2 = vld [vmem:[#allocation5 + $0x220] sm:$0xff] }
 0x511   :  { %9527 = vst [vmem:[#allocation16_spill] sm:$0xff] %v7502_v18  ;;  %2822 = vmatpush.msrb.mxu1 %v7517_v2  ;;  %v7520_v18 = vld [vmem:[#allocation5 + $0x180] sm:$0xff] }
 0x512   :  { %9528 = vst [vmem:[#allocation78_spill] sm:$0xff] %v7505_v48  ;;  %2791 = vmatpush.msrb.mxu0 %v7520_v18  ;;  %v7523_v48 = vld [vmem:[#allocation5 + $0x228] sm:$0xff] }
 0x513   :  { %9529 = vst [vmem:[#allocation17_spill] sm:$0xff] %v7508_v62  ;;  %2862 = vmatpush.msrb.mxu3 %v7523_v48  ;;  %v7526_v62 = vld [vmem:[#allocation5 + $0x188] sm:$0xff] }
 0x514   :  { %9530 = vst [vmem:[#allocation79_spill] sm:$0xff] %v7511_v12  ;;  %2831 = vmatpush.msrb.mxu2 %v7526_v62  ;;  %v7529_v12 = vld [vmem:[#allocation5 + $0x200] sm:$0xff] }
 0x515   :  { %9531 = vst [vmem:[#allocation30_spill] sm:$0xff] %v7514_v39  ;;  %2823 = vmatpush.msrb.mxu1 %v7529_v12  ;;  %v7532_v39 = vld [vmem:[#allocation5 + $0x160] sm:$0xff] }
 0x516   :  { %9532 = vst [vmem:[#allocation82_spill] sm:$0xff] %v7517_v2  ;;  %2792 = vmatpush.msrb.mxu0 %v7532_v39  ;;  %v7535_v2 = vld [vmem:[#allocation5 + $0x208] sm:$0xff] }
 0x517   :  { %9533 = vst [vmem:[#allocation33_spill] sm:$0xff] %v7520_v18  ;;  %2863 = vmatpush.msrb.mxu3 %v7535_v2  ;;  %v7538_v18 = vld [vmem:[#allocation5 + $0x168] sm:$0xff] }
 0x518   :  { %9534 = vst [vmem:[#allocation83_spill] sm:$0xff] %v7523_v48  ;;  %2832 = vmatpush.msrb.mxu2 %v7538_v18  ;;  %v7541_v48 = vld [vmem:[#allocation5 + $0x3f0] sm:$0xff] }
 0x519   :  { %9535 = vst [vmem:[#allocation34_spill] sm:$0xff] %v7526_v62  ;;  %2888 = vmatpush.msra.mxu1 %v7541_v48  ;;  %v7544_v62 = vld [vmem:[#allocation5 + $0x3f8] sm:$0xff] }
 0x51a   :  { %9536 = vst [vmem:[#allocation86_spill] sm:$0xff] %v7529_v12  ;;  %2928 = vmatpush.msra.mxu3 %v7544_v62  ;;  %v7547_v12 = vld [vmem:[#allocation5 + $0x140] sm:$0xff] }
 0x51b   :  { %9537 = vst [vmem:[#allocation37_spill] sm:$0xff] %v7532_v39  ;;  %2793 = vmatpush.msrb.mxu0 %v7547_v12  ;;  %v7550_v39 = vld [vmem:[#allocation5 + $0x148] sm:$0xff] }
 0x51c   :  { %9538 = vst [vmem:[#allocation45_spill] sm:$0xff] %v7535_v2  ;;  %2833 = vmatpush.msrb.mxu2 %v7550_v39  ;;  %v7553_v2 = vld [vmem:[#allocation5 + $0x3d0] sm:$0xff] }
 0x51d   :  { %9539 = vst [vmem:[#allocation38_spill] sm:$0xff] %v7538_v18  ;;  %2889 = vmatpush.msra.mxu1 %v7553_v2  ;;  %v7556_v18 = vld [vmem:[#allocation5 + $0x3d8] sm:$0xff] }
 0x51e   :  { %9540 = vst [vmem:[#allocation46_spill] sm:$0xff] %v7541_v48  ;;  %2929 = vmatpush.msra.mxu3 %v7556_v18  ;;  %v7559_v48 = vld [vmem:[#allocation5 + $0x120] sm:$0xff] }
 0x51f   :  { %9541 = vst [vmem:[#allocation42_spill] sm:$0xff] %v7544_v62  ;;  %2794 = vmatpush.msrb.mxu0 %v7559_v48  ;;  %v7562_v62 = vld [vmem:[#allocation5 + $0x128] sm:$0xff] }
 0x520   :  { %9542 = vst [vmem:[#allocation41_spill] sm:$0xff] %v7547_v12  ;;  %2834 = vmatpush.msrb.mxu2 %v7562_v62  ;;  %v7565_v12 = vld [vmem:[#allocation5 + $0x3b0] sm:$0xff] }
 0x521   :  { %9543 = vst [vmem:[#allocation49_spill] sm:$0xff] %v7550_v39  ;;  %2890 = vmatpush.msra.mxu1 %v7565_v12  ;;  %v7568_v39 = vld [vmem:[#allocation5 + $0x3b8] sm:$0xff] }
 0x522   :  { %9544 = vst [vmem:[#allocation89_spill] sm:$0xff] %v7553_v2  ;;  %2930 = vmatpush.msra.mxu3 %v7568_v39  ;;  %v7571_v2 = vld [vmem:[#allocation5 + $0x100] sm:$0xff] }
 0x523   :  { %9545 = vst [vmem:[#allocation50_spill] sm:$0xff] %v7556_v18  ;;  %2795 = vmatpush.msrb.mxu0 %v7571_v2  ;;  %v7574_v18 = vld [vmem:[#allocation5 + $0x108] sm:$0xff] }
 0x524   :  { %9546 = vst [vmem:[#allocation52_spill] sm:$0xff] %v7559_v48  ;;  %2835 = vmatpush.msrb.mxu2 %v7574_v18  ;;  %v7577_v48 = vld [vmem:[#allocation5 + $0x390] sm:$0xff] }
 0x525   :  { %9547 = vst [vmem:[#allocation53_spill] sm:$0xff] %v7562_v62  ;;  %2891 = vmatpush.msra.mxu1 %v7577_v48  ;;  %v7580_v62 = vld [vmem:[#allocation5 + $0x398] sm:$0xff] }
 0x526   :  { %9548 = vst [vmem:[#allocation56_spill] sm:$0xff] %v7565_v12  ;;  %2931 = vmatpush.msra.mxu3 %v7580_v62  ;;  %v7583_v12 = vld [vmem:[#allocation5 + $0xe0] sm:$0xff] }
 0x527   :  { %9549 = vst [vmem:[#allocation57_spill] sm:$0xff] %v7568_v39  ;;  %2796 = vmatpush.msrb.mxu0 %v7583_v12  ;;  %v7586_v39 = vld [vmem:[#allocation5 + $0xe8] sm:$0xff] }
 0x528   :  { %9550 = vst [vmem:[#allocation60_spill] sm:$0xff] %v7571_v2  ;;  %2836 = vmatpush.msrb.mxu2 %v7586_v39  ;;  %v7589_v2 = vld [vmem:[#allocation5 + $0x370] sm:$0xff] }
 0x529   :  { %9551 = vst [vmem:[#allocation61_spill] sm:$0xff] %v7574_v18  ;;  %2892 = vmatpush.msra.mxu1 %v7589_v2  ;;  %v7592_v18 = vld [vmem:[#allocation5 + $0x378] sm:$0xff] }
 0x52a   :  { %9552 = vst [vmem:[#allocation64_spill] sm:$0xff] %v7577_v48  ;;  %2932 = vmatpush.msra.mxu3 %v7592_v18  ;;  %v7595_v48 = vld [vmem:[#allocation5 + $0xc0] sm:$0xff] }
 0x52b   :  { %9553 = vst [vmem:[#allocation65_spill] sm:$0xff] %v7580_v62  ;;  %2797 = vmatpush.msrb.mxu0 %v7595_v48  ;;  %v7598_v62 = vld [vmem:[#allocation5 + $0xc8] sm:$0xff] }
 0x52c   :  { %9554 = vst [vmem:[#allocation68_spill] sm:$0xff] %v7583_v12  ;;  %2837 = vmatpush.msrb.mxu2 %v7598_v62  ;;  %v7601_v12 = vld [vmem:[#allocation5 + $0x350] sm:$0xff] }
 0x52d   :  { %9555 = vst [vmem:[#allocation69_spill] sm:$0xff] %v7586_v39  ;;  %2893 = vmatpush.msra.mxu1 %v7601_v12  ;;  %v7604_v39 = vld [vmem:[#allocation5 + $0x358] sm:$0xff] }
 0x52e   :  { %9556 = vst [vmem:[#allocation72_spill] sm:$0xff] %v7589_v2  ;;  %2933 = vmatpush.msra.mxu3 %v7604_v39  ;;  %v7607_v2 = vld [vmem:[#allocation5 + $0xa0] sm:$0xff] }
 0x52f   :  { %9557 = vst [vmem:[#allocation73_spill] sm:$0xff] %v7592_v18  ;;  %2798 = vmatpush.msrb.mxu0 %v7607_v2  ;;  %v7610_v18 = vld [vmem:[#allocation5 + $0xa8] sm:$0xff] }
 0x530   :  { %9558 = vst [vmem:[#allocation76_spill] sm:$0xff] %v7595_v48  ;;  %2838 = vmatpush.msrb.mxu2 %v7610_v18  ;;  %v7613_v48 = vld [vmem:[#allocation5 + $0x330] sm:$0xff] }
 0x531   :  { %9559 = vst [vmem:[#allocation77_spill] sm:$0xff] %v7598_v62  ;;  %2894 = vmatpush.msra.mxu1 %v7613_v48  ;;  %v7616_v62 = vld [vmem:[#allocation5 + $0x338] sm:$0xff] }
 0x532   :  { %9560 = vst [vmem:[#allocation80_spill] sm:$0xff] %v7601_v12  ;;  %2934 = vmatpush.msra.mxu3 %v7616_v62  ;;  %v7619_v12 = vld [vmem:[#allocation5 + $0x80] sm:$0xff] }
 0x533   :  { %9561 = vst [vmem:[#allocation81_spill] sm:$0xff] %v7604_v39  ;;  %2799 = vmatpush.msrb.mxu0 %v7619_v12  ;;  %v7622_v39 = vld [vmem:[#allocation5 + $0x88] sm:$0xff] }
 0x534   :  { %9562 = vst [vmem:[#allocation84_spill] sm:$0xff] %v7607_v2  ;;  %2839 = vmatpush.msrb.mxu2 %v7622_v39  ;;  %v7625_v2 = vld [vmem:[#allocation5 + $0x310] sm:$0xff] }
 0x535   :  { %9563 = vst [vmem:[#allocation85_spill] sm:$0xff] %v7610_v18  ;;  %2895 = vmatpush.msra.mxu1 %v7625_v2  ;;  %v7628_v18 = vld [vmem:[#allocation5 + $0x318] sm:$0xff] }
 0x536   :  { %9564 = vst [vmem:[#allocation87_spill] sm:$0xff] %v7613_v48  ;;  %2935 = vmatpush.msra.mxu3 %v7628_v18  ;;  %v7631_v48 = vld [vmem:[#allocation5 + $0x60] sm:$0xff] }
 0x537   :  { %9565 = vst [vmem:[#allocation88_spill] sm:$0xff] %v7616_v62  ;;  %2800 = vmatpush.msrb.mxu0 %v7631_v48  ;;  %v7634_v62 = vld [vmem:[#allocation5 + $0x68] sm:$0xff] }
 0x538   :  { %9566 = vst [vmem:[#allocation90_spill] sm:$0xff] %v7619_v12  ;;  %2840 = vmatpush.msrb.mxu2 %v7634_v62  ;;  %v7637_v12 = vld [vmem:[#allocation5 + $0x2f0] sm:$0xff] }
 0x539   :  { %9567 = vst [vmem:[#allocation91_spill] sm:$0xff] %v7622_v39  ;;  %2896 = vmatpush.msra.mxu1 %v7637_v12  ;;  %v7640_v39 = vld [vmem:[#allocation5 + $0x2f8] sm:$0xff] }
 0x53a   :  { %9568 = vst [vmem:[#allocation92_spill] sm:$0xff] %v7625_v2  ;;  %2936 = vmatpush.msra.mxu3 %v7640_v39  ;;  %v7643_v2 = vld [vmem:[#allocation5 + $0x40] sm:$0xff] }
 0x53b   :  { %9569 = vst [vmem:[#allocation93_spill] sm:$0xff] %v7628_v18  ;;  %2801 = vmatpush.msrb.mxu0 %v7643_v2  ;;  %v7646_v18 = vld [vmem:[#allocation5 + $0x48] sm:$0xff] }
 0x53c   :  { %9570 = vst [vmem:[#allocation94_spill] sm:$0xff] %v7631_v48  ;;  %2841 = vmatpush.msrb.mxu2 %v7646_v18  ;;  %v7649_v48 = vld [vmem:[#allocation5 + $0x2d0] sm:$0xff] }
 0x53d   :  { %9571 = vst [vmem:[#allocation95_spill] sm:$0xff] %v7634_v62  ;;  %2897 = vmatpush.msra.mxu1 %v7649_v48  ;;  %v7652_v62 = vld [vmem:[#allocation5 + $0x2d8] sm:$0xff] }
 0x53e   :  { %9572 = vst [vmem:[#allocation96_spill] sm:$0xff] %v7637_v12  ;;  %2937 = vmatpush.msra.mxu3 %v7652_v62  ;;  %v7655_v12 = vld [vmem:[#allocation5 + $0x20] sm:$0xff] }
 0x53f   :  { %9573 = vst [vmem:[#allocation97_spill] sm:$0xff] %v7640_v39  ;;  %2802 = vmatpush.msrb.mxu0 %v7655_v12  ;;  %v7658_v39 = vld [vmem:[#allocation5 + $0x28] sm:$0xff] }
 0x540   :  { %9574 = vst [vmem:[#allocation100_spill] sm:$0xff] %v7643_v2  ;;  %2842 = vmatpush.msrb.mxu2 %v7658_v39  ;;  %v7661_v2 = vld [vmem:[#allocation5 + $0x2b0] sm:$0xff] }
 0x541   :  { %9575 = vst [vmem:[#allocation103_spill] sm:$0xff] %v7646_v18  ;;  %2898 = vmatpush.msra.mxu1 %v7661_v2  ;;  %v7664_v18 = vld [vmem:[#allocation5 + $0x2b8] sm:$0xff] }
 0x542   :  { %9576 = vst [vmem:[#allocation104_spill] sm:$0xff] %v7649_v48  ;;  %2938 = vmatpush.msra.mxu3 %v7664_v18  ;;  %v7667_v48 = vld [vmem:[#allocation5] sm:$0xff] }
 0x543   :  { %9577 = vst [vmem:[#allocation107_spill] sm:$0xff] %v7652_v62  ;;  %2803 = vmatpush.msrb.mxu0 %v7667_v48  ;;  %v7670_v62 = vld [vmem:[#allocation5 + $0x8] sm:$0xff] }
 0x544   :  { %9578 = vst [vmem:[#allocation108_spill] sm:$0xff] %v7655_v12  ;;  %2843 = vmatpush.msrb.mxu2 %v7670_v62  ;;  %v7673_v12 = vld [vmem:[#allocation5 + $0x290] sm:$0xff] }
 0x545   :  { %9579 = vst [vmem:[#allocation109_spill] sm:$0xff] %v7658_v39  ;;  %2899 = vmatpush.msra.mxu1 %v7673_v12  ;;  %v7676_v39 = vld [vmem:[#allocation5 + $0x298] sm:$0xff] }
 0x546   :  { %9580 = vst [vmem:[#allocation110_spill] sm:$0xff] %v7661_v2  ;;  %2939 = vmatpush.msra.mxu3 %v7676_v39  ;;  %v7679_v2 = vld [vmem:[#allocation5 + $0x1f0] sm:$0xff] }
 0x547   :  { %9581 = vst [vmem:[#allocation111_spill] sm:$0xff] %v7664_v18  ;;  %2868 = vmatpush.msra.mxu0 %v7679_v2  ;;  %v7682_v18 = vld [vmem:[#allocation5 + $0x1f8] sm:$0xff] }
 0x548   :  { %9582 = vst [vmem:[#allocation112_spill] sm:$0xff] %v7667_v48  ;;  %2908 = vmatpush.msra.mxu2 %v7682_v18  ;;  %v7685_v48 = vld [vmem:[#allocation5 + $0x270] sm:$0xff] }
 0x549   :  { %9583 = vst [vmem:[#allocation113_spill] sm:$0xff] %v7670_v62  ;;  %2900 = vmatpush.msra.mxu1 %v7685_v48  ;;  %v7688_v62 = vld [vmem:[#allocation5 + $0x278] sm:$0xff] }
 0x54a   :  { %9584 = vst [vmem:[#allocation114_spill] sm:$0xff] %v7673_v12  ;;  %2940 = vmatpush.msra.mxu3 %v7688_v62  ;;  %v7691_v12 = vld [vmem:[#allocation5 + $0x1d0] sm:$0xff] }
 0x54b   :  { %9585 = vst [vmem:[#allocation115_spill] sm:$0xff] %v7676_v39  ;;  %2869 = vmatpush.msra.mxu0 %v7691_v12  ;;  %v7694_v39 = vld [vmem:[#allocation5 + $0x1d8] sm:$0xff] }
 0x54c   :  { %9586 = vst [vmem:[#allocation116_spill] sm:$0xff] %v7679_v2  ;;  %2909 = vmatpush.msra.mxu2 %v7694_v39  ;;  %v7697_v2 = vld [vmem:[#allocation5 + $0x250] sm:$0xff] }
 0x54d   :  { %9587 = vst [vmem:[#allocation117_spill] sm:$0xff] %v7682_v18  ;;  %2901 = vmatpush.msra.mxu1 %v7697_v2  ;;  %v7700_v18 = vld [vmem:[#allocation5 + $0x258] sm:$0xff] }
 0x54e   :  { %9588 = vst [vmem:[#allocation118_spill] sm:$0xff] %v7685_v48  ;;  %2941 = vmatpush.msra.mxu3 %v7700_v18  ;;  %v7703_v48 = vld [vmem:[#allocation5 + $0x1b0] sm:$0xff] }
 0x54f   :  { %9589 = vst [vmem:[#allocation119_spill] sm:$0xff] %v7688_v62  ;;  %2870 = vmatpush.msra.mxu0 %v7703_v48  ;;  %v7706_v62 = vld [vmem:[#allocation5 + $0x1b8] sm:$0xff] }
 0x550   :  { %9590 = vst [vmem:[#allocation120_spill] sm:$0xff] %v7691_v12  ;;  %2910 = vmatpush.msra.mxu2 %v7706_v62  ;;  %v7709_v12 = vld [vmem:[#allocation5 + $0x230] sm:$0xff] }
 0x551   :  { %9591 = vst [vmem:[#allocation121_spill] sm:$0xff] %v7694_v39  ;;  %2902 = vmatpush.msra.mxu1 %v7709_v12  ;;  %v7712_v39 = vld [vmem:[#allocation5 + $0x238] sm:$0xff] }
 0x552   :  { %9592 = vst [vmem:[#allocation122_spill] sm:$0xff] %v7697_v2  ;;  %2942 = vmatpush.msra.mxu3 %v7712_v39  ;;  %v7715_v2 = vld [vmem:[#allocation5 + $0x190] sm:$0xff] }
 0x553   :  { %9593 = vst [vmem:[#allocation123_spill] sm:$0xff] %v7700_v18  ;;  %2871 = vmatpush.msra.mxu0 %v7715_v2  ;;  %v7718_v18 = vld [vmem:[#allocation5 + $0x198] sm:$0xff] }
 0x554   :  { %9594 = vst [vmem:[#allocation124_spill] sm:$0xff] %v7703_v48  ;;  %2911 = vmatpush.msra.mxu2 %v7718_v18  ;;  %v7721_v48 = vld [vmem:[#allocation5 + $0x210] sm:$0xff] }
 0x555   :  { %9595 = vst [vmem:[#allocation125_spill] sm:$0xff] %v7706_v62  ;;  %2903 = vmatpush.msra.mxu1 %v7721_v48  ;;  %v7724_v62 = vld [vmem:[#allocation5 + $0x218] sm:$0xff] }
 0x556   :  { %9596 = vst [vmem:[#allocation126_spill] sm:$0xff] %v7709_v12  ;;  %2943 = vmatpush.msra.mxu3 %v7724_v62  ;;  %v7727_v12 = vld [vmem:[#allocation5 + $0x170] sm:$0xff] }
 0x557   :  { %9597 = vst [vmem:[#allocation127_spill] sm:$0xff] %v7712_v39  ;;  %2872 = vmatpush.msra.mxu0 %v7727_v12  ;;  %v7730_v39 = vld [vmem:[#allocation5 + $0x178] sm:$0xff] }
 0x558   :  { %9598 = vst [vmem:[#allocation128_spill] sm:$0xff] %v7715_v2  ;;  %2912 = vmatpush.msra.mxu2 %v7730_v39  ;;  %v7733_v2 = vld [vmem:[#allocation5 + $0x150] sm:$0xff] }
 0x559   :  { %9599 = vst [vmem:[#allocation129_spill] sm:$0xff] %v7718_v18  ;;  %2873 = vmatpush.msra.mxu0 %v7733_v2  ;;  %v7736_v18 = vld [vmem:[#allocation5 + $0x158] sm:$0xff] }
 0x55a   :  { %9600 = vst [vmem:[#allocation130_spill] sm:$0xff] %v7721_v48  ;;  %2913 = vmatpush.msra.mxu2 %v7736_v18  ;;  %v7739_v48 = vld [vmem:[#allocation5 + $0x130] sm:$0xff] }
 0x55b   :  { %9601 = vst [vmem:[#allocation131_spill] sm:$0xff] %v7724_v62  ;;  %2874 = vmatpush.msra.mxu0 %v7739_v48  ;;  %v7742_v62 = vld [vmem:[#allocation5 + $0x138] sm:$0xff] }
 0x55c   :  { %9602 = vst [vmem:[#allocation132_spill] sm:$0xff] %v7727_v12  ;;  %2914 = vmatpush.msra.mxu2 %v7742_v62  ;;  %v7745_v12 = vld [vmem:[#allocation5 + $0x110] sm:$0xff] }
 0x55d   :  { %9603 = vst [vmem:[#allocation133_spill] sm:$0xff] %v7730_v39  ;;  %2875 = vmatpush.msra.mxu0 %v7745_v12  ;;  %v7748_v39 = vld [vmem:[#allocation5 + $0x118] sm:$0xff] }
 0x55e   :  { %9604 = vst [vmem:[#allocation134_spill] sm:$0xff] %v7733_v2  ;;  %2915 = vmatpush.msra.mxu2 %v7748_v39  ;;  %v7751_v2 = vld [vmem:[#allocation5 + $0xf0] sm:$0xff] }
 0x55f   :  { %9605 = vst [vmem:[#allocation135_spill] sm:$0xff] %v7736_v18  ;;  %2876 = vmatpush.msra.mxu0 %v7751_v2  ;;  %v7754_v18 = vld [vmem:[#allocation5 + $0xf8] sm:$0xff] }
 0x560   :  { %9606 = vst [vmem:[#allocation136_spill] sm:$0xff] %v7739_v48  ;;  %2916 = vmatpush.msra.mxu2 %v7754_v18  ;;  %v7757_v48 = vld [vmem:[#allocation5 + $0xd0] sm:$0xff] }
 0x561   :  { %9607 = vst [vmem:[#allocation137_spill] sm:$0xff] %v7742_v62  ;;  %2877 = vmatpush.msra.mxu0 %v7757_v48  ;;  %v7760_v62 = vld [vmem:[#allocation5 + $0xd8] sm:$0xff] }
 0x562   :  { %9608 = vst [vmem:[#allocation138_spill] sm:$0xff] %v7745_v12  ;;  %2917 = vmatpush.msra.mxu2 %v7760_v62  ;;  %v7763_v12 = vld [vmem:[#allocation5 + $0xb0] sm:$0xff]  ;;  %v2431_v59 = vpop.f32.mrf.mxu0 }
 0x563   :  { %9609 = vst [vmem:[#allocation139_spill] sm:$0xff] %v7748_v39  ;;  %2878 = vmatpush.msra.mxu0 %v7763_v12  ;;  %v7766_v39 = vld [vmem:[#allocation5 + $0xb8] sm:$0xff] }
 0x564   :  { %9610 = vst [vmem:[#allocation140_spill] sm:$0xff] %v7751_v2  ;;  %2918 = vmatpush.msra.mxu2 %v7766_v39  ;;  %v7769_v2 = vld [vmem:[#allocation5 + $0x90] sm:$0xff] }
 0x565   :  { %9611 = vst [vmem:[#allocation141_spill] sm:$0xff] %v7754_v18  ;;  %2879 = vmatpush.msra.mxu0 %v7769_v2  ;;  %v7772_v18 = vld [vmem:[#allocation5 + $0x98] sm:$0xff] }
 0x566   :  { %9612 = vst [vmem:[#allocation142_spill] sm:$0xff] %v7757_v48  ;;  %2919 = vmatpush.msra.mxu2 %v7772_v18  ;;  %v7775_v48 = vld [vmem:[#allocation5 + $0x70] sm:$0xff] }
 0x567   :  { %9613 = vst [vmem:[#allocation143_spill] sm:$0xff] %v7760_v62  ;;  %2880 = vmatpush.msra.mxu0 %v7775_v48  ;;  %v7778_v62 = vld [vmem:[#allocation5 + $0x78] sm:$0xff] }
 0x568   :  { %9614 = vst [vmem:[#allocation144_spill] sm:$0xff] %v7763_v12  ;;  %2920 = vmatpush.msra.mxu2 %v7778_v62  ;;  %v7781_v12 = vld [vmem:[#allocation5 + $0x50] sm:$0xff]  ;;  %v2471_v4 = vpop.f32.mrf.mxu2 }
 0x569   :  { %9615 = vst [vmem:[#allocation145_spill] sm:$0xff] %v7766_v39  ;;  %2881 = vmatpush.msra.mxu0 %v7781_v12  ;;  %v7784_v39 = vld [vmem:[#allocation5 + $0x58] sm:$0xff] }
 0x56a   :  { %9616 = vst [vmem:[#allocation146_spill] sm:$0xff] %v7769_v2  ;;  %2921 = vmatpush.msra.mxu2 %v7784_v39  ;;  %v7787_v2 = vld [vmem:[#allocation5 + $0x30] sm:$0xff] }
 0x56b   :  { %9617 = vst [vmem:[#allocation147_spill] sm:$0xff] %v7772_v18  ;;  %2882 = vmatpush.msra.mxu0 %v7787_v2  ;;  %v7790_v18 = vld [vmem:[#allocation5 + $0x38] sm:$0xff] }
 0x56c   :  { %9618 = vst [vmem:[#allocation148_spill] sm:$0xff] %v7775_v48  ;;  %2922 = vmatpush.msra.mxu2 %v7790_v18  ;;  %v7793_v48 = vld [vmem:[#allocation5 + $0x10] sm:$0xff] }
 0x56d   :  { %9619 = vst [vmem:[#allocation149_spill] sm:$0xff] %v7778_v62  ;;  %2883 = vmatpush.msra.mxu0 %v7793_v48  ;;  %v7796_v62 = vld [vmem:[#allocation5 + $0x18] sm:$0xff] }
 0x56e   :  { %9620 = vst [vmem:[#allocation150_spill] sm:$0xff] %v7781_v12  ;;  %2923 = vmatpush.msra.mxu2 %v7796_v62  ;;  %v2451_v12 = vpop.f32.mrf.mxu1 }
 0x56f   :  { %9621 = vst [vmem:[#allocation151_spill] sm:$0xff] %v7784_v39  ;;  %v2452_v31 = vadd.f32 %v2451_v12, %v2431_v59  ;;  %v2491_v39 = vpop.f32.mrf.mxu3 }
 0x570   :  { %9622 = vst [vmem:[#allocation152_spill] sm:$0xff] %v7787_v2 }
 0x571   :  { %9623 = vst [vmem:[#allocation153_spill] sm:$0xff] %v7790_v18  ;;  %v2574_v2 = vadd.f32 %v2452_v31, %v5310_v15  ;;  %v146_v18 = vmul.f32 %v9476_v54, %v7799_v34  ;;  %v2551_v38 = vpop.f32.mrf.mxu2 }
 0x572   :  { %9624 = vst [vmem:[#allocation154_spill] sm:$0xff] %v7793_v48  ;;  %v2492_v48 = vadd.f32 %v2491_v39, %v2471_v4  ;;  %v2511_v4 = vpop.f32.mrf.mxu0 }
 0x573   :  { %9625 = vst [vmem:[#allocation155_spill] sm:$0xff] %v7796_v62  ;;  %v3470_v16 = vmul.f32 -1.442695, %v2574_v2  ;;  %v188_v62 = vadd.f32 %v9478_v36, %v146_v18  ;;  %v148_v2 = vmul.f32 %v9479_v5, %v7799_v34 }
 0x574   :  { %v2575_v40 = vadd.f32 %v2492_v48, %v9477_v52 }
 0x575   :  { %3671 = vpow2.f32 %v3470_v16 }
 0x576   :  { %v2531_v8 = vpop.f32.mrf.mxu1  ;;  %v3471_v13 = vmul.f32 -1.442695, %v2575_v40 }
 0x577   :  { %v2571_v59 = vpop.f32.mrf.mxu3 }
 0x578   :  { %3673 = vpow2.f32 %v3471_v13  ;;  %v2572_v54 = vadd.f32 %v2571_v59, %v2551_v38 }
 0x57a   :  { %v2577_v48 = vadd.f32 %v2572_v54, %v9480_v57  ;;  %v145_v54 = vmul.f32 %v9483_v32, %v7799_v34 }
 0x57b   :  { %v3672_v37 = vpop.eup %3671 }
 0x57c   :  { %v2581_v22 = vadd.f32 1.0, %v3672_v37  ;;  %v3472_v40 = vmul.f32 -1.442695, %v2577_v48  ;;  %v2532_v37 = vadd.f32 %v2531_v8, %v2511_v4 }
 0x57e   :  { %v2678_v24 = vpop.f32.mrf.mxu1  ;;  %3675 = vrcp.f32 %v2581_v22  ;;  %v3674_v16 = vpop.eup %3673  ;;  %v2576_v38 = vadd.f32 %v2532_v37, %v9482_v17  ;;  %v2593_v8 = vand.u32 2147483648, %v2581_v22  ;;  %vm2587_vm5 = vweird.f32 %v2581_v22 }
 0x57f   :  { %v2722_v12 = vadd.f32 %v2678_v24, %v188_v62  ;;  %v2600_v39 = vadd.f32 1.0, %v3674_v16  ;;  %v2718_v18 = vpop.f32.mrf.mxu3  ;;  %v190_v24 = vadd.f32 %v9481_v14, %v148_v2 }
 0x581   :  { %v3474_v31 = vmul.f32 -1.442695, %v2722_v12  ;;  %v2724_v12 = vadd.f32 %v2718_v18, %v190_v24  ;;  %v2612_v24 = vand.u32 2147483648, %v2600_v39  ;;  %v2610_v37 = vand.u32 2147483647, %v2600_v39 }
 0x582   :  { %vm2606_vm8 = vweird.f32 %v2600_v39 }
 0x583   :  { %3677 = vpow2.f32 %v3474_v31  ;;  %v3475_v5 = vmul.f32 -1.442695, %v2724_v12  ;;  %vm2611_vm11 = vcmp.eq.f32.partialorder %v2610_v37, 8.507059e+37 }
 0x584   :  { %v3676_v62 = vpop.eup %3675  ;;  %3679 = vrcp.f32 %v2600_v39 }
 0x585   :  { %v2583_v13 = vmul.f32 %v3676_v62, %v2581_v22  ;;  %3681 = vpow2.f32 %v3472_v40  ;;  %vm2588_vm4 = vweird.f32 %v3676_v62  ;;  %v2591_v40 = vand.u32 2147483647, %v2581_v22 }
 0x586   :  { %3683 = vtanh.f32 %v2576_v38  ;;  %vm7815_vm6 = vmor %vm2587_vm5, %vm2588_vm4  ;;  %v2658_v38 = vpop.f32.mrf.mxu0 }
 0x587   :  { %v2584_v36 = vsub.f32 1.0, %v2583_v13  ;;  %3685 = vpow2.f32 %v3475_v5  ;;  %v187_v13 = vadd.f32 %v9486_v27, %v145_v54  ;;  %vm2592_vm9 = vcmp.eq.f32.partialorder %v2591_v40, 8.507059e+37 }
 0x589   :  { %v3678_v52 = vpop.eup %3677  ;;  %v2585_v59 = vmul.f32 %v3676_v62, %v2584_v36  ;;  %v2721_v22 = vadd.f32 %v2658_v38, %v187_v13 }
 0x58a   :  { %v3680_v15 = vpop.eup %3679  ;;  %v7813_v2 = vadd.f32 1.0, %v3678_v52 }
 0x58b   :  { %v3682_v31 = vpop.eup %3681  ;;  %v2602_v16 = vmul.f32 %v3680_v15, %v2600_v39  ;;  %v2586_v48 = vadd.f32 %v3676_v62, %v2585_v59  ;;  %vm2607_vm7 = vweird.f32 %v3680_v15  ;;  %v2594_v59 = vor.u32 1.1754944e-38, %v2593_v8 }
 0x58c   :  { %v2620_v4 = vadd.f32 1.0, %v3682_v31  ;;  %v3684_v31 = vpop.eup %3683  ;;  %vm2608_vm10 = vmor %vm2606_vm8, %vm2607_vm7  ;;  %v3473_v17 = vmul.f32 -1.442695, %v2721_v22  ;;  %vm2753_vm1 = vweird.f32 %v7813_v2 }
 0x58d   :  { %v2603_v18 = vsub.f32 1.0, %v2602_v16  ;;  %v2590_v52 = vsel %vm7815_vm6, %v3676_v62, %v2586_v48  ;;  %v2613_v16 = vor.u32 1.1754944e-38, %v2612_v24  ;;  %v3686_v14 = vpop.eup %3685 }
 0x58e   :  { %3687 = vrcp.f32 %v2620_v4  ;;  %v2595_v32 = vsel %vm2592_vm9, %v2594_v59, %v2590_v52  ;;  %v7830_v13 = vadd.f32 1.0, %v3686_v14  ;;  %v2632_v37 = vand.u32 2147483648, %v2620_v4 }
 0x58f   :  { %v2604_v12 = vmul.f32 %v3680_v15, %v2603_v18  ;;  %3689 = vrcp.f32 %v7813_v2  ;;  %v2637_v8 = vmul.f32 %v3684_v31, %v2595_v32  ;;  %vm2626_vm13 = vweird.f32 %v2620_v4  ;;  %v2698_v31 = vpop.f32.mrf.mxu2 }
 0x590   :  { %3691 = vpow2.f32 %v3473_v17  ;;  %v2630_v17 = vand.u32 2147483647, %v2620_v4  ;;  %v147_v32 = vmul.f32 %v5031_v43, %v7799_v34  ;;  %v2633_v14 = vor.u32 1.1754944e-38, %v2632_v37 }
 0x591   :  { %v2605_v5 = vadd.f32 %v3680_v15, %v2604_v12  ;;  %vm2773_vm9 = vweird.f32 %v7830_v13 }
 0x592   :  { %vm2631_vm15 = vcmp.eq.f32.partialorder %v2630_v17, 8.507059e+37 }
 0x593   :  { %v2609_v54 = vsel %vm2608_vm10, %v3680_v15, %v2605_v5 }
 0x594   :  { %v3688_v18 = vpop.eup %3687  ;;  %v2614_v27 = vsel %vm2611_vm11, %v2613_v16, %v2609_v54  ;;  %v189_v54 = vadd.f32 %v5057_v63, %v147_v32  ;;  %v9630_v32 = vld [vmem:[#allocation22_spill] sm:$0xff] }
 0x595   :  { %v7823_v62 = vpop.eup %3689  ;;  %v2636_v48 = vmul.f32 %v2614_v27, %v7213_v35  ;;  %v2622_v36 = vmul.f32 %v3688_v18, %v2620_v4  ;;  %vm2627_vm12 = vweird.f32 %v3688_v18 }
 0x596   :  { %v2749_v24 = vmul.f32 %v7823_v62, %v7813_v2  ;;  %v3692_v12 = vpop.eup %3691  ;;  %vm2628_vm14 = vmor %vm2626_vm13, %vm2627_vm12  ;;  %vm2754_vm0 = vweird.f32 %v7823_v62 }
 0x597   :  { %v7826_v39 = vadd.f32 %v2637_v8, %v2636_v48  ;;  %v2623_v40 = vsub.f32 1.0, %v2622_v36  ;;  %v2728_v52 = vadd.f32 1.0, %v3692_v12  ;;  %v2723_v8 = vadd.f32 %v2698_v31, %v189_v54  ;;  %vm7851_vm2 = vmor %vm2753_vm1, %vm2754_vm0  ;;  %v9634_v31 = vld [vmem:[#allocation26_spill] sm:$0xff]  ;;  %v9635_v54 = vld [vmem:[#allocation27_spill] sm:$0xff] }
 0x598   :  { %v2750_v27 = vsub.f32 1.0, %v2749_v24  ;;  %v2759_v36 = vand.u32 2147483648, %v7813_v2 }
 0x599   :  { %3693 = vtanh.f32 %v7826_v39  ;;  %v2624_v15 = vmul.f32 %v3688_v18, %v2623_v40  ;;  %vm2734_vm4 = vweird.f32 %v2728_v52 }
 0x59a   :  { %3695 = vrcp.f32 %v7830_v13  ;;  %v2751_v5 = vmul.f32 %v7823_v62, %v2750_v27  ;;  %v2760_v12 = vor.u32 1.1754944e-38, %v2759_v36  ;;  %v9640_v36 = vld [vmem:[#allocation36_spill] sm:$0xff] }
 0x59b   :  { %v2625_v38 = vadd.f32 %v3688_v18, %v2624_v15  ;;  %3697 = vrcp.f32 %v2728_v52  ;;  %v2740_v15 = vand.u32 2147483648, %v2728_v52 }
 0x59c   :  { %3699 = vtanh.f32 %v2723_v8  ;;  %v9638_v8 = vld [vmem:[#allocation32_spill] sm:$0xff] }
 0x59d   :  { %v2629_v35 = vsel %vm2628_vm14, %v3688_v18, %v2625_v38  ;;  %v2752_v18 = vadd.f32 %v7823_v62, %v2751_v5  ;;  %v4333_v5 = vld [vmem:[#allocation3 + $0x180] sm:$0xff] }
 0x59e   :  { %v2634_v22 = vsel %vm2631_vm15, %v2633_v14, %v2629_v35  ;;  %v9633_v14 = vld [vmem:[#allocation25_spill] sm:$0xff] }
 0x59f   :  { %v3694_v59 = vpop.eup %3693 }
 0x5a0   :  { %v2640_v16 = vmul.f32 %v3694_v59, %v2634_v22  ;;  %v7838_v48 = vpop.eup %3695  ;;  %v4327_v22 = vld [vmem:[#allocation3 + $0x1e0] sm:$0xff] }
 0x5a1   :  { %v3698_v4 = vpop.eup %3697  ;;  %v2769_v40 = vmul.f32 %v7838_v48, %v7830_v13  ;;  %vm2774_vm8 = vweird.f32 %v7838_v48 }
 0x5a2   :  { %2824 = vmatmul.f32.vlgmr.msrb.gmra.mxu1 %v2640_v16  ;;  %2864 = vmatmul.f32.vlgmr.msrb.gmra.mxu3 %v2640_v16  ;;  %v2730_v34 = vmul.f32 %v3698_v4, %v2728_v52  ;;  %vm2735_vm3 = vweird.f32 %v3698_v4  ;;  %vm2775_vm10 = vmor %vm2773_vm9, %vm2774_vm8 }
 0x5a3   :  { %3035 = vmatpush.msrb.mxu1 %v7230_v23  ;;  %3075 = vmatpush.msrb.mxu3 %v7233_v25  ;;  %v2757_v23 = vand.u32 2147483647, %v7813_v2  ;;  %v2770_v17 = vsub.f32 1.0, %v2769_v40  ;;  %vm2736_vm6 = vmor %vm2734_vm4, %vm2735_vm3  ;;  %v4348_v40 = vld [vmem:[#allocation3 + $0xb0] sm:$0xff]  ;;  %v9642_v25 = vld [vmem:[#allocation48_spill] sm:$0xff] }
 0x5a4   :  { %v2731_v24 = vsub.f32 1.0, %v2730_v34  ;;  %v9639_v34 = vld [vmem:[#allocation35_spill] sm:$0xff] }
 0x5a5   :  { %3036 = vmatpush.msrb.mxu1 %v7242_v45  ;;  %3076 = vmatpush.msrb.mxu3 %v7245_v7  ;;  %v2738_v45 = vand.u32 2147483647, %v2728_v52  ;;  %v2756_v7 = vsel %vm7851_vm2, %v7823_v62, %v2752_v18  ;;  %vm2758_vm5 = vcmp.eq.f32.partialorder %v2757_v23, 8.507059e+37  ;;  %v3700_v62 = vpop.eup %3699  ;;  %v2771_v27 = vmul.f32 %v7838_v48, %v2770_v17  ;;  %v4347_v18 = vld [vmem:[#allocation3 + $0xa0] sm:$0xff]  ;;  %v9648_v17 = vld [vmem:[#allocation10_spill] sm:$0xff] }
 0x5a6   :  { %v2732_v37 = vmul.f32 %v3698_v4, %v2731_v24  ;;  %v9641_v24 = vld [vmem:[#allocation44_spill] sm:$0xff]  ;;  %v4349_v23 = vld [vmem:[#allocation3 + $0x80] sm:$0xff] }
 0x5a7   :  { %3037 = vmatpush.msrb.mxu1 %v7255_v49  ;;  %3077 = vmatpush.msrb.mxu3 %v7258_v6  ;;  %v2741_v49 = vor.u32 1.1754944e-38, %v2740_v15  ;;  %v2761_v6 = vsel %vm2758_vm5, %v2760_v12, %v2756_v7  ;;  %vm2739_vm7 = vcmp.eq.f32.partialorder %v2738_v45, 8.507059e+37  ;;  %v9643_v15 = vld [vmem:[#allocation40_spill] sm:$0xff]  ;;  %v9645_v45 = vld [vmem:[#allocation39_spill] sm:$0xff]  ;;  %v9646_v7 = vld [vmem:[#allocation9_spill] sm:$0xff] }
 0x5a8   :  { %v2733_v2 = vadd.f32 %v3698_v4, %v2732_v37  ;;  %v9644_v37 = vld [vmem:[#allocation54_spill] sm:$0xff]  ;;  %v9647_v12 = vld [vmem:[#allocation43_spill] sm:$0xff] }
 0x5a9   :  { %3038 = vmatpush.msrb.mxu1 %v7265_v50  ;;  %3078 = vmatpush.msrb.mxu3 %v7268_v20  ;;  %v2783_v20 = vmul.f32 %v2761_v6, %v7292_v1  ;;  %v9651_v6 = vld [vmem:[#allocation51_spill] sm:$0xff] }
 0x5aa   :  { %2904 = vmatmul.f32.vlgmr.msra.gmra.mxu1 %v2640_v16  ;;  %2944 = vmatmul.f32.vlgmr.msra.gmra.mxu3 %v2640_v16  ;;  %v2737_v38 = vsel %vm2736_vm6, %v3698_v4, %v2733_v2  ;;  %v4342_v16 = vld [vmem:[#allocation3 + $0x110] sm:$0xff] }
 0x5ab   :  { %3039 = vmatpush.msrb.mxu1 %v7272_v55  ;;  %3079 = vmatpush.msrb.mxu3 %v7275_v42  ;;  %v2742_v50 = vsel %vm2739_vm7, %v2741_v49, %v2737_v38  ;;  %v2772_v42 = vadd.f32 %v7838_v48, %v2771_v27  ;;  %v9637_v4 = vld [vmem:[#allocation31_spill] sm:$0xff]  ;;  %v9652_v38 = vld [vmem:[#allocation12_spill] sm:$0xff]  ;;  %v9654_v27 = vld [vmem:[#allocation13_spill] sm:$0xff] }
 0x5ac   :  { %v2784_v52 = vmul.f32 %v3700_v62, %v2742_v50  ;;  %v9649_v2 = vld [vmem:[#allocation47_spill] sm:$0xff]  ;;  %v9655_v50 = vld [vmem:[#allocation58_spill] sm:$0xff] }
 0x5ad   :  { %3040 = vmatpush.msrb.mxu1 %v7279_v28  ;;  %3080 = vmatpush.msrb.mxu3 %v7282_v30  ;;  %v2779_v28 = vand.u32 2147483648, %v7830_v13  ;;  %v2777_v30 = vand.u32 2147483647, %v7830_v13  ;;  %v2776_v1 = vsel %vm2775_vm10, %v7838_v48, %v2772_v42  ;;  %v9636_v48 = vld [vmem:[#allocation28_spill] sm:$0xff]  ;;  %v9650_v49 = vld [vmem:[#allocation11_spill] sm:$0xff] }
 0x5ae   :  { %v7870_v55 = vadd.f32 %v2784_v52, %v2783_v20  ;;  %v9653_v62 = vld [vmem:[#allocation55_spill] sm:$0xff]  ;;  %v9656_v20 = vld [vmem:[#allocation66_spill] sm:$0xff] }
 0x5af   :  { %3041 = vmatpush.msrb.mxu1 %v7286_v44  ;;  %3081 = vmatpush.msrb.mxu3 %v7289_v0  ;;  %v9631_v44 = vld [vmem:[#allocation23_spill] sm:$0xff]  ;;  %v9632_v0 = vld [vmem:[#allocation24_spill] sm:$0xff]  ;;  %vm2778_vm11 = vcmp.eq.f32.partialorder %v2777_v30, 8.507059e+37 }
 0x5b0   :  { %3701 = vtanh.f32 %v7870_v55  ;;  %v9657_v52 = vld [vmem:[#allocation59_spill] sm:$0xff] }
 0x5b1   :  { %3042 = vmatpush.msrb.mxu1 %v7296_v41  ;;  %3082 = vmatpush.msrb.mxu3 %v9630_v32  ;;  %v2780_v41 = vor.u32 1.1754944e-38, %v2779_v28  ;;  %v9658_v42 = vld [vmem:[#allocation63_spill] sm:$0xff]  ;;  %v9659_v32 = vld [vmem:[#allocation62_spill] sm:$0xff] }
 0x5b2   :  { %v9660_v28 = vld [vmem:[#allocation70_spill] sm:$0xff]  ;;  %v9661_v30 = vld [vmem:[#allocation71_spill] sm:$0xff] }
 0x5b3   :  { %3043 = vmatpush.msrb.mxu1 %v9631_v44  ;;  %3083 = vmatpush.msrb.mxu3 %v9632_v0  ;;  %v2781_v59 = vsel %vm2778_vm11, %v2780_v41, %v2776_v1  ;;  %v9662_v44 = vld [vmem:[#allocation67_spill] sm:$0xff]  ;;  %v9663_v0 = vld [vmem:[#allocation29_spill] sm:$0xff]  ;;  %v9664_v1 = vld [vmem:[#allocation14_spill] sm:$0xff] }
 0x5b4   :  { %v9666_v41 = vld [vmem:[#allocation15_spill] sm:$0xff] }
 0x5b5   :  { %3044 = vmatpush.msrb.mxu1 %v9633_v14  ;;  %3084 = vmatpush.msrb.mxu3 %v7316_v46  ;;  %v4328_v46 = vld [vmem:[#allocation3 + $0x1f0] sm:$0xff]  ;;  %v9665_v14 = vld [vmem:[#allocation74_spill] sm:$0xff] }
 0x5b6   :  { %v3702_v35 = vpop.eup %3701 }
 0x5b7   :  { %3045 = vmatpush.msrb.mxu1 %v7319_v3  ;;  %3085 = vmatpush.msrb.mxu3 %v7322_v60  ;;  %v7887_v13 = vmul.f32 %v3702_v35, %v2781_v59  ;;  %v4329_v60 = vld [vmem:[#allocation3 + $0x1c0] sm:$0xff]  ;;  %v4330_v3 = vld [vmem:[#allocation3 + $0x1d0] sm:$0xff]  ;;  %v9668_v59 = vld [vmem:[#allocation16_spill] sm:$0xff] }
 0x5b8   :  { %v9667_v35 = vld [vmem:[#allocation75_spill] sm:$0xff] }
 0x5b9   :  { %3046 = vmatpush.msrb.mxu1 %v7327_v51  ;;  %3086 = vmatpush.msrb.mxu3 %v7330_v56  ;;  %v4331_v51 = vld [vmem:[#allocation3 + $0x1a0] sm:$0xff]  ;;  %v4332_v56 = vld [vmem:[#allocation3 + $0x1b0] sm:$0xff] }
 0x5ba   :  { %2804 = vmatmul.f32.vlgmr.msrb.gmra.mxu0 %v7887_v13  ;;  %2844 = vmatmul.f32.vlgmr.msrb.gmra.mxu2 %v7887_v13 }
 0x5bb   :  { %3015 = vmatpush.msrb.mxu0 %v4327_v22  ;;  %3055 = vmatpush.msrb.mxu2 %v4328_v46  ;;  %v9669_v22 = vld [vmem:[#allocation78_spill] sm:$0xff]  ;;  %v9671_v46 = vld [vmem:[#allocation79_spill] sm:$0xff] }
 0x5bc   :  { %3047 = vmatpush.msrb.mxu1 %v7337_v61  ;;  %3087 = vmatpush.msrb.mxu3 %v7340_v19  ;;  %v4334_v61 = vld [vmem:[#allocation3 + $0x190] sm:$0xff]  ;;  %v4335_v19 = vld [vmem:[#allocation3 + $0x160] sm:$0xff] }
 0x5bd   :  { %3016 = vmatpush.msrb.mxu0 %v4329_v60  ;;  %3056 = vmatpush.msrb.mxu2 %v4330_v3  ;;  %v9672_v60 = vld [vmem:[#allocation30_spill] sm:$0xff] }
 0x5be   :  { %3048 = vmatpush.msrb.mxu1 %v7345_v26  ;;  %3088 = vmatpush.msrb.mxu3 %v7348_v9  ;;  %v4336_v26 = vld [vmem:[#allocation3 + $0x170] sm:$0xff]  ;;  %v4337_v9 = vld [vmem:[#allocation3 + $0x140] sm:$0xff]  ;;  %v9673_v3 = vld [vmem:[#allocation82_spill] sm:$0xff] }
 0x5bf   :  { %3017 = vmatpush.msrb.mxu0 %v4331_v51  ;;  %3057 = vmatpush.msrb.mxu2 %v4332_v56  ;;  %v9674_v51 = vld [vmem:[#allocation33_spill] sm:$0xff]  ;;  %v9675_v56 = vld [vmem:[#allocation83_spill] sm:$0xff] }
 0x5c0   :  { %3049 = vmatpush.msrb.mxu1 %v7353_v58  ;;  %3089 = vmatpush.msrb.mxu3 %v7356_v29  ;;  %v4338_v58 = vld [vmem:[#allocation3 + $0x150] sm:$0xff]  ;;  %v4339_v29 = vld [vmem:[#allocation3 + $0x120] sm:$0xff] }
 0x5c1   :  { %3018 = vmatpush.msrb.mxu0 %v4333_v5  ;;  %3058 = vmatpush.msrb.mxu2 %v4334_v61  ;;  %v9676_v5 = vld [vmem:[#allocation34_spill] sm:$0xff] }
 0x5c2   :  { %3050 = vmatpush.msrb.mxu1 %v7361_v11  ;;  %3090 = vmatpush.msrb.mxu3 %v7364_v10  ;;  %v4340_v11 = vld [vmem:[#allocation3 + $0x130] sm:$0xff]  ;;  %v4341_v10 = vld [vmem:[#allocation3 + $0x100] sm:$0xff]  ;;  %v9677_v61 = vld [vmem:[#allocation86_spill] sm:$0xff] }
 0x5c3   :  { %2884 = vmatmul.f32.vlgmr.msra.gmra.mxu0 %v7887_v13  ;;  %2924 = vmatmul.f32.vlgmr.msra.gmra.mxu2 %v7887_v13 }
 0x5c4   :  { %3019 = vmatpush.msrb.mxu0 %v4335_v19  ;;  %3051 = vmatmul.f32.vlgmr.msrb.gmra.mxu1 %v7887_v13  ;;  %v9678_v19 = vld [vmem:[#allocation37_spill] sm:$0xff] }
 0x5c5   :  { %3059 = vmatpush.msrb.mxu2 %v4336_v26  ;;  %3091 = vmatmul.f32.vlgmr.msrb.gmra.mxu3 %v7887_v13  ;;  %v9679_v26 = vld [vmem:[#allocation45_spill] sm:$0xff] }
 0x5c6   :  { %3020 = vmatpush.msrb.mxu0 %v4337_v9  ;;  %3182 = vmatpush.msra.mxu1 %v7374_v33  ;;  %v4343_v33 = vld [vmem:[#allocation3 + $0xe0] sm:$0xff]  ;;  %v9680_v9 = vld [vmem:[#allocation38_spill] sm:$0xff] }
 0x5c7   :  { %3060 = vmatpush.msrb.mxu2 %v4338_v58  ;;  %3222 = vmatpush.msra.mxu3 %v7378_v21  ;;  %v4344_v21 = vld [vmem:[#allocation3 + $0xf0] sm:$0xff]  ;;  %v9681_v58 = vld [vmem:[#allocation46_spill] sm:$0xff] }
 0x5c8   :  { %3021 = vmatpush.msrb.mxu0 %v4339_v29  ;;  %3183 = vmatpush.msra.mxu1 %v7382_v53  ;;  %v4345_v53 = vld [vmem:[#allocation3 + $0xc0] sm:$0xff]  ;;  %v9682_v29 = vld [vmem:[#allocation42_spill] sm:$0xff] }
 0x5c9   :  { %3061 = vmatpush.msrb.mxu2 %v4340_v11  ;;  %3223 = vmatpush.msra.mxu3 %v7386_v47  ;;  %v4346_v47 = vld [vmem:[#allocation3 + $0xd0] sm:$0xff]  ;;  %v9683_v11 = vld [vmem:[#allocation41_spill] sm:$0xff] }
 0x5ca   :  { %3022 = vmatpush.msrb.mxu0 %v4341_v10  ;;  %3184 = vmatpush.msra.mxu1 %v9634_v31  ;;  %v9684_v10 = vld [vmem:[#allocation49_spill] sm:$0xff] }
 0x5cb   :  { %3062 = vmatpush.msrb.mxu2 %v4342_v16  ;;  %3224 = vmatpush.msra.mxu3 %v9635_v54  ;;  %v9685_v31 = vld [vmem:[#allocation89_spill] sm:$0xff]  ;;  %v9686_v16 = vld [vmem:[#allocation50_spill] sm:$0xff]  ;;  %v9687_v54 = vld [vmem:[#allocation52_spill] sm:$0xff] }
 0x5cc   :  { %3023 = vmatpush.msrb.mxu0 %v4343_v33  ;;  %3185 = vmatpush.msra.mxu1 %v9636_v48  ;;  %v9688_v33 = vld [vmem:[#allocation53_spill] sm:$0xff]  ;;  %v9689_v48 = vld [vmem:[#allocation56_spill] sm:$0xff] }
 0x5cd   :  { %3063 = vmatpush.msrb.mxu2 %v4344_v21  ;;  %3225 = vmatpush.msra.mxu3 %v9637_v4  ;;  %v9690_v21 = vld [vmem:[#allocation57_spill] sm:$0xff]  ;;  %v9691_v4 = vld [vmem:[#allocation60_spill] sm:$0xff] }
 0x5ce   :  { %3024 = vmatpush.msrb.mxu0 %v4345_v53  ;;  %3186 = vmatpush.msra.mxu1 %v9638_v8  ;;  %v9692_v53 = vld [vmem:[#allocation61_spill] sm:$0xff]  ;;  %v9693_v8 = vld [vmem:[#allocation64_spill] sm:$0xff] }
 0x5cf   :  { %3064 = vmatpush.msrb.mxu2 %v4346_v47  ;;  %3226 = vmatpush.msra.mxu3 %v9639_v34  ;;  %v9694_v47 = vld [vmem:[#allocation65_spill] sm:$0xff]  ;;  %v9695_v34 = vld [vmem:[#allocation68_spill] sm:$0xff] }
 0x5d0   :  { %3025 = vmatpush.msrb.mxu0 %v4347_v18  ;;  %3187 = vmatpush.msra.mxu1 %v9640_v36  ;;  %v9696_v18 = vld [vmem:[#allocation69_spill] sm:$0xff]  ;;  %v9697_v36 = vld [vmem:[#allocation72_spill] sm:$0xff] }
 0x5d1   :  { %3065 = vmatpush.msrb.mxu2 %v4348_v40  ;;  %3227 = vmatpush.msra.mxu3 %v9641_v24  ;;  %v9698_v40 = vld [vmem:[#allocation73_spill] sm:$0xff]  ;;  %v9699_v24 = vld [vmem:[#allocation76_spill] sm:$0xff] }
 0x5d2   :  { %3026 = vmatpush.msrb.mxu0 %v4349_v23  ;;  %3188 = vmatpush.msra.mxu1 %v9642_v25  ;;  %v9700_v23 = vld [vmem:[#allocation77_spill] sm:$0xff]  ;;  %v9701_v25 = vld [vmem:[#allocation80_spill] sm:$0xff] }
 0x5d3   :  { %3066 = vmatpush.msrb.mxu2 %v9643_v15  ;;  %3228 = vmatpush.msra.mxu3 %v9644_v37  ;;  %v9702_v15 = vld [vmem:[#allocation81_spill] sm:$0xff]  ;;  %v9703_v37 = vld [vmem:[#allocation84_spill] sm:$0xff] }
 0x5d4   :  { %3027 = vmatpush.msrb.mxu0 %v9645_v45  ;;  %3189 = vmatpush.msra.mxu1 %v9646_v7  ;;  %v9704_v45 = vld [vmem:[#allocation85_spill] sm:$0xff]  ;;  %v9705_v7 = vld [vmem:[#allocation87_spill] sm:$0xff] }
 0x5d5   :  { %3067 = vmatpush.msrb.mxu2 %v9647_v12  ;;  %3229 = vmatpush.msra.mxu3 %v9648_v17  ;;  %v9706_v12 = vld [vmem:[#allocation88_spill] sm:$0xff]  ;;  %v9707_v17 = vld [vmem:[#allocation90_spill] sm:$0xff] }
 0x5d6   :  { %3028 = vmatpush.msrb.mxu0 %v9649_v2  ;;  %3190 = vmatpush.msra.mxu1 %v9650_v49  ;;  %v9708_v2 = vld [vmem:[#allocation91_spill] sm:$0xff]  ;;  %v9709_v49 = vld [vmem:[#allocation92_spill] sm:$0xff] }
 0x5d7   :  { %3068 = vmatpush.msrb.mxu2 %v9651_v6  ;;  %3230 = vmatpush.msra.mxu3 %v9652_v38  ;;  %v9710_v6 = vld [vmem:[#allocation93_spill] sm:$0xff]  ;;  %v9711_v38 = vld [vmem:[#allocation94_spill] sm:$0xff] }
 0x5d8   :  { %3029 = vmatpush.msrb.mxu0 %v9653_v62  ;;  %3191 = vmatpush.msra.mxu1 %v9654_v27  ;;  %v9712_v62 = vld [vmem:[#allocation95_spill] sm:$0xff]  ;;  %v9713_v27 = vld [vmem:[#allocation96_spill] sm:$0xff] }
 0x5d9   :  { %3069 = vmatpush.msrb.mxu2 %v9655_v50  ;;  %3231 = vmatpush.msra.mxu3 %v9656_v20  ;;  %v9714_v50 = vld [vmem:[#allocation97_spill] sm:$0xff]  ;;  %v9715_v20 = vld [vmem:[#allocation100_spill] sm:$0xff] }
 0x5da   :  { %3030 = vmatpush.msrb.mxu0 %v9657_v52  ;;  %3192 = vmatpush.msra.mxu1 %v9658_v42  ;;  %v9716_v52 = vld [vmem:[#allocation103_spill] sm:$0xff]  ;;  %v9717_v42 = vld [vmem:[#allocation104_spill] sm:$0xff] }
 0x5db   :  { %3070 = vmatpush.msrb.mxu2 %v9659_v32  ;;  %3031 = vmatmul.f32.vlgmr.msrb.gmra.mxu0 %v7887_v13  ;;  %v9718_v32 = vld [vmem:[#allocation107_spill] sm:$0xff] }
 0x5dc   :  { %3071 = vmatmul.f32.vlgmr.msrb.gmra.mxu2 %v7887_v13  ;;  %3232 = vmatpush.msra.mxu3 %v9660_v28  ;;  %v9670_v13 = vld [vmem:[#allocation17_spill] sm:$0xff]  ;;  %v9719_v28 = vld [vmem:[#allocation108_spill] sm:$0xff] }
 0x5dd   :  { %3193 = vmatpush.msra.mxu1 %v9661_v30  ;;  %3162 = vmatpush.msra.mxu0 %v9662_v44  ;;  %v9720_v30 = vld [vmem:[#allocation109_spill] sm:$0xff]  ;;  %v9721_v44 = vld [vmem:[#allocation110_spill] sm:$0xff] }
 0x5de   :  { %3233 = vmatpush.msra.mxu3 %v9663_v0  ;;  %3202 = vmatpush.msra.mxu2 %v9664_v1  ;;  %v9722_v0 = vld [vmem:[#allocation111_spill] sm:$0xff]  ;;  %v9723_v1 = vld [vmem:[#allocation112_spill] sm:$0xff] }
 0x5df   :  { %3194 = vmatpush.msra.mxu1 %v9665_v14  ;;  %3163 = vmatpush.msra.mxu0 %v9666_v41  ;;  %v9724_v14 = vld [vmem:[#allocation113_spill] sm:$0xff]  ;;  %v9725_v41 = vld [vmem:[#allocation114_spill] sm:$0xff] }
 0x5e0   :  { %3234 = vmatpush.msra.mxu3 %v9667_v35  ;;  %3203 = vmatpush.msra.mxu2 %v9668_v59  ;;  %v9726_v35 = vld [vmem:[#allocation115_spill] sm:$0xff]  ;;  %v9727_v59 = vld [vmem:[#allocation116_spill] sm:$0xff] }
 0x5e1   :  { %3195 = vmatpush.msra.mxu1 %v9669_v22  ;;  %3164 = vmatpush.msra.mxu0 %v9670_v13  ;;  %v9728_v22 = vld [vmem:[#allocation117_spill] sm:$0xff]  ;;  %v9729_v13 = vld [vmem:[#allocation118_spill] sm:$0xff] }
 0x5e2   :  { %3235 = vmatpush.msra.mxu3 %v9671_v46  ;;  %3204 = vmatpush.msra.mxu2 %v9672_v60  ;;  %v9730_v46 = vld [vmem:[#allocation119_spill] sm:$0xff]  ;;  %v9731_v60 = vld [vmem:[#allocation120_spill] sm:$0xff] }
 0x5e3   :  { %3196 = vmatpush.msra.mxu1 %v9673_v3  ;;  %3165 = vmatpush.msra.mxu0 %v9674_v51  ;;  %v9732_v3 = vld [vmem:[#allocation121_spill] sm:$0xff]  ;;  %v9733_v51 = vld [vmem:[#allocation122_spill] sm:$0xff] }
 0x5e4   :  { %3236 = vmatpush.msra.mxu3 %v9675_v56  ;;  %3205 = vmatpush.msra.mxu2 %v9676_v5  ;;  %v9734_v56 = vld [vmem:[#allocation123_spill] sm:$0xff]  ;;  %v9735_v5 = vld [vmem:[#allocation124_spill] sm:$0xff] }
 0x5e5   :  { %3197 = vmatpush.msra.mxu1 %v9677_v61  ;;  %3166 = vmatpush.msra.mxu0 %v9678_v19  ;;  %v9736_v61 = vld [vmem:[#allocation125_spill] sm:$0xff]  ;;  %v9737_v19 = vld [vmem:[#allocation126_spill] sm:$0xff] }
 0x5e6   :  { %3237 = vmatpush.msra.mxu3 %v9679_v26  ;;  %3206 = vmatpush.msra.mxu2 %v9680_v9  ;;  %v9738_v26 = vld [vmem:[#allocation127_spill] sm:$0xff]  ;;  %v9739_v9 = vld [vmem:[#allocation128_spill] sm:$0xff] }
 0x5e7   :  { %3262 = vmatpush.msrb.mxu1 %v9681_v58  ;;  %3167 = vmatpush.msra.mxu0 %v9683_v11  ;;  %v9740_v58 = vld [vmem:[#allocation129_spill] sm:$0xff]  ;;  %v9742_v11 = vld [vmem:[#allocation131_spill] sm:$0xff] }
 0x5e8   :  { %3302 = vmatpush.msrb.mxu3 %v9682_v29  ;;  %3207 = vmatpush.msra.mxu2 %v9684_v10  ;;  %v9741_v29 = vld [vmem:[#allocation130_spill] sm:$0xff]  ;;  %v9743_v10 = vld [vmem:[#allocation132_spill] sm:$0xff] }
 0x5e9   :  { %3263 = vmatpush.msrb.mxu1 %v9685_v31  ;;  %3168 = vmatpush.msra.mxu0 %v9687_v54  ;;  %v9744_v31 = vld [vmem:[#allocation133_spill] sm:$0xff]  ;;  %v9746_v54 = vld [vmem:[#allocation135_spill] sm:$0xff] }
 0x5ea   :  { %3303 = vmatpush.msrb.mxu3 %v9686_v16  ;;  %3208 = vmatpush.msra.mxu2 %v9688_v33  ;;  %v9745_v16 = vld [vmem:[#allocation134_spill] sm:$0xff]  ;;  %v9747_v33 = vld [vmem:[#allocation136_spill] sm:$0xff] }
 0x5eb   :  { %3264 = vmatpush.msrb.mxu1 %v9689_v48  ;;  %3169 = vmatpush.msra.mxu0 %v9691_v4  ;;  %v9748_v48 = vld [vmem:[#allocation137_spill] sm:$0xff]  ;;  %v9750_v4 = vld [vmem:[#allocation139_spill] sm:$0xff] }
 0x5ec   :  { %3304 = vmatpush.msrb.mxu3 %v9690_v21  ;;  %3209 = vmatpush.msra.mxu2 %v9692_v53  ;;  %v9749_v21 = vld [vmem:[#allocation138_spill] sm:$0xff]  ;;  %v9751_v53 = vld [vmem:[#allocation140_spill] sm:$0xff] }
 0x5ed   :  { %3265 = vmatpush.msrb.mxu1 %v9693_v8  ;;  %3170 = vmatpush.msra.mxu0 %v9695_v34  ;;  %v9752_v8 = vld [vmem:[#allocation141_spill] sm:$0xff]  ;;  %v9754_v34 = vld [vmem:[#allocation143_spill] sm:$0xff] }
 0x5ee   :  { %3305 = vmatpush.msrb.mxu3 %v9694_v47  ;;  %3210 = vmatpush.msra.mxu2 %v9696_v18  ;;  %v9753_v47 = vld [vmem:[#allocation142_spill] sm:$0xff]  ;;  %v9755_v18 = vld [vmem:[#allocation144_spill] sm:$0xff] }
 0x5ef   :  { %3266 = vmatpush.msrb.mxu1 %v9697_v36  ;;  %3171 = vmatpush.msra.mxu0 %v9699_v24  ;;  %v9756_v36 = vld [vmem:[#allocation145_spill] sm:$0xff]  ;;  %v9758_v24 = vld [vmem:[#allocation147_spill] sm:$0xff] }
 0x5f0   :  { %3306 = vmatpush.msrb.mxu3 %v9698_v40  ;;  %3211 = vmatpush.msra.mxu2 %v9700_v23  ;;  %v9757_v40 = vld [vmem:[#allocation146_spill] sm:$0xff]  ;;  %v9759_v23 = vld [vmem:[#allocation148_spill] sm:$0xff] }
 0x5f1   :  { %3267 = vmatpush.msrb.mxu1 %v9701_v25  ;;  %3172 = vmatpush.msra.mxu0 %v9703_v37  ;;  %v9760_v25 = vld [vmem:[#allocation149_spill] sm:$0xff]  ;;  %v9762_v37 = vld [vmem:[#allocation151_spill] sm:$0xff] }
 0x5f2   :  { %3307 = vmatpush.msrb.mxu3 %v9702_v15  ;;  %3212 = vmatpush.msra.mxu2 %v9704_v45  ;;  %v9761_v15 = vld [vmem:[#allocation150_spill] sm:$0xff]  ;;  %v9763_v45 = vld [vmem:[#allocation152_spill] sm:$0xff] }
 0x5f3   :  { %3268 = vmatpush.msrb.mxu1 %v9705_v7  ;;  %3173 = vmatpush.msra.mxu0 %v9707_v17  ;;  %v9764_v7 = vld [vmem:[#allocation153_spill] sm:$0xff]  ;;  %v9766_v17 = vld [vmem:[#allocation155_spill] sm:$0xff] }
 0x5f4   :  { %3308 = vmatpush.msrb.mxu3 %v9706_v12  ;;  %3213 = vmatpush.msra.mxu2 %v9708_v2  ;;  %v9765_v12 = vld [vmem:[#allocation154_spill] sm:$0xff] }
 0x5f5   :  { %3269 = vmatpush.msrb.mxu1 %v9709_v49  ;;  %3174 = vmatpush.msra.mxu0 %v9711_v38 }
 0x5f6   :  { %3309 = vmatpush.msrb.mxu3 %v9710_v6  ;;  %3214 = vmatpush.msra.mxu2 %v9712_v62 }
 0x5f7   :  { %3270 = vmatpush.msrb.mxu1 %v9713_v27  ;;  %3175 = vmatpush.msra.mxu0 %v9715_v20  ;;  %v8044_v27 = vpop.permute.xlu1 %109 }
 0x5f8   :  { %3310 = vmatpush.msrb.mxu3 %v9714_v50  ;;  %3215 = vmatpush.msra.mxu2 %v9716_v52  ;;  %v9767_v50 = vld [vmem:[#allocation18_spill] sm:$0xff] }
 0x5f9   :  { %3271 = vmatpush.msrb.mxu1 %v9717_v42  ;;  %3176 = vmatpush.msra.mxu0 %v9719_v28  ;;  %v9768_v42 = vld [vmem:[#allocation99_spill] sm:$0xff] }
 0x5fa   :  { %3311 = vmatpush.msrb.mxu3 %v9718_v32  ;;  %3216 = vmatpush.msra.mxu2 %v9720_v30  ;;  %v150_v32 = vmul.f32 %v9768_v42, %v8044_v27 }
 0x5fb   :  { %3272 = vmatpush.msrb.mxu1 %v9721_v44  ;;  %3177 = vmatpush.msra.mxu0 %v9723_v1  ;;  %v9769_v44 = vld [vmem:[#allocation19_spill] sm:$0xff]  ;;  %v9770_v1 = vld [vmem:[#allocation102_spill] sm:$0xff] }
 0x5fc   :  { %3312 = vmatpush.msrb.mxu3 %v9722_v0  ;;  %3217 = vmatpush.msra.mxu2 %v9724_v14  ;;  %v192_v14 = vadd.f32 %v9770_v1, %v150_v32 }
 0x5fd   :  { %3273 = vmatpush.msrb.mxu1 %v9725_v41  ;;  %3242 = vmatpush.msrb.mxu0 %v9727_v59 }
 0x5fe   :  { %3313 = vmatpush.msrb.mxu3 %v9726_v35  ;;  %3282 = vmatpush.msrb.mxu2 %v9728_v22 }
 0x5ff   :  { %3274 = vmatpush.msrb.mxu1 %v9729_v13  ;;  %3243 = vmatpush.msrb.mxu0 %v9731_v60 }
 0x600   :  { %3314 = vmatpush.msrb.mxu3 %v9730_v46  ;;  %3283 = vmatpush.msrb.mxu2 %v9732_v3 }
 0x601   :  { %3275 = vmatpush.msrb.mxu1 %v9733_v51  ;;  %3244 = vmatpush.msrb.mxu0 %v9735_v5  ;;  %v9771_v51 = vld [vmem:[#allocation105_spill] sm:$0xff] }
 0x602   :  { %3315 = vmatpush.msrb.mxu3 %v9734_v56  ;;  %3284 = vmatpush.msrb.mxu2 %v9736_v61  ;;  %v152_v56 = vmul.f32 %v9771_v51, %v8044_v27 }
 0x603   :  { %3276 = vmatpush.msrb.mxu1 %v9737_v19  ;;  %3245 = vmatpush.msrb.mxu0 %v9739_v9 }
 0x604   :  { %3316 = vmatpush.msrb.mxu3 %v9738_v26  ;;  %3285 = vmatpush.msrb.mxu2 %v9740_v58 }
 0x605   :  { %3277 = vmatpush.msrb.mxu1 %v9741_v29  ;;  %3246 = vmatpush.msrb.mxu0 %v9743_v10 }
 0x606   :  { %3317 = vmatpush.msrb.mxu3 %v9742_v11  ;;  %3286 = vmatpush.msrb.mxu2 %v9744_v31  ;;  %v9772_v11 = vld [vmem:[#allocation106_spill] sm:$0xff] }
 0x607   :  { %3247 = vmatpush.msrb.mxu0 %v9745_v16  ;;  %v194_v10 = vadd.f32 %v9772_v11, %v152_v56 }
 0x608   :  { %3287 = vmatpush.msrb.mxu2 %v9746_v54 }
 0x609   :  { %3248 = vmatpush.msrb.mxu0 %v9747_v33 }
 0x60a   :  { %3288 = vmatpush.msrb.mxu2 %v9748_v48 }
 0x60b   :  { %3249 = vmatpush.msrb.mxu0 %v9749_v21 }
 0x60c   :  { %3289 = vmatpush.msrb.mxu2 %v9750_v4  ;;  %v9773_v4 = vld [vmem:[#allocation21_spill] sm:$0xff] }
 0x60d   :  { %3250 = vmatpush.msrb.mxu0 %v9751_v53 }
 0x60e   :  { %3290 = vmatpush.msrb.mxu2 %v9752_v8 }
 0x60f   :  { %3251 = vmatpush.msrb.mxu0 %v9753_v47 }
 0x610   :  { %3291 = vmatpush.msrb.mxu2 %v9754_v34 }
 0x611   :  { %3252 = vmatpush.msrb.mxu0 %v9755_v18  ;;  %v9774_v18 = vld [vmem:[#allocation98_spill] sm:$0xff] }
 0x612   :  { %3292 = vmatpush.msrb.mxu2 %v9756_v36  ;;  %v149_v36 = vmul.f32 %v9774_v18, %v8044_v27 }
 0x613   :  { %3253 = vmatpush.msrb.mxu0 %v9757_v40 }
 0x614   :  { %3293 = vmatpush.msrb.mxu2 %v9758_v24 }
 0x615   :  { %3254 = vmatpush.msrb.mxu0 %v9759_v23 }
 0x616   :  { %3294 = vmatpush.msrb.mxu2 %v9760_v25 }
 0x617   :  { %3255 = vmatpush.msrb.mxu0 %v9761_v15 }
 0x618   :  { %3295 = vmatpush.msrb.mxu2 %v9762_v37 }
 0x619   :  { %3256 = vmatpush.msrb.mxu0 %v9763_v45 }
 0x61a   :  { %3296 = vmatpush.msrb.mxu2 %v9764_v7 }
 0x61b   :  { %3257 = vmatpush.msrb.mxu0 %v9765_v12 }
 0x61c   :  { %3297 = vmatpush.msrb.mxu2 %v9766_v17 }
 0x61f   :  { %v2825_v2 = vpop.f32.mrf.mxu1 }
 0x625   :  { %v2865_v38 = vpop.f32.mrf.mxu3 }
 0x627   :  { %v2905_v62 = vpop.f32.mrf.mxu1 }
 0x62d   :  { %v2945_v59 = vpop.f32.mrf.mxu3 }
 0x637   :  { %v2805_v49 = vpop.f32.mrf.mxu0 }
 0x638   :  { %v2826_v6 = vadd.f32 %v2825_v2, %v2805_v49  ;;  %v9777_v49 = vld [vmem:[#allocation101_spill] sm:$0xff] }
 0x63a   :  { %v2948_v20 = vadd.f32 %v2826_v6, %v9767_v50  ;;  %v191_v6 = vadd.f32 %v9777_v49, %v149_v36 }
 0x63c   :  { %v3476_v52 = vmul.f32 -1.442695, %v2948_v20 }
 0x63d   :  { %v2845_v28 = vpop.f32.mrf.mxu2 }
 0x63e   :  { %3703 = vpow2.f32 %v3476_v52  ;;  %v2866_v30 = vadd.f32 %v2865_v38, %v2845_v28 }
 0x640   :  { %v2949_v0 = vadd.f32 %v2866_v30, %v9769_v44  ;;  %v2885_v19 = vpop.f32.mrf.mxu0 }
 0x641   :  { %v3052_v41 = vpop.f32.mrf.mxu1  ;;  %v2906_v16 = vadd.f32 %v2905_v62, %v2885_v19 }
 0x642   :  { %v3477_v35 = vmul.f32 -1.442695, %v2949_v0  ;;  %v3096_v22 = vadd.f32 %v3052_v41, %v192_v14 }
 0x643   :  { %v2950_v53 = vadd.f32 %v2906_v16, %v9773_v4 }
 0x644   :  { %v3704_v13 = vpop.eup %3703  ;;  %3705 = vpow2.f32 %v3477_v35  ;;  %v3480_v3 = vmul.f32 -1.442695, %v3096_v22 }
 0x645   :  { %v2955_v46 = vadd.f32 1.0, %v3704_v13 }
 0x646   :  { %v2925_v60 = vpop.f32.mrf.mxu2 }
 0x647   :  { %3707 = vrcp.f32 %v2955_v46  ;;  %v2946_v5 = vadd.f32 %v2945_v59, %v2925_v60  ;;  %v2967_v15 = vand.u32 2147483648, %v2955_v46  ;;  %vm2961_vm13 = vweird.f32 %v2955_v46 }
 0x648   :  { %3709 = vpow2.f32 %v3480_v3  ;;  %v3092_v58 = vpop.f32.mrf.mxu3  ;;  %v2965_v7 = vand.u32 2147483647, %v2955_v46 }
 0x649   :  { %v2951_v26 = vadd.f32 %v2946_v5, %v9480_v57  ;;  %v3098_v33 = vadd.f32 %v3092_v58, %v194_v10  ;;  %v2968_v52 = vor.u32 1.1754944e-38, %v2967_v15 }
 0x64a   :  { %v3706_v61 = vpop.eup %3705  ;;  %vm2966_vm1 = vcmp.eq.f32.partialorder %v2965_v7, 8.507059e+37 }
 0x64b   :  { %v2974_v9 = vadd.f32 1.0, %v3706_v61  ;;  %v3478_v29 = vmul.f32 -1.442695, %v2951_v26  ;;  %v3481_v47 = vmul.f32 -1.442695, %v3098_v33 }
 0x64d   :  { %v3708_v31 = vpop.eup %3707  ;;  %3711 = vrcp.f32 %v2974_v9  ;;  %v2986_v12 = vand.u32 2147483648, %v2974_v9  ;;  %v2984_v2 = vand.u32 2147483647, %v2974_v9  ;;  %vm2980_vm0 = vweird.f32 %v2974_v9 }
 0x64e   :  { %v2957_v54 = vmul.f32 %v3708_v31, %v2955_v46  ;;  %3713 = vpow2.f32 %v3478_v29  ;;  %v3710_v21 = vpop.eup %3709  ;;  %vm2962_vm12 = vweird.f32 %v3708_v31 }
 0x64f   :  { %v8058_v25 = vadd.f32 1.0, %v3710_v21  ;;  %3715 = vtanh.f32 %v2950_v53  ;;  %vm8060_vm14 = vmor %vm2961_vm13, %vm2962_vm12  ;;  %v2987_v30 = vor.u32 1.1754944e-38, %v2986_v12  ;;  %vm2985_vm3 = vcmp.eq.f32.partialorder %v2984_v2, 8.507059e+37 }
 0x650   :  { %v2958_v48 = vsub.f32 1.0, %v2957_v54  ;;  %3717 = vpow2.f32 %v3481_v47 }
 0x651   :  { %vm3127_vm9 = vweird.f32 %v8058_v25 }
 0x652   :  { %v2959_v8 = vmul.f32 %v3708_v31, %v2958_v48 }
 0x653   :  { %v3712_v34 = vpop.eup %3711 }
 0x654   :  { %v3714_v40 = vpop.eup %3713  ;;  %v2976_v24 = vmul.f32 %v3712_v34, %v2974_v9  ;;  %v2960_v23 = vadd.f32 %v3708_v31, %v2959_v8  ;;  %vm2981_vm15 = vweird.f32 %v3712_v34 }
 0x655   :  { %v2994_v37 = vadd.f32 1.0, %v3714_v40  ;;  %v3716_v28 = vpop.eup %3715  ;;  %vm2982_vm2 = vmor %vm2980_vm0, %vm2981_vm15 }
 0x656   :  { %v2977_v45 = vsub.f32 1.0, %v2976_v24  ;;  %v2964_v62 = vsel %vm8060_vm14, %v3708_v31, %v2960_v23  ;;  %v3718_v14 = vpop.eup %3717  ;;  %v3131_v24 = vand.u32 2147483647, %v8058_v25 }
 0x657   :  { %3719 = vrcp.f32 %v2994_v37  ;;  %v2969_v0 = vsel %vm2966_vm1, %v2968_v52, %v2964_v62  ;;  %v8072_v5 = vadd.f32 1.0, %v3718_v14  ;;  %v3006_v19 = vand.u32 2147483648, %v2994_v37 }
 0x658   :  { %v2978_v38 = vmul.f32 %v3712_v34, %v2977_v45  ;;  %3721 = vrcp.f32 %v8058_v25  ;;  %v3032_v20 = vpop.f32.mrf.mxu0  ;;  %v3011_v46 = vmul.f32 %v3716_v28, %v2969_v0  ;;  %v3004_v9 = vand.u32 2147483647, %v2994_v37 }
 0x659   :  { %v3095_v42 = vadd.f32 %v3032_v20, %v191_v6  ;;  %vm3000_vm5 = vweird.f32 %v2994_v37  ;;  %v3007_v10 = vor.u32 1.1754944e-38, %v3006_v19  ;;  %vm3132_vm13 = vcmp.eq.f32.partialorder %v3131_v24, 8.507059e+37  ;;  %v3389_v24 = vld [vmem:[%s8155_s6] sm:$0xff] }
 0x65a   :  { %v2979_v32 = vadd.f32 %v3712_v34, %v2978_v38  ;;  %vm3005_vm7 = vcmp.eq.f32.partialorder %v3004_v9, 8.507059e+37  ;;  %v3153_v28 = vand.u32 2147483648, %v8072_v5  ;;  %vm3147_vm1 = vweird.f32 %v8072_v5  ;;  %v3398_v9 = vld [vmem:[%s8155_s6 + $0x48] sm:$0xff] }
 0x65b   :  { %v3479_v1 = vmul.f32 -1.442695, %v3095_v42 }
 0x65c   :  { %v2983_v41 = vsel %vm2982_vm2, %v3712_v34, %v2979_v32 }
 0x65d   :  { %v3720_v35 = vpop.eup %3719  ;;  %v2988_v59 = vsel %vm2985_vm3, %v2987_v30, %v2983_v41  ;;  %3723 = vpow2.f32 %v3479_v1  ;;  %v3151_v30 = vand.u32 2147483647, %v8072_v5  ;;  %v3154_v1 = vor.u32 1.1754944e-38, %v3153_v28 }
 0x65e   :  { %v3722_v22 = vpop.eup %3721  ;;  %v3010_v13 = vmul.f32 %v2988_v59, %v7826_v39  ;;  %v2996_v60 = vmul.f32 %v3720_v35, %v2994_v37  ;;  %vm3001_vm4 = vweird.f32 %v3720_v35  ;;  %v151_v39 = vmul.f32 %v5031_v43, %v8044_v27  ;;  %v3403_v59 = vld [vmem:[%s8155_s6 + $0x70] sm:$0xff] }
 0x65f   :  { %v3123_v56 = vmul.f32 %v3722_v22, %v8058_v25  ;;  %vm3002_vm6 = vmor %vm3000_vm5, %vm3001_vm4  ;;  %v3072_v48 = vpop.f32.mrf.mxu2  ;;  %vm3128_vm8 = vweird.f32 %v3722_v22  ;;  %v3133_v27 = vand.u32 2147483648, %v8058_v25  ;;  %vm3152_vm3 = vcmp.eq.f32.partialorder %v3151_v30, 8.507059e+37 }
 0x660   :  { %v8069_v3 = vadd.f32 %v3011_v46, %v3010_v13  ;;  %v2997_v51 = vsub.f32 1.0, %v2996_v60  ;;  %v193_v53 = vadd.f32 %v5057_v63, %v151_v39  ;;  %vm8083_vm10 = vmor %vm3127_vm9, %vm3128_vm8  ;;  %v3401_v13 = vld [vmem:[%s8155_s6 + $0x60] sm:$0xff]  ;;  %v3396_v39 = vld [vmem:[%s8155_s6 + $0x38] sm:$0xff] }
 0x661   :  { %v3124_v11 = vsub.f32 1.0, %v3123_v56  ;;  %v3134_v7 = vor.u32 1.1754944e-38, %v3133_v27  ;;  %v3400_v56 = vld [vmem:[%s8155_s6 + $0x58] sm:$0xff]  ;;  %v3390_v27 = vld [vmem:[%s8155_s6 + $0x8] sm:$0xff] }
 0x662   :  { %3725 = vtanh.f32 %v8069_v3  ;;  %v2998_v61 = vmul.f32 %v3720_v35, %v2997_v51  ;;  %v3097_v34 = vadd.f32 %v3072_v48, %v193_v53 }
 0x663   :  { %v3724_v26 = vpop.eup %3723  ;;  %3727 = vrcp.f32 %v8072_v5  ;;  %v3125_v33 = vmul.f32 %v3722_v22, %v3124_v11  ;;  %v3397_v11 = vld [vmem:[%s8155_s6 + $0x40] sm:$0xff] }
 0x664   :  { %v3102_v58 = vadd.f32 1.0, %v3724_v26  ;;  %v2999_v29 = vadd.f32 %v3720_v35, %v2998_v61  ;;  %v3399_v61 = vld [vmem:[%s8155_s6 + $0x50] sm:$0xff] }
 0x665   :  { %v3126_v43 = vadd.f32 %v3722_v22, %v3125_v33 }
 0x666   :  { %3729 = vrcp.f32 %v3102_v58  ;;  %v3003_v31 = vsel %vm3002_vm6, %v3720_v35, %v2999_v29  ;;  %v3114_v63 = vand.u32 2147483648, %v3102_v58  ;;  %v3112_v37 = vand.u32 2147483647, %v3102_v58 }
 0x667   :  { %v3008_v54 = vsel %vm3005_vm7, %v3007_v10, %v3003_v31  ;;  %3731 = vtanh.f32 %v3097_v34  ;;  %v3130_v45 = vsel %vm8083_vm10, %v3722_v22, %v3126_v43  ;;  %vm3108_vm12 = vweird.f32 %v3102_v58  ;;  %v3402_v22 = vld [vmem:[%s8155_s6 + $0x68] sm:$0xff]  ;;  %v3395_v31 = vld [vmem:[%s8155_s6 + $0x30] sm:$0xff] }
 0x668   :  { %v3726_v16 = vpop.eup %3725  ;;  %v3115_v25 = vor.u32 1.1754944e-38, %v3114_v63  ;;  %v3135_v2 = vsel %vm3132_vm13, %v3134_v7, %v3130_v45  ;;  %vm3113_vm15 = vcmp.eq.f32.partialorder %v3112_v37, 8.507059e+37  ;;  %v3391_v34 = vld [vmem:[%s8155_s6 + $0x10] sm:$0xff] }
 0x669   :  { %v3014_v21 = vmul.f32 %v3726_v16, %v3008_v54  ;;  %v3728_v8 = vpop.eup %3727  ;;  %v3157_v20 = vmul.f32 %v3135_v2, %v7870_v55  ;;  %v3404_v55 = vld [vmem:[%s8155_s6 + $0x78] sm:$0xff]  ;;  %v3394_v16 = vld [vmem:[%s8155_s6 + $0x28] sm:$0xff] }
 0x66a   :  { %v3143_v36 = vmul.f32 %v3728_v8, %v8072_v5  ;;  %vm3148_vm0 = vweird.f32 %v3728_v8 }
 0x66b   :  { %3198 = vmatmul.f32.vlgmr.msra.gmra.mxu1 %v3014_v21  ;;  %3238 = vmatmul.f32.vlgmr.msra.gmra.mxu3 %v3014_v21  ;;  %vm3149_vm2 = vmor %vm3147_vm1, %vm3148_vm0  ;;  %vm3429_vm0 = vcmask 7168  }
 0x66c   :  { %v3730_v47 = vpop.eup %3729  ;;  %v3144_v12 = vsub.f32 1.0, %v3143_v36 }
 0x66d   :  { %v3104_v18 = vmul.f32 %v3730_v47, %v3102_v58  ;;  %vm3109_vm11 = vweird.f32 %v3730_v47  ;;  %v3732_v6 = vpop.eup %3731 }
 0x66e   :  { %vm3110_vm14 = vmor %vm3108_vm12, %vm3109_vm11  ;;  %v3145_v62 = vmul.f32 %v3728_v8, %v3144_v12 }
 0x66f   :  { %v3105_v40 = vsub.f32 1.0, %v3104_v18 }
 0x670   :  { %v3146_v32 = vadd.f32 %v3728_v8, %v3145_v62 }
 0x671   :  { %v3106_v15 = vmul.f32 %v3730_v47, %v3105_v40 }
 0x672   :  { %v3150_v0 = vsel %vm3149_vm2, %v3728_v8, %v3146_v32  ;;  %v3392_v8 = vld [vmem:[%s8155_s6 + $0x18] sm:$0xff] }
 0x673   :  { %v3107_v17 = vadd.f32 %v3730_v47, %v3106_v15  ;;  %3278 = vmatmul.f32.vlgmr.msrb.gmra.mxu1 %v3014_v21  ;;  %3318 = vmatmul.f32.vlgmr.msrb.gmra.mxu3 %v3014_v21  ;;  %v3155_v41 = vsel %vm3152_vm3, %v3154_v1, %v3150_v0 }
 0x675   :  { %v3111_v49 = vsel %vm3110_vm14, %v3730_v47, %v3107_v17 }
 0x676   :  { %v3116_v38 = vsel %vm3113_vm15, %v3115_v25, %v3111_v49 }
 0x677   :  { %v3158_v52 = vmul.f32 %v3732_v6, %v3116_v38 }
 0x679   :  { %v3159_v42 = vadd.f32 %v3158_v52, %v3157_v20 }
 0x67b   :  { %3733 = vtanh.f32 %v3159_v42 }
 0x681   :  { %v3734_v14 = vpop.eup %3733 }
 0x682   :  { %v3161_v35 = vmul.f32 %v3734_v14, %v3155_v41 }
 0x684   :  { %3178 = vmatmul.f32.vlgmr.msra.gmra.mxu0 %v3161_v35  ;;  %3218 = vmatmul.f32.vlgmr.msra.gmra.mxu2 %v3161_v35 }
 0x685   :  { %3409 = vmatpush.msra.mxu0 %v3404_v55 }
 0x687   :  { %3410 = vmatpush.msra.mxu0 %v3403_v59 }
 0x689   :  { %3411 = vmatpush.msra.mxu0 %v3402_v22 }
 0x68b   :  { %3412 = vmatpush.msra.mxu0 %v3401_v13 }
 0x68c   :  { %3258 = vmatmul.f32.vlgmr.msrb.gmra.mxu0 %v3161_v35  ;;  %3298 = vmatmul.f32.vlgmr.msrb.gmra.mxu2 %v3161_v35 }
 0x68d   :  { %3413 = vmatpush.msra.mxu0 %v3400_v56 }
 0x68f   :  { %3414 = vmatpush.msra.mxu0 %v3399_v61 }
 0x691   :  { %3415 = vmatpush.msra.mxu0 %v3398_v9 }
 0x693   :  { %3416 = vmatpush.msra.mxu0 %v3397_v11 }
 0x695   :  { %3417 = vmatpush.msra.mxu0 %v3396_v39 }
 0x697   :  { %3418 = vmatpush.msra.mxu0 %v3395_v31 }
 0x699   :  { %3419 = vmatpush.msra.mxu0 %v3394_v16 }
 0x6e8   :  { %v3199_v46 = vpop.f32.mrf.mxu1 }
 0x6ee   :  { %v3239_v19 = vpop.f32.mrf.mxu3 }
 0x6f0   :  { %v3279_v23 = vpop.f32.mrf.mxu1 }
 0x6f6   :  { %v3319_v33 = vpop.f32.mrf.mxu3 }
 0x701   :  { %v3179_v60 = vpop.f32.mrf.mxu0 }
 0x702   :  { %v3200_v51 = vadd.f32 %v3199_v46, %v3179_v60 }
 0x704   :  { %v3322_v5 = vadd.f32 %v3200_v51, %v9767_v50 }
 0x706   :  { %v3482_v26 = vmul.f32 -1.442695, %v3322_v5 }
 0x707   :  { %v3219_v58 = vpop.f32.mrf.mxu2 }
 0x708   :  { %3735 = vpow2.f32 %v3482_v26  ;;  %v3240_v29 = vadd.f32 %v3239_v19, %v3219_v58 }
 0x709   :  { %v3259_v40 = vpop.f32.mrf.mxu0 }
 0x70a   :  { %v3323_v50 = vadd.f32 %v3240_v29, %v9769_v44  ;;  %v3393_v44 = vld [vmem:[%s8155_s6 + $0x20] sm:$0xff]  ;;  %v3280_v15 = vadd.f32 %v3279_v23, %v3259_v40 }
 0x70b   :  { %3420 = vmatpush.msra.mxu0 %v3393_v44  ;;  %v3494_v29 = vld [vmem:[#allocation2] ss:$0 sm:$0xff] }
 0x70c   :  { %v3483_v10 = vmul.f32 -1.442695, %v3323_v50  ;;  %v3324_v17 = vadd.f32 %v3280_v15, %v9773_v4 }
 0x70d   :  { %3421 = vmatpush.msra.mxu0 %v3392_v8 }
 0x70e   :  { %v3736_v54 = vpop.eup %3735  ;;  %3737 = vpow2.f32 %v3483_v10 }
 0x70f   :  { %v3329_v48 = vadd.f32 1.0, %v3736_v54  ;;  %v3299_v21 = vpop.f32.mrf.mxu2  ;;  %3422 = vmatpush.msra.mxu0 %v3391_v34 }
 0x710   :  { %v3320_v53 = vadd.f32 %v3319_v33, %v3299_v21 }
 0x711   :  { %3739 = vrcp.f32 %v3329_v48  ;;  %3423 = vmatpush.msra.mxu0 %v3390_v27  ;;  %v3341_v6 = vand.u32 2147483648, %v3329_v48  ;;  %vm3335_vm5 = vweird.f32 %v3329_v48  ;;  %v3339_v62 = vand.u32 2147483647, %v3329_v48 }
 0x712   :  { %v3325_v47 = vadd.f32 %v3320_v53, %v9480_v57 }
 0x713   :  { %3424 = vmatpush.msra.mxu0 %v3389_v24  ;;  %v3342_v28 = vor.u32 1.1754944e-38, %v3341_v6  ;;  %vm3340_vm9 = vcmp.eq.f32.partialorder %v3339_v62, 8.507059e+37 }
 0x714   :  { %v3738_v18 = vpop.eup %3737  ;;  %v3484_v43 = vmul.f32 -1.442695, %v3325_v47 }
 0x715   :  { %v3348_v36 = vadd.f32 1.0, %v3738_v18 }
 0x716   :  { %3741 = vpow2.f32 %v3484_v43 }
 0x717   :  { %v3740_v57 = vpop.eup %3739  ;;  %3743 = vrcp.f32 %v3348_v36  ;;  %v3360_v20 = vand.u32 2147483648, %v3348_v36  ;;  %v3358_v32 = vand.u32 2147483647, %v3348_v36  ;;  %vm3354_vm8 = vweird.f32 %v3348_v36 }
 0x718   :  { %v3331_v63 = vmul.f32 %v3740_v57, %v3329_v48  ;;  %vm3336_vm4 = vweird.f32 %v3740_v57 }
 0x719   :  { %vm3337_vm6 = vmor %vm3335_vm5, %vm3336_vm4  ;;  %v3361_v0 = vor.u32 1.1754944e-38, %v3360_v20  ;;  %vm3359_vm11 = vcmp.eq.f32.partialorder %v3358_v32, 8.507059e+37 }
 0x71a   :  { %v3332_v37 = vsub.f32 1.0, %v3331_v63 }
 0x71c   :  { %v3742_v45 = vpop.eup %3741  ;;  %v3333_v7 = vmul.f32 %v3740_v57, %v3332_v37 }
 0x71d   :  { %v3744_v12 = vpop.eup %3743  ;;  %v3368_v25 = vadd.f32 1.0, %v3742_v45 }
 0x71e   :  { %v3350_v2 = vmul.f32 %v3744_v12, %v3348_v36  ;;  %v3334_v49 = vadd.f32 %v3740_v57, %v3333_v7  ;;  %vm3355_vm7 = vweird.f32 %v3744_v12 }
 0x71f   :  { %3745 = vrcp.f32 %v3368_v25  ;;  %vm3356_vm10 = vmor %vm3354_vm8, %vm3355_vm7  ;;  %v3380_v51 = vand.u32 2147483648, %v3368_v25  ;;  %vm3374_vm13 = vweird.f32 %v3368_v25  ;;  %v3378_v5 = vand.u32 2147483647, %v3368_v25 }
 0x720   :  { %v3351_v38 = vsub.f32 1.0, %v3350_v2  ;;  %3747 = vtanh.f32 %v3324_v17  ;;  %v3338_v42 = vsel %vm3337_vm6, %v3740_v57, %v3334_v49 }
 0x721   :  { %v3343_v1 = vsel %vm3340_vm9, %v3342_v28, %v3338_v42  ;;  %v3381_v19 = vor.u32 1.1754944e-38, %v3380_v51  ;;  %vm3379_vm15 = vcmp.eq.f32.partialorder %v3378_v5, 8.507059e+37 }
 0x722   :  { %v3352_v52 = vmul.f32 %v3744_v12, %v3351_v38 }
 0x724   :  { %v3353_v4 = vadd.f32 %v3744_v12, %v3352_v52 }
 0x725   :  { %v3746_v30 = vpop.eup %3745 }
 0x726   :  { %v3357_v14 = vsel %vm3356_vm10, %v3744_v12, %v3353_v4  ;;  %v3370_v41 = vmul.f32 %v3746_v30, %v3368_v25  ;;  %v3748_v35 = vpop.eup %3747  ;;  %vm3375_vm12 = vweird.f32 %v3746_v30 }
 0x727   :  { %v3362_v55 = vsel %vm3359_vm11, %v3361_v0, %v3357_v14  ;;  %v3385_v22 = vmul.f32 %v3748_v35, %v3343_v1  ;;  %vm3376_vm14 = vmor %vm3374_vm13, %vm3375_vm12 }
 0x728   :  { %v3384_v59 = vmul.f32 %v3362_v55, %v8069_v3  ;;  %v3371_v13 = vsub.f32 1.0, %v3370_v41 }
 0x72a   :  { %v3386_v46 = vadd.f32 %v3385_v22, %v3384_v59  ;;  %v3372_v60 = vmul.f32 %v3746_v30, %v3371_v13 }
 0x72c   :  { %3749 = vtanh.f32 %v3386_v46  ;;  %v3373_v56 = vadd.f32 %v3746_v30, %v3372_v60 }
 0x72e   :  { %v3377_v61 = vsel %vm3376_vm14, %v3746_v30, %v3373_v56 }
 0x72f   :  { %v3382_v9 = vsel %vm3379_vm15, %v3381_v19, %v3377_v61 }
 0x732   :  { %v3750_v26 = vpop.eup %3749 }
 0x733   :  { %v3388_v58 = vmul.f32 %v3750_v26, %v3382_v9 }
 0x735   :  { %3425 = vmatmul.f32.vlgmr.msra.gmra.mxu0 %v3388_v58 }
 0x7b2   :  { %v3426_v3 = vpop.f32.mrf.mxu0 }
 0x7b3   :  { %v3427_v11 = vadd.f32 %v3494_v29, %v3426_v3 }
 0x7b5   :  { %3430 = vst.msk [vmem:[%s8157_s8] sm:$0xff] %vm3429_vm0, %v3427_v11 }
 0x7b6   :  { %3435 = vsyncpa [#allocation4], 1 }
 0x7b7   :  { %3436 = vsyncpa [#allocation6], 1 }

</bundles_post_ra>
